<compile_context>
chip_gen: v6e
topology: v6e:2x2x1
jax: 0.10.0
libtpu: 0.0.40
codegen_flags: <defaults>
</compile_context>

<pallas_src>
import jax
import jax.numpy as jnp
from jax.experimental import pallas as pl
from jax.experimental.pallas import tpu as pltpu

EPS = 1e-5
VMEM_LIMIT = 32 * 1024 * 1024  # explicit scoped-VMEM cap, safe on v5e/v6e/v7x


# ----------------------------------------------------------------------------
# Helpers
# ----------------------------------------------------------------------------
def _bcast_spec(shape, grid_rank):
    """Whole-array block, same block for every grid step (weights / biases)."""
    zeros = (0,) * len(shape)
    if grid_rank == 1:
        return pl.BlockSpec(shape, lambda i: zeros)
    return pl.BlockSpec(shape, lambda i, j: zeros)


def _choose_tile(n):
    """Point-dimension tile: biggest of {512,256,128} dividing N, else whole N."""
    for t in (512, 256, 128):
        if n % t == 0:
            return t
    return n  # small / odd N: whole axis (full-dim layout exemption)


# ----------------------------------------------------------------------------
# Kernel 1: TNet(k=3) point-feature stack (conv1/2/3 + folded BN + relu) with a
#           running max over point tiles -> (B, 1024)
# ----------------------------------------------------------------------------
def _tnet_feat_kernel(x_ref, w1, b1, w2, b2, w3, b3, g_ref):
    @pl.when(pl.program_id(1) == 0)
    def _init():
        g_ref[...] = jnp.full(g_ref.shape, -jnp.inf, dtype=g_ref.dtype)

    x = x_ref[0].astype(w1.dtype)                                        # (TN, k)
    h = jnp.dot(x, w1[...], preferred_element_type=jnp.float32) + b1[...]
    h = jnp.maximum(h, 0.0).astype(w2.dtype)                             # (TN, 64)
    h = jnp.dot(h, w2[...], preferred_element_type=jnp.float32) + b2[...]
    h = jnp.maximum(h, 0.0).astype(w3.dtype)                             # (TN, 128)
    h = jnp.dot(h, w3[...], preferred_element_type=jnp.float32) + b3[...]
    h = jnp.maximum(h, 0.0)                                              # (TN, 1024)
    g_ref[0] = jnp.maximum(g_ref[0], jnp.max(h, axis=0, keepdims=True))


def tnet_point_feature(x_pts, p, tile_n):
    B, N, k = x_pts.shape
    n_tiles = N // tile_n
    weights = [p["w1"], p["b1"], p["w2"], p["b2"], p["w3"], p["b3"]]
    in_specs = [pl.BlockSpec((1, tile_n, k), lambda b, n: (b, n, 0))] + \
               [_bcast_spec(w.shape, 2) for w in weights]
    g = pl.pallas_call(
        _tnet_feat_kernel,
        out_shape=jax.ShapeDtypeStruct((B, 1, 1024), jnp.float32),
        grid=(B, n_tiles),
        in_specs=in_specs,
        out_specs=pl.BlockSpec((1, 1, 1024), lambda b, n: (b, 0, 0)),
        compiler_params=pltpu.CompilerParams(
            dimension_semantics=("parallel", "arbitrary"),
            vmem_limit_bytes=VMEM_LIMIT),
    )(x_pts, *weights)
    return g.reshape(B, 1024)


# ----------------------------------------------------------------------------
# Kernel 2: TNet FC head  fc1->bn->relu, fc2->bn->relu, fc3 (lane-padded out)
# ----------------------------------------------------------------------------
def _tnet_head_kernel(g_ref, w1, b1, w2, b2, w3, b3, m_ref):
    h = jnp.dot(g_ref[...], w1[...], preferred_element_type=jnp.float32) + b1[...]
    h = jnp.maximum(h, 0.0)                                              # (B, 512)
    h = jnp.dot(h, w2[...], preferred_element_type=jnp.float32) + b2[...]
    h = jnp.maximum(h, 0.0)                                              # (B, 256)
    m_ref[...] = jnp.dot(h, w3[...], preferred_element_type=jnp.float32) + b3[...]


def tnet_head(g, p, k):
    B = g.shape[0]
    kk_pad = p["fw3"].shape[1]                      # k*k padded up to >=128 lanes
    weights = [p["fw1"], p["fb1"], p["fw2"], p["fb2"], p["fw3"], p["fb3"]]
    in_specs = [_bcast_spec(g.shape, 1)] + [_bcast_spec(w.shape, 1) for w in weights]
    m = pl.pallas_call(
        _tnet_head_kernel,
        out_shape=jax.ShapeDtypeStruct((B, kk_pad), jnp.float32),
        grid=(1,),
        in_specs=in_specs,
        out_specs=_bcast_spec((B, kk_pad), 1),
        compiler_params=pltpu.CompilerParams(vmem_limit_bytes=VMEM_LIMIT),
    )(g, *weights)
    # slice the padding away, reshape, add identity (fc3 is zero-init)
    return m[:, :k * k].reshape(B, k, k) + jnp.eye(k, dtype=jnp.float32)[None]


# ----------------------------------------------------------------------------
# Kernel 3 (fused): conv1+bn1+relu (with the per-batch 3x3 input transform
# folded into its weight) AND the TNet(k=64) point-feature stack in one pass.
# Output: running-max g64 (B, 1024).  No (B, N, 64) activation is written.
# ----------------------------------------------------------------------------
def _conv1_tnet64_kernel(x_ref, wf_ref, cb_ref, w1, b1, w2, b2, w3, b3, g_ref):
    @pl.when(pl.program_id(1) == 0)
    def _init():
        g_ref[...] = jnp.full(g_ref.shape, -jnp.inf, dtype=g_ref.dtype)

    # conv1 (3->64) with per-batch input transform folded into wf (B,3,64)
    y = jnp.dot(x_ref[0], wf_ref[0], preferred_element_type=jnp.float32) + cb_ref[...]
    y = jnp.maximum(y, 0.0).astype(w1.dtype)                             # (TN, 64) bf16

    # TNet(k=64) feature stack on the fresh tile, running max into g
    h = jnp.dot(y, w1[...], preferred_element_type=jnp.float32) + b1[...]
    h = jnp.maximum(h, 0.0).astype(w2.dtype)                             # (TN, 64)
    h = jnp.dot(h, w2[...], preferred_element_type=jnp.float32) + b2[...]
    h = jnp.maximum(h, 0.0).astype(w3.dtype)                             # (TN, 128)
    h = jnp.dot(h, w3[...], preferred_element_type=jnp.float32) + b3[...]
    h = jnp.maximum(h, 0.0)                                              # (TN, 1024)
    g_ref[0] = jnp.maximum(g_ref[0], jnp.max(h, axis=0, keepdims=True))


def conv1_tnet64(x_pts, c1w_fused, c1b, p64, tile_n):
    B, N, _ = x_pts.shape
    n_tiles = N // tile_n
    consts = [c1b, p64["w1"], p64["b1"], p64["w2"], p64["b2"], p64["w3"], p64["b3"]]
    in_specs = [pl.BlockSpec((1, tile_n, 3), lambda b, n: (b, n, 0)),
                pl.BlockSpec((1, 3, 64), lambda b, n: (b, 0, 0))] + \
               [_bcast_spec(c.shape, 2) for c in consts]
    g = pl.pallas_call(
        _conv1_tnet64_kernel,
        out_shape=jax.ShapeDtypeStruct((B, 1, 1024), jnp.float32),
        grid=(B, n_tiles),
        in_specs=in_specs,
        out_specs=pl.BlockSpec((1, 1, 1024), lambda b, n: (b, 0, 0)),
        compiler_params=pltpu.CompilerParams(
            dimension_semantics=("parallel", "arbitrary"),
            vmem_limit_bytes=VMEM_LIMIT),
    )(x_pts, c1w_fused, *consts)
    return g.reshape(B, 1024)


# ----------------------------------------------------------------------------
# Kernel 4 (fused): recompute conv1+bn1+relu from x (tiny K=3 matmul), then
# conv2+bn2+relu (with the 64x64 feature transform folded into its weight),
# conv3+bn3 (no relu), and the running global max over point tiles.
# Avoids any HBM round trip of a (B, N, 64) activation.
# ----------------------------------------------------------------------------
def _conv123_max_kernel(x_ref, w1f_ref, b1_ref, w2f_ref, b2_ref, w3, b3, o_ref):
    @pl.when(pl.program_id(1) == 0)
    def _init():
        o_ref[...] = jnp.full(o_ref.shape, -jnp.inf, dtype=o_ref.dtype)

    # conv1 (3->64), per-batch mat3 folded into w1f
    y = jnp.dot(x_ref[0], w1f_ref[0], preferred_element_type=jnp.float32) + b1_ref[...]
    y = jnp.maximum(y, 0.0).astype(w2f_ref.dtype)                        # (TN, 64) bf16
    # conv2 (64->128), per-batch mat64 folded into w2f
    h = jnp.dot(y, w2f_ref[0], preferred_element_type=jnp.float32) + b2_ref[...]
    h = jnp.maximum(h, 0.0).astype(w3.dtype)                             # (TN, 128)
    # conv3 (128->1024) + bn3, NO relu
    h = jnp.dot(h, w3[...], preferred_element_type=jnp.float32) + b3[...]
    o_ref[0] = jnp.maximum(o_ref[0], jnp.max(h, axis=0, keepdims=True))


def conv123_max(x_pts, c1w_fused, c1b, c2w_fused, c2b, c3w, c3b, tile_n):
    B, N, _ = x_pts.shape
    n_tiles = N // tile_n
    consts = [c1b, c2b, c3w, c3b]
    in_specs = [pl.BlockSpec((1, tile_n, 3), lambda b, n: (b, n, 0)),
                pl.BlockSpec((1, 3, 64), lambda b, n: (b, 0, 0)),
                _bcast_spec(c1b.shape, 2),
                pl.BlockSpec((1, 64, 128), lambda b, n: (b, 0, 0)),
                _bcast_spec(c2b.shape, 2),
                _bcast_spec(c3w.shape, 2),
                _bcast_spec(c3b.shape, 2)]
    out = pl.pallas_call(
        _conv123_max_kernel,
        out_shape=jax.ShapeDtypeStruct((B, 1, 1024), jnp.float32),
        grid=(B, n_tiles),
        in_specs=in_specs,
        out_specs=pl.BlockSpec((1, 1, 1024), lambda b, n: (b, 0, 0)),
        compiler_params=pltpu.CompilerParams(
            dimension_semantics=("parallel", "arbitrary"),
            vmem_limit_bytes=VMEM_LIMIT),
    )(x_pts, c1w_fused, c1b, c2w_fused, c2b, c3w, c3b)
    return out.reshape(B, 1024)


# ----------------------------------------------------------------------------
# Parameter construction (deterministic, synthetic) + BN / bias folding
# ----------------------------------------------------------------------------
def _bn_affine(key, c):
    k1, k2, k3, k4 = jax.random.split(key, 4)
    gamma = 1.0 + 0.1 * jax.random.normal(k1, (c,), jnp.float32)
    beta = 0.1 * jax.random.normal(k2, (c,), jnp.float32)
    mean = 0.1 * jax.random.normal(k3, (c,), jnp.float32)
    var = 1.0 + 0.1 * jax.random.uniform(k4, (c,), jnp.float32)
    s = gamma / jnp.sqrt(var + EPS)
    t = beta - mean * s
    return s.reshape(1, c), t.reshape(1, c)


def make_tnet_params(key, k):
    keys = jax.random.split(key, 15)

    def w(kk, shape, scale=0.1):
        return scale * jax.random.normal(kk, shape, jnp.float32)

    p = {}
    p["w1"] = w(keys[0], (k, 64));      p["b1"] = w(keys[1], (1, 64))
    p["w2"] = w(keys[2], (64, 128));    p["b2"] = w(keys[3], (1, 128))
    p["w3"] = w(keys[4], (128, 1024));  p["b3"] = w(keys[5], (1, 1024))
    p["s1"], p["t1"] = _bn_affine(keys[6], 64)
    p["s2"], p["t2"] = _bn_affine(keys[7], 128)
    p["s3"], p["t3"] = _bn_affine(keys[8], 1024)
    p["fw1"] = w(keys[9], (1024, 512));  p["fb1"] = w(keys[10], (1, 512))
    p["fw2"] = w(keys[11], (512, 256));  p["fb2"] = w(keys[12], (1, 256))
    p["fw3"] = jnp.zeros((256, k * k), jnp.float32)   # nn.init.zeros_
    p["fb3"] = jnp.zeros((1, k * k), jnp.float32)     # nn.init.zeros_
    p["s4"], p["t4"] = _bn_affine(keys[13], 512)
    p["s5"], p["t5"] = _bn_affine(keys[14], 256)
    return p


def make_transformnet_params(key):
    keys = jax.random.split(key, 11)

    def w(kk, shape, scale=0.1):
        return scale * jax.random.normal(kk, shape, jnp.float32)

    p = {"tnet3": make_tnet_params(keys[0], 3),
         "tnet64": make_tnet_params(keys[1], 64)}
    p["c1w"] = w(keys[2], (3, 64));      p["c1b"] = w(keys[3], (1, 64))
    p["c2w"] = w(keys[4], (64, 128));    p["c2b"] = w(keys[5], (1, 128))
    p["c3w"] = w(keys[6], (128, 1024));  p["c3b"] = w(keys[7], (1, 1024))
    p["c1s"], p["c1t"] = _bn_affine(keys[8], 64)
    p["c2s"], p["c2t"] = _bn_affine(keys[9], 128)
    p["c3s"], p["c3t"] = _bn_affine(keys[10], 1024)
    return p


def _fold(w, b, s, t, dtype):
    """Fold BN affine (scale s, shift t) and bias into the weight / bias."""
    wf = (w * s).astype(dtype)
    bf = (b * s + t).astype(jnp.float32)
    return wf, bf


def fold_tnet_params(p, first_dtype):
    f = {}
    f["w1"], f["b1"] = _fold(p["w1"], p["b1"], p["s1"], p["t1"], first_dtype)
    f["w2"], f["b2"] = _fold(p["w2"], p["b2"], p["s2"], p["t2"], jnp.bfloat16)
    f["w3"], f["b3"] = _fold(p["w3"], p["b3"], p["s3"], p["t3"], jnp.bfloat16)
    f["fw1"], f["fb1"] = _fold(p["fw1"], p["fb1"], p["s4"], p["t4"], jnp.float32)
    f["fw2"], f["fb2"] = _fold(p["fw2"], p["fb2"], p["s5"], p["t5"], jnp.float32)
    # fc3 (no BN): pad k*k output width to a lane-dense multiple of 128.
    kk = p["fw3"].shape[1]
    kk_pad = max(128, ((kk + 127) // 128) * 128)
    f["fw3"] = jnp.zeros((p["fw3"].shape[0], kk_pad), jnp.float32).at[:, :kk].set(p["fw3"])
    f["fb3"] = jnp.zeros((1, kk_pad), jnp.float32).at[:, :kk].set(p["fb3"])
    return f


def fold_transformnet_params(p):
    f = {"tnet3": fold_tnet_params(p["tnet3"], jnp.float32),    # K=3: keep f32
         "tnet64": fold_tnet_params(p["tnet64"], jnp.bfloat16)}
    f["c1w"], f["c1b"] = _fold(p["c1w"], p["c1b"], p["c1s"], p["c1t"], jnp.float32)
    f["c2w"], f["c2b"] = _fold(p["c2w"], p["c2b"], p["c2s"], p["c2t"], jnp.float32)
    f["c3w"], f["c3b"] = _fold(p["c3w"], p["c3b"], p["c3s"], p["c3t"], jnp.bfloat16)
    return f


# ----------------------------------------------------------------------------
# Full forward (return_global=False path)
# ----------------------------------------------------------------------------
def transform_net_forward(x, fp):
    # x: (B, 3, N) like PyTorch; internally channels-last (B, N, 3)
    B, _, N = x.shape
    x_pts = jnp.transpose(x, (0, 2, 1))                          # (B, N, 3)
    tile_n = _choose_tile(N)

    # input transform TNet(k=3)
    g3 = tnet_point_feature(x_pts, fp["tnet3"], tile_n)          # (B, 1024)
    mat3 = tnet_head(g3, fp["tnet3"], 3)                         # (B, 3, 3)

    # fold bmm(x, mat3) into conv1's weight: per-batch (3,3)@(3,64) -- tiny
    c1w_fused = jnp.einsum("bij,jk->bik", mat3, fp["c1w"])       # (B, 3, 64) f32

    # fused conv1+bn1+relu + TNet(k=64) point-feature stack (one HBM pass over x)
    g64 = conv1_tnet64(x_pts, c1w_fused, fp["c1b"], fp["tnet64"], tile_n)
    mat64 = tnet_head(g64, fp["tnet64"], 64)                     # (B, 64, 64)

    # fold bmm(y, mat64) into conv2's weight: per-batch (64,64)@(64,128)
    c2w_fused = jnp.einsum("bij,jk->bik", mat64, fp["c2w"]).astype(jnp.bfloat16)

    # conv1 (recomputed) -> conv2+bn2+relu -> conv3+bn3 (no relu) -> global max
    out = conv123_max(x_pts, c1w_fused, fp["c1b"], c2w_fused, fp["c2b"],
                      fp["c3w"], fp["c3b"], tile_n)
    return out, mat3, mat64


if __name__ == "__main__":
    key = jax.random.PRNGKey(0)
    pkey, xkey = jax.random.split(key)
    raw_params = make_transformnet_params(pkey)
    params = fold_transformnet_params(raw_params)

    B, N = 2, 16
    x = jax.random.normal(xkey, (B, 3, N), jnp.float32)          # PyTorch NCL layout

    fwd = jax.jit(transform_net_forward)
    out, mat3, mat64 = fwd(x, params)
    jax.block_until_ready((out, mat3, mat64))

    assert out.shape == (B, 1024)
    assert mat3.shape == (B, 3, 3)
    assert mat64.shape == (B, 64, 64)
    print("KERNEL_OK")
</pallas_src>

<mosaic_0001>
module attributes {stable_mosaic.version = 11 : i64} {
  func.func @_tnet_head_kernel(%arg0: i32, %arg1: memref<2x1024xf32, #tpu.memory_space<vmem>>, %arg2: memref<1024x512xf32, #tpu.memory_space<vmem>>, %arg3: memref<1x512xf32, #tpu.memory_space<vmem>>, %arg4: memref<512x256xf32, #tpu.memory_space<vmem>>, %arg5: memref<1x256xf32, #tpu.memory_space<vmem>>, %arg6: memref<256x128xf32, #tpu.memory_space<vmem>>, %arg7: memref<1x128xf32, #tpu.memory_space<vmem>>, %arg8: memref<2x128xf32, #tpu.memory_space<vmem>>) attributes {dimension_semantics = [#tpu.dimension_semantics<arbitrary>], iteration_bounds = array<i64: 1>, scalar_prefetch = 0 : i64, scratch_operands = 0 : i64, tpu.core_type = #tpu.core_type<tc>, window_params = [{pipeline_mode = #tpu.pipeline_mode<synchronous>, transform_indices = @transform_0, window_bounds = array<i64: 2, 1024>}, {pipeline_mode = #tpu.pipeline_mode<synchronous>, transform_indices = @transform_1, window_bounds = array<i64: 1024, 512>}, {pipeline_mode = #tpu.pipeline_mode<synchronous>, transform_indices = @transform_2, window_bounds = array<i64: 1, 512>}, {pipeline_mode = #tpu.pipeline_mode<synchronous>, transform_indices = @transform_3, window_bounds = array<i64: 512, 256>}, {pipeline_mode = #tpu.pipeline_mode<synchronous>, transform_indices = @transform_4, window_bounds = array<i64: 1, 256>}, {pipeline_mode = #tpu.pipeline_mode<synchronous>, transform_indices = @transform_5, window_bounds = array<i64: 256, 128>}, {pipeline_mode = #tpu.pipeline_mode<synchronous>, transform_indices = @transform_6, window_bounds = array<i64: 1, 128>}, {pipeline_mode = #tpu.pipeline_mode<synchronous>, transform_indices = @transform_7, window_bounds = array<i64: 2, 128>}]} {
    %c0 = arith.constant 0 : index
    %c0_0 = arith.constant 0 : index
    %0 = vector.load %arg1[%c0, %c0_0] : memref<2x1024xf32, #tpu.memory_space<vmem>>, vector<2x1024xf32>
    %c0_1 = arith.constant 0 : index
    %c0_2 = arith.constant 0 : index
    %1 = vector.load %arg2[%c0_1, %c0_2] : memref<1024x512xf32, #tpu.memory_space<vmem>>, vector<1024x512xf32>
    %cst = arith.constant dense<0.000000e+00> : vector<2x512xf32>
    %2 = tpu.matmul %0, %1, %cst {dimension_numbers = #tpu.dot_dimension_numbers<[1], [0], [0], [1], [0, 0, 1, 1], [], []>} : vector<2x1024xf32>, vector<1024x512xf32>, vector<2x512xf32> -> vector<2x512xf32>
    %c0_3 = arith.constant 0 : index
    %c0_4 = arith.constant 0 : index
    %3 = vector.load %arg3[%c0_3, %c0_4] : memref<1x512xf32, #tpu.memory_space<vmem>>, vector<1x512xf32>
    %4 = vector.broadcast %3 : vector<1x512xf32> to vector<2x512xf32>
    %5 = arith.addf %2, %4 : vector<2x512xf32>
    %cst_5 = arith.constant 0.000000e+00 : f32
    %6 = vector.broadcast %cst_5 : f32 to vector<2x512xf32>
    %7 = arith.maximumf %5, %6 : vector<2x512xf32>
    %c0_6 = arith.constant 0 : index
    %c0_7 = arith.constant 0 : index
    %8 = vector.load %arg4[%c0_6, %c0_7] : memref<512x256xf32, #tpu.memory_space<vmem>>, vector<512x256xf32>
    %cst_8 = arith.constant dense<0.000000e+00> : vector<2x256xf32>
    %9 = tpu.matmul %7, %8, %cst_8 {dimension_numbers = #tpu.dot_dimension_numbers<[1], [0], [0], [1], [0, 0, 1, 1], [], []>} : vector<2x512xf32>, vector<512x256xf32>, vector<2x256xf32> -> vector<2x256xf32>
    %c0_9 = arith.constant 0 : index
    %c0_10 = arith.constant 0 : index
    %10 = vector.load %arg5[%c0_9, %c0_10] : memref<1x256xf32, #tpu.memory_space<vmem>>, vector<1x256xf32>
    %11 = vector.broadcast %10 : vector<1x256xf32> to vector<2x256xf32>
    %12 = arith.addf %9, %11 : vector<2x256xf32>
    %cst_11 = arith.constant 0.000000e+00 : f32
    %13 = vector.broadcast %cst_11 : f32 to vector<2x256xf32>
    %14 = arith.maximumf %12, %13 : vector<2x256xf32>
    %c0_12 = arith.constant 0 : index
    %c0_13 = arith.constant 0 : index
    %15 = vector.load %arg6[%c0_12, %c0_13] : memref<256x128xf32, #tpu.memory_space<vmem>>, vector<256x128xf32>
    %cst_14 = arith.constant dense<0.000000e+00> : vector<2x128xf32>
    %16 = tpu.matmul %14, %15, %cst_14 {dimension_numbers = #tpu.dot_dimension_numbers<[1], [0], [0], [1], [0, 0, 1, 1], [], []>} : vector<2x256xf32>, vector<256x128xf32>, vector<2x128xf32> -> vector<2x128xf32>
    %c0_15 = arith.constant 0 : index
    %c0_16 = arith.constant 0 : index
    %17 = vector.load %arg7[%c0_15, %c0_16] : memref<1x128xf32, #tpu.memory_space<vmem>>, vector<1x128xf32>
    %18 = vector.broadcast %17 : vector<1x128xf32> to vector<2x128xf32>
    %19 = arith.addf %16, %18 : vector<2x128xf32>
    %c0_17 = arith.constant 0 : index
    %c0_18 = arith.constant 0 : index
    %20 = vector.load %arg8[%c0_17, %c0_18] : memref<2x128xf32, #tpu.memory_space<vmem>>, vector<2x128xf32>
    tpu.vector_store %arg8[%c0_17, %c0_18], %19 {strides = array<i32>} : memref<2x128xf32, #tpu.memory_space<vmem>>, vector<2x128xf32>,
    return
  }
  func.func @transform_0(%arg0: i32) -> (i32, i32) {
    %c0_i32 = arith.constant 0 : i32
    %c0_i32_0 = arith.constant 0 : i32
    %c0_i32_1 = arith.constant 0 : i32
    return %c0_i32, %c0_i32_0 : i32, i32
  }
  func.func @transform_1(%arg0: i32) -> (i32, i32) {
    %c0_i32 = arith.constant 0 : i32
    %c0_i32_0 = arith.constant 0 : i32
    %c0_i32_1 = arith.constant 0 : i32
    return %c0_i32, %c0_i32_0 : i32, i32
  }
  func.func @transform_2(%arg0: i32) -> (i32, i32) {
    %c0_i32 = arith.constant 0 : i32
    %c0_i32_0 = arith.constant 0 : i32
    %c0_i32_1 = arith.constant 0 : i32
    return %c0_i32, %c0_i32_0 : i32, i32
  }
  func.func @transform_3(%arg0: i32) -> (i32, i32) {
    %c0_i32 = arith.constant 0 : i32
    %c0_i32_0 = arith.constant 0 : i32
    %c0_i32_1 = arith.constant 0 : i32
    return %c0_i32, %c0_i32_0 : i32, i32
  }
  func.func @transform_4(%arg0: i32) -> (i32, i32) {
    %c0_i32 = arith.constant 0 : i32
    %c0_i32_0 = arith.constant 0 : i32
    %c0_i32_1 = arith.constant 0 : i32
    return %c0_i32, %c0_i32_0 : i32, i32
  }
  func.func @transform_5(%arg0: i32) -> (i32, i32) {
    %c0_i32 = arith.constant 0 : i32
    %c0_i32_0 = arith.constant 0 : i32
    %c0_i32_1 = arith.constant 0 : i32
    return %c0_i32, %c0_i32_0 : i32, i32
  }
  func.func @transform_6(%arg0: i32) -> (i32, i32) {
    %c0_i32 = arith.constant 0 : i32
    %c0_i32_0 = arith.constant 0 : i32
    %c0_i32_1 = arith.constant 0 : i32
    return %c0_i32, %c0_i32_0 : i32, i32
  }
  func.func @transform_7(%arg0: i32) -> (i32, i32) {
    %c0_i32 = arith.constant 0 : i32
    %c0_i32_0 = arith.constant 0 : i32
    %c0_i32_1 = arith.constant 0 : i32
    return %c0_i32, %c0_i32_0 : i32, i32
  }
}

module attributes {stable_mosaic.version = 11 : i64} {
  func.func @_tnet_feat_kernel(%arg0: i32, %arg1: i32, %arg2: memref<1x16x3xf32, #tpu.memory_space<vmem>>, %arg3: memref<3x64xf32, #tpu.memory_space<vmem>>, %arg4: memref<1x64xf32, #tpu.memory_space<vmem>>, %arg5: memref<64x128xbf16, #tpu.memory_space<vmem>>, %arg6: memref<1x128xf32, #tpu.memory_space<vmem>>, %arg7: memref<128x1024xbf16, #tpu.memory_space<vmem>>, %arg8: memref<1x1024xf32, #tpu.memory_space<vmem>>, %arg9: memref<1x1x1024xf32, #tpu.memory_space<vmem>>) attributes {dimension_semantics = [#tpu.dimension_semantics<parallel>, #tpu.dimension_semantics<arbitrary>], iteration_bounds = array<i64: 2, 1>, scalar_prefetch = 0 : i64, scratch_operands = 0 : i64, tpu.core_type = #tpu.core_type<tc>, window_params = [{transform_indices = @transform_0, window_bounds = array<i64: 1, 16, 3>}, {pipeline_mode = #tpu.pipeline_mode<synchronous>, transform_indices = @transform_1, window_bounds = array<i64: 3, 64>}, {pipeline_mode = #tpu.pipeline_mode<synchronous>, transform_indices = @transform_2, window_bounds = array<i64: 1, 64>}, {pipeline_mode = #tpu.pipeline_mode<synchronous>, transform_indices = @transform_3, window_bounds = array<i64: 64, 128>}, {pipeline_mode = #tpu.pipeline_mode<synchronous>, transform_indices = @transform_4, window_bounds = array<i64: 1, 128>}, {pipeline_mode = #tpu.pipeline_mode<synchronous>, transform_indices = @transform_5, window_bounds = array<i64: 128, 1024>}, {pipeline_mode = #tpu.pipeline_mode<synchronous>, transform_indices = @transform_6, window_bounds = array<i64: 1, 1024>}, {transform_indices = @transform_7, window_bounds = array<i64: 1, 1, 1024>}]} {
    %c0_i32 = arith.constant 0 : i32
    %0 = arith.cmpi eq, %arg1, %c0_i32 : i32
    %1 = arith.extui %0 : i1 to i32
    %c0_i32_0 = arith.constant 0 : i32
    %2 = arith.cmpi ne, %1, %c0_i32_0 : i32
    scf.if %2 {
      %cst_27 = arith.constant 0xFF800000 : f32
      %36 = vector.broadcast %cst_27 : f32 to vector<1x1x1024xf32>
      %c0_28 = arith.constant 0 : index
      %c0_29 = arith.constant 0 : index
      %c0_30 = arith.constant 0 : index
      %37 = vector.load %arg9[%c0_28, %c0_29, %c0_30] : memref<1x1x1024xf32, #tpu.memory_space<vmem>>, vector<1x1x1024xf32>
      tpu.vector_store %arg9[%c0_28, %c0_29, %c0_30], %36 {strides = array<i32>} : memref<1x1x1024xf32, #tpu.memory_space<vmem>>, vector<1x1x1024xf32>,
    } else {
    }
    %c0 = arith.constant 0 : index
    %c0_1 = arith.constant 0 : index
    %c0_2 = arith.constant 0 : index
    %3 = vector.load %arg2[%c0, %c0_1, %c0_2] : memref<1x16x3xf32, #tpu.memory_space<vmem>>, vector<1x16x3xf32>
    %4 = vector.shape_cast %3 : vector<1x16x3xf32> to vector<16x3xf32>
    %c0_3 = arith.constant 0 : index
    %c0_4 = arith.constant 0 : index
    %5 = vector.load %arg3[%c0_3, %c0_4] : memref<3x64xf32, #tpu.memory_space<vmem>>, vector<3x64xf32>
    %cst = arith.constant dense<0.000000e+00> : vector<16x64xf32>
    %6 = tpu.matmul %4, %5, %cst {dimension_numbers = #tpu.dot_dimension_numbers<[1], [0], [0], [1], [0, 0, 1, 1], [], []>} : vector<16x3xf32>, vector<3x64xf32>, vector<16x64xf32> -> vector<16x64xf32>
    %c0_5 = arith.constant 0 : index
    %c0_6 = arith.constant 0 : index
    %7 = vector.load %arg4[%c0_5, %c0_6] : memref<1x64xf32, #tpu.memory_space<vmem>>, vector<1x64xf32>
    %8 = vector.broadcast %7 : vector<1x64xf32> to vector<16x64xf32>
    %9 = arith.addf %6, %8 : vector<16x64xf32>
    %cst_7 = arith.constant 0.000000e+00 : f32
    %10 = vector.broadcast %cst_7 : f32 to vector<16x64xf32>
    %11 = arith.maximumf %9, %10 : vector<16x64xf32>
    %12 = arith.truncf %11 : vector<16x64xf32> to vector<16x64xbf16>
    %c0_8 = arith.constant 0 : index
    %c0_9 = arith.constant 0 : index
    %13 = vector.load %arg5[%c0_8, %c0_9] : memref<64x128xbf16, #tpu.memory_space<vmem>>, vector<64x128xbf16>
    %cst_10 = arith.constant dense<0.000000e+00> : vector<16x128xf32>
    %14 = tpu.matmul %12, %13, %cst_10 {dimension_numbers = #tpu.dot_dimension_numbers<[1], [0], [0], [1], [0, 0, 1, 1], [], []>} : vector<16x64xbf16>, vector<64x128xbf16>, vector<16x128xf32> -> vector<16x128xf32>
    %c0_11 = arith.constant 0 : index
    %c0_12 = arith.constant 0 : index
    %15 = vector.load %arg6[%c0_11, %c0_12] : memref<1x128xf32, #tpu.memory_space<vmem>>, vector<1x128xf32>
    %16 = vector.broadcast %15 : vector<1x128xf32> to vector<16x128xf32>
    %17 = arith.addf %14, %16 : vector<16x128xf32>
    %cst_13 = arith.constant 0.000000e+00 : f32
    %18 = vector.broadcast %cst_13 : f32 to vector<16x128xf32>
    %19 = arith.maximumf %17, %18 : vector<16x128xf32>
    %20 = arith.truncf %19 : vector<16x128xf32> to vector<16x128xbf16>
    %c0_14 = arith.constant 0 : index
    %c0_15 = arith.constant 0 : index
    %21 = vector.load %arg7[%c0_14, %c0_15] : memref<128x1024xbf16, #tpu.memory_space<vmem>>, vector<128x1024xbf16>
    %cst_16 = arith.constant dense<0.000000e+00> : vector<16x1024xf32>
    %22 = tpu.matmul %20, %21, %cst_16 {dimension_numbers = #tpu.dot_dimension_numbers<[1], [0], [0], [1], [0, 0, 1, 1], [], []>} : vector<16x128xbf16>, vector<128x1024xbf16>, vector<16x1024xf32> -> vector<16x1024xf32>
    %c0_17 = arith.constant 0 : index
    %c0_18 = arith.constant 0 : index
    %23 = vector.load %arg8[%c0_17, %c0_18] : memref<1x1024xf32, #tpu.memory_space<vmem>>, vector<1x1024xf32>
    %24 = vector.broadcast %23 : vector<1x1024xf32> to vector<16x1024xf32>
    %25 = arith.addf %22, %24 : vector<16x1024xf32>
    %cst_19 = arith.constant 0.000000e+00 : f32
    %26 = vector.broadcast %cst_19 : f32 to vector<16x1024xf32>
    %27 = arith.maximumf %25, %26 : vector<16x1024xf32>
    %c0_20 = arith.constant 0 : index
    %c0_21 = arith.constant 0 : index
    %c0_22 = arith.constant 0 : index
    %28 = vector.load %arg9[%c0_20, %c0_21, %c0_22] : memref<1x1x1024xf32, #tpu.memory_space<vmem>>, vector<1x1x1024xf32>
    %29 = vector.shape_cast %28 : vector<1x1x1024xf32> to vector<1x1024xf32>
    %cst_23 = arith.constant dense<0xFF800000> : vector<1024xf32>
    %30 = vector.multi_reduction <maximumf>, %27, %cst_23 [0] : vector<16x1024xf32> to vector<1024xf32>
    %31 = vector.shape_cast %30 : vector<1024xf32> to vector<1x1024xf32>
    %32 = arith.maximumf %29, %31 : vector<1x1024xf32>
    %c0_24 = arith.constant 0 : index
    %c0_25 = arith.constant 0 : index
    %c0_26 = arith.constant 0 : index
    %33 = vector.load %arg9[%c0_24, %c0_25, %c0_26] : memref<1x1x1024xf32, #tpu.memory_space<vmem>>, vector<1x1x1024xf32>
    %34 = vector.shape_cast %33 : vector<1x1x1024xf32> to vector<1x1024xf32>
    %35 = vector.shape_cast %32 : vector<1x1024xf32> to vector<1x1x1024xf32>
    tpu.vector_store %arg9[%c0_24, %c0_25, %c0_26], %35 {strides = array<i32>} : memref<1x1x1024xf32, #tpu.memory_space<vmem>>, vector<1x1x1024xf32>,
    return
  }
  func.func @transform_0(%arg0: i32, %arg1: i32) -> (i32, i32, i32) {
    %c0_i32 = arith.constant 0 : i32
    %c0_i32_0 = arith.constant 0 : i32
    return %arg0, %arg1, %c0_i32 : i32, i32, i32
  }
  func.func @transform_1(%arg0: i32, %arg1: i32) -> (i32, i32) {
    %c0_i32 = arith.constant 0 : i32
    %c0_i32_0 = arith.constant 0 : i32
    %c0_i32_1 = arith.constant 0 : i32
    return %c0_i32, %c0_i32_0 : i32, i32
  }
  func.func @transform_2(%arg0: i32, %arg1: i32) -> (i32, i32) {
    %c0_i32 = arith.constant 0 : i32
    %c0_i32_0 = arith.constant 0 : i32
    %c0_i32_1 = arith.constant 0 : i32
    return %c0_i32, %c0_i32_0 : i32, i32
  }
  func.func @transform_3(%arg0: i32, %arg1: i32) -> (i32, i32) {
    %c0_i32 = arith.constant 0 : i32
    %c0_i32_0 = arith.constant 0 : i32
    %c0_i32_1 = arith.constant 0 : i32
    return %c0_i32, %c0_i32_0 : i32, i32
  }
  func.func @transform_4(%arg0: i32, %arg1: i32) -> (i32, i32) {
    %c0_i32 = arith.constant 0 : i32
    %c0_i32_0 = arith.constant 0 : i32
    %c0_i32_1 = arith.constant 0 : i32
    return %c0_i32, %c0_i32_0 : i32, i32
  }
  func.func @transform_5(%arg0: i32, %arg1: i32) -> (i32, i32) {
    %c0_i32 = arith.constant 0 : i32
    %c0_i32_0 = arith.constant 0 : i32
    %c0_i32_1 = arith.constant 0 : i32
    return %c0_i32, %c0_i32_0 : i32, i32
  }
  func.func @transform_6(%arg0: i32, %arg1: i32) -> (i32, i32) {
    %c0_i32 = arith.constant 0 : i32
    %c0_i32_0 = arith.constant 0 : i32
    %c0_i32_1 = arith.constant 0 : i32
    return %c0_i32, %c0_i32_0 : i32, i32
  }
  func.func @transform_7(%arg0: i32, %arg1: i32) -> (i32, i32, i32) {
    %c0_i32 = arith.constant 0 : i32
    %c0_i32_0 = arith.constant 0 : i32
    %c0_i32_1 = arith.constant 0 : i32
    return %arg0, %c0_i32, %c0_i32_0 : i32, i32, i32
  }
}

module attributes {stable_mosaic.version = 11 : i64} {
  func.func @_tnet_head_kernel(%arg0: i32, %arg1: memref<2x1024xf32, #tpu.memory_space<vmem>>, %arg2: memref<1024x512xf32, #tpu.memory_space<vmem>>, %arg3: memref<1x512xf32, #tpu.memory_space<vmem>>, %arg4: memref<512x256xf32, #tpu.memory_space<vmem>>, %arg5: memref<1x256xf32, #tpu.memory_space<vmem>>, %arg6: memref<256x4096xf32, #tpu.memory_space<vmem>>, %arg7: memref<1x4096xf32, #tpu.memory_space<vmem>>, %arg8: memref<2x4096xf32, #tpu.memory_space<vmem>>) attributes {dimension_semantics = [#tpu.dimension_semantics<arbitrary>], iteration_bounds = array<i64: 1>, scalar_prefetch = 0 : i64, scratch_operands = 0 : i64, tpu.core_type = #tpu.core_type<tc>, window_params = [{pipeline_mode = #tpu.pipeline_mode<synchronous>, transform_indices = @transform_0, window_bounds = array<i64: 2, 1024>}, {pipeline_mode = #tpu.pipeline_mode<synchronous>, transform_indices = @transform_1, window_bounds = array<i64: 1024, 512>}, {pipeline_mode = #tpu.pipeline_mode<synchronous>, transform_indices = @transform_2, window_bounds = array<i64: 1, 512>}, {pipeline_mode = #tpu.pipeline_mode<synchronous>, transform_indices = @transform_3, window_bounds = array<i64: 512, 256>}, {pipeline_mode = #tpu.pipeline_mode<synchronous>, transform_indices = @transform_4, window_bounds = array<i64: 1, 256>}, {pipeline_mode = #tpu.pipeline_mode<synchronous>, transform_indices = @transform_5, window_bounds = array<i64: 256, 4096>}, {pipeline_mode = #tpu.pipeline_mode<synchronous>, transform_indices = @transform_6, window_bounds = array<i64: 1, 4096>}, {pipeline_mode = #tpu.pipeline_mode<synchronous>, transform_indices = @transform_7, window_bounds = array<i64: 2, 4096>}]} {
    %c0 = arith.constant 0 : index
    %c0_0 = arith.constant 0 : index
    %0 = vector.load %arg1[%c0, %c0_0] : memref<2x1024xf32, #tpu.memory_space<vmem>>, vector<2x1024xf32>
    %c0_1 = arith.constant 0 : index
    %c0_2 = arith.constant 0 : index
    %1 = vector.load %arg2[%c0_1, %c0_2] : memref<1024x512xf32, #tpu.memory_space<vmem>>, vector<1024x512xf32>
    %cst = arith.constant dense<0.000000e+00> : vector<2x512xf32>
    %2 = tpu.matmul %0, %1, %cst {dimension_numbers = #tpu.dot_dimension_numbers<[1], [0], [0], [1], [0, 0, 1, 1], [], []>} : vector<2x1024xf32>, vector<1024x512xf32>, vector<2x512xf32> -> vector<2x512xf32>
    %c0_3 = arith.constant 0 : index
    %c0_4 = arith.constant 0 : index
    %3 = vector.load %arg3[%c0_3, %c0_4] : memref<1x512xf32, #tpu.memory_space<vmem>>, vector<1x512xf32>
    %4 = vector.broadcast %3 : vector<1x512xf32> to vector<2x512xf32>
    %5 = arith.addf %2, %4 : vector<2x512xf32>
    %cst_5 = arith.constant 0.000000e+00 : f32
    %6 = vector.broadcast %cst_5 : f32 to vector<2x512xf32>
    %7 = arith.maximumf %5, %6 : vector<2x512xf32>
    %c0_6 = arith.constant 0 : index
    %c0_7 = arith.constant 0 : index
    %8 = vector.load %arg4[%c0_6, %c0_7] : memref<512x256xf32, #tpu.memory_space<vmem>>, vector<512x256xf32>
    %cst_8 = arith.constant dense<0.000000e+00> : vector<2x256xf32>
    %9 = tpu.matmul %7, %8, %cst_8 {dimension_numbers = #tpu.dot_dimension_numbers<[1], [0], [0], [1], [0, 0, 1, 1], [], []>} : vector<2x512xf32>, vector<512x256xf32>, vector<2x256xf32> -> vector<2x256xf32>
    %c0_9 = arith.constant 0 : index
    %c0_10 = arith.constant 0 : index
    %10 = vector.load %arg5[%c0_9, %c0_10] : memref<1x256xf32, #tpu.memory_space<vmem>>, vector<1x256xf32>
    %11 = vector.broadcast %10 : vector<1x256xf32> to vector<2x256xf32>
    %12 = arith.addf %9, %11 : vector<2x256xf32>
    %cst_11 = arith.constant 0.000000e+00 : f32
    %13 = vector.broadcast %cst_11 : f32 to vector<2x256xf32>
    %14 = arith.maximumf %12, %13 : vector<2x256xf32>
    %c0_12 = arith.constant 0 : index
    %c0_13 = arith.constant 0 : index
    %15 = vector.load %arg6[%c0_12, %c0_13] : memref<256x4096xf32, #tpu.memory_space<vmem>>, vector<256x4096xf32>
    %cst_14 = arith.constant dense<0.000000e+00> : vector<2x4096xf32>
    %16 = tpu.matmul %14, %15, %cst_14 {dimension_numbers = #tpu.dot_dimension_numbers<[1], [0], [0], [1], [0, 0, 1, 1], [], []>} : vector<2x256xf32>, vector<256x4096xf32>, vector<2x4096xf32> -> vector<2x4096xf32>
    %c0_15 = arith.constant 0 : index
    %c0_16 = arith.constant 0 : index
    %17 = vector.load %arg7[%c0_15, %c0_16] : memref<1x4096xf32, #tpu.memory_space<vmem>>, vector<1x4096xf32>
    %18 = vector.broadcast %17 : vector<1x4096xf32> to vector<2x4096xf32>
    %19 = arith.addf %16, %18 : vector<2x4096xf32>
    %c0_17 = arith.constant 0 : index
    %c0_18 = arith.constant 0 : index
    %20 = vector.load %arg8[%c0_17, %c0_18] : memref<2x4096xf32, #tpu.memory_space<vmem>>, vector<2x4096xf32>
    tpu.vector_store %arg8[%c0_17, %c0_18], %19 {strides = array<i32>} : memref<2x4096xf32, #tpu.memory_space<vmem>>, vector<2x4096xf32>,
    return
  }
  func.func @transform_0(%arg0: i32) -> (i32, i32) {
    %c0_i32 = arith.constant 0 : i32
    %c0_i32_0 = arith.constant 0 : i32
    %c0_i32_1 = arith.constant 0 : i32
    return %c0_i32, %c0_i32_0 : i32, i32
  }
  func.func @transform_1(%arg0: i32) -> (i32, i32) {
    %c0_i32 = arith.constant 0 : i32
    %c0_i32_0 = arith.constant 0 : i32
    %c0_i32_1 = arith.constant 0 : i32
    return %c0_i32, %c0_i32_0 : i32, i32
  }
  func.func @transform_2(%arg0: i32) -> (i32, i32) {
    %c0_i32 = arith.constant 0 : i32
    %c0_i32_0 = arith.constant 0 : i32
    %c0_i32_1 = arith.constant 0 : i32
    return %c0_i32, %c0_i32_0 : i32, i32
  }
  func.func @transform_3(%arg0: i32) -> (i32, i32) {
    %c0_i32 = arith.constant 0 : i32
    %c0_i32_0 = arith.constant 0 : i32
    %c0_i32_1 = arith.constant 0 : i32
    return %c0_i32, %c0_i32_0 : i32, i32
  }
  func.func @transform_4(%arg0: i32) -> (i32, i32) {
    %c0_i32 = arith.constant 0 : i32
    %c0_i32_0 = arith.constant 0 : i32
    %c0_i32_1 = arith.constant 0 : i32
    return %c0_i32, %c0_i32_0 : i32, i32
  }
  func.func @transform_5(%arg0: i32) -> (i32, i32) {
    %c0_i32 = arith.constant 0 : i32
    %c0_i32_0 = arith.constant 0 : i32
    %c0_i32_1 = arith.constant 0 : i32
    return %c0_i32, %c0_i32_0 : i32, i32
  }
  func.func @transform_6(%arg0: i32) -> (i32, i32) {
    %c0_i32 = arith.constant 0 : i32
    %c0_i32_0 = arith.constant 0 : i32
    %c0_i32_1 = arith.constant 0 : i32
    return %c0_i32, %c0_i32_0 : i32, i32
  }
  func.func @transform_7(%arg0: i32) -> (i32, i32) {
    %c0_i32 = arith.constant 0 : i32
    %c0_i32_0 = arith.constant 0 : i32
    %c0_i32_1 = arith.constant 0 : i32
    return %c0_i32, %c0_i32_0 : i32, i32
  }
}

module attributes {stable_mosaic.version = 11 : i64} {
  func.func @_conv1_tnet64_kernel(%arg0: i32, %arg1: i32, %arg2: memref<1x16x3xf32, #tpu.memory_space<vmem>>, %arg3: memref<1x3x64xf32, #tpu.memory_space<vmem>>, %arg4: memref<1x64xf32, #tpu.memory_space<vmem>>, %arg5: memref<64x64xbf16, #tpu.memory_space<vmem>>, %arg6: memref<1x64xf32, #tpu.memory_space<vmem>>, %arg7: memref<64x128xbf16, #tpu.memory_space<vmem>>, %arg8: memref<1x128xf32, #tpu.memory_space<vmem>>, %arg9: memref<128x1024xbf16, #tpu.memory_space<vmem>>, %arg10: memref<1x1024xf32, #tpu.memory_space<vmem>>, %arg11: memref<1x1x1024xf32, #tpu.memory_space<vmem>>) attributes {dimension_semantics = [#tpu.dimension_semantics<parallel>, #tpu.dimension_semantics<arbitrary>], iteration_bounds = array<i64: 2, 1>, scalar_prefetch = 0 : i64, scratch_operands = 0 : i64, tpu.core_type = #tpu.core_type<tc>, window_params = [{transform_indices = @transform_0, window_bounds = array<i64: 1, 16, 3>}, {transform_indices = @transform_1, window_bounds = array<i64: 1, 3, 64>}, {pipeline_mode = #tpu.pipeline_mode<synchronous>, transform_indices = @transform_2, window_bounds = array<i64: 1, 64>}, {pipeline_mode = #tpu.pipeline_mode<synchronous>, transform_indices = @transform_3, window_bounds = array<i64: 64, 64>}, {pipeline_mode = #tpu.pipeline_mode<synchronous>, transform_indices = @transform_4, window_bounds = array<i64: 1, 64>}, {pipeline_mode = #tpu.pipeline_mode<synchronous>, transform_indices = @transform_5, window_bounds = array<i64: 64, 128>}, {pipeline_mode = #tpu.pipeline_mode<synchronous>, transform_indices = @transform_6, window_bounds = array<i64: 1, 128>}, {pipeline_mode = #tpu.pipeline_mode<synchronous>, transform_indices = @transform_7, window_bounds = array<i64: 128, 1024>}, {pipeline_mode = #tpu.pipeline_mode<synchronous>, transform_indices = @transform_8, window_bounds = array<i64: 1, 1024>}, {transform_indices = @transform_9, window_bounds = array<i64: 1, 1, 1024>}]} {
    %c0_i32 = arith.constant 0 : i32
    %0 = arith.cmpi eq, %arg1, %c0_i32 : i32
    %1 = arith.extui %0 : i1 to i32
    %c0_i32_0 = arith.constant 0 : i32
    %2 = arith.cmpi ne, %1, %c0_i32_0 : i32
    scf.if %2 {
      %cst_34 = arith.constant 0xFF800000 : f32
      %45 = vector.broadcast %cst_34 : f32 to vector<1x1x1024xf32>
      %c0_35 = arith.constant 0 : index
      %c0_36 = arith.constant 0 : index
      %c0_37 = arith.constant 0 : index
      %46 = vector.load %arg11[%c0_35, %c0_36, %c0_37] : memref<1x1x1024xf32, #tpu.memory_space<vmem>>, vector<1x1x1024xf32>
      tpu.vector_store %arg11[%c0_35, %c0_36, %c0_37], %45 {strides = array<i32>} : memref<1x1x1024xf32, #tpu.memory_space<vmem>>, vector<1x1x1024xf32>,
    } else {
    }
    %c0 = arith.constant 0 : index
    %c0_1 = arith.constant 0 : index
    %c0_2 = arith.constant 0 : index
    %3 = vector.load %arg2[%c0, %c0_1, %c0_2] : memref<1x16x3xf32, #tpu.memory_space<vmem>>, vector<1x16x3xf32>
    %4 = vector.shape_cast %3 : vector<1x16x3xf32> to vector<16x3xf32>
    %c0_3 = arith.constant 0 : index
    %c0_4 = arith.constant 0 : index
    %c0_5 = arith.constant 0 : index
    %5 = vector.load %arg3[%c0_3, %c0_4, %c0_5] : memref<1x3x64xf32, #tpu.memory_space<vmem>>, vector<1x3x64xf32>
    %6 = vector.shape_cast %5 : vector<1x3x64xf32> to vector<3x64xf32>
    %cst = arith.constant dense<0.000000e+00> : vector<16x64xf32>
    %7 = tpu.matmul %4, %6, %cst {dimension_numbers = #tpu.dot_dimension_numbers<[1], [0], [0], [1], [0, 0, 1, 1], [], []>} : vector<16x3xf32>, vector<3x64xf32>, vector<16x64xf32> -> vector<16x64xf32>
    %c0_6 = arith.constant 0 : index
    %c0_7 = arith.constant 0 : index
    %8 = vector.load %arg4[%c0_6, %c0_7] : memref<1x64xf32, #tpu.memory_space<vmem>>, vector<1x64xf32>
    %9 = vector.broadcast %8 : vector<1x64xf32> to vector<16x64xf32>
    %10 = arith.addf %7, %9 : vector<16x64xf32>
    %cst_8 = arith.constant 0.000000e+00 : f32
    %11 = vector.broadcast %cst_8 : f32 to vector<16x64xf32>
    %12 = arith.maximumf %10, %11 : vector<16x64xf32>
    %13 = arith.truncf %12 : vector<16x64xf32> to vector<16x64xbf16>
    %c0_9 = arith.constant 0 : index
    %c0_10 = arith.constant 0 : index
    %14 = vector.load %arg5[%c0_9, %c0_10] : memref<64x64xbf16, #tpu.memory_space<vmem>>, vector<64x64xbf16>
    %cst_11 = arith.constant dense<0.000000e+00> : vector<16x64xf32>
    %15 = tpu.matmul %13, %14, %cst_11 {dimension_numbers = #tpu.dot_dimension_numbers<[1], [0], [0], [1], [0, 0, 1, 1], [], []>} : vector<16x64xbf16>, vector<64x64xbf16>, vector<16x64xf32> -> vector<16x64xf32>
    %c0_12 = arith.constant 0 : index
    %c0_13 = arith.constant 0 : index
    %16 = vector.load %arg6[%c0_12, %c0_13] : memref<1x64xf32, #tpu.memory_space<vmem>>, vector<1x64xf32>
    %17 = vector.broadcast %16 : vector<1x64xf32> to vector<16x64xf32>
    %18 = arith.addf %15, %17 : vector<16x64xf32>
    %cst_14 = arith.constant 0.000000e+00 : f32
    %19 = vector.broadcast %cst_14 : f32 to vector<16x64xf32>
    %20 = arith.maximumf %18, %19 : vector<16x64xf32>
    %21 = arith.truncf %20 : vector<16x64xf32> to vector<16x64xbf16>
    %c0_15 = arith.constant 0 : index
    %c0_16 = arith.constant 0 : index
    %22 = vector.load %arg7[%c0_15, %c0_16] : memref<64x128xbf16, #tpu.memory_space<vmem>>, vector<64x128xbf16>
    %cst_17 = arith.constant dense<0.000000e+00> : vector<16x128xf32>
    %23 = tpu.matmul %21, %22, %cst_17 {dimension_numbers = #tpu.dot_dimension_numbers<[1], [0], [0], [1], [0, 0, 1, 1], [], []>} : vector<16x64xbf16>, vector<64x128xbf16>, vector<16x128xf32> -> vector<16x128xf32>
    %c0_18 = arith.constant 0 : index
    %c0_19 = arith.constant 0 : index
    %24 = vector.load %arg8[%c0_18, %c0_19] : memref<1x128xf32, #tpu.memory_space<vmem>>, vector<1x128xf32>
    %25 = vector.broadcast %24 : vector<1x128xf32> to vector<16x128xf32>
    %26 = arith.addf %23, %25 : vector<16x128xf32>
    %cst_20 = arith.constant 0.000000e+00 : f32
    %27 = vector.broadcast %cst_20 : f32 to vector<16x128xf32>
    %28 = arith.maximumf %26, %27 : vector<16x128xf32>
    %29 = arith.truncf %28 : vector<16x128xf32> to vector<16x128xbf16>
    %c0_21 = arith.constant 0 : index
    %c0_22 = arith.constant 0 : index
    %30 = vector.load %arg9[%c0_21, %c0_22] : memref<128x1024xbf16, #tpu.memory_space<vmem>>, vector<128x1024xbf16>
    %cst_23 = arith.constant dense<0.000000e+00> : vector<16x1024xf32>
    %31 = tpu.matmul %29, %30, %cst_23 {dimension_numbers = #tpu.dot_dimension_numbers<[1], [0], [0], [1], [0, 0, 1, 1], [], []>} : vector<16x128xbf16>, vector<128x1024xbf16>, vector<16x1024xf32> -> vector<16x1024xf32>
    %c0_24 = arith.constant 0 : index
    %c0_25 = arith.constant 0 : index
    %32 = vector.load %arg10[%c0_24, %c0_25] : memref<1x1024xf32, #tpu.memory_space<vmem>>, vector<1x1024xf32>
    %33 = vector.broadcast %32 : vector<1x1024xf32> to vector<16x1024xf32>
    %34 = arith.addf %31, %33 : vector<16x1024xf32>
    %cst_26 = arith.constant 0.000000e+00 : f32
    %35 = vector.broadcast %cst_26 : f32 to vector<16x1024xf32>
    %36 = arith.maximumf %34, %35 : vector<16x1024xf32>
    %c0_27 = arith.constant 0 : index
    %c0_28 = arith.constant 0 : index
    %c0_29 = arith.constant 0 : index
    %37 = vector.load %arg11[%c0_27, %c0_28, %c0_29] : memref<1x1x1024xf32, #tpu.memory_space<vmem>>, vector<1x1x1024xf32>
    %38 = vector.shape_cast %37 : vector<1x1x1024xf32> to vector<1x1024xf32>
    %cst_30 = arith.constant dense<0xFF800000> : vector<1024xf32>
    %39 = vector.multi_reduction <maximumf>, %36, %cst_30 [0] : vector<16x1024xf32> to vector<1024xf32>
    %40 = vector.shape_cast %39 : vector<1024xf32> to vector<1x1024xf32>
    %41 = arith.maximumf %38, %40 : vector<1x1024xf32>
    %c0_31 = arith.constant 0 : index
    %c0_32 = arith.constant 0 : index
    %c0_33 = arith.constant 0 : index
    %42 = vector.load %arg11[%c0_31, %c0_32, %c0_33] : memref<1x1x1024xf32, #tpu.memory_space<vmem>>, vector<1x1x1024xf32>
    %43 = vector.shape_cast %42 : vector<1x1x1024xf32> to vector<1x1024xf32>
    %44 = vector.shape_cast %41 : vector<1x1024xf32> to vector<1x1x1024xf32>
    tpu.vector_store %arg11[%c0_31, %c0_32, %c0_33], %44 {strides = array<i32>} : memref<1x1x1024xf32, #tpu.memory_space<vmem>>, vector<1x1x1024xf32>,
    return
  }
  func.func @transform_0(%arg0: i32, %arg1: i32) -> (i32, i32, i32) {
    %c0_i32 = arith.constant 0 : i32
    %c0_i32_0 = arith.constant 0 : i32
    return %arg0, %arg1, %c0_i32 : i32, i32, i32
  }
  func.func @transform_1(%arg0: i32, %arg1: i32) -> (i32, i32, i32) {
    %c0_i32 = arith.constant 0 : i32
    %c0_i32_0 = arith.constant 0 : i32
    %c0_i32_1 = arith.constant 0 : i32
    return %arg0, %c0_i32, %c0_i32_0 : i32, i32, i32
  }
  func.func @transform_2(%arg0: i32, %arg1: i32) -> (i32, i32) {
    %c0_i32 = arith.constant 0 : i32
    %c0_i32_0 = arith.constant 0 : i32
    %c0_i32_1 = arith.constant 0 : i32
    return %c0_i32, %c0_i32_0 : i32, i32
  }
  func.func @transform_3(%arg0: i32, %arg1: i32) -> (i32, i32) {
    %c0_i32 = arith.constant 0 : i32
    %c0_i32_0 = arith.constant 0 : i32
    %c0_i32_1 = arith.constant 0 : i32
    return %c0_i32, %c0_i32_0 : i32, i32
  }
  func.func @transform_4(%arg0: i32, %arg1: i32) -> (i32, i32) {
    %c0_i32 = arith.constant 0 : i32
    %c0_i32_0 = arith.constant 0 : i32
    %c0_i32_1 = arith.constant 0 : i32
    return %c0_i32, %c0_i32_0 : i32, i32
  }
  func.func @transform_5(%arg0: i32, %arg1: i32) -> (i32, i32) {
    %c0_i32 = arith.constant 0 : i32
    %c0_i32_0 = arith.constant 0 : i32
    %c0_i32_1 = arith.constant 0 : i32
    return %c0_i32, %c0_i32_0 : i32, i32
  }
  func.func @transform_6(%arg0: i32, %arg1: i32) -> (i32, i32) {
    %c0_i32 = arith.constant 0 : i32
    %c0_i32_0 = arith.constant 0 : i32
    %c0_i32_1 = arith.constant 0 : i32
    return %c0_i32, %c0_i32_0 : i32, i32
  }
  func.func @transform_7(%arg0: i32, %arg1: i32) -> (i32, i32) {
    %c0_i32 = arith.constant 0 : i32
    %c0_i32_0 = arith.constant 0 : i32
    %c0_i32_1 = arith.constant 0 : i32
    return %c0_i32, %c0_i32_0 : i32, i32
  }
  func.func @transform_8(%arg0: i32, %arg1: i32) -> (i32, i32) {
    %c0_i32 = arith.constant 0 : i32
    %c0_i32_0 = arith.constant 0 : i32
    %c0_i32_1 = arith.constant 0 : i32
    return %c0_i32, %c0_i32_0 : i32, i32
  }
  func.func @transform_9(%arg0: i32, %arg1: i32) -> (i32, i32, i32) {
    %c0_i32 = arith.constant 0 : i32
    %c0_i32_0 = arith.constant 0 : i32
    %c0_i32_1 = arith.constant 0 : i32
    return %arg0, %c0_i32, %c0_i32_0 : i32, i32, i32
  }
}

module attributes {stable_mosaic.version = 11 : i64} {
  func.func @_conv123_max_kernel(%arg0: i32, %arg1: i32, %arg2: memref<1x16x3xf32, #tpu.memory_space<vmem>>, %arg3: memref<1x3x64xf32, #tpu.memory_space<vmem>>, %arg4: memref<1x64xf32, #tpu.memory_space<vmem>>, %arg5: memref<1x64x128xbf16, #tpu.memory_space<vmem>>, %arg6: memref<1x128xf32, #tpu.memory_space<vmem>>, %arg7: memref<128x1024xbf16, #tpu.memory_space<vmem>>, %arg8: memref<1x1024xf32, #tpu.memory_space<vmem>>, %arg9: memref<1x1x1024xf32, #tpu.memory_space<vmem>>) attributes {dimension_semantics = [#tpu.dimension_semantics<parallel>, #tpu.dimension_semantics<arbitrary>], iteration_bounds = array<i64: 2, 1>, scalar_prefetch = 0 : i64, scratch_operands = 0 : i64, tpu.core_type = #tpu.core_type<tc>, window_params = [{transform_indices = @transform_0, window_bounds = array<i64: 1, 16, 3>}, {transform_indices = @transform_1, window_bounds = array<i64: 1, 3, 64>}, {pipeline_mode = #tpu.pipeline_mode<synchronous>, transform_indices = @transform_2, window_bounds = array<i64: 1, 64>}, {transform_indices = @transform_3, window_bounds = array<i64: 1, 64, 128>}, {pipeline_mode = #tpu.pipeline_mode<synchronous>, transform_indices = @transform_4, window_bounds = array<i64: 1, 128>}, {pipeline_mode = #tpu.pipeline_mode<synchronous>, transform_indices = @transform_5, window_bounds = array<i64: 128, 1024>}, {pipeline_mode = #tpu.pipeline_mode<synchronous>, transform_indices = @transform_6, window_bounds = array<i64: 1, 1024>}, {transform_indices = @transform_7, window_bounds = array<i64: 1, 1, 1024>}]} {
    %c0_i32 = arith.constant 0 : i32
    %0 = arith.cmpi eq, %arg1, %c0_i32 : i32
    %1 = arith.extui %0 : i1 to i32
    %c0_i32_0 = arith.constant 0 : i32
    %2 = arith.cmpi ne, %1, %c0_i32_0 : i32
    scf.if %2 {
      %cst_28 = arith.constant 0xFF800000 : f32
      %36 = vector.broadcast %cst_28 : f32 to vector<1x1x1024xf32>
      %c0_29 = arith.constant 0 : index
      %c0_30 = arith.constant 0 : index
      %c0_31 = arith.constant 0 : index
      %37 = vector.load %arg9[%c0_29, %c0_30, %c0_31] : memref<1x1x1024xf32, #tpu.memory_space<vmem>>, vector<1x1x1024xf32>
      tpu.vector_store %arg9[%c0_29, %c0_30, %c0_31], %36 {strides = array<i32>} : memref<1x1x1024xf32, #tpu.memory_space<vmem>>, vector<1x1x1024xf32>,
    } else {
    }
    %c0 = arith.constant 0 : index
    %c0_1 = arith.constant 0 : index
    %c0_2 = arith.constant 0 : index
    %3 = vector.load %arg2[%c0, %c0_1, %c0_2] : memref<1x16x3xf32, #tpu.memory_space<vmem>>, vector<1x16x3xf32>
    %4 = vector.shape_cast %3 : vector<1x16x3xf32> to vector<16x3xf32>
    %c0_3 = arith.constant 0 : index
    %c0_4 = arith.constant 0 : index
    %c0_5 = arith.constant 0 : index
    %5 = vector.load %arg3[%c0_3, %c0_4, %c0_5] : memref<1x3x64xf32, #tpu.memory_space<vmem>>, vector<1x3x64xf32>
    %6 = vector.shape_cast %5 : vector<1x3x64xf32> to vector<3x64xf32>
    %cst = arith.constant dense<0.000000e+00> : vector<16x64xf32>
    %7 = tpu.matmul %4, %6, %cst {dimension_numbers = #tpu.dot_dimension_numbers<[1], [0], [0], [1], [0, 0, 1, 1], [], []>} : vector<16x3xf32>, vector<3x64xf32>, vector<16x64xf32> -> vector<16x64xf32>
    %c0_6 = arith.constant 0 : index
    %c0_7 = arith.constant 0 : index
    %8 = vector.load %arg4[%c0_6, %c0_7] : memref<1x64xf32, #tpu.memory_space<vmem>>, vector<1x64xf32>
    %9 = vector.broadcast %8 : vector<1x64xf32> to vector<16x64xf32>
    %10 = arith.addf %7, %9 : vector<16x64xf32>
    %cst_8 = arith.constant 0.000000e+00 : f32
    %11 = vector.broadcast %cst_8 : f32 to vector<16x64xf32>
    %12 = arith.maximumf %10, %11 : vector<16x64xf32>
    %13 = arith.truncf %12 : vector<16x64xf32> to vector<16x64xbf16>
    %c0_9 = arith.constant 0 : index
    %c0_10 = arith.constant 0 : index
    %c0_11 = arith.constant 0 : index
    %14 = vector.load %arg5[%c0_9, %c0_10, %c0_11] : memref<1x64x128xbf16, #tpu.memory_space<vmem>>, vector<1x64x128xbf16>
    %15 = vector.shape_cast %14 : vector<1x64x128xbf16> to vector<64x128xbf16>
    %cst_12 = arith.constant dense<0.000000e+00> : vector<16x128xf32>
    %16 = tpu.matmul %13, %15, %cst_12 {dimension_numbers = #tpu.dot_dimension_numbers<[1], [0], [0], [1], [0, 0, 1, 1], [], []>} : vector<16x64xbf16>, vector<64x128xbf16>, vector<16x128xf32> -> vector<16x128xf32>
    %c0_13 = arith.constant 0 : index
    %c0_14 = arith.constant 0 : index
    %17 = vector.load %arg6[%c0_13, %c0_14] : memref<1x128xf32, #tpu.memory_space<vmem>>, vector<1x128xf32>
    %18 = vector.broadcast %17 : vector<1x128xf32> to vector<16x128xf32>
    %19 = arith.addf %16, %18 : vector<16x128xf32>
    %cst_15 = arith.constant 0.000000e+00 : f32
    %20 = vector.broadcast %cst_15 : f32 to vector<16x128xf32>
    %21 = arith.maximumf %19, %20 : vector<16x128xf32>
    %22 = arith.truncf %21 : vector<16x128xf32> to vector<16x128xbf16>
    %c0_16 = arith.constant 0 : index
    %c0_17 = arith.constant 0 : index
    %23 = vector.load %arg7[%c0_16, %c0_17] : memref<128x1024xbf16, #tpu.memory_space<vmem>>, vector<128x1024xbf16>
    %cst_18 = arith.constant dense<0.000000e+00> : vector<16x1024xf32>
    %24 = tpu.matmul %22, %23, %cst_18 {dimension_numbers = #tpu.dot_dimension_numbers<[1], [0], [0], [1], [0, 0, 1, 1], [], []>} : vector<16x128xbf16>, vector<128x1024xbf16>, vector<16x1024xf32> -> vector<16x1024xf32>
    %c0_19 = arith.constant 0 : index
    %c0_20 = arith.constant 0 : index
    %25 = vector.load %arg8[%c0_19, %c0_20] : memref<1x1024xf32, #tpu.memory_space<vmem>>, vector<1x1024xf32>
    %26 = vector.broadcast %25 : vector<1x1024xf32> to vector<16x1024xf32>
    %27 = arith.addf %24, %26 : vector<16x1024xf32>
    %c0_21 = arith.constant 0 : index
    %c0_22 = arith.constant 0 : index
    %c0_23 = arith.constant 0 : index
    %28 = vector.load %arg9[%c0_21, %c0_22, %c0_23] : memref<1x1x1024xf32, #tpu.memory_space<vmem>>, vector<1x1x1024xf32>
    %29 = vector.shape_cast %28 : vector<1x1x1024xf32> to vector<1x1024xf32>
    %cst_24 = arith.constant dense<0xFF800000> : vector<1024xf32>
    %30 = vector.multi_reduction <maximumf>, %27, %cst_24 [0] : vector<16x1024xf32> to vector<1024xf32>
    %31 = vector.shape_cast %30 : vector<1024xf32> to vector<1x1024xf32>
    %32 = arith.maximumf %29, %31 : vector<1x1024xf32>
    %c0_25 = arith.constant 0 : index
    %c0_26 = arith.constant 0 : index
    %c0_27 = arith.constant 0 : index
    %33 = vector.load %arg9[%c0_25, %c0_26, %c0_27] : memref<1x1x1024xf32, #tpu.memory_space<vmem>>, vector<1x1x1024xf32>
    %34 = vector.shape_cast %33 : vector<1x1x1024xf32> to vector<1x1024xf32>
    %35 = vector.shape_cast %32 : vector<1x1024xf32> to vector<1x1x1024xf32>
    tpu.vector_store %arg9[%c0_25, %c0_26, %c0_27], %35 {strides = array<i32>} : memref<1x1x1024xf32, #tpu.memory_space<vmem>>, vector<1x1x1024xf32>,
    return
  }
  func.func @transform_0(%arg0: i32, %arg1: i32) -> (i32, i32, i32) {
    %c0_i32 = arith.constant 0 : i32
    %c0_i32_0 = arith.constant 0 : i32
    return %arg0, %arg1, %c0_i32 : i32, i32, i32
  }
  func.func @transform_1(%arg0: i32, %arg1: i32) -> (i32, i32, i32) {
    %c0_i32 = arith.constant 0 : i32
    %c0_i32_0 = arith.constant 0 : i32
    %c0_i32_1 = arith.constant 0 : i32
    return %arg0, %c0_i32, %c0_i32_0 : i32, i32, i32
  }
  func.func @transform_2(%arg0: i32, %arg1: i32) -> (i32, i32) {
    %c0_i32 = arith.constant 0 : i32
    %c0_i32_0 = arith.constant 0 : i32
    %c0_i32_1 = arith.constant 0 : i32
    return %c0_i32, %c0_i32_0 : i32, i32
  }
  func.func @transform_3(%arg0: i32, %arg1: i32) -> (i32, i32, i32) {
    %c0_i32 = arith.constant 0 : i32
    %c0_i32_0 = arith.constant 0 : i32
    %c0_i32_1 = arith.constant 0 : i32
    return %arg0, %c0_i32, %c0_i32_0 : i32, i32, i32
  }
  func.func @transform_4(%arg0: i32, %arg1: i32) -> (i32, i32) {
    %c0_i32 = arith.constant 0 : i32
    %c0_i32_0 = arith.constant 0 : i32
    %c0_i32_1 = arith.constant 0 : i32
    return %c0_i32, %c0_i32_0 : i32, i32
  }
  func.func @transform_5(%arg0: i32, %arg1: i32) -> (i32, i32) {
    %c0_i32 = arith.constant 0 : i32
    %c0_i32_0 = arith.constant 0 : i32
    %c0_i32_1 = arith.constant 0 : i32
    return %c0_i32, %c0_i32_0 : i32, i32
  }
  func.func @transform_6(%arg0: i32, %arg1: i32) -> (i32, i32) {
    %c0_i32 = arith.constant 0 : i32
    %c0_i32_0 = arith.constant 0 : i32
    %c0_i32_1 = arith.constant 0 : i32
    return %c0_i32, %c0_i32_0 : i32, i32
  }
  func.func @transform_7(%arg0: i32, %arg1: i32) -> (i32, i32, i32) {
    %c0_i32 = arith.constant 0 : i32
    %c0_i32_0 = arith.constant 0 : i32
    %c0_i32_1 = arith.constant 0 : i32
    return %arg0, %c0_i32, %c0_i32_0 : i32, i32, i32
  }
}

</mosaic_0001>

<bundles_post_ra>
// kernel: transform_net_forward.5
= control target key start
LH: loop header
LB: loop body
LE: loop exit
PB: predicated region body
PF: predicated region fallthrough
CT: control target
= control target key end

     0   :  { %12 = vsyncpa [#allocation3], 0  ;;  %s2053_s0 = inlined_call_operand.vmem [shape: f32[2,16,3], index: 0, kind: input, shape index: {}]   ;;  %s2054_s1 = inlined_call_operand.hbm [shape: f32[3,64], index: 1, kind: input, shape index: {}]   ;;  %s2055_s2 = inlined_call_operand.hbm [shape: f32[1,64], index: 2, kind: input, shape index: {}]   ;;  %s2056_s3 = inlined_call_operand.hbm [shape: bf16[64,128], index: 3, kind: input, shape index: {}]   ;;  %s2057_s4 = inlined_call_operand.hbm [shape: f32[1,128], index: 4, kind: input, shape index: {}]   ;;  %s2058_s5 = inlined_call_operand.hbm [shape: bf16[128,1024], index: 5, kind: input, shape index: {}]   ;;  %s2059_s6 = inlined_call_operand.hbm [shape: f32[1,1024], index: 6, kind: input, shape index: {}]   ;;  %s2060_s7 = inlined_call_operand.vmem [shape: f32[2,1,1024], index: 7, kind: output, shape index: {}]  }
   0x1   :  { %13 = vsyncpa [#allocation5], 0 }
   0x2   :  { %14 = vsyncpa [#allocation8], 0 }
   0x3   :  { %15 = vsyncpa [#allocation11], 0  ;;  %s1906_s24 = smov 0   ;;  %s1908_s25 = smov 0  }
   0x4   :  { %s1910_s26 = smov 0  }
   0x5 LB: > { %s1852_s27 = smov [#allocation4]   ;;  %s1436_s29 = sadd.s32 4294967295, %s1850_s26   ;;  %s1850_s26 = sphi %s1910_s26, %s21_s26   ;;  %s1846_s25 = sphi %s1908_s25, %s2073_s25   ;;  %s1842_s24 = sphi %s1906_s24, %s2072_s24  }
   0x6   : > { %s242_s28 = sshll.u32 %s1852_s27, 4  ;;  %p1438_p0 = scmp.ge.s32.totalorder %s1850_s26, 1  ;;  %s243_s28 = int_to_ptr.vmem [resolvable:$true] %s242_s28 }
   0x7   : > { %p218_p1 = scmp.lt.s32.totalorder %s1850_s26, 3  ;;  %p1924_p2 = scmp.eq.s32.totalorder %s1436_s29, 0 }
   0x8   : > { %s1853_s9 = smov [#allocation7]   ;;  %s33_s12 = sadd.s32 1, %s1846_s25 }
   0x9   : > { %s2064_s30 = scalar_select %p1924_p2, 1, 0 }
   0xa   : > { %p1928_p3 = pnand %p1438_p0, %p218_p1  ;;  %s266_s10 = sshll.u32 %s1853_s9, 4  ;;  %s267_s10 = int_to_ptr.vmem [resolvable:$true] %s266_s10 }
   0xb   : > { %p1941_p6 = scmp.ge.s32.totalorder %s33_s12, 2  ;;  %s1667_s15 = scalar_lea.vmem %s243_s28, 16 }
   0xc   : > { %s2065_s8 = scalar_select %p1928_p3, 1, 0 }
   0xd   : > { %p1582_p4 = pneg %p1928_p3  ;;  %p1668_p8 = scmp.ne.s32.totalorder %s243_s28, %s1667_s15 }
   0xe   : > { %s2067_s13 = scalar_select %p1941_p6, 1, 0 }
   0xf   : > { %p1936_p5 = pnand %p1924_p2, %p1582_p4  ;;  %s1674_s16 = scalar_lea.vmem %s243_s28, 32 }
  0x10   : > { %p1675_p11 = scmp.lt.s32.totalorder %s243_s28, %s243_s28  ;;  %p1676_p12 = scmp.lt.s32.totalorder %s1674_s16, %s1667_s15 }
  0x11   : > { %p1947_p7 = pneg %p1936_p5 }
  0x12   : > { %p1677_p13 = por %p1676_p12, %p1675_p11 }
  0x13   : > { %p1670_p9 = pnand %p1668_p8, %p1947_p7 }
  0x15   : > { %p1671_p10 = pneg %p1670_p9 }
  0x17   : > { %p1678_p0 = pnand %p1677_p13, %p1671_p10 }
  0x19   : > { %1681 = shalt.err (!%p1678_p0)
}
  0x1a   : > { %1588 = dma.hbm_to_vmem [thread:$0]  (!%p1936_p5), %s2055_s2, 16, %s243_s28, [#allocation5]  }
  0x1b   : > { %s1693_s19 = scalar_lea.vmem %s267_s10, 16  ;;  %s1700_s20 = scalar_lea.vmem %s267_s10, 32 }
  0x1c   : > { %p1694_p1 = scmp.ne.s32.totalorder %s267_s10, %s1693_s19  ;;  %p1701_p8 = scmp.lt.s32.totalorder %s267_s10, %s267_s10 }
  0x1d   : > { %p1702_p9 = scmp.lt.s32.totalorder %s1700_s20, %s1693_s19 }
  0x1e   : > { %p1696_p4 = pnand %p1694_p1, %p1947_p7 }
  0x1f   : > { %p1703_p3 = por %p1702_p9, %p1701_p8 }
  0x20   : > { %p1697_p2 = pneg %p1696_p4 }
  0x22   : > { %p1704_p6 = pnand %p1703_p3, %p1697_p2 }
  0x24   : > { %1707 = shalt.err (!%p1704_p6)
}
  0x25   : > { %1594 = dma.hbm_to_vmem [thread:$0]  (!%p1936_p5), %s2057_s4, 16, %s267_s10, [#allocation8]  }
  0x26   : > { %p2069_p10 = scmp.ne.s32.totalorder %s2067_s13, 0  ;;  %s1854_s23 = smov [#allocation2]  }
  0x27   : > { %s231_s27 = sshll.u32 %s1854_s23, 4  ;;  %s1855_s28 = smov [#allocation6]   ;;  %s232_s27 = int_to_ptr.vmem [resolvable:$true] %s231_s27 }
  0x28   : > { %s2075_s12 = smov (%p2069_p10, %s33_s12), 0  ;;  %s252_s29 = sshll.u32 %s1855_s28, 4  ;;  %s253_s29 = int_to_ptr.vmem [resolvable:$true] %s252_s29 }
  0x29   : > { %s1719_s9 = scalar_lea.vmem %s232_s27, 64  ;;  %p1727_p6 = scmp.lt.s32.totalorder %s232_s27, %s232_s27 }
  0x2a   : > { %p1720_p11 = scmp.ne.s32.totalorder %s232_s27, %s1719_s9  ;;  %p1728_p12 = scmp.lt.s32.totalorder %s1719_s9, %s1719_s9 }
  0x2c   : > { %p1722_p2 = pnand %p1720_p11, %p1947_p7  ;;  %p1729_p13 = por %p1728_p12, %p1727_p6 }
  0x2e   : > { %p1723_p3 = pneg %p1722_p2 }
  0x30   : > { %p1730_p0 = pnand %p1729_p13, %p1723_p3 }
  0x32   : > { %1733 = shalt.err (!%p1730_p0)
}
  0x33   : > { %1585 = dma.hbm_to_vmem [thread:$0]  (!%p1936_p5), %s2054_s1, 64, %s232_s27, [#allocation3]  }
  0x34   : > { %s1745_s15 = scalar_lea.vmem %s253_s29, 512  ;;  %p1753_p9 = scmp.lt.s32.totalorder %s253_s29, %s253_s29 }
  0x35   : > { %p1746_p1 = scmp.ne.s32.totalorder %s253_s29, %s1745_s15  ;;  %p1754_p10 = scmp.lt.s32.totalorder %s1745_s15, %s1745_s15 }
  0x37   : > { %p1748_p4 = pnand %p1746_p1, %p1947_p7  ;;  %p1755_p11 = por %p1754_p10, %p1753_p9 }
  0x39   : > { %p1749_p8 = pneg %p1748_p4 }
  0x3b   : > { %p1756_p2 = pnand %p1755_p11, %p1749_p8 }
  0x3d   : > { %1759 = shalt.err (!%p1756_p2)
}
  0x3e   : > { %s1856_s16 = smov 64   ;;  %s1857_s17 = smov 4  }
  0x3f   : > { %1591 = dma.hbm_to_vmem [thread:$0]  (!%p1936_p5), %s2056_s3, 512, %s253_s29, [#allocation5], %s1856_s16, %s1856_s16, %s1857_s17  }
  0x40   : > { %s1858_s20 = smov [#allocation9]  }
  0x41   : > { %s276_s21 = sshll.u32 %s1858_s20, 4  ;;  %s277_s21 = int_to_ptr.vmem [resolvable:$true] %s276_s21 }
  0x42   : > { %s1771_s22 = scalar_lea.vmem %s277_s21, 8192  ;;  %p1779_p13 = scmp.lt.s32.totalorder %s277_s21, %s277_s21 }
  0x43   : > { %p1772_p3 = scmp.ne.s32.totalorder %s277_s21, %s1771_s22  ;;  %p1780_p0 = scmp.lt.s32.totalorder %s1771_s22, %s1771_s22 }
  0x45   : > { %p1774_p6 = pnand %p1772_p3, %p1947_p7  ;;  %p1781_p1 = por %p1780_p0, %p1779_p13 }
  0x47   : > { %p1775_p12 = pneg %p1774_p6 }
  0x49   : > { %p1782_p4 = pnand %p1781_p1, %p1775_p12 }
  0x4b   : > { %1785 = shalt.err (!%p1782_p4)
}
  0x4c   : > { %s1859_s23 = smov 512   ;;  %s1860_s27 = smov 32  }
  0x4d   : > { %1597 = dma.hbm_to_vmem [thread:$0]  (!%p1936_p5), %s2058_s5, 8192, %s277_s21, [#allocation8], %s1859_s23, %s1859_s23, %s1860_s27  }
  0x4e   : > { %s1861_s9 = smov [#allocation10]  }
  0x4f   : > { %s290_s10 = sshll.u32 %s1861_s9, 4  ;;  %s291_s10 = int_to_ptr.vmem [resolvable:$true] %s290_s10 }
  0x50   : > { %s1797_s13 = scalar_lea.vmem %s291_s10, 128  ;;  %p1805_p11 = scmp.lt.s32.totalorder %s291_s10, %s291_s10 }
  0x51   : > { %p1798_p8 = scmp.ne.s32.totalorder %s291_s10, %s1797_s13  ;;  %p1806_p2 = scmp.lt.s32.totalorder %s1797_s13, %s1797_s13 }
  0x53   : > { %p1800_p9 = pnand %p1798_p8, %p1947_p7  ;;  %p1807_p3 = por %p1806_p2, %p1805_p11 }
  0x55   : > { %p1801_p10 = pneg %p1800_p9 }
  0x57   : > { %p1808_p6 = pnand %p1807_p3, %p1801_p10 }
  0x59   : > { %1811 = shalt.err (!%p1808_p6)
}
  0x5a   : > { %1600 = dma.hbm_to_vmem [thread:$0]  (!%p1936_p5), %s2059_s6, 128, %s291_s10, [#allocation11]  }
  0x5b   : > { %p2070_p12 = scmp.ne.s32.totalorder %s2065_s8, 0 }
  0x5c   : > { %p2071_p13 = scmp.ne.s32.totalorder (!%p2070_p12), %s2064_s30, 0 }
  0x5d   : > { %316 = sbr.rel (%p2070_p12) target bundleno = 776 (0x308), region = 48 }
  0x62   : > { %1825 = dma.done.wait (%p2071_p13), [#allocation3], 64  }
  0x63   : > { %1827 = vsyncadd (%p2071_p13), [#allocation3], 4294967232 }
  0x64   : > { %1829 = dma.done.wait (%p2071_p13), [#allocation5], 528  }
  0x65   : > { %1831 = vsyncadd (%p2071_p13), [#allocation5], 4294966768 }
  0x66   : > { %1833 = dma.done.wait (%p2071_p13), [#allocation8], 8208  }
  0x67   : > { %1835 = vsyncadd (%p2071_p13), [#allocation8], 4294959088 }
  0x68   : > { %1837 = dma.done.wait (%p2071_p13), [#allocation11], 128  }
  0x69   : > { %1839 = vsyncadd (%p2071_p13), [#allocation11], 4294967168  ;;  %p372_p5 = scmp.lt.s32.totalorder %s1842_s24, 1  ;;  %v1862_v0 = vmov 0.0   ;;  %vm408_vm0 = vcmask 1042432   ;;  %vm401_vm1 = vcmask 23552  }
  0x6a   : > { %1546 = vmatprep.subr.bf16.mxu1 %v1862_v0  ;;  %v393_v1 = vld [vmem:[#allocation2] sm:$0x7]  ;;  %v1653_v5 = vld [vmem:[#allocation6 + $0x10] sm:$0xff]   ;;  %v1654_v6 = vld [vmem:[#allocation6 + $0x8] sm:$0xff]   ;;  %vm1863_vm2 = vmmov 0   ;;  %vm529_vm3 = vcmask 523264  }
  0x6b   : > { %s2077_s24 = smov (!%p372_p5, %s1842_s24), 1  ;;  %1541 = vmatprep.subr.msk.mxu0 %vm408_vm0, %v393_v1  ;;  %v1652_v4 = vld [vmem:[#allocation6 + $0x18] sm:$0xff]   ;;  %v1655_v7 = vld [vmem:[#allocation6] sm:$0xff]   ;;  %1554 = vmatprep.mubr.msk.bf16.mxu1 %vm1863_vm2, %v1862_v0  ;;  %v634_v10 = vld [vmem:[#allocation9 + $0x1c8] sm:$0xff] }
  0x6c   : > { %s1532_s8 = sshll.u32 %s2077_s24, 4  ;;  %1542 = vmatpush3.msk.msra.mxu0 %vm408_vm0, %v393_v1  ;;  %1547 = vmatpush3.bf16.msra.mxu1 %v1652_v4  ;;  %v633_v8 = vld [vmem:[#allocation9 + $0x1c0] sm:$0xff]  ;;  %v638_v13 = vld [vmem:[#allocation9 + $0x1e8] sm:$0xff]  ;;  %v1456_v36 = vld [vmem:[#allocation4] ss:$0 sm:$0xff]  ;;  %s1455_s30 = sshll.u32 %s2077_s24, 3 }
  0x6d   : > { %s379_s17 = scalar_lea.vmem %s2053_s0, %s1532_s8  ;;  %1548 = vmatprep.subr.bf16.mxu1 %v1862_v0  ;;  %v637_v9 = vld [vmem:[#allocation9 + $0x1e0] sm:$0xff]  ;;  %v1524_v16 = vcombine.low %v634_v10, %v638_v13  ;;  %v1525_v17 = vcombine.high %v634_v10, %v638_v13  ;;  %v626_v41 = vld [vmem:[#allocation9 + $0x188] sm:$0xff]  ;;  %s384_s20 = scalar_lea.vmem %s2060_s7, %s1455_s30 }
  0x6e   : > { %v391_v2 = vld [vmem:[%s379_s17] sm:$0xff]  ;;  %v392_v3 = vld [vmem:[%s379_s17 + $0x8] sm:$0xff]  ;;  %v1522_v11 = vcombine.low %v633_v8, %v637_v9  ;;  %v1523_v12 = vcombine.high %v633_v8, %v637_v9  ;;  %v630_v42 = vld [vmem:[#allocation9 + $0x1a8] sm:$0xff] }
  0x6f   : > { %1543 = vmatprep.mubr.msk.f32.mxu0 %vm401_vm1, %v391_v2  ;;  %v625_v14 = vld [vmem:[#allocation9 + $0x180] sm:$0xff]  ;;  %v1517_v46 = vcombine.high %v626_v41, %v630_v42  ;;  %v618_v47 = vld [vmem:[#allocation9 + $0x148] sm:$0xff]  ;;  %v1516_v49 = vcombine.low %v626_v41, %v630_v42  ;;  %v619_v41 = vld [vmem:[#allocation9 + $0x150] sm:$0xff] }
  0x70   : > { %1544 = vmatmul.mubr.msk.f32.vlgmr.msra.gmra.mxu0 %vm401_vm1, %v392_v3  ;;  %1549 = vmatpush3.bf16.msra.mxu1 %v1653_v5  ;;  %v629_v15 = vld [vmem:[#allocation9 + $0x1a0] sm:$0xff]  ;;  %v622_v48 = vld [vmem:[#allocation9 + $0x168] sm:$0xff]  ;;  %v623_v42 = vld [vmem:[#allocation9 + $0x170] sm:$0xff] }
  0x71   : > { %1550 = vmatprep.subr.bf16.mxu1 %v1862_v0  ;;  %v1515_v18 = vcombine.high %v625_v14, %v629_v15  ;;  %1003 = vmatprep.subr.bf16.mxu0 %v1523_v12  ;;  %v1514_v19 = vcombine.low %v625_v14, %v629_v15  ;;  %v617_v20 = vld [vmem:[#allocation9 + $0x140] sm:$0xff]  ;;  %v1509_v50 = vcombine.high %v618_v47, %v622_v48  ;;  %v610_v51 = vld [vmem:[#allocation9 + $0x108] sm:$0xff] }
  0x72   : > { %1004 = vmatpush1.bf16.msra.mxu0 %v1522_v11  ;;  %v621_v21 = vld [vmem:[#allocation9 + $0x160] sm:$0xff]  ;;  %v614_v52 = vld [vmem:[#allocation9 + $0x128] sm:$0xff]  ;;  %v1508_v53 = vcombine.low %v618_v47, %v622_v48  ;;  %v1511_v47 = vcombine.high %v619_v41, %v623_v42 }
  0x73   : > { %1005 = vmatprep.subr.bf16.mxu0 %v1515_v18  ;;  %v1507_v22 = vcombine.high %v617_v20, %v621_v21  ;;  %v1506_v23 = vcombine.low %v617_v20, %v621_v21  ;;  %v609_v24 = vld [vmem:[#allocation9 + $0x100] sm:$0xff]  ;;  %v1501_v54 = vcombine.high %v610_v51, %v614_v52  ;;  %v602_v55 = vld [vmem:[#allocation9 + $0xc8] sm:$0xff]  ;;  %v1500_v57 = vcombine.low %v610_v51, %v614_v52  ;;  %v636_v18 = vld [vmem:[#allocation9 + $0x1d8] sm:$0xff] }
  0x74   : > { %1551 = vmatpush3.bf16.msra.mxu1 %v1654_v6  ;;  %v613_v25 = vld [vmem:[#allocation9 + $0x120] sm:$0xff]  ;;  %v606_v56 = vld [vmem:[#allocation9 + $0xe8] sm:$0xff]  ;;  %v640_v20 = vld [vmem:[#allocation9 + $0x1f8] sm:$0xff] }
  0x75   : > { %1552 = vmatprep.subr.bf16.mxu1 %v1862_v0  ;;  %v1499_v26 = vcombine.high %v609_v24, %v613_v25  ;;  %v1498_v27 = vcombine.low %v609_v24, %v613_v25  ;;  %v601_v28 = vld [vmem:[#allocation9 + $0xc0] sm:$0xff]  ;;  %v1493_v58 = vcombine.high %v602_v55, %v606_v56  ;;  %v594_v59 = vld [vmem:[#allocation9 + $0x88] sm:$0xff]  ;;  %v1492_v61 = vcombine.low %v602_v55, %v606_v56  ;;  %v1460_v25 = vld [vmem:[#allocation7] ss:$0 sm:$0xff] }
  0x76   : > { %1006 = vmatpush1.bf16.msra.mxu0 %v1514_v19  ;;  %v605_v29 = vld [vmem:[#allocation9 + $0xe0] sm:$0xff]  ;;  %v598_v60 = vld [vmem:[#allocation9 + $0xa8] sm:$0xff]  ;;  %v1864_v24 = vmov 0   ;;  %v612_v51 = vld [vmem:[#allocation9 + $0x118] sm:$0xff] }
  0x77   : > { %1007 = vmatprep.subr.bf16.mxu0 %v1507_v22  ;;  %v1491_v30 = vcombine.high %v601_v28, %v605_v29  ;;  %v1490_v31 = vcombine.low %v601_v28, %v605_v29  ;;  %v593_v32 = vld [vmem:[#allocation9 + $0x80] sm:$0xff]  ;;  %v1485_v62 = vcombine.high %v594_v59, %v598_v60  ;;  %v1484_v63 = vcombine.low %v594_v59, %v598_v60  ;;  %v586_v2 = vld [vmem:[#allocation9 + $0x48] sm:$0xff]  ;;  %v616_v52 = vld [vmem:[#allocation9 + $0x138] sm:$0xff] }
  0x78   : > { %1553 = vmatpush3.bf16.msra.mxu1 %v1655_v7  ;;  %v597_v33 = vld [vmem:[#allocation9 + $0xa0] sm:$0xff]  ;;  %v590_v4 = vld [vmem:[#allocation9 + $0x68] sm:$0xff]  ;;  %v1528_v22 = vcombine.low %v636_v18, %v640_v20  ;;  %1035 = vmatprep.mubr.bf16.mxu0 %v1864_v24  ;;  %v1505_v56 = vcombine.high %v612_v51, %v616_v52  ;;  %v604_v59 = vld [vmem:[#allocation9 + $0xd8] sm:$0xff] }
  0x79   : > { %1046 = vmatprep.subr.bf16.mxu1 %v1525_v17  ;;  %v1483_v34 = vcombine.high %v593_v32, %v597_v33  ;;  %v1482_v35 = vcombine.low %v593_v32, %v597_v33  ;;  %v585_v0 = vld [vmem:[#allocation9 + $0x40] sm:$0xff]  ;;  %v1476_v6 = vcombine.low %v586_v2, %v590_v4  ;;  %v1477_v7 = vcombine.high %v586_v2, %v590_v4  ;;  %v578_v10 = vld [vmem:[#allocation9 + $0x8] sm:$0xff]  ;;  %v639_v17 = vld [vmem:[#allocation9 + $0x1f0] sm:$0xff] }
  0x7a   : > { %1008 = vmatpush1.bf16.msra.mxu0 %v1506_v23  ;;  %v589_v1 = vld [vmem:[#allocation9 + $0x60] sm:$0xff]  ;;  %v582_v12 = vld [vmem:[#allocation9 + $0x28] sm:$0xff]  ;;  %v1529_v23 = vcombine.high %v636_v18, %v640_v20  ;;  %v631_v33 = vld [vmem:[#allocation9 + $0x1b0] sm:$0xff] }
  0x7b   : > { %1009 = vmatprep.subr.bf16.mxu0 %v1499_v26  ;;  %v1475_v3 = vcombine.high %v585_v0, %v589_v1  ;;  %v1474_v5 = vcombine.low %v585_v0, %v589_v1  ;;  %v577_v8 = vld [vmem:[#allocation9] sm:$0xff]  ;;  %v1468_v14 = vcombine.low %v578_v10, %v582_v12  ;;  %v1469_v15 = vcombine.high %v578_v10, %v582_v12  ;;  %v608_v60 = vld [vmem:[#allocation9 + $0xf8] sm:$0xff]  ;;  %v595_v1 = vld [vmem:[#allocation9 + $0x90] sm:$0xff] }
  0x7c   : > { %v581_v9 = vld [vmem:[#allocation9 + $0x20] sm:$0xff]  ;;  %v1497_v0 = vcombine.high %v604_v59, %v608_v60  ;;  %v599_v2 = vld [vmem:[#allocation9 + $0xb0] sm:$0xff]  ;;  %v600_v4 = vld [vmem:[#allocation9 + $0xb8] sm:$0xff] }
  0x7d   : > { %v1467_v11 = vcombine.high %v577_v8, %v581_v9  ;;  %v1466_v13 = vcombine.low %v577_v8, %v581_v9  ;;  %v587_v9 = vld [vmem:[#allocation9 + $0x50] sm:$0xff]  ;;  %v592_v12 = vld [vmem:[#allocation9 + $0x78] sm:$0xff] }
  0x7e   : > { %1010 = vmatpush1.bf16.msra.mxu0 %v1498_v27  ;;  %v591_v10 = vld [vmem:[#allocation9 + $0x70] sm:$0xff]  ;;  %v584_v20 = vld [vmem:[#allocation9 + $0x38] sm:$0xff] }
  0x7f   : > { %1011 = vmatprep.subr.bf16.mxu0 %v1491_v30  ;;  %v583_v18 = vld [vmem:[#allocation9 + $0x30] sm:$0xff] }
  0x82   : > { %1012 = vmatpush1.bf16.msra.mxu0 %v1490_v31  ;;  %v627_v31 = vld [vmem:[#allocation9 + $0x190] sm:$0xff] }
  0x83   : > { %1013 = vmatprep.subr.bf16.mxu0 %v1483_v34  ;;  %v628_v34 = vld [vmem:[#allocation9 + $0x198] sm:$0xff] }
  0x86   : > { %1014 = vmatpush1.bf16.msra.mxu0 %v1482_v35  ;;  %v632_v35 = vld [vmem:[#allocation9 + $0x1b8] sm:$0xff] }
  0x87   : > { %1015 = vmatprep.subr.bf16.mxu0 %v1475_v3  ;;  %v596_v3 = vld [vmem:[#allocation9 + $0x98] sm:$0xff] }
  0x88   : > { %v1489_v8 = vcombine.high %v596_v3, %v600_v4 }
  0x8a   : > { %1016 = vmatpush1.bf16.msra.mxu0 %v1474_v5 }
  0x8b   : > { %1017 = vmatprep.subr.bf16.mxu0 %v1467_v11  ;;  %v588_v11 = vld [vmem:[#allocation9 + $0x58] sm:$0xff] }
  0x8e   : > { %1018 = vmatpush1.bf16.msra.mxu0 %v1466_v13  ;;  %v1486_v13 = vcombine.low %v595_v1, %v599_v2 }
 0x130   : > { %v1545_v37 = vpop.f32.mrf.mxu0 }
 0x131   : > { %v484_v38 = vadd.f32 %v1545_v37, %v1456_v36 }
 0x132   : > { %v478_v39 = vpop.f32.mrf.mxu0 }
 0x133   : > { %v479_v40 = vadd.f32 %v1456_v36, %v478_v39  ;;  %v488_v43 = vmax.f32 %v484_v38, 0.0  ;;  %v1519_v39 = vcombine.high %v627_v31, %v631_v33 }
 0x135   : > { %v487_v44 = vmax.f32 %v479_v40, 0.0  ;;  %v1521_v40 = vcombine.high %v628_v34, %v632_v35 }
 0x137   : > { %v489_v45 = vpack.c.bf16 %v488_v43, %v487_v44  ;;  %v620_v43 = vld [vmem:[#allocation9 + $0x158] sm:$0xff] }
 0x138   : > { %v624_v44 = vld [vmem:[#allocation9 + $0x178] sm:$0xff] }
 0x139   : > { %1555 = vmatmul.mubr.msk.bf16.vlgmr.msra.gmra.mxu1 %vm529_vm3, %v489_v45  ;;  %v1518_v45 = vcombine.low %v627_v31, %v631_v33  ;;  %v1513_v48 = vcombine.high %v620_v43, %v624_v44 }
 0x13a   : > { %1047 = vmatpush1.bf16.msra.mxu1 %v1524_v16  ;;  %v635_v16 = vld [vmem:[#allocation9 + $0x1d0] sm:$0xff]  ;;  %1078 = vmatprep.mubr.bf16.mxu1 %v1864_v24 }
 0x13b   : > { %1048 = vmatprep.subr.bf16.mxu1 %v1517_v46  ;;  %v1527_v19 = vcombine.high %v635_v16, %v639_v17  ;;  %v1526_v21 = vcombine.low %v635_v16, %v639_v17  ;;  %v1520_v46 = vcombine.low %v628_v34, %v632_v35  ;;  %v1481_v16 = vcombine.high %v588_v11, %v592_v12  ;;  %v579_v17 = vld [vmem:[#allocation9 + $0x10] sm:$0xff] }
 0x13d   : > { %1089 = vmatprep.subr.bf16.mxu0 %v1527_v19  ;;  %v580_v19 = vld [vmem:[#allocation9 + $0x18] sm:$0xff] }
 0x13e   : > { %1049 = vmatpush1.bf16.msra.mxu1 %v1516_v49  ;;  %v611_v49 = vld [vmem:[#allocation9 + $0x110] sm:$0xff] }
 0x13f   : > { %1050 = vmatprep.subr.bf16.mxu1 %v1509_v50  ;;  %v615_v50 = vld [vmem:[#allocation9 + $0x130] sm:$0xff] }
 0x140   : > { %v1503_v55 = vcombine.high %v611_v49, %v615_v50 }
 0x142   : > { %1051 = vmatpush1.bf16.msra.mxu1 %v1508_v53  ;;  %v1510_v53 = vcombine.low %v619_v41, %v623_v42 }
 0x143   : > { %1052 = vmatprep.subr.bf16.mxu1 %v1501_v54  ;;  %v1512_v54 = vcombine.low %v620_v43, %v624_v44 }
 0x146   : > { %1053 = vmatpush1.bf16.msra.mxu1 %v1500_v57  ;;  %v603_v57 = vld [vmem:[#allocation9 + $0xd0] sm:$0xff] }
 0x147   : > { %1054 = vmatprep.subr.bf16.mxu1 %v1493_v58  ;;  %v607_v58 = vld [vmem:[#allocation9 + $0xf0] sm:$0xff] }
 0x148   : > { %v1494_v5 = vcombine.low %v603_v57, %v607_v58 }
 0x14a   : > { %1055 = vmatpush1.bf16.msra.mxu1 %v1492_v61  ;;  %v1502_v61 = vcombine.low %v611_v49, %v615_v50 }
 0x14b   : > { %1056 = vmatprep.subr.bf16.mxu1 %v1485_v62  ;;  %v1504_v62 = vcombine.low %v612_v51, %v616_v52 }
 0x14e   : > { %1057 = vmatpush1.bf16.msra.mxu1 %v1484_v63  ;;  %v1495_v63 = vcombine.high %v603_v57, %v607_v58 }
 0x14f   : > { %1058 = vmatprep.subr.bf16.mxu1 %v1477_v7  ;;  %v1487_v7 = vcombine.high %v595_v1, %v599_v2 }
 0x152   : > { %1059 = vmatpush1.bf16.msra.mxu1 %v1476_v6  ;;  %v1496_v6 = vcombine.low %v604_v59, %v608_v60 }
 0x153   : > { %1060 = vmatprep.subr.bf16.mxu1 %v1469_v15  ;;  %v1479_v15 = vcombine.high %v587_v9, %v591_v10 }
 0x156   : > { %1061 = vmatpush1.bf16.msra.mxu1 %v1468_v14  ;;  %v1488_v14 = vcombine.low %v596_v3, %v600_v4 }
 0x157   : > { %1132 = vmatprep.subr.bf16.mxu1 %v1529_v23  ;;  %v1471_v23 = vcombine.high %v579_v17, %v583_v18 }
 0x1f9   : > { %v567_v26 = vpop.f32.mrf.mxu1 }
 0x1fa   : > { %v568_v28 = vadd.f32 %v1460_v25, %v567_v26  ;;  %v1472_v26 = vcombine.low %v580_v19, %v584_v20 }
 0x1fb   : > { %v1556_v27 = vpop.f32.mrf.mxu1 }
 0x1fc   : > { %v574_v36 = vmax.f32 %v568_v28, 0.0 }
 0x1fd   : > { %v570_v29 = vpop.f32.mrf.mxu1 }
 0x1fe   : > { %v571_v30 = vadd.f32 %v1460_v25, %v570_v29  ;;  %v1470_v25 = vcombine.low %v579_v17, %v583_v18  ;;  %v643_v29 = vlaneseq }
 0x1ff   : > { %v1557_v32 = vpop.f32.mrf.mxu1 }
 0x200   : > { %v575_v37 = vmax.f32 %v571_v30, 0.0  ;;  %v2029_v32 = vshrl.u32 %v643_v29, 7 }
 0x202   : > { %v2023_v38 = vpack.c.bf16 %v575_v37, %v574_v36  ;;  %v649_v35 = vsub.s32 1, %v2029_v32  ;;  %v657_v36 = vsub.s32 3, %v2029_v32  ;;  %v645_v37 = vsub.s32 0, %v2029_v32 }
 0x203   : > { %v661_v4 = vsub.s32 4, %v2029_v32 }
 0x204   : > { %1036 = vmatmul.mubr.bf16.vlgmr.msra.gmra.mxu0 %v2023_v38  ;;  %1079 = vmatmul.mubr.bf16.vlgmr.msra.gmra.mxu1 %v2023_v38 }
 0x205   : > { %1090 = vmatpush1.bf16.msra.mxu0 %v1526_v21  ;;  %1133 = vmatpush1.bf16.msra.mxu1 %v1528_v22  ;;  %v1478_v21 = vcombine.low %v587_v9, %v591_v10  ;;  %v1480_v22 = vcombine.low %v588_v11, %v592_v12  ;;  %v673_v9 = vsub.s32 7, %v2029_v32 }
 0x206   : > { %1091 = vmatprep.subr.bf16.mxu0 %v1519_v39  ;;  %1134 = vmatprep.subr.bf16.mxu1 %v1521_v40  ;;  %v653_v39 = vsub.s32 2, %v2029_v32  ;;  %v641_v40 = vld [vmem:[#allocation10] sm:$0xff] }
 0x207   : > { %1121 = vmatprep.mubr.bf16.mxu0 %v1864_v24  ;;  %1164 = vmatprep.mubr.bf16.mxu1 %v1864_v24  ;;  %v1473_v24 = vcombine.high %v580_v19, %v584_v20  ;;  %v650_v42 = vrot.slane %v641_v40, %v649_v35  ;;  %v658_v43 = vrot.slane %v641_v40, %v657_v36 }
 0x208   : > { %v646_v44 = vrot.slane %v641_v40, %v645_v37  ;;  %v662_v12 = vrot.slane %v641_v40, %v661_v4  ;;  %v674_v19 = vrot.slane %v641_v40, %v673_v9 }
 0x209   : > { %1092 = vmatpush1.bf16.msra.mxu0 %v1518_v45  ;;  %1135 = vmatpush1.bf16.msra.mxu1 %v1520_v46  ;;  %v654_v45 = vrot.slane %v641_v40, %v653_v39 }
 0x20a   : > { %1093 = vmatprep.subr.bf16.mxu0 %v1511_v47  ;;  %1136 = vmatprep.subr.bf16.mxu1 %v1513_v48 }
 0x20d   : > { %1094 = vmatpush1.bf16.msra.mxu0 %v1510_v53  ;;  %1137 = vmatpush1.bf16.msra.mxu1 %v1512_v54 }
 0x20e   : > { %1095 = vmatprep.subr.bf16.mxu0 %v1503_v55  ;;  %1138 = vmatprep.subr.bf16.mxu1 %v1505_v56 }
 0x211   : > { %1096 = vmatpush1.bf16.msra.mxu0 %v1502_v61  ;;  %1139 = vmatpush1.bf16.msra.mxu1 %v1504_v62 }
 0x212   : > { %1097 = vmatprep.subr.bf16.mxu0 %v1495_v63  ;;  %1140 = vmatprep.subr.bf16.mxu1 %v1497_v0 }
 0x215   : > { %1098 = vmatpush1.bf16.msra.mxu0 %v1494_v5  ;;  %1141 = vmatpush1.bf16.msra.mxu1 %v1496_v6  ;;  %v669_v5 = vsub.s32 6, %v2029_v32 }
 0x216   : > { %1099 = vmatprep.subr.bf16.mxu0 %v1487_v7  ;;  %1142 = vmatprep.subr.bf16.mxu1 %v1489_v8  ;;  %v665_v8 = vsub.s32 5, %v2029_v32 }
 0x218   : > { %v666_v18 = vrot.slane %v641_v40, %v665_v8 }
 0x219   : > { %1100 = vmatpush1.bf16.msra.mxu0 %v1486_v13  ;;  %1143 = vmatpush1.bf16.msra.mxu1 %v1488_v14  ;;  %v670_v13 = vrot.slane %v641_v40, %v669_v5 }
 0x21a   : > { %1101 = vmatprep.subr.bf16.mxu0 %v1479_v15  ;;  %1144 = vmatprep.subr.bf16.mxu1 %v1481_v16 }
 0x21d   : > { %1102 = vmatpush1.bf16.msra.mxu0 %v1478_v21  ;;  %1145 = vmatpush1.bf16.msra.mxu1 %v1480_v22 }
 0x21e   : > { %1103 = vmatprep.subr.bf16.mxu0 %v1471_v23  ;;  %1146 = vmatprep.subr.bf16.mxu1 %v1473_v24 }
 0x221   : > { %1104 = vmatpush1.bf16.msra.mxu0 %v1470_v25  ;;  %1147 = vmatpush1.bf16.msra.mxu1 %v1472_v26 }
 0x224   : > { %1122 = vmatmul.mubr.bf16.vlgmr.msra.gmra.mxu0 %v2023_v38  ;;  %1165 = vmatmul.mubr.bf16.vlgmr.msra.gmra.mxu1 %v2023_v38 }
 0x2c4   : > { %v1037_v27 = vpop.f32.mrf.mxu0  ;;  %v1080_v28 = vpop.f32.mrf.mxu1 }
 0x2c5   : > { %v1038_v52 = vadd.f32 %v1037_v27, %v646_v44  ;;  %v1081_v53 = vadd.f32 %v1080_v28, %v654_v45 }
 0x2c6   : > { %v1039_v30 = vpop.f32.mrf.mxu0  ;;  %v1082_v31 = vpop.f32.mrf.mxu1 }
 0x2c7   : > { %v1040_v48 = vadd.f32 %v1039_v30, %v650_v42  ;;  %v1083_v49 = vadd.f32 %v1082_v31, %v658_v43  ;;  %v1175_v60 = vmax.f32 %v1038_v52, 0.0  ;;  %v1177_v61 = vmax.f32 %v1081_v53, 0.0 }
 0x2c8   : > { %v1041_v33 = vpop.f32.mrf.mxu0  ;;  %v1084_v34 = vpop.f32.mrf.mxu1 }
 0x2c9   : > { %v1042_v50 = vadd.f32 %v1041_v33, %v646_v44  ;;  %v1085_v51 = vadd.f32 %v1084_v34, %v654_v45  ;;  %v1176_v56 = vmax.f32 %v1040_v48, 0.0  ;;  %v1178_v57 = vmax.f32 %v1083_v49, 0.0 }
 0x2ca   : > { %v1043_v41 = vpop.f32.mrf.mxu0  ;;  %v1086_v38 = vpop.f32.mrf.mxu1 }
 0x2cb   : > { %v1044_v46 = vadd.f32 %v1043_v41, %v650_v42  ;;  %v1087_v47 = vadd.f32 %v1086_v38, %v658_v43  ;;  %v1183_v58 = vmax.f32 %v1042_v50, 0.0  ;;  %v1185_v59 = vmax.f32 %v1085_v51, 0.0 }
 0x2cd   : > { %v1184_v54 = vmax.f32 %v1044_v46, 0.0  ;;  %v1186_v55 = vmax.f32 %v1087_v47, 0.0  ;;  %v1192_v0 = vmax.f32 %v1175_v60, %v1183_v58  ;;  %v1206_v1 = vmax.f32 %v1177_v61, %v1185_v59 }
 0x2cf   : > { %v1199_v62 = vmax.f32 %v1176_v56, %v1184_v54  ;;  %v1213_v63 = vmax.f32 %v1178_v57, %v1186_v55  ;;  %v1193_v6 = vrot.slane %v1192_v0, 4  ;;  %v1207_v7 = vrot.slane %v1206_v1, 4 }
 0x2d0   : > { %v1865_v54 = vmov 1966171168  }
 0x2d1   : > { %v1200_v2 = vrot.slane %v1199_v62, 4  ;;  %v1214_v3 = vrot.slane %v1213_v63, 4  ;;  %v1194_v14 = vmax.f32 %v1192_v0, %v1193_v6  ;;  %v1208_v15 = vmax.f32 %v1206_v1, %v1207_v7 }
 0x2d2   : > { %v1261_v55 = vunpack.c.l.s4 %v1865_v54 }
 0x2d3   : > { %v1201_v10 = vmax.f32 %v1199_v62, %v1200_v2  ;;  %v1215_v11 = vmax.f32 %v1213_v63, %v1214_v3  ;;  %v1195_v26 = vrot.slane %v1194_v14, 2  ;;  %v1209_v27 = vrot.slane %v1208_v15, 2 }
 0x2d4   : > { %v1262_v4 = vunpack.c.0.s8 %v1261_v55 }
 0x2d5   : > { %v1202_v20 = vrot.slane %v1201_v10, 2  ;;  %v1216_v21 = vrot.slane %v1215_v11, 2  ;;  %v1196_v45 = vmax.f32 %v1194_v14, %v1195_v26  ;;  %v1210_v46 = vmax.f32 %v1208_v15, %v1209_v27 }
 0x2d7   : > { %v1203_v35 = vmax.f32 %v1201_v10, %v1202_v20  ;;  %v1217_v36 = vmax.f32 %v1215_v11, %v1216_v21  ;;  %v1197_v61 = vrot.slane %v1196_v45, 1  ;;  %v1211_v62 = vrot.slane %v1210_v46, 1 }
 0x2d9   : > { %v1204_v53 = vrot.slane %v1203_v35, 1  ;;  %v1218_v56 = vrot.slane %v1217_v36, 1  ;;  %v1198_v10 = vmax.f32 %v1196_v45, %v1197_v61  ;;  %v1212_v11 = vmax.f32 %v1210_v46, %v1211_v62 }
 0x2db   : > { %v1205_v3 = vmax.f32 %v1203_v35, %v1204_v53  ;;  %v1219_v5 = vmax.f32 %v1217_v36, %v1218_v56 }
 0x2e4   : > { %v1123_v16 = vpop.f32.mrf.mxu0  ;;  %v1166_v17 = vpop.f32.mrf.mxu1 }
 0x2e5   : > { %v1124_v22 = vadd.f32 %v1123_v16, %v662_v12  ;;  %v1167_v23 = vadd.f32 %v1166_v17, %v670_v13  ;;  %v1256_v16 = vcombine.low %v1198_v10, %v1205_v3  ;;  %v1265_v17 = vsub.s32 %v1262_v4, %v2029_v32 }
 0x2e6   : > { %v1125_v24 = vpop.f32.mrf.mxu0  ;;  %v1168_v25 = vpop.f32.mrf.mxu1 }
 0x2e7   : > { %v1126_v28 = vadd.f32 %v1125_v24, %v666_v18  ;;  %v1169_v29 = vadd.f32 %v1168_v25, %v674_v19  ;;  %v1179_v37 = vmax.f32 %v1124_v22, 0.0  ;;  %v1181_v39 = vmax.f32 %v1167_v23, 0.0 }
 0x2e8   : > { %v1127_v30 = vpop.f32.mrf.mxu0  ;;  %v1170_v31 = vpop.f32.mrf.mxu1  ;;  %v1266_v25 = vrot.slane %v1256_v16, %v1265_v17 }
 0x2e9   : > { %v1128_v33 = vadd.f32 %v1127_v30, %v662_v12  ;;  %v1171_v34 = vadd.f32 %v1170_v31, %v670_v13  ;;  %v1180_v47 = vmax.f32 %v1126_v28, 0.0  ;;  %v1182_v48 = vmax.f32 %v1169_v29, 0.0 }
 0x2ea   : > { %v1129_v41 = vpop.f32.mrf.mxu0  ;;  %v1172_v40 = vpop.f32.mrf.mxu1 }
 0x2eb   : > { %v1187_v38 = vmax.f32 %v1128_v33, 0.0  ;;  %v1189_v42 = vmax.f32 %v1171_v34, 0.0  ;;  %v1130_v43 = vadd.f32 %v1129_v41, %v666_v18  ;;  %v1173_v44 = vadd.f32 %v1172_v40, %v674_v19 }
 0x2ec   : > { %v1257_v18 = vcombine.low %v1212_v11, %v1219_v5 }
 0x2ed   : > { %v1220_v49 = vmax.f32 %v1179_v37, %v1187_v38  ;;  %v1234_v50 = vmax.f32 %v1181_v39, %v1189_v42  ;;  %v1188_v51 = vmax.f32 %v1130_v43, 0.0  ;;  %v1190_v52 = vmax.f32 %v1173_v44, 0.0 }
 0x2ee   : > { %v1273_v26 = vrot.slane %v1257_v18, %v1265_v17 }
 0x2ef   : > { %v1221_v57 = vrot.slane %v1220_v49, 4  ;;  %v1235_v58 = vrot.slane %v1234_v50, 4  ;;  %v1227_v59 = vmax.f32 %v1180_v47, %v1188_v51  ;;  %v1241_v60 = vmax.f32 %v1182_v48, %v1190_v52 }
 0x2f0   : > { %v1288_v34 = vcombine.low %v1266_v25, %v1273_v26 }
 0x2f1   : > { %v1222_v63 = vmax.f32 %v1220_v49, %v1221_v57  ;;  %v1236_v0 = vmax.f32 %v1234_v50, %v1235_v58  ;;  %v1228_v1 = vrot.slane %v1227_v59, 4  ;;  %v1242_v2 = vrot.slane %v1241_v60, 4 }
 0x2f2   : > { %v1296_v37 = vrot.slane %v1288_v34, %v1265_v17 }
 0x2f3   : > { %v1223_v6 = vrot.slane %v1222_v63, 2  ;;  %v1237_v7 = vrot.slane %v1236_v0, 2  ;;  %v1229_v8 = vmax.f32 %v1227_v59, %v1228_v1  ;;  %v1243_v9 = vmax.f32 %v1241_v60, %v1242_v2 }
 0x2f5   : > { %v1224_v12 = vmax.f32 %v1222_v63, %v1223_v6  ;;  %v1238_v13 = vmax.f32 %v1236_v0, %v1237_v7  ;;  %v1230_v14 = vrot.slane %v1229_v8, 2  ;;  %v1244_v15 = vrot.slane %v1243_v9, 2 }
 0x2f7   : > { %v1225_v19 = vrot.slane %v1224_v12, 1  ;;  %v1239_v20 = vrot.slane %v1238_v13, 1  ;;  %v1231_v21 = vmax.f32 %v1229_v8, %v1230_v14  ;;  %v1245_v22 = vmax.f32 %v1243_v9, %v1244_v15 }
 0x2f9   : > { %v1232_v23 = vrot.slane %v1231_v21, 1  ;;  %v1246_v24 = vrot.slane %v1245_v22, 1  ;;  %v1226_v27 = vmax.f32 %v1224_v12, %v1225_v19  ;;  %v1240_v28 = vmax.f32 %v1238_v13, %v1239_v20 }
 0x2fb   : > { %v1233_v29 = vmax.f32 %v1231_v21, %v1232_v23  ;;  %v1247_v30 = vmax.f32 %v1245_v22, %v1246_v24 }
 0x2fd   : > { %v1258_v31 = vcombine.low %v1226_v27, %v1233_v29  ;;  %v1259_v33 = vcombine.low %v1240_v28, %v1247_v30 }
 0x2ff   : > { %v1280_v35 = vrot.slane %v1258_v31, %v1265_v17  ;;  %v1287_v36 = vrot.slane %v1259_v33, %v1265_v17 }
 0x301   : > { %v1289_v32 = vcombine.low %v1280_v35, %v1287_v36 }
 0x303   : > { %v1303_v39 = vrot.slane %v1289_v32, %v1265_v17 }
 0x305   : > { %v1304_v41 = vcombine.low %v1296_v37, %v1303_v39 }
 0x307   : > { %1307 = vst [vmem:[%s384_s20] sm:$0xff] %v1304_v41 }
 0x308 PF: > { %s21_s26 = sadd.s32 1, %s1850_s26   ;;  %s2072_s24 = smov %s1846_s25 }
 0x309   : > { %p18_p7 = scmp.ge.s32.totalorder %s21_s26, 4   ;;  %s2073_s25 = smov %s2075_s12 }
 0x30b   :  { %20 = sbr.rel (!%p18_p7) target bundleno = 5 (0x5), region = 107 }
 0x310   :  { %1327 = vsyncpa [#allocation3], 1 }
 0x311   :  { %1329 = vsyncpa [#allocation3 + $0x1], 1 }
 0x312   :  { %1330 = vsyncpa [#allocation5], 1 }
 0x313   :  { %1331 = vsyncpa [#allocation8], 1 }
 0x314   :  { %1332 = vsyncpa [#allocation11], 1 }

// kernel: transform_net_forward.7
= control target key start
LH: loop header
LB: loop body
LE: loop exit
PB: predicated region body
PF: predicated region fallthrough
CT: control target
= control target key end

     0   :  { %s1713_s30 = smov 0   ;;  %s1715_s10 = smov 0   ;;  %s2001_s0 = inlined_call_operand.vmem [shape: f32[2,16,3], index: 0, kind: input, shape index: {}]   ;;  %s2002_s1 = inlined_call_operand.vmem [shape: f32[2,3,64], index: 1, kind: input, shape index: {}]   ;;  %s2003_s2 = inlined_call_operand.vmem [shape: f32[1,64], index: 2, kind: input, shape index: {}]   ;;  %s2004_s3 = inlined_call_operand.vmem [shape: bf16[64,64], index: 3, kind: input, shape index: {}]   ;;  %s2005_s4 = inlined_call_operand.vmem [shape: f32[1,64], index: 4, kind: input, shape index: {}]   ;;  %s2006_s5 = inlined_call_operand.vmem [shape: bf16[64,128], index: 5, kind: input, shape index: {}]   ;;  %s2007_s6 = inlined_call_operand.vmem [shape: f32[1,128], index: 6, kind: input, shape index: {}]   ;;  %s2008_s7 = inlined_call_operand.vmem [shape: bf16[128,1024], index: 7, kind: input, shape index: {}]   ;;  %s2009_s8 = inlined_call_operand.vmem [shape: f32[1,1024], index: 8, kind: input, shape index: {}]   ;;  %s2010_s9 = inlined_call_operand.vmem [shape: f32[2,1,1024], index: 9, kind: output, shape index: {}]  }
   0x1   :  { %s1717_s11 = smov 0  }
   0x2 LB: > { %s31_s12 = sadd.s32 1, %s1653_s10  ;;  %p1468_p0 = scmp.ge.s32.totalorder %s1657_s11, 1  ;;  %s1657_s11 = sphi %s1717_s11, %s19_s11   ;;  %s1653_s10 = sphi %s1715_s10, %s2012_s10   ;;  %s1649_s30 = sphi %s1713_s30, %s2011_s30  }
   0x3   : > { %p33_p1 = scmp.ge.s32.totalorder %s31_s12, 2  ;;  %p315_p2 = scmp.lt.s32.totalorder %s1657_s11, 3 }
   0x5   : > { %s2014_s12 = smov (%p33_p1, %s31_s12), 0  ;;  %p316_p3 = pnand %p1468_p0, %p315_p2 }
   0x6   : > { %p359_p4 = scmp.lt.s32.totalorder (!%p316_p3), %s1649_s30, 1 }
   0x7   : > { %319 = sbr.rel (%p316_p3) target bundleno = 886 (0x376), region = 56 }
   0xc   : > { %v1627_v0 = vld [vmem:[%s2004_s3 + $0x18] sm:$0xff]   ;;  %v1659_v1 = vmov 0.0   ;;  %s2016_s30 = smov (!%p359_p4, %s1649_s30), 1  ;;  %v1628_v2 = vld [vmem:[%s2004_s3 + $0x10] sm:$0xff]   ;;  %vm399_vm0 = vcmask 1042432   ;;  %vm392_vm1 = vcmask 23552  }
   0xd   : > { %1574 = vmatprep.subr.bf16.mxu1 %v1659_v1  ;;  %s1471_s17 = sshll.u32 %s2016_s30, 2  ;;  %s1555_s21 = sshll.u32 %s2016_s30, 4  ;;  %v1629_v6 = vld [vmem:[%s2004_s3 + $0x8] sm:$0xff]   ;;  %v1630_v7 = vld [vmem:[%s2004_s3] sm:$0xff]   ;;  %vm1660_vm2 = vmmov 0   ;;  %v1631_v8 = vld [vmem:[%s2006_s5 + $0x18] sm:$0xff]  }
   0xe   : > { %1575 = vmatpush3.bf16.msra.mxu1 %v1627_v0  ;;  %s371_s20 = scalar_lea.vmem %s2002_s1, %s1471_s17  ;;  %s366_s24 = scalar_lea.vmem %s2001_s0, %s1555_s21  ;;  %1582 = vmatprep.mubr.msk.bf16.mxu1 %vm1660_vm2, %v1659_v1  ;;  %v1473_v9 = vld [vmem:[%s2003_s2] ss:$0 sm:$0xff]  ;;  %vm520_vm3 = vcmask 523264   ;;  %v1632_v17 = vld [vmem:[%s2006_s5 + $0x10] sm:$0xff]   ;;  %v1633_v18 = vld [vmem:[%s2006_s5 + $0x8] sm:$0xff]  }
   0xf   : > { %1576 = vmatprep.subr.bf16.mxu1 %v1659_v1  ;;  %v384_v3 = vld [vmem:[%s371_s20] sm:$0x7]  ;;  %v383_v5 = vld [vmem:[%s366_s24 + $0x8] sm:$0xff]  ;;  %s1472_s20 = sshll.u32 %s2016_s30, 3 }
  0x10   : > { %1569 = vmatprep.subr.msk.mxu0 %vm399_vm0, %v384_v3  ;;  %v382_v4 = vld [vmem:[%s366_s24] sm:$0xff]  ;;  %v711_v22 = vld [vmem:[%s2008_s7 + $0x1c8] sm:$0xff]  ;;  %s375_s23 = scalar_lea.vmem %s2010_s9, %s1472_s20 }
  0x11   : > { %1570 = vmatpush3.msk.msra.mxu0 %vm399_vm0, %v384_v3  ;;  %1571 = vmatprep.mubr.msk.f32.mxu0 %vm392_vm1, %v382_v4  ;;  %v1634_v19 = vld [vmem:[%s2006_s5] sm:$0xff]   ;;  %v715_v25 = vld [vmem:[%s2008_s7 + $0x1e8] sm:$0xff] }
  0x12   : > { %1577 = vmatpush3.bf16.msra.mxu1 %v1628_v2  ;;  %1586 = vmatprep.subr.bf16.mxu0 %v1659_v1  ;;  %v710_v20 = vld [vmem:[%s2008_s7 + $0x1c0] sm:$0xff]  ;;  %v1547_v28 = vcombine.low %v711_v22, %v715_v25  ;;  %v1548_v29 = vcombine.high %v711_v22, %v715_v25  ;;  %v703_v55 = vld [vmem:[%s2008_s7 + $0x188] sm:$0xff] }
  0x13   : > { %1578 = vmatprep.subr.bf16.mxu1 %v1659_v1  ;;  %1572 = vmatmul.mubr.msk.f32.vlgmr.msra.gmra.mxu0 %vm392_vm1, %v383_v5  ;;  %v714_v21 = vld [vmem:[%s2008_s7 + $0x1e0] sm:$0xff]  ;;  %v707_v56 = vld [vmem:[%s2008_s7 + $0x1a8] sm:$0xff] }
  0x14   : > { %1594 = vmatprep.mubr.msk.bf16.mxu0 %vm1660_vm2, %v1659_v1  ;;  %1587 = vmatpush3.bf16.msra.mxu0 %v1631_v8  ;;  %v1545_v23 = vcombine.low %v710_v20, %v714_v21  ;;  %v1546_v24 = vcombine.high %v710_v20, %v714_v21  ;;  %v702_v26 = vld [vmem:[%s2008_s7 + $0x180] sm:$0xff]  ;;  %v1540_v60 = vcombine.high %v703_v55, %v707_v56  ;;  %v695_v61 = vld [vmem:[%s2008_s7 + $0x148] sm:$0xff] }
  0x15   : > { %1588 = vmatprep.subr.bf16.mxu0 %v1659_v1  ;;  %v706_v27 = vld [vmem:[%s2008_s7 + $0x1a0] sm:$0xff]  ;;  %v699_v62 = vld [vmem:[%s2008_s7 + $0x168] sm:$0xff]  ;;  %v1539_v63 = vcombine.low %v703_v55, %v707_v56  ;;  %v696_v55 = vld [vmem:[%s2008_s7 + $0x150] sm:$0xff] }
  0x16   : > { %1579 = vmatpush3.bf16.msra.mxu1 %v1629_v6  ;;  %v1538_v30 = vcombine.high %v702_v26, %v706_v27  ;;  %v1537_v31 = vcombine.low %v702_v26, %v706_v27  ;;  %v694_v32 = vld [vmem:[%s2008_s7 + $0x140] sm:$0xff]  ;;  %v1532_v0 = vcombine.high %v695_v61, %v699_v62  ;;  %v691_v2 = vld [vmem:[%s2008_s7 + $0x128] sm:$0xff]  ;;  %v1531_v3 = vcombine.low %v695_v61, %v699_v62  ;;  %v700_v56 = vld [vmem:[%s2008_s7 + $0x170] sm:$0xff] }
  0x17   : > { %1580 = vmatprep.subr.bf16.mxu1 %v1659_v1  ;;  %v698_v33 = vld [vmem:[%s2008_s7 + $0x160] sm:$0xff]  ;;  %v679_v5 = vld [vmem:[%s2008_s7 + $0xc8] sm:$0xff]  ;;  %v1534_v61 = vcombine.high %v696_v55, %v700_v56 }
  0x18   : > { %1589 = vmatpush3.bf16.msra.mxu0 %v1632_v17  ;;  %v1530_v34 = vcombine.high %v694_v32, %v698_v33  ;;  %v1529_v35 = vcombine.low %v694_v32, %v698_v33  ;;  %v686_v36 = vld [vmem:[%s2008_s7 + $0x100] sm:$0xff]  ;;  %v683_v6 = vld [vmem:[%s2008_s7 + $0xe8] sm:$0xff]  ;;  %v713_v32 = vld [vmem:[%s2008_s7 + $0x1d8] sm:$0xff] }
  0x19   : > { %1590 = vmatprep.subr.bf16.mxu0 %v1659_v1  ;;  %v690_v37 = vld [vmem:[%s2008_s7 + $0x120] sm:$0xff]  ;;  %v1516_v8 = vcombine.high %v679_v5, %v683_v6  ;;  %v659_v26 = vld [vmem:[%s2008_s7 + $0x28] sm:$0xff] }
  0x1a   : > { %1581 = vmatpush3.bf16.msra.mxu1 %v1630_v7  ;;  %v1522_v38 = vcombine.high %v686_v36, %v690_v37  ;;  %v1521_v39 = vcombine.low %v686_v36, %v690_v37  ;;  %v678_v40 = vld [vmem:[%s2008_s7 + $0xc0] sm:$0xff] }
  0x1b   : > { %1080 = vmatprep.subr.bf16.mxu1 %v1546_v24  ;;  %v682_v41 = vld [vmem:[%s2008_s7 + $0xe0] sm:$0xff]  ;;  %v655_v24 = vld [vmem:[%s2008_s7 + $0x8] sm:$0xff] }
  0x1c   : > { %1591 = vmatpush3.bf16.msra.mxu0 %v1633_v18  ;;  %v1514_v42 = vcombine.high %v678_v40, %v682_v41  ;;  %v1513_v43 = vcombine.low %v678_v40, %v682_v41  ;;  %v670_v44 = vld [vmem:[%s2008_s7 + $0x80] sm:$0xff]  ;;  %v667_v18 = vld [vmem:[%s2008_s7 + $0x68] sm:$0xff] }
  0x1d   : > { %1592 = vmatprep.subr.bf16.mxu0 %v1659_v1  ;;  %v674_v45 = vld [vmem:[%s2008_s7 + $0xa0] sm:$0xff]  ;;  %v687_v1 = vld [vmem:[%s2008_s7 + $0x108] sm:$0xff] }
  0x1e   : > { %v1506_v46 = vcombine.high %v670_v44, %v674_v45  ;;  %v1505_v47 = vcombine.low %v670_v44, %v674_v45  ;;  %v1477_v48 = vld [vmem:[%s2005_s4] ss:$0 sm:$0xff]  ;;  %v1524_v4 = vcombine.high %v687_v1, %v691_v2  ;;  %v1523_v7 = vcombine.low %v687_v1, %v691_v2  ;;  %v704_v45 = vld [vmem:[%s2008_s7 + $0x190] sm:$0xff]  ;;  %v689_v1 = vld [vmem:[%s2008_s7 + $0x118] sm:$0xff] }
  0x1f   : > { %v654_v22 = vld [vmem:[%s2008_s7] sm:$0xff]  ;;  %v693_v2 = vld [vmem:[%s2008_s7 + $0x138] sm:$0xff] }
  0x20   : > { %1593 = vmatpush3.bf16.msra.mxu0 %v1634_v19 }
  0x21   : > { %1123 = vmatprep.subr.bf16.mxu0 %v1548_v29  ;;  %v1492_v29 = vcombine.high %v655_v24, %v659_v26 }
  0xd3   : > { %v1573_v10 = vpop.f32.mrf.mxu0 }
  0xd4   : > { %v475_v11 = vadd.f32 %v1573_v10, %v1473_v9  ;;  %v675_v10 = vld [vmem:[%s2008_s7 + $0xa8] sm:$0xff] }
  0xd5   : > { %v469_v12 = vpop.f32.mrf.mxu0 }
  0xd6   : > { %v470_v13 = vadd.f32 %v1473_v9, %v469_v12  ;;  %v479_v14 = vmax.f32 %v475_v11, 0.0  ;;  %v671_v9 = vld [vmem:[%s2008_s7 + $0x88] sm:$0xff]  ;;  %v1515_v11 = vcombine.low %v679_v5, %v683_v6  ;;  %v1528_v6 = vcombine.high %v689_v1, %v693_v2 }
  0xd7   : > { %v1508_v12 = vcombine.high %v671_v9, %v675_v10 }
  0xd8   : > { %v478_v15 = vmax.f32 %v470_v13, 0.0  ;;  %v1507_v13 = vcombine.low %v671_v9, %v675_v10  ;;  %v681_v9 = vld [vmem:[%s2008_s7 + $0xd8] sm:$0xff] }
  0xd9   : > { %v685_v10 = vld [vmem:[%s2008_s7 + $0xf8] sm:$0xff] }
  0xda   : > { %v480_v16 = vpack.c.bf16 %v479_v14, %v478_v15  ;;  %v662_v14 = vld [vmem:[%s2008_s7 + $0x40] sm:$0xff] }
  0xdb   : > { %v666_v15 = vld [vmem:[%s2008_s7 + $0x60] sm:$0xff] }
  0xdc   : > { %1583 = vmatmul.mubr.msk.bf16.vlgmr.msra.gmra.mxu1 %vm520_vm3, %v480_v16  ;;  %v663_v16 = vld [vmem:[%s2008_s7 + $0x48] sm:$0xff]  ;;  %v1498_v17 = vcombine.high %v662_v14, %v666_v15  ;;  %v1497_v19 = vcombine.low %v662_v14, %v666_v15  ;;  %v1520_v14 = vcombine.high %v681_v9, %v685_v10  ;;  %v672_v15 = vld [vmem:[%s2008_s7 + $0x90] sm:$0xff] }
  0xdd   : > { %1081 = vmatpush1.bf16.msra.mxu1 %v1545_v23  ;;  %v1499_v20 = vcombine.low %v663_v16, %v667_v18  ;;  %v1500_v21 = vcombine.high %v663_v16, %v667_v18  ;;  %v658_v23 = vld [vmem:[%s2008_s7 + $0x20] sm:$0xff]  ;;  %v676_v16 = vld [vmem:[%s2008_s7 + $0xb0] sm:$0xff]  ;;  %v677_v18 = vld [vmem:[%s2008_s7 + $0xb8] sm:$0xff] }
  0xde   : > { %1082 = vmatprep.subr.bf16.mxu1 %v1538_v30  ;;  %v1490_v25 = vcombine.high %v654_v22, %v658_v23  ;;  %v1489_v27 = vcombine.low %v654_v22, %v658_v23  ;;  %v712_v30 = vld [vmem:[%s2008_s7 + $0x1d0] sm:$0xff] }
  0xdf   : > { %v664_v23 = vld [vmem:[%s2008_s7 + $0x50] sm:$0xff] }
  0xe1   : > { %1083 = vmatpush1.bf16.msra.mxu1 %v1537_v31  ;;  %v716_v31 = vld [vmem:[%s2008_s7 + $0x1f0] sm:$0xff] }
  0xe2   : > { %1084 = vmatprep.subr.bf16.mxu1 %v1530_v34  ;;  %v1550_v33 = vcombine.high %v712_v30, %v716_v31  ;;  %v717_v34 = vld [vmem:[%s2008_s7 + $0x1f8] sm:$0xff] }
  0xe3   : > { %v1551_v36 = vcombine.low %v713_v32, %v717_v34  ;;  %v1552_v37 = vcombine.high %v713_v32, %v717_v34  ;;  %v660_v32 = vld [vmem:[%s2008_s7 + $0x30] sm:$0xff]  ;;  %v661_v34 = vld [vmem:[%s2008_s7 + $0x38] sm:$0xff] }
  0xe5   : > { %1085 = vmatpush1.bf16.msra.mxu1 %v1529_v35  ;;  %v1549_v35 = vcombine.low %v712_v30, %v716_v31  ;;  %v656_v31 = vld [vmem:[%s2008_s7 + $0x10] sm:$0xff] }
  0xe6   : > { %1086 = vmatprep.subr.bf16.mxu1 %v1522_v38  ;;  %v1661_v38 = vmov 0  }
  0xe7   : > { %1112 = vmatprep.mubr.bf16.mxu1 %v1661_v38 }
  0xe9   : > { %1087 = vmatpush1.bf16.msra.mxu1 %v1521_v39  ;;  %v1483_v39 = vld [vmem:[%s2007_s6] ss:$0 sm:$0xff] }
  0xea   : > { %1088 = vmatprep.subr.bf16.mxu1 %v1514_v42 }
  0xed   : > { %1089 = vmatpush1.bf16.msra.mxu1 %v1513_v43 }
  0xee   : > { %1090 = vmatprep.subr.bf16.mxu1 %v1506_v46 }
  0xf1   : > { %1091 = vmatpush1.bf16.msra.mxu1 %v1505_v47  ;;  %v708_v47 = vld [vmem:[%s2008_s7 + $0x1b0] sm:$0xff] }
  0xf2   : > { %1092 = vmatprep.subr.bf16.mxu1 %v1498_v17  ;;  %v673_v17 = vld [vmem:[%s2008_s7 + $0x98] sm:$0xff] }
  0xf3   : > { %v1512_v22 = vcombine.high %v673_v17, %v677_v18 }
  0xf5   : > { %1093 = vmatpush1.bf16.msra.mxu1 %v1497_v19 }
  0xf6   : > { %1094 = vmatprep.subr.bf16.mxu1 %v1490_v25  ;;  %v665_v25 = vld [vmem:[%s2008_s7 + $0x58] sm:$0xff] }
  0xf9   : > { %1095 = vmatpush1.bf16.msra.mxu1 %v1489_v27  ;;  %v1509_v27 = vcombine.low %v672_v15, %v676_v16 }
  0xfa   : > { %1166 = vmatprep.subr.bf16.mxu1 %v1550_v33  ;;  %v657_v33 = vld [vmem:[%s2008_s7 + $0x18] sm:$0xff] }
 0x19c   : > { %v558_v49 = vpop.f32.mrf.mxu1 }
 0x19d   : > { %v559_v51 = vadd.f32 %v1477_v48, %v558_v49  ;;  %v709_v49 = vld [vmem:[%s2008_s7 + $0x1b8] sm:$0xff] }
 0x19e   : > { %v1584_v50 = vpop.f32.mrf.mxu1 }
 0x19f   : > { %v565_v57 = vmax.f32 %v559_v51, 0.0 }
 0x1a0   : > { %v561_v52 = vpop.f32.mrf.mxu1 }
 0x1a1   : > { %v562_v53 = vadd.f32 %v1477_v48, %v561_v52  ;;  %v705_v48 = vld [vmem:[%s2008_s7 + $0x198] sm:$0xff] }
 0x1a2   : > { %v1585_v54 = vpop.f32.mrf.mxu1 }
 0x1a3   : > { %v566_v58 = vmax.f32 %v562_v53, 0.0  ;;  %v1542_v53 = vcombine.high %v704_v45, %v708_v47  ;;  %v1544_v54 = vcombine.high %v705_v48, %v709_v49 }
 0x1a5   : > { %v567_v59 = vpack.c.bf16 %v566_v58, %v565_v57  ;;  %v697_v57 = vld [vmem:[%s2008_s7 + $0x158] sm:$0xff] }
 0x1a6   : > { %v701_v58 = vld [vmem:[%s2008_s7 + $0x178] sm:$0xff] }
 0x1a7   : > { %1595 = vmatmul.mubr.msk.bf16.vlgmr.msra.gmra.mxu0 %vm520_vm3, %v567_v59  ;;  %v1541_v59 = vcombine.low %v704_v45, %v708_v47  ;;  %v1536_v62 = vcombine.high %v697_v57, %v701_v58 }
 0x1a8   : > { %1124 = vmatpush1.bf16.msra.mxu0 %v1547_v28  ;;  %v1491_v28 = vcombine.low %v655_v24, %v659_v26  ;;  %1155 = vmatprep.mubr.bf16.mxu0 %v1661_v38  ;;  %v668_v24 = vld [vmem:[%s2008_s7 + $0x70] sm:$0xff]  ;;  %v669_v26 = vld [vmem:[%s2008_s7 + $0x78] sm:$0xff] }
 0x1a9   : > { %1125 = vmatprep.subr.bf16.mxu0 %v1540_v60  ;;  %v1543_v60 = vcombine.low %v705_v48, %v709_v49  ;;  %v1504_v30 = vcombine.high %v665_v25, %v669_v26 }
 0x1ac   : > { %1126 = vmatpush1.bf16.msra.mxu0 %v1539_v63  ;;  %v688_v63 = vld [vmem:[%s2008_s7 + $0x110] sm:$0xff] }
 0x1ad   : > { %1127 = vmatprep.subr.bf16.mxu0 %v1532_v0  ;;  %v692_v0 = vld [vmem:[%s2008_s7 + $0x130] sm:$0xff] }
 0x1ae   : > { %v1526_v5 = vcombine.high %v688_v63, %v692_v0 }
 0x1b0   : > { %1128 = vmatpush1.bf16.msra.mxu0 %v1531_v3  ;;  %v1533_v3 = vcombine.low %v696_v55, %v700_v56 }
 0x1b1   : > { %1129 = vmatprep.subr.bf16.mxu0 %v1524_v4  ;;  %v1535_v4 = vcombine.low %v697_v57, %v701_v58 }
 0x1b4   : > { %1130 = vmatpush1.bf16.msra.mxu0 %v1523_v7  ;;  %v680_v7 = vld [vmem:[%s2008_s7 + $0xd0] sm:$0xff] }
 0x1b5   : > { %1131 = vmatprep.subr.bf16.mxu0 %v1516_v8  ;;  %v684_v8 = vld [vmem:[%s2008_s7 + $0xf0] sm:$0xff] }
 0x1b6   : > { %v1517_v19 = vcombine.low %v680_v7, %v684_v8 }
 0x1b8   : > { %1132 = vmatpush1.bf16.msra.mxu0 %v1515_v11  ;;  %v1525_v11 = vcombine.low %v688_v63, %v692_v0 }
 0x1b9   : > { %1133 = vmatprep.subr.bf16.mxu0 %v1508_v12  ;;  %v1527_v12 = vcombine.low %v689_v1, %v693_v2 }
 0x1bc   : > { %1134 = vmatpush1.bf16.msra.mxu0 %v1507_v13  ;;  %v1518_v13 = vcombine.high %v680_v7, %v684_v8 }
 0x1bd   : > { %1135 = vmatprep.subr.bf16.mxu0 %v1500_v21  ;;  %v1510_v21 = vcombine.high %v672_v15, %v676_v16 }
 0x1c0   : > { %1136 = vmatpush1.bf16.msra.mxu0 %v1499_v20  ;;  %v1519_v20 = vcombine.low %v681_v9, %v685_v10 }
 0x1c1   : > { %1137 = vmatprep.subr.bf16.mxu0 %v1492_v29  ;;  %v1502_v29 = vcombine.high %v664_v23, %v668_v24 }
 0x1c4   : > { %1138 = vmatpush1.bf16.msra.mxu0 %v1491_v28  ;;  %v1511_v28 = vcombine.low %v673_v17, %v677_v18 }
 0x1c5   : > { %1209 = vmatprep.subr.bf16.mxu0 %v1552_v37  ;;  %v1494_v37 = vcombine.high %v656_v31, %v660_v32 }
 0x267   : > { %v644_v40 = vpop.f32.mrf.mxu0 }
 0x268   : > { %v645_v42 = vadd.f32 %v1483_v39, %v644_v40  ;;  %v1495_v40 = vcombine.low %v657_v33, %v661_v34 }
 0x269   : > { %v1596_v41 = vpop.f32.mrf.mxu0 }
 0x26a   : > { %v651_v50 = vmax.f32 %v645_v42, 0.0 }
 0x26b   : > { %v647_v43 = vpop.f32.mrf.mxu0 }
 0x26c   : > { %v648_v44 = vadd.f32 %v1483_v39, %v647_v43  ;;  %v1493_v39 = vcombine.low %v656_v31, %v660_v32  ;;  %v720_v43 = vlaneseq }
 0x26d   : > { %v1597_v46 = vpop.f32.mrf.mxu0 }
 0x26e   : > { %v652_v51 = vmax.f32 %v648_v44, 0.0  ;;  %v1974_v46 = vshrl.u32 %v720_v43, 7 }
 0x270   : > { %v1896_v52 = vpack.c.bf16 %v652_v51, %v651_v50  ;;  %v726_v49 = vsub.s32 1, %v1974_v46  ;;  %v734_v50 = vsub.s32 3, %v1974_v46  ;;  %v722_v51 = vsub.s32 0, %v1974_v46 }
 0x271   : > { %v738_v18 = vsub.s32 4, %v1974_v46 }
 0x272   : > { %1113 = vmatmul.mubr.bf16.vlgmr.msra.gmra.mxu1 %v1896_v52  ;;  %1156 = vmatmul.mubr.bf16.vlgmr.msra.gmra.mxu0 %v1896_v52 }
 0x273   : > { %1167 = vmatpush1.bf16.msra.mxu1 %v1549_v35  ;;  %1210 = vmatpush1.bf16.msra.mxu0 %v1551_v36  ;;  %v1501_v35 = vcombine.low %v664_v23, %v668_v24  ;;  %v1503_v36 = vcombine.low %v665_v25, %v669_v26  ;;  %v750_v23 = vsub.s32 7, %v1974_v46 }
 0x274   : > { %1168 = vmatprep.subr.bf16.mxu1 %v1542_v53  ;;  %1211 = vmatprep.subr.bf16.mxu0 %v1544_v54  ;;  %v730_v53 = vsub.s32 2, %v1974_v46 }
 0x275   : > { %1198 = vmatprep.mubr.bf16.mxu1 %v1661_v38  ;;  %1241 = vmatprep.mubr.bf16.mxu0 %v1661_v38  ;;  %v1496_v38 = vcombine.high %v657_v33, %v661_v34 }
 0x277   : > { %1169 = vmatpush1.bf16.msra.mxu1 %v1541_v59  ;;  %1212 = vmatpush1.bf16.msra.mxu0 %v1543_v60 }
 0x278   : > { %1170 = vmatprep.subr.bf16.mxu1 %v1534_v61  ;;  %1213 = vmatprep.subr.bf16.mxu0 %v1536_v62 }
 0x27b   : > { %1171 = vmatpush1.bf16.msra.mxu1 %v1533_v3  ;;  %1214 = vmatpush1.bf16.msra.mxu0 %v1535_v4 }
 0x27c   : > { %1172 = vmatprep.subr.bf16.mxu1 %v1526_v5  ;;  %1215 = vmatprep.subr.bf16.mxu0 %v1528_v6 }
 0x27f   : > { %1173 = vmatpush1.bf16.msra.mxu1 %v1525_v11  ;;  %1216 = vmatpush1.bf16.msra.mxu0 %v1527_v12 }
 0x280   : > { %1174 = vmatprep.subr.bf16.mxu1 %v1518_v13  ;;  %1217 = vmatprep.subr.bf16.mxu0 %v1520_v14 }
 0x283   : > { %1175 = vmatpush1.bf16.msra.mxu1 %v1517_v19  ;;  %1218 = vmatpush1.bf16.msra.mxu0 %v1519_v20  ;;  %v746_v19 = vsub.s32 6, %v1974_v46 }
 0x284   : > { %1176 = vmatprep.subr.bf16.mxu1 %v1510_v21  ;;  %1219 = vmatprep.subr.bf16.mxu0 %v1512_v22  ;;  %v742_v22 = vsub.s32 5, %v1974_v46 }
 0x287   : > { %1177 = vmatpush1.bf16.msra.mxu1 %v1509_v27  ;;  %1220 = vmatpush1.bf16.msra.mxu0 %v1511_v28 }
 0x288   : > { %1178 = vmatprep.subr.bf16.mxu1 %v1502_v29  ;;  %1221 = vmatprep.subr.bf16.mxu0 %v1504_v30 }
 0x28b   : > { %1179 = vmatpush1.bf16.msra.mxu1 %v1501_v35  ;;  %1222 = vmatpush1.bf16.msra.mxu0 %v1503_v36 }
 0x28c   : > { %1180 = vmatprep.subr.bf16.mxu1 %v1494_v37  ;;  %1223 = vmatprep.subr.bf16.mxu0 %v1496_v38 }
 0x28f   : > { %1181 = vmatpush1.bf16.msra.mxu1 %v1493_v39  ;;  %1224 = vmatpush1.bf16.msra.mxu0 %v1495_v40 }
 0x292   : > { %1199 = vmatmul.mubr.bf16.vlgmr.msra.gmra.mxu1 %v1896_v52  ;;  %1242 = vmatmul.mubr.bf16.vlgmr.msra.gmra.mxu0 %v1896_v52  ;;  %v718_v52 = vld [vmem:[%s2009_s8] sm:$0xff] }
 0x293   : > { %v727_v56 = vrot.slane %v718_v52, %v726_v49  ;;  %v735_v57 = vrot.slane %v718_v52, %v734_v50  ;;  %v723_v58 = vrot.slane %v718_v52, %v722_v51  ;;  %v731_v59 = vrot.slane %v718_v52, %v730_v53 }
 0x294   : > { %v739_v26 = vrot.slane %v718_v52, %v738_v18  ;;  %v747_v27 = vrot.slane %v718_v52, %v746_v19  ;;  %v743_v32 = vrot.slane %v718_v52, %v742_v22  ;;  %v751_v33 = vrot.slane %v718_v52, %v750_v23 }
 0x332   : > { %v1114_v41 = vpop.f32.mrf.mxu1  ;;  %v1157_v42 = vpop.f32.mrf.mxu0 }
 0x333   : > { %v1115_v2 = vadd.f32 %v1114_v41, %v723_v58  ;;  %v1158_v3 = vadd.f32 %v1157_v42, %v731_v59 }
 0x334   : > { %v1116_v44 = vpop.f32.mrf.mxu1  ;;  %v1159_v45 = vpop.f32.mrf.mxu0 }
 0x335   : > { %v1117_v62 = vadd.f32 %v1116_v44, %v727_v56  ;;  %v1160_v63 = vadd.f32 %v1159_v45, %v735_v57  ;;  %v1252_v10 = vmax.f32 %v1115_v2, 0.0  ;;  %v1254_v11 = vmax.f32 %v1158_v3, 0.0 }
 0x336   : > { %v1118_v47 = vpop.f32.mrf.mxu1  ;;  %v1161_v48 = vpop.f32.mrf.mxu0 }
 0x337   : > { %v1119_v0 = vadd.f32 %v1118_v47, %v723_v58  ;;  %v1162_v1 = vadd.f32 %v1161_v48, %v731_v59  ;;  %v1253_v6 = vmax.f32 %v1117_v62, 0.0  ;;  %v1255_v7 = vmax.f32 %v1160_v63, 0.0 }
 0x338   : > { %v1120_v54 = vpop.f32.mrf.mxu1  ;;  %v1163_v55 = vpop.f32.mrf.mxu0 }
 0x339   : > { %v1121_v60 = vadd.f32 %v1120_v54, %v727_v56  ;;  %v1164_v61 = vadd.f32 %v1163_v55, %v735_v57  ;;  %v1260_v8 = vmax.f32 %v1119_v0, 0.0  ;;  %v1262_v9 = vmax.f32 %v1162_v1, 0.0 }
 0x33b   : > { %v1261_v4 = vmax.f32 %v1121_v60, 0.0  ;;  %v1263_v5 = vmax.f32 %v1164_v61, 0.0  ;;  %v1269_v14 = vmax.f32 %v1252_v10, %v1260_v8  ;;  %v1283_v15 = vmax.f32 %v1254_v11, %v1262_v9 }
 0x33d   : > { %v1276_v12 = vmax.f32 %v1253_v6, %v1261_v4  ;;  %v1290_v13 = vmax.f32 %v1255_v7, %v1263_v5  ;;  %v1270_v20 = vrot.slane %v1269_v14, 4  ;;  %v1284_v21 = vrot.slane %v1283_v15, 4 }
 0x33e   : > { %v1662_v4 = vmov 1966171168  }
 0x33f   : > { %v1277_v16 = vrot.slane %v1276_v12, 4  ;;  %v1291_v17 = vrot.slane %v1290_v13, 4  ;;  %v1271_v28 = vmax.f32 %v1269_v14, %v1270_v20  ;;  %v1285_v29 = vmax.f32 %v1283_v15, %v1284_v21 }
 0x340   : > { %v1338_v5 = vunpack.c.l.s4 %v1662_v4 }
 0x341   : > { %v1278_v24 = vmax.f32 %v1276_v12, %v1277_v16  ;;  %v1292_v25 = vmax.f32 %v1290_v13, %v1291_v17  ;;  %v1272_v40 = vrot.slane %v1271_v28, 2  ;;  %v1286_v41 = vrot.slane %v1285_v29, 2 }
 0x342   : > { %v1339_v18 = vunpack.c.0.s8 %v1338_v5 }
 0x343   : > { %v1279_v34 = vrot.slane %v1278_v24, 2  ;;  %v1293_v35 = vrot.slane %v1292_v25, 2  ;;  %v1273_v59 = vmax.f32 %v1271_v28, %v1272_v40  ;;  %v1287_v60 = vmax.f32 %v1285_v29, %v1286_v41 }
 0x345   : > { %v1280_v49 = vmax.f32 %v1278_v24, %v1279_v34  ;;  %v1294_v50 = vmax.f32 %v1292_v25, %v1293_v35  ;;  %v1274_v11 = vrot.slane %v1273_v59, 1  ;;  %v1288_v12 = vrot.slane %v1287_v60, 1 }
 0x347   : > { %v1281_v3 = vrot.slane %v1280_v49, 1  ;;  %v1295_v6 = vrot.slane %v1294_v50, 1  ;;  %v1275_v24 = vmax.f32 %v1273_v59, %v1274_v11  ;;  %v1289_v25 = vmax.f32 %v1287_v60, %v1288_v12 }
 0x349   : > { %v1282_v17 = vmax.f32 %v1280_v49, %v1281_v3  ;;  %v1296_v19 = vmax.f32 %v1294_v50, %v1295_v6 }
 0x352   : > { %v1200_v30 = vpop.f32.mrf.mxu1  ;;  %v1243_v31 = vpop.f32.mrf.mxu0 }
 0x353   : > { %v1201_v36 = vadd.f32 %v1200_v30, %v739_v26  ;;  %v1244_v37 = vadd.f32 %v1243_v31, %v747_v27  ;;  %v1333_v30 = vcombine.low %v1275_v24, %v1282_v17  ;;  %v1342_v31 = vsub.s32 %v1339_v18, %v1974_v46 }
 0x354   : > { %v1202_v38 = vpop.f32.mrf.mxu1  ;;  %v1245_v39 = vpop.f32.mrf.mxu0 }
 0x355   : > { %v1203_v42 = vadd.f32 %v1202_v38, %v743_v32  ;;  %v1246_v43 = vadd.f32 %v1245_v39, %v751_v33  ;;  %v1256_v51 = vmax.f32 %v1201_v36, 0.0  ;;  %v1258_v53 = vmax.f32 %v1244_v37, 0.0 }
 0x356   : > { %v1204_v44 = vpop.f32.mrf.mxu1  ;;  %v1247_v45 = vpop.f32.mrf.mxu0  ;;  %v1343_v39 = vrot.slane %v1333_v30, %v1342_v31 }
 0x357   : > { %v1205_v47 = vadd.f32 %v1204_v44, %v739_v26  ;;  %v1248_v48 = vadd.f32 %v1247_v45, %v747_v27  ;;  %v1257_v61 = vmax.f32 %v1203_v42, 0.0  ;;  %v1259_v62 = vmax.f32 %v1246_v43, 0.0 }
 0x358   : > { %v1206_v54 = vpop.f32.mrf.mxu1  ;;  %v1249_v52 = vpop.f32.mrf.mxu0 }
 0x359   : > { %v1264_v55 = vmax.f32 %v1205_v47, 0.0  ;;  %v1266_v56 = vmax.f32 %v1248_v48, 0.0  ;;  %v1207_v57 = vadd.f32 %v1206_v54, %v743_v32  ;;  %v1250_v58 = vadd.f32 %v1249_v52, %v751_v33 }
 0x35a   : > { %v1334_v32 = vcombine.low %v1289_v25, %v1296_v19 }
 0x35b   : > { %v1297_v63 = vmax.f32 %v1256_v51, %v1264_v55  ;;  %v1311_v0 = vmax.f32 %v1258_v53, %v1266_v56  ;;  %v1265_v1 = vmax.f32 %v1207_v57, 0.0  ;;  %v1267_v2 = vmax.f32 %v1250_v58, 0.0 }
 0x35c   : > { %v1350_v40 = vrot.slane %v1334_v32, %v1342_v31 }
 0x35d   : > { %v1298_v7 = vrot.slane %v1297_v63, 4  ;;  %v1312_v8 = vrot.slane %v1311_v0, 4  ;;  %v1304_v9 = vmax.f32 %v1257_v61, %v1265_v1  ;;  %v1318_v10 = vmax.f32 %v1259_v62, %v1267_v2 }
 0x35e   : > { %v1365_v48 = vcombine.low %v1343_v39, %v1350_v40 }
 0x35f   : > { %v1299_v13 = vmax.f32 %v1297_v63, %v1298_v7  ;;  %v1313_v14 = vmax.f32 %v1311_v0, %v1312_v8  ;;  %v1305_v15 = vrot.slane %v1304_v9, 4  ;;  %v1319_v16 = vrot.slane %v1318_v10, 4 }
 0x360   : > { %v1373_v51 = vrot.slane %v1365_v48, %v1342_v31 }
 0x361   : > { %v1300_v20 = vrot.slane %v1299_v13, 2  ;;  %v1314_v21 = vrot.slane %v1313_v14, 2  ;;  %v1306_v22 = vmax.f32 %v1304_v9, %v1305_v15  ;;  %v1320_v23 = vmax.f32 %v1318_v10, %v1319_v16 }
 0x363   : > { %v1301_v26 = vmax.f32 %v1299_v13, %v1300_v20  ;;  %v1315_v27 = vmax.f32 %v1313_v14, %v1314_v21  ;;  %v1307_v28 = vrot.slane %v1306_v22, 2  ;;  %v1321_v29 = vrot.slane %v1320_v23, 2 }
 0x365   : > { %v1302_v33 = vrot.slane %v1301_v26, 1  ;;  %v1316_v34 = vrot.slane %v1315_v27, 1  ;;  %v1308_v35 = vmax.f32 %v1306_v22, %v1307_v28  ;;  %v1322_v36 = vmax.f32 %v1320_v23, %v1321_v29 }
 0x367   : > { %v1309_v37 = vrot.slane %v1308_v35, 1  ;;  %v1323_v38 = vrot.slane %v1322_v36, 1  ;;  %v1303_v41 = vmax.f32 %v1301_v26, %v1302_v33  ;;  %v1317_v42 = vmax.f32 %v1315_v27, %v1316_v34 }
 0x369   : > { %v1310_v43 = vmax.f32 %v1308_v35, %v1309_v37  ;;  %v1324_v44 = vmax.f32 %v1322_v36, %v1323_v38 }
 0x36b   : > { %v1335_v45 = vcombine.low %v1303_v41, %v1310_v43  ;;  %v1336_v47 = vcombine.low %v1317_v42, %v1324_v44 }
 0x36d   : > { %v1357_v49 = vrot.slane %v1335_v45, %v1342_v31  ;;  %v1364_v50 = vrot.slane %v1336_v47, %v1342_v31 }
 0x36f   : > { %v1366_v46 = vcombine.low %v1357_v49, %v1364_v50 }
 0x371   : > { %v1380_v53 = vrot.slane %v1366_v46, %v1342_v31 }
 0x373   : > { %v1381_v54 = vcombine.low %v1373_v51, %v1380_v53 }
 0x375   : > { %1384 = vst [vmem:[%s375_s23] sm:$0xff] %v1381_v54 }
 0x376 PF: > { %s19_s11 = sadd.s32 1, %s1657_s11   ;;  %s2011_s30 = smov %s1653_s10 }
 0x377   : > { %p16_p5 = scmp.ge.s32.totalorder %s19_s11, 4   ;;  %s2012_s10 = smov %s2014_s12 }
 0x379   :  { %18 = sbr.rel (!%p16_p5) target bundleno = 2 (0x2), region = 93 }

// kernel: transform_net_forward.6
= control target key start
LH: loop header
LB: loop body
LE: loop exit
PB: predicated region body
PF: predicated region fallthrough
CT: control target
= control target key end

     0   :  { %12 = vsyncpa [#allocation3], 0  ;;  %s1982_s0 = inlined_call_operand.vmem [shape: f32[2,1024], index: 0, kind: input, shape index: {}]   ;;  %s1983_s1 = inlined_call_operand.hbm [shape: f32[1024,512], index: 1, kind: input, shape index: {}]   ;;  %s1984_s2 = inlined_call_operand.hbm [shape: f32[1,512], index: 2, kind: input, shape index: {}]   ;;  %s1985_s3 = inlined_call_operand.hbm [shape: f32[512,256], index: 3, kind: input, shape index: {}]   ;;  %s1986_s4 = inlined_call_operand.hbm [shape: f32[1,256], index: 4, kind: input, shape index: {}]   ;;  %s1987_s5 = inlined_call_operand.hbm [shape: f32[256,128], index: 5, kind: input, shape index: {}]   ;;  %s1988_s6 = inlined_call_operand.hbm [shape: f32[1,128], index: 6, kind: input, shape index: {}]   ;;  %s1989_s7 = inlined_call_operand.vmem [shape: f32[2,128], index: 7, kind: output, shape index: {}]  }
   0x1   :  { %13 = vsyncpa [#allocation5], 0 }
   0x2   :  { %14 = vsyncpa [#allocation8], 0 }
   0x3   :  { %15 = vsyncpa [#allocation11], 0  ;;  %s1835_s24 = smov [#allocation4]   ;;  %s1836_s26 = smov [#allocation7]  }
   0x4   :  { %s36_s25 = sshll.u32 %s1835_s24, 4  ;;  %s58_s27 = sshll.u32 %s1836_s26, 4  ;;  %s37_s25 = int_to_ptr.vmem [resolvable:$true] %s36_s25  ;;  %s59_s27 = int_to_ptr.vmem [resolvable:$true] %s58_s27 }
   0x5   :  { %s1715_s28 = scalar_lea.vmem %s37_s25, 64  ;;  %p1720_p1 = scmp.lt.s32.totalorder %s37_s25, %s37_s25 }
   0x6   :  { %p1716_p0 = scmp.ne.s32.totalorder %s37_s25, %s1715_s28  ;;  %p1721_p2 = scmp.lt.s32.totalorder %s1715_s28, %s1715_s28 }
   0x8   :  { %p1722_p3 = por %p1721_p2, %p1720_p1 }
   0xa   :  { %p1723_p4 = pnand %p1722_p3, %p1716_p0 }
   0xc   :  { %1726 = shalt.err (!%p1723_p4)
}
   0xd   :  { %39 = dma.hbm_to_vmem [thread:$0]  %s1984_s2, 64, %s37_s25, [#allocation5]  }
   0xe   :  { %s1735_s8 = scalar_lea.vmem %s59_s27, 32  ;;  %p1740_p6 = scmp.lt.s32.totalorder %s59_s27, %s59_s27 }
   0xf   :  { %p1736_p5 = scmp.ne.s32.totalorder %s59_s27, %s1735_s8  ;;  %p1741_p7 = scmp.lt.s32.totalorder %s1735_s8, %s1735_s8 }
  0x11   :  { %p1742_p8 = por %p1741_p7, %p1740_p6 }
  0x13   :  { %p1743_p9 = pnand %p1742_p8, %p1736_p5 }
  0x15   :  { %1746 = shalt.err (!%p1743_p9)
}
  0x16   :  { %61 = dma.hbm_to_vmem [thread:$0]  %s1986_s4, 32, %s59_s27, [#allocation8]  }
  0x17   :  { %s1837_s11 = smov [#allocation2]  }
  0x18   :  { %s23_s12 = sshll.u32 %s1837_s11, 4  ;;  %s24_s12 = int_to_ptr.vmem [resolvable:$true] %s23_s12 }
  0x19   :  { %s1755_s13 = scalar_lea.vmem %s24_s12, 65536  ;;  %p1760_p11 = scmp.lt.s32.totalorder %s24_s12, %s24_s12 }
  0x1a   :  { %p1756_p10 = scmp.ne.s32.totalorder %s24_s12, %s1755_s13  ;;  %p1761_p12 = scmp.lt.s32.totalorder %s1755_s13, %s1755_s13 }
  0x1c   :  { %p1762_p13 = por %p1761_p12, %p1760_p11 }
  0x1e   :  { %p1763_p0 = pnand %p1762_p13, %p1756_p10 }
  0x20   :  { %1766 = shalt.err (!%p1763_p0)
}
  0x21   :  { %s1838_s2 = smov 512   ;;  %s1839_s14 = smov 32  }
  0x22   :  { %29 = dma.hbm_to_vmem [thread:$0]  %s1983_s1, 65536, %s24_s12, [#allocation3], %s1838_s2, %s1838_s2, %s1839_s14  }
  0x23   :  { %s1840_s17 = smov [#allocation6]  }
  0x24   :  { %s45_s18 = sshll.u32 %s1840_s17, 4  ;;  %s46_s18 = int_to_ptr.vmem [resolvable:$true] %s45_s18 }
  0x25   :  { %s1775_s4 = scalar_lea.vmem %s46_s18, 16384  ;;  %p1780_p2 = scmp.lt.s32.totalorder %s46_s18, %s46_s18 }
  0x26   :  { %p1776_p1 = scmp.ne.s32.totalorder %s46_s18, %s1775_s4  ;;  %p1781_p3 = scmp.lt.s32.totalorder %s1775_s4, %s1775_s4 }
  0x28   :  { %p1782_p4 = por %p1781_p3, %p1780_p2 }
  0x2a   :  { %p1783_p5 = pnand %p1782_p4, %p1776_p1 }
  0x2c   :  { %1786 = shalt.err (!%p1783_p5)
}
  0x2d   :  { %s1841_s19 = smov 256   ;;  %s1842_s20 = smov 16  }
  0x2e   :  { %51 = dma.hbm_to_vmem [thread:$0]  %s1985_s3, 16384, %s46_s18, [#allocation5], %s1841_s19, %s1841_s19, %s1842_s20  }
  0x2f   :  { %s1843_s23 = smov [#allocation9]  }
  0x30   :  { %s67_s24 = sshll.u32 %s1843_s23, 4  ;;  %s68_s24 = int_to_ptr.vmem [resolvable:$true] %s67_s24 }
  0x31   :  { %s1795_s1 = scalar_lea.vmem %s68_s24, 4096  ;;  %p1800_p7 = scmp.lt.s32.totalorder %s68_s24, %s68_s24 }
  0x32   :  { %p1796_p6 = scmp.ne.s32.totalorder %s68_s24, %s1795_s1  ;;  %p1801_p8 = scmp.lt.s32.totalorder %s1795_s1, %s1795_s1 }
  0x34   :  { %p1802_p9 = por %p1801_p8, %p1800_p7 }
  0x36   :  { %p1803_p10 = pnand %p1802_p9, %p1796_p6 }
  0x38   :  { %1806 = shalt.err (!%p1803_p10)
}
  0x39   :  { %s1844_s25 = smov 128   ;;  %s1845_s26 = smov 8  }
  0x3a   :  { %73 = dma.hbm_to_vmem [thread:$0]  %s1987_s5, 4096, %s68_s24, [#allocation8], %s1844_s25, %s1844_s25, %s1845_s26  }
  0x3b   :  { %s1846_s29 = smov [#allocation10]  }
  0x3c   :  { %s80_s30 = sshll.u32 %s1846_s29, 4  ;;  %s81_s30 = int_to_ptr.vmem [resolvable:$true] %s80_s30 }
  0x3d   :  { %s1815_s3 = scalar_lea.vmem %s81_s30, 16  ;;  %s1819_s8 = scalar_lea.vmem %s81_s30, 32 }
  0x3e   :  { %p1816_p11 = scmp.ne.s32.totalorder %s81_s30, %s1815_s3  ;;  %p1820_p12 = scmp.lt.s32.totalorder %s81_s30, %s81_s30 }
  0x3f   :  { %p1821_p13 = scmp.lt.s32.totalorder %s1819_s8, %s1815_s3 }
  0x41   :  { %p1822_p0 = por %p1821_p13, %p1820_p12 }
  0x43   :  { %p1823_p1 = pnand %p1822_p0, %p1816_p11 }
  0x45   :  { %1826 = shalt.err (!%p1823_p1)
}
  0x46   :  { %83 = dma.hbm_to_vmem [thread:$0]  %s1988_s6, 16, %s81_s30, [#allocation11]  }
  0x47   :  { %1827 = dma.done.wait [#allocation3], 65536  }
  0x48   :  { %1828 = vsyncadd [#allocation3], 4294901760 }
  0x49   :  { %1829 = dma.done.wait [#allocation5], 16448  }
  0x4a   :  { %1830 = vsyncadd [#allocation5], 4294950848 }
  0x4b   :  { %1831 = dma.done.wait [#allocation8], 4128  }
  0x4c   :  { %1832 = vsyncadd [#allocation8], 4294963168 }
  0x4d   :  { %1833 = dma.done.wait [#allocation11], 16  }
  0x4e   :  { %1834 = vsyncadd [#allocation11], 4294967280  ;;  %v165_v0 = vld [vmem:[#allocation2 + $0x1e8] sm:$0xff]  ;;  %v164_v2 = vld [vmem:[#allocation2 + $0x1e0] sm:$0xff] }
  0x4f   :  { %v293_v1 = vld [vmem:[#allocation2 + $0x5e8] sm:$0xff]  ;;  %682 = vmatprep.subr.mxu0 %v165_v0  ;;  %v292_v3 = vld [vmem:[#allocation2 + $0x5e0] sm:$0xff] }
  0x50   :  { %753 = vmatprep.subr.mxu1 %v293_v1  ;;  %v161_v4 = vld [vmem:[#allocation2 + $0x1c8] sm:$0xff]  ;;  %683 = vmatpush1.msra.mxu0 %v164_v2  ;;  %v160_v6 = vld [vmem:[#allocation2 + $0x1c0] sm:$0xff] }
  0x51   :  { %v289_v5 = vld [vmem:[#allocation2 + $0x5c8] sm:$0xff]  ;;  %754 = vmatpush1.msra.mxu1 %v292_v3  ;;  %v288_v7 = vld [vmem:[#allocation2 + $0x5c0] sm:$0xff]  ;;  %684 = vmatprep.subr.mxu0 %v161_v4 }
  0x52   :  { %v157_v8 = vld [vmem:[#allocation2 + $0x1a8] sm:$0xff]  ;;  %755 = vmatprep.subr.mxu1 %v289_v5  ;;  %v156_v10 = vld [vmem:[#allocation2 + $0x1a0] sm:$0xff]  ;;  %685 = vmatpush1.msra.mxu0 %v160_v6 }
  0x53   :  { %v285_v9 = vld [vmem:[#allocation2 + $0x5a8] sm:$0xff]  ;;  %v284_v11 = vld [vmem:[#allocation2 + $0x5a0] sm:$0xff]  ;;  %756 = vmatpush1.msra.mxu1 %v288_v7  ;;  %686 = vmatprep.subr.mxu0 %v157_v8 }
  0x54   :  { %v153_v12 = vld [vmem:[#allocation2 + $0x188] sm:$0xff]  ;;  %757 = vmatprep.subr.mxu1 %v285_v9  ;;  %v152_v14 = vld [vmem:[#allocation2 + $0x180] sm:$0xff]  ;;  %687 = vmatpush1.msra.mxu0 %v156_v10 }
  0x55   :  { %v281_v13 = vld [vmem:[#allocation2 + $0x588] sm:$0xff]  ;;  %v280_v15 = vld [vmem:[#allocation2 + $0x580] sm:$0xff]  ;;  %758 = vmatpush1.msra.mxu1 %v284_v11  ;;  %688 = vmatprep.subr.mxu0 %v153_v12 }
  0x56   :  { %v149_v16 = vld [vmem:[#allocation2 + $0x168] sm:$0xff]  ;;  %759 = vmatprep.subr.mxu1 %v281_v13  ;;  %v148_v18 = vld [vmem:[#allocation2 + $0x160] sm:$0xff]  ;;  %689 = vmatpush1.msra.mxu0 %v152_v14 }
  0x57   :  { %v277_v17 = vld [vmem:[#allocation2 + $0x568] sm:$0xff]  ;;  %v276_v19 = vld [vmem:[#allocation2 + $0x560] sm:$0xff]  ;;  %760 = vmatpush1.msra.mxu1 %v280_v15  ;;  %690 = vmatprep.subr.mxu0 %v149_v16 }
  0x58   :  { %v145_v20 = vld [vmem:[#allocation2 + $0x148] sm:$0xff]  ;;  %761 = vmatprep.subr.mxu1 %v277_v17  ;;  %v144_v22 = vld [vmem:[#allocation2 + $0x140] sm:$0xff]  ;;  %691 = vmatpush1.msra.mxu0 %v148_v18 }
  0x59   :  { %v273_v21 = vld [vmem:[#allocation2 + $0x548] sm:$0xff]  ;;  %v272_v23 = vld [vmem:[#allocation2 + $0x540] sm:$0xff]  ;;  %762 = vmatpush1.msra.mxu1 %v276_v19  ;;  %692 = vmatprep.subr.mxu0 %v145_v20 }
  0x5a   :  { %v141_v24 = vld [vmem:[#allocation2 + $0x128] sm:$0xff]  ;;  %763 = vmatprep.subr.mxu1 %v273_v21  ;;  %v140_v26 = vld [vmem:[#allocation2 + $0x120] sm:$0xff]  ;;  %693 = vmatpush1.msra.mxu0 %v144_v22 }
  0x5b   :  { %v269_v25 = vld [vmem:[#allocation2 + $0x528] sm:$0xff]  ;;  %v268_v27 = vld [vmem:[#allocation2 + $0x520] sm:$0xff]  ;;  %764 = vmatpush1.msra.mxu1 %v272_v23  ;;  %694 = vmatprep.subr.mxu0 %v141_v24 }
  0x5c   :  { %v137_v28 = vld [vmem:[#allocation2 + $0x108] sm:$0xff]  ;;  %765 = vmatprep.subr.mxu1 %v269_v25  ;;  %v136_v30 = vld [vmem:[#allocation2 + $0x100] sm:$0xff]  ;;  %695 = vmatpush1.msra.mxu0 %v140_v26 }
  0x5d   :  { %v265_v29 = vld [vmem:[#allocation2 + $0x508] sm:$0xff]  ;;  %v264_v31 = vld [vmem:[#allocation2 + $0x500] sm:$0xff]  ;;  %766 = vmatpush1.msra.mxu1 %v268_v27  ;;  %696 = vmatprep.subr.mxu0 %v137_v28 }
  0x5e   :  { %v133_v32 = vld [vmem:[#allocation2 + $0xe8] sm:$0xff]  ;;  %767 = vmatprep.subr.mxu1 %v265_v29  ;;  %v132_v34 = vld [vmem:[#allocation2 + $0xe0] sm:$0xff]  ;;  %697 = vmatpush1.msra.mxu0 %v136_v30  ;;  %v618_v30 = vlaneseq }
  0x5f   :  { %v261_v33 = vld [vmem:[#allocation2 + $0x4e8] sm:$0xff]  ;;  %v260_v35 = vld [vmem:[#allocation2 + $0x4e0] sm:$0xff]  ;;  %768 = vmatpush1.msra.mxu1 %v264_v31  ;;  %698 = vmatprep.subr.mxu0 %v133_v32  ;;  %v1847_v31 = vmov 1983009808  }
  0x60   :  { %v129_v36 = vld [vmem:[#allocation2 + $0xc8] sm:$0xff]  ;;  %769 = vmatprep.subr.mxu1 %v261_v33  ;;  %v128_v38 = vld [vmem:[#allocation2 + $0xc0] sm:$0xff]  ;;  %699 = vmatpush1.msra.mxu0 %v132_v34  ;;  %v642_v32 = vunpack.c.l.s4 %v1847_v31 }
  0x61   :  { %v257_v37 = vld [vmem:[#allocation2 + $0x4c8] sm:$0xff]  ;;  %v256_v39 = vld [vmem:[#allocation2 + $0x4c0] sm:$0xff]  ;;  %770 = vmatpush1.msra.mxu1 %v260_v35  ;;  %700 = vmatprep.subr.mxu0 %v129_v36 }
  0x62   :  { %v125_v40 = vld [vmem:[#allocation2 + $0xa8] sm:$0xff]  ;;  %771 = vmatprep.subr.mxu1 %v257_v37  ;;  %v124_v42 = vld [vmem:[#allocation2 + $0xa0] sm:$0xff]  ;;  %701 = vmatpush1.msra.mxu0 %v128_v38 }
  0x63   :  { %v253_v41 = vld [vmem:[#allocation2 + $0x4a8] sm:$0xff]  ;;  %v252_v43 = vld [vmem:[#allocation2 + $0x4a0] sm:$0xff]  ;;  %772 = vmatpush1.msra.mxu1 %v256_v39  ;;  %702 = vmatprep.subr.mxu0 %v125_v40 }
  0x64   :  { %v121_v44 = vld [vmem:[#allocation2 + $0x88] sm:$0xff]  ;;  %773 = vmatprep.subr.mxu1 %v253_v41  ;;  %v120_v46 = vld [vmem:[#allocation2 + $0x80] sm:$0xff]  ;;  %703 = vmatpush1.msra.mxu0 %v124_v42  ;;  %v1906_v41 = vshrl.u32 %v618_v30, 7  ;;  %v643_v42 = vunpack.c.0.s8 %v642_v32 }
  0x65   :  { %v249_v45 = vld [vmem:[#allocation2 + $0x488] sm:$0xff]  ;;  %v248_v47 = vld [vmem:[#allocation2 + $0x480] sm:$0xff]  ;;  %774 = vmatpush1.msra.mxu1 %v252_v43  ;;  %704 = vmatprep.subr.mxu0 %v121_v44 }
  0x66   :  { %v117_v48 = vld [vmem:[#allocation2 + $0x68] sm:$0xff]  ;;  %775 = vmatprep.subr.mxu1 %v249_v45  ;;  %v116_v50 = vld [vmem:[#allocation2 + $0x60] sm:$0xff]  ;;  %705 = vmatpush1.msra.mxu0 %v120_v46 }
  0x67   :  { %v245_v49 = vld [vmem:[#allocation2 + $0x468] sm:$0xff]  ;;  %v244_v51 = vld [vmem:[#allocation2 + $0x460] sm:$0xff]  ;;  %776 = vmatpush1.msra.mxu1 %v248_v47  ;;  %706 = vmatprep.subr.mxu0 %v117_v48 }
  0x68   :  { %v113_v52 = vld [vmem:[#allocation2 + $0x48] sm:$0xff]  ;;  %777 = vmatprep.subr.mxu1 %v245_v49  ;;  %v112_v54 = vld [vmem:[#allocation2 + $0x40] sm:$0xff]  ;;  %707 = vmatpush1.msra.mxu0 %v116_v50 }
  0x69   :  { %v241_v53 = vld [vmem:[#allocation2 + $0x448] sm:$0xff]  ;;  %v240_v55 = vld [vmem:[#allocation2 + $0x440] sm:$0xff]  ;;  %778 = vmatpush1.msra.mxu1 %v244_v51  ;;  %708 = vmatprep.subr.mxu0 %v113_v52  ;;  %v1912_v52 = vsub.s32 %v643_v42, %v1906_v41 }
  0x6a   :  { %v109_v56 = vld [vmem:[#allocation2 + $0x28] sm:$0xff]  ;;  %779 = vmatprep.subr.mxu1 %v241_v53  ;;  %v108_v58 = vld [vmem:[#allocation2 + $0x20] sm:$0xff]  ;;  %709 = vmatpush1.msra.mxu0 %v112_v54 }
  0x6b   :  { %v237_v57 = vld [vmem:[#allocation2 + $0x428] sm:$0xff]  ;;  %v236_v59 = vld [vmem:[#allocation2 + $0x420] sm:$0xff]  ;;  %780 = vmatpush1.msra.mxu1 %v240_v55  ;;  %710 = vmatprep.subr.mxu0 %v109_v56 }
  0x6c   :  { %v105_v60 = vld [vmem:[#allocation2 + $0x8] sm:$0xff]  ;;  %781 = vmatprep.subr.mxu1 %v237_v57  ;;  %v104_v62 = vld [vmem:[#allocation2] sm:$0xff]  ;;  %711 = vmatpush1.msra.mxu0 %v108_v58 }
  0x6d   :  { %v233_v61 = vld [vmem:[#allocation2 + $0x408] sm:$0xff]  ;;  %v232_v63 = vld [vmem:[#allocation2 + $0x400] sm:$0xff]  ;;  %782 = vmatpush1.msra.mxu1 %v236_v59  ;;  %712 = vmatprep.subr.mxu0 %v105_v60 }
  0x6e   :  { %v229_v0 = vld [vmem:[#allocation2 + $0x3e8] sm:$0xff]  ;;  %783 = vmatprep.subr.mxu1 %v233_v61  ;;  %v228_v2 = vld [vmem:[#allocation2 + $0x3e0] sm:$0xff]  ;;  %713 = vmatpush1.msra.mxu0 %v104_v62 }
  0x6f   :  { %v357_v1 = vld [vmem:[#allocation2 + $0x7e8] sm:$0xff]  ;;  %v356_v3 = vld [vmem:[#allocation2 + $0x7e0] sm:$0xff]  ;;  %784 = vmatpush1.msra.mxu1 %v232_v63  ;;  %714 = vmatprep.subr.mxu0 %v229_v0 }
  0x70   :  { %v225_v4 = vld [vmem:[#allocation2 + $0x3c8] sm:$0xff]  ;;  %785 = vmatprep.subr.mxu1 %v357_v1  ;;  %v224_v6 = vld [vmem:[#allocation2 + $0x3c0] sm:$0xff]  ;;  %715 = vmatpush2.msra.mxu0 %v228_v2 }
  0x71   :  { %v353_v5 = vld [vmem:[#allocation2 + $0x7c8] sm:$0xff]  ;;  %v352_v7 = vld [vmem:[#allocation2 + $0x7c0] sm:$0xff]  ;;  %786 = vmatpush2.msra.mxu1 %v356_v3  ;;  %716 = vmatprep.subr.mxu0 %v225_v4 }
  0x72   :  { %v221_v8 = vld [vmem:[#allocation2 + $0x3a8] sm:$0xff]  ;;  %787 = vmatprep.subr.mxu1 %v353_v5  ;;  %v220_v10 = vld [vmem:[#allocation2 + $0x3a0] sm:$0xff]  ;;  %717 = vmatpush2.msra.mxu0 %v224_v6 }
  0x73   :  { %v349_v9 = vld [vmem:[#allocation2 + $0x7a8] sm:$0xff]  ;;  %v348_v11 = vld [vmem:[#allocation2 + $0x7a0] sm:$0xff]  ;;  %788 = vmatpush2.msra.mxu1 %v352_v7  ;;  %718 = vmatprep.subr.mxu0 %v221_v8 }
  0x74   :  { %v217_v12 = vld [vmem:[#allocation2 + $0x388] sm:$0xff]  ;;  %789 = vmatprep.subr.mxu1 %v349_v9  ;;  %v216_v14 = vld [vmem:[#allocation2 + $0x380] sm:$0xff]  ;;  %719 = vmatpush2.msra.mxu0 %v220_v10 }
  0x75   :  { %v345_v13 = vld [vmem:[#allocation2 + $0x788] sm:$0xff]  ;;  %v344_v15 = vld [vmem:[#allocation2 + $0x780] sm:$0xff]  ;;  %790 = vmatpush2.msra.mxu1 %v348_v11  ;;  %720 = vmatprep.subr.mxu0 %v217_v12 }
  0x76   :  { %v213_v16 = vld [vmem:[#allocation2 + $0x368] sm:$0xff]  ;;  %791 = vmatprep.subr.mxu1 %v345_v13  ;;  %v212_v18 = vld [vmem:[#allocation2 + $0x360] sm:$0xff]  ;;  %721 = vmatpush2.msra.mxu0 %v216_v14 }
  0x77   :  { %v341_v17 = vld [vmem:[#allocation2 + $0x768] sm:$0xff]  ;;  %v340_v19 = vld [vmem:[#allocation2 + $0x760] sm:$0xff]  ;;  %792 = vmatpush2.msra.mxu1 %v344_v15  ;;  %722 = vmatprep.subr.mxu0 %v213_v16 }
  0x78   :  { %v209_v20 = vld [vmem:[#allocation2 + $0x348] sm:$0xff]  ;;  %793 = vmatprep.subr.mxu1 %v341_v17  ;;  %v208_v22 = vld [vmem:[#allocation2 + $0x340] sm:$0xff]  ;;  %723 = vmatpush2.msra.mxu0 %v212_v18 }
  0x79   :  { %v337_v21 = vld [vmem:[#allocation2 + $0x748] sm:$0xff]  ;;  %v336_v23 = vld [vmem:[#allocation2 + $0x740] sm:$0xff]  ;;  %794 = vmatpush2.msra.mxu1 %v340_v19  ;;  %724 = vmatprep.subr.mxu0 %v209_v20 }
  0x7a   :  { %v205_v24 = vld [vmem:[#allocation2 + $0x328] sm:$0xff]  ;;  %795 = vmatprep.subr.mxu1 %v337_v21  ;;  %v204_v26 = vld [vmem:[#allocation2 + $0x320] sm:$0xff]  ;;  %725 = vmatpush2.msra.mxu0 %v208_v22 }
  0x7b   :  { %v333_v25 = vld [vmem:[#allocation2 + $0x728] sm:$0xff]  ;;  %v332_v27 = vld [vmem:[#allocation2 + $0x720] sm:$0xff]  ;;  %796 = vmatpush2.msra.mxu1 %v336_v23  ;;  %726 = vmatprep.subr.mxu0 %v205_v24 }
  0x7c   :  { %v201_v28 = vld [vmem:[#allocation2 + $0x308] sm:$0xff]  ;;  %797 = vmatprep.subr.mxu1 %v333_v25  ;;  %v200_v33 = vld [vmem:[#allocation2 + $0x300] sm:$0xff]  ;;  %727 = vmatpush2.msra.mxu0 %v204_v26 }
  0x7d   :  { %v329_v29 = vld [vmem:[#allocation2 + $0x708] sm:$0xff]  ;;  %v328_v34 = vld [vmem:[#allocation2 + $0x700] sm:$0xff]  ;;  %798 = vmatpush2.msra.mxu1 %v332_v27  ;;  %728 = vmatprep.subr.mxu0 %v201_v28 }
  0x7e   :  { %v197_v35 = vld [vmem:[#allocation2 + $0x2e8] sm:$0xff]  ;;  %799 = vmatprep.subr.mxu1 %v329_v29  ;;  %v196_v37 = vld [vmem:[#allocation2 + $0x2e0] sm:$0xff]  ;;  %729 = vmatpush2.msra.mxu0 %v200_v33 }
  0x7f   :  { %v325_v36 = vld [vmem:[#allocation2 + $0x6e8] sm:$0xff]  ;;  %v324_v38 = vld [vmem:[#allocation2 + $0x6e0] sm:$0xff]  ;;  %800 = vmatpush2.msra.mxu1 %v328_v34  ;;  %730 = vmatprep.subr.mxu0 %v197_v35 }
  0x80   :  { %v193_v39 = vld [vmem:[#allocation2 + $0x2c8] sm:$0xff]  ;;  %801 = vmatprep.subr.mxu1 %v325_v36  ;;  %v192_v43 = vld [vmem:[#allocation2 + $0x2c0] sm:$0xff]  ;;  %731 = vmatpush2.msra.mxu0 %v196_v37 }
  0x81   :  { %v321_v40 = vld [vmem:[#allocation2 + $0x6c8] sm:$0xff]  ;;  %v320_v44 = vld [vmem:[#allocation2 + $0x6c0] sm:$0xff]  ;;  %802 = vmatpush2.msra.mxu1 %v324_v38  ;;  %732 = vmatprep.subr.mxu0 %v193_v39 }
  0x82   :  { %v189_v45 = vld [vmem:[#allocation2 + $0x2a8] sm:$0xff]  ;;  %803 = vmatprep.subr.mxu1 %v321_v40  ;;  %v188_v47 = vld [vmem:[#allocation2 + $0x2a0] sm:$0xff]  ;;  %733 = vmatpush2.msra.mxu0 %v192_v43 }
  0x83   :  { %v317_v46 = vld [vmem:[#allocation2 + $0x6a8] sm:$0xff]  ;;  %v316_v48 = vld [vmem:[#allocation2 + $0x6a0] sm:$0xff]  ;;  %804 = vmatpush2.msra.mxu1 %v320_v44  ;;  %734 = vmatprep.subr.mxu0 %v189_v45 }
  0x84   :  { %v102_v49 = vld [vmem:[%s1982_s0] sm:$0xff]  ;;  %v185_v50 = vld [vmem:[#allocation2 + $0x288] sm:$0xff]  ;;  %805 = vmatprep.subr.mxu1 %v317_v46  ;;  %735 = vmatpush2.msra.mxu0 %v188_v47 }
  0x85   :  { %v313_v51 = vld [vmem:[#allocation2 + $0x688] sm:$0xff]  ;;  %v184_v53 = vld [vmem:[#allocation2 + $0x280] sm:$0xff]  ;;  %806 = vmatpush2.msra.mxu1 %v316_v48  ;;  %v640_v57 = vcombine.high %v102_v49, %v102_v49  ;;  %736 = vmatprep.subr.mxu0 %v185_v50  ;;  %v1915_v62 = vrot.slane %v102_v49, %v1912_v52 }
  0x86   :  { %v312_v54 = vld [vmem:[#allocation2 + $0x680] sm:$0xff]  ;;  %v181_v55 = vld [vmem:[#allocation2 + $0x268] sm:$0xff]  ;;  %807 = vmatprep.subr.mxu1 %v313_v51  ;;  %737 = vmatpush2.msra.mxu0 %v184_v53 }
  0x87   :  { %v309_v56 = vld [vmem:[#allocation2 + $0x668] sm:$0xff]  ;;  %v180_v58 = vld [vmem:[#allocation2 + $0x260] sm:$0xff]  ;;  %808 = vmatpush2.msra.mxu1 %v312_v54  ;;  %738 = vmatprep.subr.mxu0 %v181_v55  ;;  %v1918_v3 = vrot.slane %v640_v57, %v1912_v52  ;;  %v1922_v8 = vcombine.high %v1915_v62, %v1915_v62 }
  0x88   :  { %v308_v59 = vld [vmem:[#allocation2 + $0x660] sm:$0xff]  ;;  %v177_v60 = vld [vmem:[#allocation2 + $0x248] sm:$0xff]  ;;  %809 = vmatprep.subr.mxu1 %v309_v56  ;;  %739 = vmatpush2.msra.mxu0 %v180_v58 }
  0x89   :  { %v305_v61 = vld [vmem:[#allocation2 + $0x648] sm:$0xff]  ;;  %v176_v63 = vld [vmem:[#allocation2 + $0x240] sm:$0xff]  ;;  %810 = vmatpush2.msra.mxu1 %v308_v59  ;;  %740 = vmatprep.subr.mxu0 %v177_v60  ;;  %v1926_v11 = vcombine.high %v1918_v3, %v1918_v3 }
  0x8a   :  { %v304_v0 = vld [vmem:[#allocation2 + $0x640] sm:$0xff]  ;;  %v173_v1 = vld [vmem:[#allocation2 + $0x228] sm:$0xff]  ;;  %811 = vmatprep.subr.mxu1 %v305_v61  ;;  %741 = vmatpush2.msra.mxu0 %v176_v63 }
  0x8b   :  { %v301_v2 = vld [vmem:[#allocation2 + $0x628] sm:$0xff]  ;;  %v172_v4 = vld [vmem:[#allocation2 + $0x220] sm:$0xff]  ;;  %812 = vmatpush2.msra.mxu1 %v304_v0  ;;  %742 = vmatprep.subr.mxu0 %v173_v1 }
  0x8c   :  { %v300_v5 = vld [vmem:[#allocation2 + $0x620] sm:$0xff]  ;;  %v169_v6 = vld [vmem:[#allocation2 + $0x208] sm:$0xff]  ;;  %813 = vmatprep.subr.mxu1 %v301_v2  ;;  %743 = vmatpush2.msra.mxu0 %v172_v4 }
  0x8d   :  { %v297_v7 = vld [vmem:[#allocation2 + $0x608] sm:$0xff]  ;;  %v168_v9 = vld [vmem:[#allocation2 + $0x200] sm:$0xff]  ;;  %814 = vmatpush2.msra.mxu1 %v300_v5  ;;  %744 = vmatprep.subr.mxu0 %v169_v6 }
  0x8e   :  { %v296_v10 = vld [vmem:[#allocation2 + $0x600] sm:$0xff]  ;;  %815 = vmatprep.subr.mxu1 %v297_v7  ;;  %v421_v12 = vld [vmem:[#allocation2 + $0x9e8] sm:$0xff]  ;;  %745 = vmatpush2.msra.mxu0 %v168_v9 }
  0x8f   :  { %746 = vmatprep.mubr.f32.mxu0 %v1922_v8  ;;  %v549_v13 = vld [vmem:[#allocation2 + $0xde8] sm:$0xff]  ;;  %816 = vmatpush2.msra.mxu1 %v296_v10  ;;  %v420_v14 = vld [vmem:[#allocation2 + $0x9e0] sm:$0xff] }
  0x90   :  { %747 = vmatmul.mubr.f32.vlgmr.msra.gmra.mxu0 %v1915_v62  ;;  %v548_v15 = vld [vmem:[#allocation2 + $0xde0] sm:$0xff]  ;;  %817 = vmatprep.mubr.f32.mxu1 %v1926_v11  ;;  %v417_v16 = vld [vmem:[#allocation2 + $0x9c8] sm:$0xff] }
  0x91   :  { %824 = vmatprep.subr.mxu0 %v421_v12  ;;  %v545_v17 = vld [vmem:[#allocation2 + $0xdc8] sm:$0xff]  ;;  %895 = vmatprep.subr.mxu1 %v549_v13  ;;  %v416_v18 = vld [vmem:[#allocation2 + $0x9c0] sm:$0xff] }
  0x92   :  { %818 = vmatmul.mubr.f32.vlgmr.msra.gmra.mxu1 %v1918_v3  ;;  %v544_v19 = vld [vmem:[#allocation2 + $0xdc0] sm:$0xff]  ;;  %825 = vmatpush1.msra.mxu0 %v420_v14  ;;  %v413_v20 = vld [vmem:[#allocation2 + $0x9a8] sm:$0xff] }
  0x93   :  { %896 = vmatpush1.msra.mxu1 %v548_v15  ;;  %v541_v21 = vld [vmem:[#allocation2 + $0xda8] sm:$0xff]  ;;  %826 = vmatprep.subr.mxu0 %v417_v16  ;;  %v412_v22 = vld [vmem:[#allocation2 + $0x9a0] sm:$0xff] }
  0x94   :  { %897 = vmatprep.subr.mxu1 %v545_v17  ;;  %v540_v23 = vld [vmem:[#allocation2 + $0xda0] sm:$0xff]  ;;  %827 = vmatpush1.msra.mxu0 %v416_v18  ;;  %v409_v24 = vld [vmem:[#allocation2 + $0x988] sm:$0xff] }
  0x95   :  { %898 = vmatpush1.msra.mxu1 %v544_v19  ;;  %v537_v25 = vld [vmem:[#allocation2 + $0xd88] sm:$0xff]  ;;  %828 = vmatprep.subr.mxu0 %v413_v20  ;;  %v408_v26 = vld [vmem:[#allocation2 + $0x980] sm:$0xff] }
  0x96   :  { %899 = vmatprep.subr.mxu1 %v541_v21  ;;  %v536_v27 = vld [vmem:[#allocation2 + $0xd80] sm:$0xff]  ;;  %829 = vmatpush1.msra.mxu0 %v412_v22  ;;  %v405_v28 = vld [vmem:[#allocation2 + $0x968] sm:$0xff] }
  0x97   :  { %900 = vmatpush1.msra.mxu1 %v540_v23  ;;  %v533_v29 = vld [vmem:[#allocation2 + $0xd68] sm:$0xff]  ;;  %830 = vmatprep.subr.mxu0 %v409_v24  ;;  %v404_v30 = vld [vmem:[#allocation2 + $0x960] sm:$0xff] }
  0x98   :  { %901 = vmatprep.subr.mxu1 %v537_v25  ;;  %v532_v31 = vld [vmem:[#allocation2 + $0xd60] sm:$0xff]  ;;  %831 = vmatpush1.msra.mxu0 %v408_v26  ;;  %v401_v32 = vld [vmem:[#allocation2 + $0x948] sm:$0xff] }
  0x99   :  { %902 = vmatpush1.msra.mxu1 %v536_v27  ;;  %v529_v33 = vld [vmem:[#allocation2 + $0xd48] sm:$0xff]  ;;  %832 = vmatprep.subr.mxu0 %v405_v28  ;;  %v400_v34 = vld [vmem:[#allocation2 + $0x940] sm:$0xff] }
  0x9a   :  { %903 = vmatprep.subr.mxu1 %v533_v29  ;;  %v528_v35 = vld [vmem:[#allocation2 + $0xd40] sm:$0xff]  ;;  %833 = vmatpush1.msra.mxu0 %v404_v30  ;;  %v397_v36 = vld [vmem:[#allocation2 + $0x928] sm:$0xff] }
  0x9b   :  { %904 = vmatpush1.msra.mxu1 %v532_v31  ;;  %v525_v37 = vld [vmem:[#allocation2 + $0xd28] sm:$0xff]  ;;  %834 = vmatprep.subr.mxu0 %v401_v32  ;;  %v396_v38 = vld [vmem:[#allocation2 + $0x920] sm:$0xff] }
  0x9c   :  { %905 = vmatprep.subr.mxu1 %v529_v33  ;;  %v524_v39 = vld [vmem:[#allocation2 + $0xd20] sm:$0xff]  ;;  %835 = vmatpush1.msra.mxu0 %v400_v34  ;;  %v393_v40 = vld [vmem:[#allocation2 + $0x908] sm:$0xff] }
  0x9d   :  { %906 = vmatpush1.msra.mxu1 %v528_v35  ;;  %v521_v42 = vld [vmem:[#allocation2 + $0xd08] sm:$0xff]  ;;  %836 = vmatprep.subr.mxu0 %v397_v36  ;;  %v392_v43 = vld [vmem:[#allocation2 + $0x900] sm:$0xff] }
  0x9e   :  { %907 = vmatprep.subr.mxu1 %v525_v37  ;;  %v520_v44 = vld [vmem:[#allocation2 + $0xd00] sm:$0xff]  ;;  %837 = vmatpush1.msra.mxu0 %v396_v38  ;;  %v389_v45 = vld [vmem:[#allocation2 + $0x8e8] sm:$0xff] }
  0x9f   :  { %908 = vmatpush1.msra.mxu1 %v524_v39  ;;  %v517_v46 = vld [vmem:[#allocation2 + $0xce8] sm:$0xff]  ;;  %838 = vmatprep.subr.mxu0 %v393_v40  ;;  %v388_v47 = vld [vmem:[#allocation2 + $0x8e0] sm:$0xff] }
  0xa0   :  { %909 = vmatprep.subr.mxu1 %v521_v42  ;;  %v516_v48 = vld [vmem:[#allocation2 + $0xce0] sm:$0xff]  ;;  %839 = vmatpush1.msra.mxu0 %v392_v43  ;;  %v385_v49 = vld [vmem:[#allocation2 + $0x8c8] sm:$0xff] }
  0xa1   :  { %910 = vmatpush1.msra.mxu1 %v520_v44  ;;  %v513_v50 = vld [vmem:[#allocation2 + $0xcc8] sm:$0xff]  ;;  %840 = vmatprep.subr.mxu0 %v389_v45  ;;  %v384_v51 = vld [vmem:[#allocation2 + $0x8c0] sm:$0xff] }
  0xa2   :  { %911 = vmatprep.subr.mxu1 %v517_v46  ;;  %v512_v53 = vld [vmem:[#allocation2 + $0xcc0] sm:$0xff]  ;;  %841 = vmatpush1.msra.mxu0 %v388_v47  ;;  %v381_v54 = vld [vmem:[#allocation2 + $0x8a8] sm:$0xff] }
  0xa3   :  { %912 = vmatpush1.msra.mxu1 %v516_v48  ;;  %v509_v55 = vld [vmem:[#allocation2 + $0xca8] sm:$0xff]  ;;  %842 = vmatprep.subr.mxu0 %v385_v49  ;;  %v380_v56 = vld [vmem:[#allocation2 + $0x8a0] sm:$0xff] }
  0xa4   :  { %913 = vmatprep.subr.mxu1 %v513_v50  ;;  %v508_v57 = vld [vmem:[#allocation2 + $0xca0] sm:$0xff]  ;;  %843 = vmatpush1.msra.mxu0 %v384_v51  ;;  %v377_v58 = vld [vmem:[#allocation2 + $0x888] sm:$0xff] }
  0xa5   :  { %914 = vmatpush1.msra.mxu1 %v512_v53  ;;  %v505_v59 = vld [vmem:[#allocation2 + $0xc88] sm:$0xff]  ;;  %844 = vmatprep.subr.mxu0 %v381_v54  ;;  %v376_v60 = vld [vmem:[#allocation2 + $0x880] sm:$0xff] }
  0xa6   :  { %915 = vmatprep.subr.mxu1 %v509_v55  ;;  %v504_v61 = vld [vmem:[#allocation2 + $0xc80] sm:$0xff]  ;;  %845 = vmatpush1.msra.mxu0 %v380_v56  ;;  %v373_v63 = vld [vmem:[#allocation2 + $0x868] sm:$0xff] }
  0xa7   :  { %916 = vmatpush1.msra.mxu1 %v508_v57  ;;  %v501_v0 = vld [vmem:[#allocation2 + $0xc68] sm:$0xff]  ;;  %846 = vmatprep.subr.mxu0 %v377_v58  ;;  %v372_v1 = vld [vmem:[#allocation2 + $0x860] sm:$0xff] }
  0xa8   :  { %917 = vmatprep.subr.mxu1 %v505_v59  ;;  %v500_v2 = vld [vmem:[#allocation2 + $0xc60] sm:$0xff]  ;;  %847 = vmatpush1.msra.mxu0 %v376_v60  ;;  %v369_v4 = vld [vmem:[#allocation2 + $0x848] sm:$0xff] }
  0xa9   :  { %918 = vmatpush1.msra.mxu1 %v504_v61  ;;  %v497_v5 = vld [vmem:[#allocation2 + $0xc48] sm:$0xff]  ;;  %848 = vmatprep.subr.mxu0 %v373_v63  ;;  %v368_v6 = vld [vmem:[#allocation2 + $0x840] sm:$0xff] }
  0xaa   :  { %919 = vmatprep.subr.mxu1 %v501_v0  ;;  %v496_v7 = vld [vmem:[#allocation2 + $0xc40] sm:$0xff]  ;;  %849 = vmatpush1.msra.mxu0 %v372_v1  ;;  %v365_v9 = vld [vmem:[#allocation2 + $0x828] sm:$0xff] }
  0xab   :  { %920 = vmatpush1.msra.mxu1 %v500_v2  ;;  %v493_v10 = vld [vmem:[#allocation2 + $0xc28] sm:$0xff]  ;;  %850 = vmatprep.subr.mxu0 %v369_v4  ;;  %v364_v12 = vld [vmem:[#allocation2 + $0x820] sm:$0xff] }
  0xac   :  { %921 = vmatprep.subr.mxu1 %v497_v5  ;;  %v492_v13 = vld [vmem:[#allocation2 + $0xc20] sm:$0xff]  ;;  %851 = vmatpush1.msra.mxu0 %v368_v6  ;;  %v361_v14 = vld [vmem:[#allocation2 + $0x808] sm:$0xff] }
  0xad   :  { %922 = vmatpush1.msra.mxu1 %v496_v7  ;;  %v489_v15 = vld [vmem:[#allocation2 + $0xc08] sm:$0xff]  ;;  %852 = vmatprep.subr.mxu0 %v365_v9  ;;  %v360_v16 = vld [vmem:[#allocation2 + $0x800] sm:$0xff] }
  0xae   :  { %923 = vmatprep.subr.mxu1 %v493_v10  ;;  %v488_v17 = vld [vmem:[#allocation2 + $0xc00] sm:$0xff]  ;;  %853 = vmatpush1.msra.mxu0 %v364_v12  ;;  %v485_v18 = vld [vmem:[#allocation2 + $0xbe8] sm:$0xff] }
  0xaf   :  { %924 = vmatpush1.msra.mxu1 %v492_v13  ;;  %v613_v19 = vld [vmem:[#allocation2 + $0xfe8] sm:$0xff]  ;;  %854 = vmatprep.subr.mxu0 %v361_v14  ;;  %v484_v20 = vld [vmem:[#allocation2 + $0xbe0] sm:$0xff] }
  0xb0   :  { %925 = vmatprep.subr.mxu1 %v489_v15  ;;  %v612_v21 = vld [vmem:[#allocation2 + $0xfe0] sm:$0xff]  ;;  %855 = vmatpush1.msra.mxu0 %v360_v16  ;;  %v481_v22 = vld [vmem:[#allocation2 + $0xbc8] sm:$0xff] }
  0xb1   :  { %926 = vmatpush1.msra.mxu1 %v488_v17  ;;  %v609_v23 = vld [vmem:[#allocation2 + $0xfc8] sm:$0xff]  ;;  %856 = vmatprep.subr.mxu0 %v485_v18  ;;  %v480_v24 = vld [vmem:[#allocation2 + $0xbc0] sm:$0xff] }
  0xb2   :  { %927 = vmatprep.subr.mxu1 %v613_v19  ;;  %v608_v25 = vld [vmem:[#allocation2 + $0xfc0] sm:$0xff]  ;;  %857 = vmatpush2.msra.mxu0 %v484_v20  ;;  %v477_v26 = vld [vmem:[#allocation2 + $0xba8] sm:$0xff] }
  0xb3   :  { %928 = vmatpush2.msra.mxu1 %v612_v21  ;;  %v605_v27 = vld [vmem:[#allocation2 + $0xfa8] sm:$0xff]  ;;  %858 = vmatprep.subr.mxu0 %v481_v22  ;;  %v476_v28 = vld [vmem:[#allocation2 + $0xba0] sm:$0xff] }
  0xb4   :  { %929 = vmatprep.subr.mxu1 %v609_v23  ;;  %v604_v29 = vld [vmem:[#allocation2 + $0xfa0] sm:$0xff]  ;;  %859 = vmatpush2.msra.mxu0 %v480_v24  ;;  %v473_v30 = vld [vmem:[#allocation2 + $0xb88] sm:$0xff] }
  0xb5   :  { %930 = vmatpush2.msra.mxu1 %v608_v25  ;;  %v601_v31 = vld [vmem:[#allocation2 + $0xf88] sm:$0xff]  ;;  %860 = vmatprep.subr.mxu0 %v477_v26  ;;  %v472_v32 = vld [vmem:[#allocation2 + $0xb80] sm:$0xff] }
  0xb6   :  { %931 = vmatprep.subr.mxu1 %v605_v27  ;;  %v600_v33 = vld [vmem:[#allocation2 + $0xf80] sm:$0xff]  ;;  %861 = vmatpush2.msra.mxu0 %v476_v28  ;;  %v469_v34 = vld [vmem:[#allocation2 + $0xb68] sm:$0xff] }
  0xb7   :  { %932 = vmatpush2.msra.mxu1 %v604_v29  ;;  %v597_v35 = vld [vmem:[#allocation2 + $0xf68] sm:$0xff]  ;;  %862 = vmatprep.subr.mxu0 %v473_v30  ;;  %v468_v36 = vld [vmem:[#allocation2 + $0xb60] sm:$0xff]  ;;  %v167_v29 = vld [vmem:[#allocation2 + $0x1f8] sm:$0xff] }
  0xb8   :  { %933 = vmatprep.subr.mxu1 %v601_v31  ;;  %v596_v37 = vld [vmem:[#allocation2 + $0xf60] sm:$0xff]  ;;  %863 = vmatpush2.msra.mxu0 %v472_v32  ;;  %v465_v38 = vld [vmem:[#allocation2 + $0xb48] sm:$0xff]  ;;  %v295_v30 = vld [vmem:[#allocation2 + $0x5f8] sm:$0xff] }
  0xb9   :  { %934 = vmatpush2.msra.mxu1 %v600_v33  ;;  %v593_v39 = vld [vmem:[#allocation2 + $0xf48] sm:$0xff]  ;;  %864 = vmatprep.subr.mxu0 %v469_v34  ;;  %v464_v40 = vld [vmem:[#allocation2 + $0xb40] sm:$0xff]  ;;  %v166_v31 = vld [vmem:[#allocation2 + $0x1f0] sm:$0xff] }
  0xba   :  { %935 = vmatprep.subr.mxu1 %v597_v35  ;;  %v592_v42 = vld [vmem:[#allocation2 + $0xf40] sm:$0xff]  ;;  %865 = vmatpush2.msra.mxu0 %v468_v36  ;;  %v461_v43 = vld [vmem:[#allocation2 + $0xb28] sm:$0xff]  ;;  %v294_v32 = vld [vmem:[#allocation2 + $0x5f0] sm:$0xff] }
  0xbb   :  { %936 = vmatpush2.msra.mxu1 %v596_v37  ;;  %v589_v44 = vld [vmem:[#allocation2 + $0xf28] sm:$0xff]  ;;  %866 = vmatprep.subr.mxu0 %v465_v38  ;;  %v460_v45 = vld [vmem:[#allocation2 + $0xb20] sm:$0xff]  ;;  %v163_v33 = vld [vmem:[#allocation2 + $0x1d8] sm:$0xff] }
  0xbc   :  { %937 = vmatprep.subr.mxu1 %v593_v39  ;;  %v588_v46 = vld [vmem:[#allocation2 + $0xf20] sm:$0xff]  ;;  %867 = vmatpush2.msra.mxu0 %v464_v40  ;;  %v457_v47 = vld [vmem:[#allocation2 + $0xb08] sm:$0xff]  ;;  %v291_v34 = vld [vmem:[#allocation2 + $0x5d8] sm:$0xff] }
  0xbd   :  { %938 = vmatpush2.msra.mxu1 %v592_v42  ;;  %v585_v48 = vld [vmem:[#allocation2 + $0xf08] sm:$0xff]  ;;  %868 = vmatprep.subr.mxu0 %v461_v43  ;;  %v456_v49 = vld [vmem:[#allocation2 + $0xb00] sm:$0xff]  ;;  %v162_v35 = vld [vmem:[#allocation2 + $0x1d0] sm:$0xff] }
  0xbe   :  { %939 = vmatprep.subr.mxu1 %v589_v44  ;;  %v584_v50 = vld [vmem:[#allocation2 + $0xf00] sm:$0xff]  ;;  %869 = vmatpush2.msra.mxu0 %v460_v45  ;;  %v453_v51 = vld [vmem:[#allocation2 + $0xae8] sm:$0xff]  ;;  %v290_v36 = vld [vmem:[#allocation2 + $0x5d0] sm:$0xff] }
  0xbf   :  { %940 = vmatpush2.msra.mxu1 %v588_v46  ;;  %v581_v53 = vld [vmem:[#allocation2 + $0xee8] sm:$0xff]  ;;  %870 = vmatprep.subr.mxu0 %v457_v47  ;;  %v452_v54 = vld [vmem:[#allocation2 + $0xae0] sm:$0xff]  ;;  %v159_v37 = vld [vmem:[#allocation2 + $0x1b8] sm:$0xff] }
  0xc0   :  { %941 = vmatprep.subr.mxu1 %v585_v48  ;;  %v580_v55 = vld [vmem:[#allocation2 + $0xee0] sm:$0xff]  ;;  %871 = vmatpush2.msra.mxu0 %v456_v49  ;;  %v449_v56 = vld [vmem:[#allocation2 + $0xac8] sm:$0xff]  ;;  %v287_v38 = vld [vmem:[#allocation2 + $0x5b8] sm:$0xff] }
  0xc1   :  { %942 = vmatpush2.msra.mxu1 %v584_v50  ;;  %v577_v57 = vld [vmem:[#allocation2 + $0xec8] sm:$0xff]  ;;  %872 = vmatprep.subr.mxu0 %v453_v51  ;;  %v448_v58 = vld [vmem:[#allocation2 + $0xac0] sm:$0xff]  ;;  %v158_v39 = vld [vmem:[#allocation2 + $0x1b0] sm:$0xff] }
  0xc2   :  { %943 = vmatprep.subr.mxu1 %v581_v53  ;;  %v576_v59 = vld [vmem:[#allocation2 + $0xec0] sm:$0xff]  ;;  %873 = vmatpush2.msra.mxu0 %v452_v54  ;;  %v445_v60 = vld [vmem:[#allocation2 + $0xaa8] sm:$0xff]  ;;  %v286_v40 = vld [vmem:[#allocation2 + $0x5b0] sm:$0xff] }
  0xc3   :  { %944 = vmatpush2.msra.mxu1 %v580_v55  ;;  %v573_v61 = vld [vmem:[#allocation2 + $0xea8] sm:$0xff]  ;;  %874 = vmatprep.subr.mxu0 %v449_v56  ;;  %v444_v63 = vld [vmem:[#allocation2 + $0xaa0] sm:$0xff]  ;;  %v155_v42 = vld [vmem:[#allocation2 + $0x198] sm:$0xff] }
  0xc4   :  { %945 = vmatprep.subr.mxu1 %v577_v57  ;;  %v572_v0 = vld [vmem:[#allocation2 + $0xea0] sm:$0xff]  ;;  %v103_v1 = vld [vmem:[%s1982_s0 + $0x8] sm:$0xff]  ;;  %875 = vmatpush2.msra.mxu0 %v448_v58  ;;  %v283_v43 = vld [vmem:[#allocation2 + $0x598] sm:$0xff] }
  0xc5   :  { %946 = vmatpush2.msra.mxu1 %v576_v59  ;;  %v441_v2 = vld [vmem:[#allocation2 + $0xa88] sm:$0xff]  ;;  %876 = vmatprep.subr.mxu0 %v445_v60  ;;  %v440_v5 = vld [vmem:[#allocation2 + $0xa80] sm:$0xff]  ;;  %v657_v10 = vcombine.high %v103_v1, %v103_v1  ;;  %v1936_v16 = vrot.slane %v103_v1, %v1912_v52  ;;  %v154_v44 = vld [vmem:[#allocation2 + $0x190] sm:$0xff] }
  0xc6   :  { %v569_v4 = vld [vmem:[#allocation2 + $0xe88] sm:$0xff]  ;;  %947 = vmatprep.subr.mxu1 %v573_v61  ;;  %v568_v6 = vld [vmem:[#allocation2 + $0xe80] sm:$0xff]  ;;  %877 = vmatpush2.msra.mxu0 %v444_v63  ;;  %v282_v45 = vld [vmem:[#allocation2 + $0x590] sm:$0xff] }
  0xc7   :  { %948 = vmatpush2.msra.mxu1 %v572_v0  ;;  %v437_v7 = vld [vmem:[#allocation2 + $0xa68] sm:$0xff]  ;;  %878 = vmatprep.subr.mxu0 %v441_v2  ;;  %v436_v12 = vld [vmem:[#allocation2 + $0xa60] sm:$0xff]  ;;  %v1939_v21 = vrot.slane %v657_v10, %v1912_v52  ;;  %v1943_v26 = vcombine.high %v1936_v16, %v1936_v16  ;;  %v151_v46 = vld [vmem:[#allocation2 + $0x178] sm:$0xff] }
  0xc8   :  { %v565_v9 = vld [vmem:[#allocation2 + $0xe68] sm:$0xff]  ;;  %949 = vmatprep.subr.mxu1 %v569_v4  ;;  %v564_v13 = vld [vmem:[#allocation2 + $0xe60] sm:$0xff]  ;;  %879 = vmatpush2.msra.mxu0 %v440_v5  ;;  %v279_v47 = vld [vmem:[#allocation2 + $0x578] sm:$0xff] }
  0xc9   :  { %950 = vmatpush2.msra.mxu1 %v568_v6  ;;  %v433_v14 = vld [vmem:[#allocation2 + $0xa48] sm:$0xff]  ;;  %880 = vmatprep.subr.mxu0 %v437_v7  ;;  %v432_v17 = vld [vmem:[#allocation2 + $0xa40] sm:$0xff]  ;;  %v1947_v52 = vcombine.high %v1939_v21, %v1939_v21  ;;  %v150_v48 = vld [vmem:[#allocation2 + $0x170] sm:$0xff] }
  0xca   :  { %v561_v15 = vld [vmem:[#allocation2 + $0xe48] sm:$0xff]  ;;  %951 = vmatprep.subr.mxu1 %v565_v9  ;;  %v560_v18 = vld [vmem:[#allocation2 + $0xe40] sm:$0xff]  ;;  %881 = vmatpush2.msra.mxu0 %v436_v12  ;;  %v278_v49 = vld [vmem:[#allocation2 + $0x570] sm:$0xff] }
  0xcb   :  { %952 = vmatpush2.msra.mxu1 %v564_v13  ;;  %v429_v19 = vld [vmem:[#allocation2 + $0xa28] sm:$0xff]  ;;  %882 = vmatprep.subr.mxu0 %v433_v14  ;;  %v428_v22 = vld [vmem:[#allocation2 + $0xa20] sm:$0xff]  ;;  %v147_v50 = vld [vmem:[#allocation2 + $0x158] sm:$0xff] }
  0xcc   :  { %v557_v20 = vld [vmem:[#allocation2 + $0xe28] sm:$0xff]  ;;  %953 = vmatprep.subr.mxu1 %v561_v15  ;;  %v556_v23 = vld [vmem:[#allocation2 + $0xe20] sm:$0xff]  ;;  %883 = vmatpush2.msra.mxu0 %v432_v17  ;;  %v275_v51 = vld [vmem:[#allocation2 + $0x558] sm:$0xff] }
  0xcd   :  { %954 = vmatpush2.msra.mxu1 %v560_v18  ;;  %v425_v24 = vld [vmem:[#allocation2 + $0xa08] sm:$0xff]  ;;  %884 = vmatprep.subr.mxu0 %v429_v19  ;;  %v424_v27 = vld [vmem:[#allocation2 + $0xa00] sm:$0xff]  ;;  %v146_v53 = vld [vmem:[#allocation2 + $0x150] sm:$0xff] }
  0xce   :  { %v553_v25 = vld [vmem:[#allocation2 + $0xe08] sm:$0xff]  ;;  %955 = vmatprep.subr.mxu1 %v557_v20  ;;  %885 = vmatpush2.msra.mxu0 %v428_v22  ;;  %v552_v28 = vld [vmem:[#allocation2 + $0xe00] sm:$0xff]  ;;  %v274_v54 = vld [vmem:[#allocation2 + $0x550] sm:$0xff] }
  0xcf   :  { %956 = vmatpush2.msra.mxu1 %v556_v23  ;;  %886 = vmatprep.subr.mxu0 %v425_v24  ;;  %v143_v55 = vld [vmem:[#allocation2 + $0x138] sm:$0xff]  ;;  %v142_v57 = vld [vmem:[#allocation2 + $0x130] sm:$0xff] }
  0xd0   :  { %957 = vmatprep.subr.mxu1 %v553_v25  ;;  %887 = vmatpush2.msra.mxu0 %v424_v27  ;;  %v271_v56 = vld [vmem:[#allocation2 + $0x538] sm:$0xff]  ;;  %v270_v58 = vld [vmem:[#allocation2 + $0x530] sm:$0xff] }
  0xd1   :  { %888 = vmatprep.mubr.f32.mxu0 %v1943_v26  ;;  %958 = vmatpush2.msra.mxu1 %v552_v28  ;;  %v139_v59 = vld [vmem:[#allocation2 + $0x118] sm:$0xff]  ;;  %v138_v61 = vld [vmem:[#allocation2 + $0x110] sm:$0xff] }
  0xd2   :  { %889 = vmatmul.mubr.f32.vlgmr.msra.gmra.mxu0 %v1936_v16  ;;  %959 = vmatprep.mubr.f32.mxu1 %v1947_v52  ;;  %v267_v60 = vld [vmem:[#allocation2 + $0x518] sm:$0xff]  ;;  %v266_v63 = vld [vmem:[#allocation2 + $0x510] sm:$0xff] }
  0xd3   :  { %966 = vmatprep.subr.mxu0 %v167_v29  ;;  %1037 = vmatprep.subr.mxu1 %v295_v30  ;;  %v135_v0 = vld [vmem:[#allocation2 + $0xf8] sm:$0xff]  ;;  %v134_v2 = vld [vmem:[#allocation2 + $0xf0] sm:$0xff] }
  0xd4   :  { %960 = vmatmul.mubr.f32.vlgmr.msra.gmra.mxu1 %v1939_v21  ;;  %967 = vmatpush1.msra.mxu0 %v166_v31  ;;  %v263_v1 = vld [vmem:[#allocation2 + $0x4f8] sm:$0xff]  ;;  %v262_v4 = vld [vmem:[#allocation2 + $0x4f0] sm:$0xff] }
  0xd5   :  { %1038 = vmatpush1.msra.mxu1 %v294_v32  ;;  %968 = vmatprep.subr.mxu0 %v163_v33  ;;  %v131_v5 = vld [vmem:[#allocation2 + $0xd8] sm:$0xff]  ;;  %v130_v7 = vld [vmem:[#allocation2 + $0xd0] sm:$0xff] }
  0xd6   :  { %1039 = vmatprep.subr.mxu1 %v291_v34  ;;  %969 = vmatpush1.msra.mxu0 %v162_v35  ;;  %v259_v6 = vld [vmem:[#allocation2 + $0x4d8] sm:$0xff]  ;;  %v258_v9 = vld [vmem:[#allocation2 + $0x4d0] sm:$0xff] }
  0xd7   :  { %1040 = vmatpush1.msra.mxu1 %v290_v36  ;;  %970 = vmatprep.subr.mxu0 %v159_v37  ;;  %v127_v10 = vld [vmem:[#allocation2 + $0xb8] sm:$0xff]  ;;  %v126_v13 = vld [vmem:[#allocation2 + $0xb0] sm:$0xff] }
  0xd8   :  { %1041 = vmatprep.subr.mxu1 %v287_v38  ;;  %971 = vmatpush1.msra.mxu0 %v158_v39  ;;  %v255_v12 = vld [vmem:[#allocation2 + $0x4b8] sm:$0xff]  ;;  %v254_v14 = vld [vmem:[#allocation2 + $0x4b0] sm:$0xff] }
  0xd9   :  { %1042 = vmatpush1.msra.mxu1 %v286_v40  ;;  %972 = vmatprep.subr.mxu0 %v155_v42  ;;  %v123_v15 = vld [vmem:[#allocation2 + $0x98] sm:$0xff]  ;;  %v122_v18 = vld [vmem:[#allocation2 + $0x90] sm:$0xff] }
  0xda   :  { %1043 = vmatprep.subr.mxu1 %v283_v43  ;;  %973 = vmatpush1.msra.mxu0 %v154_v44  ;;  %v251_v17 = vld [vmem:[#allocation2 + $0x498] sm:$0xff]  ;;  %v250_v19 = vld [vmem:[#allocation2 + $0x490] sm:$0xff] }
  0xdb   :  { %1044 = vmatpush1.msra.mxu1 %v282_v45  ;;  %974 = vmatprep.subr.mxu0 %v151_v46  ;;  %v119_v20 = vld [vmem:[#allocation2 + $0x78] sm:$0xff]  ;;  %v118_v23 = vld [vmem:[#allocation2 + $0x70] sm:$0xff] }
  0xdc   :  { %1045 = vmatprep.subr.mxu1 %v279_v47  ;;  %975 = vmatpush1.msra.mxu0 %v150_v48  ;;  %v247_v22 = vld [vmem:[#allocation2 + $0x478] sm:$0xff]  ;;  %v246_v24 = vld [vmem:[#allocation2 + $0x470] sm:$0xff] }
  0xdd   :  { %1046 = vmatpush1.msra.mxu1 %v278_v49  ;;  %976 = vmatprep.subr.mxu0 %v147_v50  ;;  %v115_v25 = vld [vmem:[#allocation2 + $0x58] sm:$0xff]  ;;  %v114_v28 = vld [vmem:[#allocation2 + $0x50] sm:$0xff] }
  0xde   :  { %1047 = vmatprep.subr.mxu1 %v275_v51  ;;  %977 = vmatpush1.msra.mxu0 %v146_v53  ;;  %v243_v27 = vld [vmem:[#allocation2 + $0x458] sm:$0xff]  ;;  %v242_v29 = vld [vmem:[#allocation2 + $0x450] sm:$0xff] }
  0xdf   :  { %1048 = vmatpush1.msra.mxu1 %v274_v54  ;;  %978 = vmatprep.subr.mxu0 %v143_v55  ;;  %v111_v30 = vld [vmem:[#allocation2 + $0x38] sm:$0xff]  ;;  %v110_v32 = vld [vmem:[#allocation2 + $0x30] sm:$0xff] }
  0xe0   :  { %1049 = vmatprep.subr.mxu1 %v271_v56  ;;  %979 = vmatpush1.msra.mxu0 %v142_v57  ;;  %v239_v31 = vld [vmem:[#allocation2 + $0x438] sm:$0xff]  ;;  %v238_v33 = vld [vmem:[#allocation2 + $0x430] sm:$0xff] }
  0xe1   :  { %1050 = vmatpush1.msra.mxu1 %v270_v58  ;;  %980 = vmatprep.subr.mxu0 %v139_v59  ;;  %v107_v34 = vld [vmem:[#allocation2 + $0x18] sm:$0xff]  ;;  %v106_v36 = vld [vmem:[#allocation2 + $0x10] sm:$0xff] }
  0xe2   :  { %1051 = vmatprep.subr.mxu1 %v267_v60  ;;  %981 = vmatpush1.msra.mxu0 %v138_v61  ;;  %v235_v35 = vld [vmem:[#allocation2 + $0x418] sm:$0xff]  ;;  %v234_v37 = vld [vmem:[#allocation2 + $0x410] sm:$0xff] }
  0xe3   :  { %1052 = vmatpush1.msra.mxu1 %v266_v63  ;;  %982 = vmatprep.subr.mxu0 %v135_v0  ;;  %v231_v38 = vld [vmem:[#allocation2 + $0x3f8] sm:$0xff]  ;;  %v230_v40 = vld [vmem:[#allocation2 + $0x3f0] sm:$0xff] }
  0xe4   :  { %1053 = vmatprep.subr.mxu1 %v263_v1  ;;  %983 = vmatpush1.msra.mxu0 %v134_v2  ;;  %v359_v39 = vld [vmem:[#allocation2 + $0x7f8] sm:$0xff]  ;;  %v358_v42 = vld [vmem:[#allocation2 + $0x7f0] sm:$0xff] }
  0xe5   :  { %1054 = vmatpush1.msra.mxu1 %v262_v4  ;;  %984 = vmatprep.subr.mxu0 %v131_v5  ;;  %v227_v43 = vld [vmem:[#allocation2 + $0x3d8] sm:$0xff]  ;;  %v226_v45 = vld [vmem:[#allocation2 + $0x3d0] sm:$0xff] }
  0xe6   :  { %1055 = vmatprep.subr.mxu1 %v259_v6  ;;  %985 = vmatpush1.msra.mxu0 %v130_v7  ;;  %v355_v44 = vld [vmem:[#allocation2 + $0x7d8] sm:$0xff]  ;;  %v354_v46 = vld [vmem:[#allocation2 + $0x7d0] sm:$0xff] }
  0xe7   :  { %1056 = vmatpush1.msra.mxu1 %v258_v9  ;;  %986 = vmatprep.subr.mxu0 %v127_v10  ;;  %v223_v47 = vld [vmem:[#allocation2 + $0x3b8] sm:$0xff]  ;;  %v222_v49 = vld [vmem:[#allocation2 + $0x3b0] sm:$0xff] }
  0xe8   :  { %1057 = vmatprep.subr.mxu1 %v255_v12  ;;  %987 = vmatpush1.msra.mxu0 %v126_v13  ;;  %v351_v48 = vld [vmem:[#allocation2 + $0x7b8] sm:$0xff]  ;;  %v350_v50 = vld [vmem:[#allocation2 + $0x7b0] sm:$0xff] }
  0xe9   :  { %1058 = vmatpush1.msra.mxu1 %v254_v14  ;;  %988 = vmatprep.subr.mxu0 %v123_v15  ;;  %v219_v51 = vld [vmem:[#allocation2 + $0x398] sm:$0xff]  ;;  %v218_v54 = vld [vmem:[#allocation2 + $0x390] sm:$0xff] }
  0xea   :  { %1059 = vmatprep.subr.mxu1 %v251_v17  ;;  %989 = vmatpush1.msra.mxu0 %v122_v18  ;;  %v347_v53 = vld [vmem:[#allocation2 + $0x798] sm:$0xff]  ;;  %v346_v55 = vld [vmem:[#allocation2 + $0x790] sm:$0xff] }
  0xeb   :  { %1060 = vmatpush1.msra.mxu1 %v250_v19  ;;  %990 = vmatprep.subr.mxu0 %v119_v20  ;;  %v215_v56 = vld [vmem:[#allocation2 + $0x378] sm:$0xff]  ;;  %v214_v58 = vld [vmem:[#allocation2 + $0x370] sm:$0xff] }
  0xec   :  { %1061 = vmatprep.subr.mxu1 %v247_v22  ;;  %991 = vmatpush1.msra.mxu0 %v118_v23  ;;  %v343_v57 = vld [vmem:[#allocation2 + $0x778] sm:$0xff]  ;;  %v342_v59 = vld [vmem:[#allocation2 + $0x770] sm:$0xff] }
  0xed   :  { %1062 = vmatpush1.msra.mxu1 %v246_v24  ;;  %992 = vmatprep.subr.mxu0 %v115_v25  ;;  %v211_v60 = vld [vmem:[#allocation2 + $0x358] sm:$0xff]  ;;  %v210_v63 = vld [vmem:[#allocation2 + $0x350] sm:$0xff] }
  0xee   :  { %1063 = vmatprep.subr.mxu1 %v243_v27  ;;  %993 = vmatpush1.msra.mxu0 %v114_v28  ;;  %v339_v61 = vld [vmem:[#allocation2 + $0x758] sm:$0xff]  ;;  %v338_v0 = vld [vmem:[#allocation2 + $0x750] sm:$0xff] }
  0xef   :  { %1064 = vmatpush1.msra.mxu1 %v242_v29  ;;  %994 = vmatprep.subr.mxu0 %v111_v30  ;;  %v207_v1 = vld [vmem:[#allocation2 + $0x338] sm:$0xff]  ;;  %v206_v4 = vld [vmem:[#allocation2 + $0x330] sm:$0xff] }
  0xf0   :  { %1065 = vmatprep.subr.mxu1 %v239_v31  ;;  %995 = vmatpush1.msra.mxu0 %v110_v32  ;;  %v335_v2 = vld [vmem:[#allocation2 + $0x738] sm:$0xff]  ;;  %v334_v5 = vld [vmem:[#allocation2 + $0x730] sm:$0xff] }
  0xf1   :  { %1066 = vmatpush1.msra.mxu1 %v238_v33  ;;  %996 = vmatprep.subr.mxu0 %v107_v34  ;;  %v203_v6 = vld [vmem:[#allocation2 + $0x318] sm:$0xff]  ;;  %v202_v9 = vld [vmem:[#allocation2 + $0x310] sm:$0xff] }
  0xf2   :  { %1067 = vmatprep.subr.mxu1 %v235_v35  ;;  %997 = vmatpush1.msra.mxu0 %v106_v36  ;;  %v331_v7 = vld [vmem:[#allocation2 + $0x718] sm:$0xff]  ;;  %v330_v10 = vld [vmem:[#allocation2 + $0x710] sm:$0xff] }
  0xf3   :  { %1068 = vmatpush1.msra.mxu1 %v234_v37  ;;  %998 = vmatprep.subr.mxu0 %v231_v38  ;;  %v199_v12 = vld [vmem:[#allocation2 + $0x2f8] sm:$0xff]  ;;  %v198_v14 = vld [vmem:[#allocation2 + $0x2f0] sm:$0xff] }
  0xf4   :  { %1069 = vmatprep.subr.mxu1 %v359_v39  ;;  %999 = vmatpush2.msra.mxu0 %v230_v40  ;;  %v327_v13 = vld [vmem:[#allocation2 + $0x6f8] sm:$0xff]  ;;  %v326_v15 = vld [vmem:[#allocation2 + $0x6f0] sm:$0xff] }
  0xf5   :  { %1070 = vmatpush2.msra.mxu1 %v358_v42  ;;  %1000 = vmatprep.subr.mxu0 %v227_v43  ;;  %v195_v17 = vld [vmem:[#allocation2 + $0x2d8] sm:$0xff]  ;;  %v194_v19 = vld [vmem:[#allocation2 + $0x2d0] sm:$0xff] }
  0xf6   :  { %1071 = vmatprep.subr.mxu1 %v355_v44  ;;  %1001 = vmatpush2.msra.mxu0 %v226_v45  ;;  %v323_v18 = vld [vmem:[#allocation2 + $0x6d8] sm:$0xff]  ;;  %v322_v20 = vld [vmem:[#allocation2 + $0x6d0] sm:$0xff] }
  0xf7   :  { %1072 = vmatpush2.msra.mxu1 %v354_v46  ;;  %1002 = vmatprep.subr.mxu0 %v223_v47  ;;  %v191_v22 = vld [vmem:[#allocation2 + $0x2b8] sm:$0xff]  ;;  %v190_v24 = vld [vmem:[#allocation2 + $0x2b0] sm:$0xff] }
  0xf8   :  { %1073 = vmatprep.subr.mxu1 %v351_v48  ;;  %1003 = vmatpush2.msra.mxu0 %v222_v49  ;;  %v319_v23 = vld [vmem:[#allocation2 + $0x6b8] sm:$0xff]  ;;  %v318_v25 = vld [vmem:[#allocation2 + $0x6b0] sm:$0xff] }
  0xf9   :  { %1074 = vmatpush2.msra.mxu1 %v350_v50  ;;  %1004 = vmatprep.subr.mxu0 %v219_v51  ;;  %v187_v27 = vld [vmem:[#allocation2 + $0x298] sm:$0xff]  ;;  %v186_v29 = vld [vmem:[#allocation2 + $0x290] sm:$0xff] }
  0xfa   :  { %1075 = vmatprep.subr.mxu1 %v347_v53  ;;  %1005 = vmatpush2.msra.mxu0 %v218_v54  ;;  %v315_v28 = vld [vmem:[#allocation2 + $0x698] sm:$0xff]  ;;  %v314_v30 = vld [vmem:[#allocation2 + $0x690] sm:$0xff] }
  0xfb   :  { %1076 = vmatpush2.msra.mxu1 %v346_v55  ;;  %1006 = vmatprep.subr.mxu0 %v215_v56  ;;  %v183_v31 = vld [vmem:[#allocation2 + $0x278] sm:$0xff]  ;;  %v182_v33 = vld [vmem:[#allocation2 + $0x270] sm:$0xff] }
  0xfc   :  { %1077 = vmatprep.subr.mxu1 %v343_v57  ;;  %1007 = vmatpush2.msra.mxu0 %v214_v58  ;;  %v311_v32 = vld [vmem:[#allocation2 + $0x678] sm:$0xff]  ;;  %v310_v34 = vld [vmem:[#allocation2 + $0x670] sm:$0xff] }
  0xfd   :  { %1078 = vmatpush2.msra.mxu1 %v342_v59  ;;  %1008 = vmatprep.subr.mxu0 %v211_v60  ;;  %v179_v35 = vld [vmem:[#allocation2 + $0x258] sm:$0xff]  ;;  %v178_v37 = vld [vmem:[#allocation2 + $0x250] sm:$0xff] }
  0xfe   :  { %1079 = vmatprep.subr.mxu1 %v339_v61  ;;  %1009 = vmatpush2.msra.mxu0 %v210_v63  ;;  %v307_v36 = vld [vmem:[#allocation2 + $0x658] sm:$0xff]  ;;  %v306_v38 = vld [vmem:[#allocation2 + $0x650] sm:$0xff] }
  0xff   :  { %1080 = vmatpush2.msra.mxu1 %v338_v0  ;;  %1010 = vmatprep.subr.mxu0 %v207_v1  ;;  %v175_v39 = vld [vmem:[#allocation2 + $0x238] sm:$0xff]  ;;  %v174_v42 = vld [vmem:[#allocation2 + $0x230] sm:$0xff] }
 0x100   :  { %1081 = vmatprep.subr.mxu1 %v335_v2  ;;  %1011 = vmatpush2.msra.mxu0 %v206_v4  ;;  %v303_v40 = vld [vmem:[#allocation2 + $0x638] sm:$0xff]  ;;  %v302_v43 = vld [vmem:[#allocation2 + $0x630] sm:$0xff] }
 0x101   :  { %1082 = vmatpush2.msra.mxu1 %v334_v5  ;;  %1012 = vmatprep.subr.mxu0 %v203_v6  ;;  %v171_v44 = vld [vmem:[#allocation2 + $0x218] sm:$0xff]  ;;  %v170_v46 = vld [vmem:[#allocation2 + $0x210] sm:$0xff] }
 0x102   :  { %1083 = vmatprep.subr.mxu1 %v331_v7  ;;  %1013 = vmatpush2.msra.mxu0 %v202_v9  ;;  %v299_v45 = vld [vmem:[#allocation2 + $0x618] sm:$0xff]  ;;  %v298_v47 = vld [vmem:[#allocation2 + $0x610] sm:$0xff] }
 0x103   :  { %1084 = vmatpush2.msra.mxu1 %v330_v10  ;;  %1014 = vmatprep.subr.mxu0 %v199_v12  ;;  %v423_v48 = vld [vmem:[#allocation2 + $0x9f8] sm:$0xff]  ;;  %v422_v50 = vld [vmem:[#allocation2 + $0x9f0] sm:$0xff] }
 0x104   :  { %1085 = vmatprep.subr.mxu1 %v327_v13  ;;  %1015 = vmatpush2.msra.mxu0 %v198_v14  ;;  %v551_v49 = vld [vmem:[#allocation2 + $0xdf8] sm:$0xff]  ;;  %v550_v51 = vld [vmem:[#allocation2 + $0xdf0] sm:$0xff] }
 0x105   :  { %1086 = vmatpush2.msra.mxu1 %v326_v15  ;;  %1016 = vmatprep.subr.mxu0 %v195_v17  ;;  %v419_v53 = vld [vmem:[#allocation2 + $0x9d8] sm:$0xff]  ;;  %v418_v55 = vld [vmem:[#allocation2 + $0x9d0] sm:$0xff] }
 0x106   :  { %1087 = vmatprep.subr.mxu1 %v323_v18  ;;  %1017 = vmatpush2.msra.mxu0 %v194_v19  ;;  %v547_v54 = vld [vmem:[#allocation2 + $0xdd8] sm:$0xff]  ;;  %v546_v56 = vld [vmem:[#allocation2 + $0xdd0] sm:$0xff] }
 0x107   :  { %1088 = vmatpush2.msra.mxu1 %v322_v20  ;;  %1018 = vmatprep.subr.mxu0 %v191_v22  ;;  %v415_v57 = vld [vmem:[#allocation2 + $0x9b8] sm:$0xff]  ;;  %v414_v58 = vld [vmem:[#allocation2 + $0x9b0] sm:$0xff] }
 0x108   :  { %1089 = vmatprep.subr.mxu1 %v319_v23  ;;  %1019 = vmatpush2.msra.mxu0 %v190_v24  ;;  %v411_v59 = vld [vmem:[#allocation2 + $0x998] sm:$0xff]  ;;  %v410_v60 = vld [vmem:[#allocation2 + $0x990] sm:$0xff] }
 0x109   :  { %1090 = vmatpush2.msra.mxu1 %v318_v25  ;;  %1020 = vmatprep.subr.mxu0 %v187_v27  ;;  %v538_v61 = vld [vmem:[#allocation2 + $0xd90] sm:$0xff]  ;;  %v535_v63 = vld [vmem:[#allocation2 + $0xd78] sm:$0xff] }
 0x10a   :  { %1091 = vmatprep.subr.mxu1 %v315_v28  ;;  %1021 = vmatpush2.msra.mxu0 %v186_v29  ;;  %v406_v0 = vld [vmem:[#allocation2 + $0x970] sm:$0xff]  ;;  %v403_v2 = vld [vmem:[#allocation2 + $0x958] sm:$0xff] }
 0x10b   :  { %1092 = vmatpush2.msra.mxu1 %v314_v30  ;;  %1022 = vmatprep.subr.mxu0 %v183_v31  ;;  %v534_v1 = vld [vmem:[#allocation2 + $0xd70] sm:$0xff]  ;;  %v531_v4 = vld [vmem:[#allocation2 + $0xd58] sm:$0xff] }
 0x10c   :  { %1093 = vmatprep.subr.mxu1 %v311_v32  ;;  %1023 = vmatpush2.msra.mxu0 %v182_v33  ;;  %v402_v5 = vld [vmem:[#allocation2 + $0x950] sm:$0xff]  ;;  %v399_v7 = vld [vmem:[#allocation2 + $0x938] sm:$0xff] }
 0x10d   :  { %1094 = vmatpush2.msra.mxu1 %v310_v34  ;;  %1024 = vmatprep.subr.mxu0 %v179_v35  ;;  %v530_v6 = vld [vmem:[#allocation2 + $0xd50] sm:$0xff]  ;;  %v527_v9 = vld [vmem:[#allocation2 + $0xd38] sm:$0xff] }
 0x10e   :  { %1095 = vmatprep.subr.mxu1 %v307_v36  ;;  %1025 = vmatpush2.msra.mxu0 %v178_v37  ;;  %v398_v10 = vld [vmem:[#allocation2 + $0x930] sm:$0xff]  ;;  %v395_v13 = vld [vmem:[#allocation2 + $0x918] sm:$0xff] }
 0x10f   :  { %1096 = vmatpush2.msra.mxu1 %v306_v38  ;;  %1026 = vmatprep.subr.mxu0 %v175_v39  ;;  %v526_v12 = vld [vmem:[#allocation2 + $0xd30] sm:$0xff]  ;;  %v523_v14 = vld [vmem:[#allocation2 + $0xd18] sm:$0xff] }
 0x110   :  { %1097 = vmatprep.subr.mxu1 %v303_v40  ;;  %1027 = vmatpush2.msra.mxu0 %v174_v42  ;;  %v394_v15 = vld [vmem:[#allocation2 + $0x910] sm:$0xff]  ;;  %v391_v18 = vld [vmem:[#allocation2 + $0x8f8] sm:$0xff] }
 0x111   :  { %1098 = vmatpush2.msra.mxu1 %v302_v43  ;;  %1028 = vmatprep.subr.mxu0 %v171_v44  ;;  %v522_v17 = vld [vmem:[#allocation2 + $0xd10] sm:$0xff]  ;;  %v519_v19 = vld [vmem:[#allocation2 + $0xcf8] sm:$0xff] }
 0x112   :  { %1099 = vmatprep.subr.mxu1 %v299_v45  ;;  %1029 = vmatpush2.msra.mxu0 %v170_v46  ;;  %v390_v20 = vld [vmem:[#allocation2 + $0x8f0] sm:$0xff]  ;;  %v387_v23 = vld [vmem:[#allocation2 + $0x8d8] sm:$0xff] }
 0x113   :  { %1030 = vmatprep.mubr.f32.mxu0 %v1922_v8  ;;  %1100 = vmatpush2.msra.mxu1 %v298_v47  ;;  %v543_v8 = vld [vmem:[#allocation2 + $0xdb8] sm:$0xff]  ;;  %v518_v22 = vld [vmem:[#allocation2 + $0xcf0] sm:$0xff] }
 0x114   :  { %1031 = vmatmul.mubr.f32.vlgmr.msra.gmra.mxu0 %v1915_v62  ;;  %1101 = vmatprep.mubr.f32.mxu1 %v1926_v11  ;;  %v542_v62 = vld [vmem:[#allocation2 + $0xdb0] sm:$0xff]  ;;  %v539_v11 = vld [vmem:[#allocation2 + $0xd98] sm:$0xff] }
 0x115   :  { %1108 = vmatprep.subr.mxu0 %v423_v48  ;;  %1179 = vmatprep.subr.mxu1 %v551_v49  ;;  %v515_v24 = vld [vmem:[#allocation2 + $0xcd8] sm:$0xff]  ;;  %v386_v25 = vld [vmem:[#allocation2 + $0x8d0] sm:$0xff] }
 0x116   :  { %1102 = vmatmul.mubr.f32.vlgmr.msra.gmra.mxu1 %v1918_v3  ;;  %1109 = vmatpush1.msra.mxu0 %v422_v50  ;;  %v407_v3 = vld [vmem:[#allocation2 + $0x978] sm:$0xff]  ;;  %v514_v27 = vld [vmem:[#allocation2 + $0xcd0] sm:$0xff] }
 0x117   :  { %1180 = vmatpush1.msra.mxu1 %v550_v51  ;;  %1110 = vmatprep.subr.mxu0 %v419_v53  ;;  %v383_v28 = vld [vmem:[#allocation2 + $0x8b8] sm:$0xff]  ;;  %v382_v30 = vld [vmem:[#allocation2 + $0x8b0] sm:$0xff] }
 0x118   :  { %1181 = vmatprep.subr.mxu1 %v547_v54  ;;  %1111 = vmatpush1.msra.mxu0 %v418_v55  ;;  %v511_v29 = vld [vmem:[#allocation2 + $0xcb8] sm:$0xff]  ;;  %v510_v31 = vld [vmem:[#allocation2 + $0xcb0] sm:$0xff] }
 0x119   :  { %1182 = vmatpush1.msra.mxu1 %v546_v56  ;;  %1112 = vmatprep.subr.mxu0 %v415_v57  ;;  %v379_v32 = vld [vmem:[#allocation2 + $0x898] sm:$0xff]  ;;  %v378_v34 = vld [vmem:[#allocation2 + $0x890] sm:$0xff] }
 0x11a   :  { %1183 = vmatprep.subr.mxu1 %v543_v8  ;;  %1113 = vmatpush1.msra.mxu0 %v414_v58  ;;  %v507_v33 = vld [vmem:[#allocation2 + $0xc98] sm:$0xff]  ;;  %v506_v35 = vld [vmem:[#allocation2 + $0xc90] sm:$0xff] }
 0x11b   :  { %1184 = vmatpush1.msra.mxu1 %v542_v62  ;;  %1114 = vmatprep.subr.mxu0 %v411_v59  ;;  %v375_v36 = vld [vmem:[#allocation2 + $0x878] sm:$0xff]  ;;  %v374_v38 = vld [vmem:[#allocation2 + $0x870] sm:$0xff] }
 0x11c   :  { %1185 = vmatprep.subr.mxu1 %v539_v11  ;;  %1115 = vmatpush1.msra.mxu0 %v410_v60  ;;  %v503_v37 = vld [vmem:[#allocation2 + $0xc78] sm:$0xff]  ;;  %v502_v39 = vld [vmem:[#allocation2 + $0xc70] sm:$0xff] }
 0x11d   :  { %1186 = vmatpush1.msra.mxu1 %v538_v61  ;;  %1116 = vmatprep.subr.mxu0 %v407_v3  ;;  %v371_v40 = vld [vmem:[#allocation2 + $0x858] sm:$0xff]  ;;  %v370_v43 = vld [vmem:[#allocation2 + $0x850] sm:$0xff] }
 0x11e   :  { %1187 = vmatprep.subr.mxu1 %v535_v63  ;;  %1117 = vmatpush1.msra.mxu0 %v406_v0  ;;  %v499_v42 = vld [vmem:[#allocation2 + $0xc58] sm:$0xff]  ;;  %v498_v44 = vld [vmem:[#allocation2 + $0xc50] sm:$0xff] }
 0x11f   :  { %1188 = vmatpush1.msra.mxu1 %v534_v1  ;;  %1118 = vmatprep.subr.mxu0 %v403_v2  ;;  %v367_v45 = vld [vmem:[#allocation2 + $0x838] sm:$0xff]  ;;  %v366_v47 = vld [vmem:[#allocation2 + $0x830] sm:$0xff] }
 0x120   :  { %1189 = vmatprep.subr.mxu1 %v531_v4  ;;  %1119 = vmatpush1.msra.mxu0 %v402_v5  ;;  %v495_v46 = vld [vmem:[#allocation2 + $0xc38] sm:$0xff]  ;;  %v494_v48 = vld [vmem:[#allocation2 + $0xc30] sm:$0xff] }
 0x121   :  { %1190 = vmatpush1.msra.mxu1 %v530_v6  ;;  %1120 = vmatprep.subr.mxu0 %v399_v7  ;;  %v363_v49 = vld [vmem:[#allocation2 + $0x818] sm:$0xff]  ;;  %v362_v51 = vld [vmem:[#allocation2 + $0x810] sm:$0xff] }
 0x122   :  { %1191 = vmatprep.subr.mxu1 %v527_v9  ;;  %1121 = vmatpush1.msra.mxu0 %v398_v10  ;;  %v491_v50 = vld [vmem:[#allocation2 + $0xc18] sm:$0xff]  ;;  %v490_v53 = vld [vmem:[#allocation2 + $0xc10] sm:$0xff] }
 0x123   :  { %1192 = vmatpush1.msra.mxu1 %v526_v12  ;;  %1122 = vmatprep.subr.mxu0 %v395_v13  ;;  %v487_v54 = vld [vmem:[#allocation2 + $0xbf8] sm:$0xff]  ;;  %v486_v56 = vld [vmem:[#allocation2 + $0xbf0] sm:$0xff] }
 0x124   :  { %1193 = vmatprep.subr.mxu1 %v523_v14  ;;  %1123 = vmatpush1.msra.mxu0 %v394_v15  ;;  %v615_v55 = vld [vmem:[#allocation2 + $0xff8] sm:$0xff]  ;;  %v614_v57 = vld [vmem:[#allocation2 + $0xff0] sm:$0xff] }
 0x125   :  { %1194 = vmatpush1.msra.mxu1 %v522_v17  ;;  %1124 = vmatprep.subr.mxu0 %v391_v18  ;;  %v483_v8 = vld [vmem:[#allocation2 + $0xbd8] sm:$0xff]  ;;  %v482_v62 = vld [vmem:[#allocation2 + $0xbd0] sm:$0xff] }
 0x126   :  { %1195 = vmatprep.subr.mxu1 %v519_v19  ;;  %1125 = vmatpush1.msra.mxu0 %v390_v20  ;;  %v611_v58 = vld [vmem:[#allocation2 + $0xfd8] sm:$0xff]  ;;  %v610_v59 = vld [vmem:[#allocation2 + $0xfd0] sm:$0xff] }
 0x127   :  { %1196 = vmatpush1.msra.mxu1 %v518_v22  ;;  %1126 = vmatprep.subr.mxu0 %v387_v23  ;;  %v479_v11 = vld [vmem:[#allocation2 + $0xbb8] sm:$0xff]  ;;  %v478_v61 = vld [vmem:[#allocation2 + $0xbb0] sm:$0xff] }
 0x128   :  { %1197 = vmatprep.subr.mxu1 %v515_v24  ;;  %1127 = vmatpush1.msra.mxu0 %v386_v25  ;;  %v607_v60 = vld [vmem:[#allocation2 + $0xfb8] sm:$0xff]  ;;  %v606_v3 = vld [vmem:[#allocation2 + $0xfb0] sm:$0xff] }
 0x129   :  { %1198 = vmatpush1.msra.mxu1 %v514_v27  ;;  %1128 = vmatprep.subr.mxu0 %v383_v28  ;;  %v475_v63 = vld [vmem:[#allocation2 + $0xb98] sm:$0xff]  ;;  %v474_v1 = vld [vmem:[#allocation2 + $0xb90] sm:$0xff] }
 0x12a   :  { %1199 = vmatprep.subr.mxu1 %v511_v29  ;;  %1129 = vmatpush1.msra.mxu0 %v382_v30  ;;  %v603_v0 = vld [vmem:[#allocation2 + $0xf98] sm:$0xff]  ;;  %v602_v2 = vld [vmem:[#allocation2 + $0xf90] sm:$0xff] }
 0x12b   :  { %1200 = vmatpush1.msra.mxu1 %v510_v31  ;;  %1130 = vmatprep.subr.mxu0 %v379_v32  ;;  %v471_v4 = vld [vmem:[#allocation2 + $0xb78] sm:$0xff]  ;;  %v470_v6 = vld [vmem:[#allocation2 + $0xb70] sm:$0xff] }
 0x12c   :  { %1201 = vmatprep.subr.mxu1 %v507_v33  ;;  %1131 = vmatpush1.msra.mxu0 %v378_v34  ;;  %v599_v5 = vld [vmem:[#allocation2 + $0xf78] sm:$0xff]  ;;  %v598_v7 = vld [vmem:[#allocation2 + $0xf70] sm:$0xff] }
 0x12d   :  { %1202 = vmatpush1.msra.mxu1 %v506_v35  ;;  %1132 = vmatprep.subr.mxu0 %v375_v36  ;;  %v467_v9 = vld [vmem:[#allocation2 + $0xb58] sm:$0xff]  ;;  %v466_v12 = vld [vmem:[#allocation2 + $0xb50] sm:$0xff] }
 0x12e   :  { %1203 = vmatprep.subr.mxu1 %v503_v37  ;;  %1133 = vmatpush1.msra.mxu0 %v374_v38  ;;  %v595_v10 = vld [vmem:[#allocation2 + $0xf58] sm:$0xff]  ;;  %v594_v13 = vld [vmem:[#allocation2 + $0xf50] sm:$0xff] }
 0x12f   :  { %1204 = vmatpush1.msra.mxu1 %v502_v39  ;;  %1134 = vmatprep.subr.mxu0 %v371_v40  ;;  %v463_v14 = vld [vmem:[#allocation2 + $0xb38] sm:$0xff]  ;;  %v462_v17 = vld [vmem:[#allocation2 + $0xb30] sm:$0xff] }
 0x130   :  { %1205 = vmatprep.subr.mxu1 %v499_v42  ;;  %1135 = vmatpush1.msra.mxu0 %v370_v43  ;;  %v591_v15 = vld [vmem:[#allocation2 + $0xf38] sm:$0xff]  ;;  %v590_v18 = vld [vmem:[#allocation2 + $0xf30] sm:$0xff] }
 0x131   :  { %1206 = vmatpush1.msra.mxu1 %v498_v44  ;;  %1136 = vmatprep.subr.mxu0 %v367_v45  ;;  %v459_v19 = vld [vmem:[#allocation2 + $0xb18] sm:$0xff]  ;;  %v458_v22 = vld [vmem:[#allocation2 + $0xb10] sm:$0xff] }
 0x132   :  { %1207 = vmatprep.subr.mxu1 %v495_v46  ;;  %1137 = vmatpush1.msra.mxu0 %v366_v47  ;;  %v587_v20 = vld [vmem:[#allocation2 + $0xf18] sm:$0xff]  ;;  %v586_v23 = vld [vmem:[#allocation2 + $0xf10] sm:$0xff] }
 0x133   :  { %1208 = vmatpush1.msra.mxu1 %v494_v48  ;;  %1138 = vmatprep.subr.mxu0 %v363_v49  ;;  %v455_v24 = vld [vmem:[#allocation2 + $0xaf8] sm:$0xff]  ;;  %v454_v27 = vld [vmem:[#allocation2 + $0xaf0] sm:$0xff] }
 0x134   :  { %1209 = vmatprep.subr.mxu1 %v491_v50  ;;  %1139 = vmatpush1.msra.mxu0 %v362_v51  ;;  %v583_v25 = vld [vmem:[#allocation2 + $0xef8] sm:$0xff]  ;;  %v582_v28 = vld [vmem:[#allocation2 + $0xef0] sm:$0xff] }
 0x135   :  { %1210 = vmatpush1.msra.mxu1 %v490_v53  ;;  %1140 = vmatprep.subr.mxu0 %v487_v54  ;;  %v451_v29 = vld [vmem:[#allocation2 + $0xad8] sm:$0xff]  ;;  %v450_v31 = vld [vmem:[#allocation2 + $0xad0] sm:$0xff] }
 0x136   :  { %1211 = vmatprep.subr.mxu1 %v615_v55  ;;  %1141 = vmatpush2.msra.mxu0 %v486_v56  ;;  %v579_v30 = vld [vmem:[#allocation2 + $0xed8] sm:$0xff]  ;;  %v578_v32 = vld [vmem:[#allocation2 + $0xed0] sm:$0xff] }
 0x137   :  { %1212 = vmatpush2.msra.mxu1 %v614_v57  ;;  %1142 = vmatprep.subr.mxu0 %v483_v8  ;;  %v447_v33 = vld [vmem:[#allocation2 + $0xab8] sm:$0xff]  ;;  %v446_v35 = vld [vmem:[#allocation2 + $0xab0] sm:$0xff] }
 0x138   :  { %1213 = vmatprep.subr.mxu1 %v611_v58  ;;  %1143 = vmatpush2.msra.mxu0 %v482_v62  ;;  %v575_v34 = vld [vmem:[#allocation2 + $0xeb8] sm:$0xff]  ;;  %v574_v36 = vld [vmem:[#allocation2 + $0xeb0] sm:$0xff] }
 0x139   :  { %1214 = vmatpush2.msra.mxu1 %v610_v59  ;;  %1144 = vmatprep.subr.mxu0 %v479_v11  ;;  %v443_v37 = vld [vmem:[#allocation2 + $0xa98] sm:$0xff]  ;;  %v442_v39 = vld [vmem:[#allocation2 + $0xa90] sm:$0xff]  ;;  %v1282_v11 = vld [vmem:[#allocation6 + $0xe0] sm:$0xff] }
 0x13a   :  { %1215 = vmatprep.subr.mxu1 %v607_v60  ;;  %1145 = vmatpush2.msra.mxu0 %v478_v61  ;;  %v571_v38 = vld [vmem:[#allocation2 + $0xe98] sm:$0xff]  ;;  %v570_v40 = vld [vmem:[#allocation2 + $0xe90] sm:$0xff] }
 0x13b   :  { %1216 = vmatpush2.msra.mxu1 %v606_v3  ;;  %1146 = vmatprep.subr.mxu0 %v475_v63  ;;  %v439_v42 = vld [vmem:[#allocation2 + $0xa78] sm:$0xff]  ;;  %v438_v44 = vld [vmem:[#allocation2 + $0xa70] sm:$0xff] }
 0x13c   :  { %1217 = vmatprep.subr.mxu1 %v603_v0  ;;  %1147 = vmatpush2.msra.mxu0 %v474_v1  ;;  %v567_v43 = vld [vmem:[#allocation2 + $0xe78] sm:$0xff]  ;;  %v566_v45 = vld [vmem:[#allocation2 + $0xe70] sm:$0xff] }
 0x13d   :  { %1218 = vmatpush2.msra.mxu1 %v602_v2  ;;  %1148 = vmatprep.subr.mxu0 %v471_v4  ;;  %v435_v46 = vld [vmem:[#allocation2 + $0xa58] sm:$0xff]  ;;  %v434_v48 = vld [vmem:[#allocation2 + $0xa50] sm:$0xff] }
 0x13e   :  { %1219 = vmatprep.subr.mxu1 %v599_v5  ;;  %1149 = vmatpush2.msra.mxu0 %v470_v6  ;;  %v563_v47 = vld [vmem:[#allocation2 + $0xe58] sm:$0xff]  ;;  %v562_v49 = vld [vmem:[#allocation2 + $0xe50] sm:$0xff]  ;;  %v1342_v6 = vld [vmem:[#allocation6 + $0x2c0] sm:$0xff] }
 0x13f   :  { %1220 = vmatpush2.msra.mxu1 %v598_v7  ;;  %1150 = vmatprep.subr.mxu0 %v467_v9  ;;  %v431_v50 = vld [vmem:[#allocation2 + $0xa38] sm:$0xff]  ;;  %v430_v53 = vld [vmem:[#allocation2 + $0xa30] sm:$0xff] }
 0x140   :  { %1221 = vmatprep.subr.mxu1 %v595_v10  ;;  %1151 = vmatpush2.msra.mxu0 %v466_v12  ;;  %v559_v51 = vld [vmem:[#allocation2 + $0xe38] sm:$0xff]  ;;  %v558_v54 = vld [vmem:[#allocation2 + $0xe30] sm:$0xff]  ;;  %v1274_v10 = vld [vmem:[#allocation6 + $0xa0] sm:$0xff] }
 0x141   :  { %1222 = vmatpush2.msra.mxu1 %v594_v13  ;;  %1152 = vmatprep.subr.mxu0 %v463_v14  ;;  %v427_v55 = vld [vmem:[#allocation2 + $0xa18] sm:$0xff]  ;;  %v426_v57 = vld [vmem:[#allocation2 + $0xa10] sm:$0xff] }
 0x142   :  { %1223 = vmatprep.subr.mxu1 %v591_v15  ;;  %1153 = vmatpush2.msra.mxu0 %v462_v17  ;;  %v555_v56 = vld [vmem:[#allocation2 + $0xe18] sm:$0xff]  ;;  %v554_v8 = vld [vmem:[#allocation2 + $0xe10] sm:$0xff]  ;;  %v1338_v17 = vld [vmem:[#allocation6 + $0x2a0] sm:$0xff] }
 0x143   :  { %1224 = vmatpush2.msra.mxu1 %v590_v18  ;;  %1154 = vmatprep.subr.mxu0 %v459_v19  ;;  %v1285_v58 = vld [vmem:[#allocation6 + $0xf8] sm:$0xff]  ;;  %v1284_v62 = vld [vmem:[#allocation6 + $0xf0] sm:$0xff]  ;;  %v1283_v59 = vld [vmem:[#allocation6 + $0xe8] sm:$0xff] }
 0x144   :  { %1225 = vmatprep.subr.mxu1 %v587_v20  ;;  %1155 = vmatpush2.msra.mxu0 %v458_v22  ;;  %v1281_v60 = vld [vmem:[#allocation6 + $0xd8] sm:$0xff]  ;;  %v1348_v3 = vld [vmem:[#allocation6 + $0x2f0] sm:$0xff]  ;;  %v1347_v63 = vld [vmem:[#allocation6 + $0x2e8] sm:$0xff] }
 0x145   :  { %1226 = vmatpush2.msra.mxu1 %v586_v23  ;;  %1156 = vmatprep.subr.mxu0 %v455_v24  ;;  %v1349_v61 = vld [vmem:[#allocation6 + $0x2f8] sm:$0xff]  ;;  %v1280_v0 = vld [vmem:[#allocation6 + $0xd0] sm:$0xff]  ;;  %v1279_v1 = vld [vmem:[#allocation6 + $0xc8] sm:$0xff] }
 0x146   :  { %1227 = vmatprep.subr.mxu1 %v583_v25  ;;  %1157 = vmatpush2.msra.mxu0 %v454_v27  ;;  %v1277_v2 = vld [vmem:[#allocation6 + $0xb8] sm:$0xff]  ;;  %v1343_v4 = vld [vmem:[#allocation6 + $0x2c8] sm:$0xff]  ;;  %v1276_v5 = vld [vmem:[#allocation6 + $0xb0] sm:$0xff] }
 0x147   :  { %1228 = vmatpush2.msra.mxu1 %v582_v28  ;;  %1158 = vmatprep.subr.mxu0 %v451_v29  ;;  %v1275_v7 = vld [vmem:[#allocation6 + $0xa8] sm:$0xff]  ;;  %v1341_v9 = vld [vmem:[#allocation6 + $0x2b8] sm:$0xff]  ;;  %v1340_v12 = vld [vmem:[#allocation6 + $0x2b0] sm:$0xff] }
 0x148   :  { %1229 = vmatprep.subr.mxu1 %v579_v30  ;;  %1159 = vmatpush2.msra.mxu0 %v450_v31  ;;  %v1273_v13 = vld [vmem:[#allocation6 + $0x98] sm:$0xff]  ;;  %v1339_v14 = vld [vmem:[#allocation6 + $0x2a8] sm:$0xff]  ;;  %v1272_v15 = vld [vmem:[#allocation6 + $0x90] sm:$0xff] }
 0x149   :  { %1230 = vmatpush2.msra.mxu1 %v578_v32  ;;  %1160 = vmatprep.subr.mxu0 %v447_v33  ;;  %v1271_v18 = vld [vmem:[#allocation6 + $0x88] sm:$0xff]  ;;  %v1337_v19 = vld [vmem:[#allocation6 + $0x298] sm:$0xff]  ;;  %v1270_v20 = vld [vmem:[#allocation6 + $0x80] sm:$0xff] }
 0x14a   :  { %1231 = vmatprep.subr.mxu1 %v575_v34  ;;  %1161 = vmatpush2.msra.mxu0 %v446_v35  ;;  %v1336_v22 = vld [vmem:[#allocation6 + $0x290] sm:$0xff]  ;;  %v1269_v23 = vld [vmem:[#allocation6 + $0x78] sm:$0xff]  ;;  %v1335_v24 = vld [vmem:[#allocation6 + $0x288] sm:$0xff] }
 0x14b   :  { %1232 = vmatpush2.msra.mxu1 %v574_v36  ;;  %1162 = vmatprep.subr.mxu0 %v443_v37  ;;  %v1268_v25 = vld [vmem:[#allocation6 + $0x70] sm:$0xff]  ;;  %v1334_v27 = vld [vmem:[#allocation6 + $0x280] sm:$0xff]  ;;  %v1267_v28 = vld [vmem:[#allocation6 + $0x68] sm:$0xff] }
 0x14c   :  { %1233 = vmatprep.subr.mxu1 %v571_v38  ;;  %1163 = vmatpush2.msra.mxu0 %v442_v39  ;;  %v1333_v29 = vld [vmem:[#allocation6 + $0x278] sm:$0xff]  ;;  %v1266_v30 = vld [vmem:[#allocation6 + $0x60] sm:$0xff]  ;;  %v1332_v31 = vld [vmem:[#allocation6 + $0x270] sm:$0xff] }
 0x14d   :  { %1234 = vmatpush2.msra.mxu1 %v570_v40  ;;  %1164 = vmatprep.subr.mxu0 %v439_v42  ;;  %v1265_v32 = vld [vmem:[#allocation6 + $0x58] sm:$0xff]  ;;  %v1331_v33 = vld [vmem:[#allocation6 + $0x268] sm:$0xff]  ;;  %v1264_v34 = vld [vmem:[#allocation6 + $0x50] sm:$0xff] }
 0x14e   :  { %1235 = vmatprep.subr.mxu1 %v567_v43  ;;  %1165 = vmatpush2.msra.mxu0 %v438_v44  ;;  %v1330_v35 = vld [vmem:[#allocation6 + $0x260] sm:$0xff]  ;;  %v1263_v36 = vld [vmem:[#allocation6 + $0x48] sm:$0xff]  ;;  %v1329_v37 = vld [vmem:[#allocation6 + $0x258] sm:$0xff] }
 0x14f   :  { %1236 = vmatpush2.msra.mxu1 %v566_v45  ;;  %1166 = vmatprep.subr.mxu0 %v435_v46  ;;  %v1262_v38 = vld [vmem:[#allocation6 + $0x40] sm:$0xff]  ;;  %v1328_v39 = vld [vmem:[#allocation6 + $0x250] sm:$0xff]  ;;  %v1261_v40 = vld [vmem:[#allocation6 + $0x38] sm:$0xff] }
 0x150   :  { %1237 = vmatprep.subr.mxu1 %v563_v47  ;;  %1167 = vmatpush2.msra.mxu0 %v434_v48  ;;  %v1327_v42 = vld [vmem:[#allocation6 + $0x248] sm:$0xff]  ;;  %v1260_v43 = vld [vmem:[#allocation6 + $0x30] sm:$0xff]  ;;  %v1326_v44 = vld [vmem:[#allocation6 + $0x240] sm:$0xff] }
 0x151   :  { %1238 = vmatpush2.msra.mxu1 %v562_v49  ;;  %1168 = vmatprep.subr.mxu0 %v431_v50  ;;  %v1259_v45 = vld [vmem:[#allocation6 + $0x28] sm:$0xff]  ;;  %v1325_v46 = vld [vmem:[#allocation6 + $0x238] sm:$0xff]  ;;  %v1258_v47 = vld [vmem:[#allocation6 + $0x20] sm:$0xff] }
 0x152   :  { %1239 = vmatprep.subr.mxu1 %v559_v51  ;;  %1169 = vmatpush2.msra.mxu0 %v430_v53  ;;  %v1324_v48 = vld [vmem:[#allocation6 + $0x230] sm:$0xff]  ;;  %v1257_v49 = vld [vmem:[#allocation6 + $0x18] sm:$0xff]  ;;  %v1323_v50 = vld [vmem:[#allocation6 + $0x228] sm:$0xff] }
 0x153   :  { %1240 = vmatpush2.msra.mxu1 %v558_v54  ;;  %1170 = vmatprep.subr.mxu0 %v427_v55  ;;  %v1256_v51 = vld [vmem:[#allocation6 + $0x10] sm:$0xff]  ;;  %v1322_v53 = vld [vmem:[#allocation6 + $0x220] sm:$0xff]  ;;  %v1255_v54 = vld [vmem:[#allocation6 + $0x8] sm:$0xff] }
 0x154   :  { %1241 = vmatprep.subr.mxu1 %v555_v56  ;;  %1171 = vmatpush2.msra.mxu0 %v426_v57  ;;  %v1321_v55 = vld [vmem:[#allocation6 + $0x218] sm:$0xff]  ;;  %v1254_v56 = vld [vmem:[#allocation6] sm:$0xff]  ;;  %v1320_v57 = vld [vmem:[#allocation6 + $0x210] sm:$0xff] }
 0x155   :  { %1172 = vmatprep.mubr.f32.mxu0 %v1943_v26  ;;  %1242 = vmatpush2.msra.mxu1 %v554_v8  ;;  %v1346_v26 = vld [vmem:[#allocation6 + $0x2e0] sm:$0xff]  ;;  %v1317_v8 = vld [vmem:[#allocation6 + $0x1f8] sm:$0xff] }
 0x156   :  { %1243 = vmatprep.mubr.f32.mxu1 %v1947_v52  ;;  %1173 = vmatmul.mubr.f32.vlgmr.msra.gmra.mxu0 %v1936_v16  ;;  %v1345_v52 = vld [vmem:[#allocation6 + $0x2d8] sm:$0xff]  ;;  %v1278_v16 = vld [vmem:[#allocation6 + $0xc0] sm:$0xff] }
 0x157   :  { %1244 = vmatmul.mubr.f32.vlgmr.msra.gmra.mxu1 %v1939_v21  ;;  %1394 = vmatprep.subr.mxu0 %v1285_v58  ;;  %v1344_v21 = vld [vmem:[#allocation6 + $0x2d0] sm:$0xff]  ;;  %v1319_v58 = vld [vmem:[#allocation6 + $0x208] sm:$0xff] }
 0x158   :  { %1395 = vmatpush1.msra.mxu0 %v1284_v62  ;;  %1465 = vmatprep.subr.mxu1 %v1349_v61  ;;  %v1316_v62 = vld [vmem:[#allocation6 + $0x1f0] sm:$0xff]  ;;  %v1314_v61 = vld [vmem:[#allocation6 + $0x1e0] sm:$0xff] }
 0x159   :  { %1396 = vmatprep.subr.mxu0 %v1283_v59  ;;  %1466 = vmatpush1.msra.mxu1 %v1348_v3  ;;  %v1318_v59 = vld [vmem:[#allocation6 + $0x200] sm:$0xff]  ;;  %v1380_v3 = vld [vmem:[#allocation6 + $0x3f0] sm:$0xff] }
 0x15a   :  { %1397 = vmatpush1.msra.mxu0 %v1282_v11  ;;  %1467 = vmatprep.subr.mxu1 %v1347_v63  ;;  %v1315_v11 = vld [vmem:[#allocation6 + $0x1e8] sm:$0xff]  ;;  %v1313_v63 = vld [vmem:[#allocation6 + $0x1d8] sm:$0xff] }
 0x15b   :  { %1398 = vmatprep.subr.mxu0 %v1281_v60  ;;  %1468 = vmatpush1.msra.mxu1 %v1346_v26  ;;  %v1381_v60 = vld [vmem:[#allocation6 + $0x3f8] sm:$0xff]  ;;  %v1312_v26 = vld [vmem:[#allocation6 + $0x1d0] sm:$0xff] }
 0x15c   :  { %1399 = vmatpush1.msra.mxu0 %v1280_v0  ;;  %1469 = vmatprep.subr.mxu1 %v1345_v52  ;;  %v1379_v0 = vld [vmem:[#allocation6 + $0x3e8] sm:$0xff] }
 0x15d   :  { %1400 = vmatprep.subr.mxu0 %v1279_v1  ;;  %1470 = vmatpush1.msra.mxu1 %v1344_v21  ;;  %v1378_v1 = vld [vmem:[#allocation6 + $0x3e0] sm:$0xff]  ;;  %v1311_v52 = vld [vmem:[#allocation6 + $0x1c8] sm:$0xff] }
 0x15e   :  { %1401 = vmatpush1.msra.mxu0 %v1278_v16  ;;  %1471 = vmatprep.subr.mxu1 %v1343_v4  ;;  %v1377_v16 = vld [vmem:[#allocation6 + $0x3d8] sm:$0xff]  ;;  %v1310_v21 = vld [vmem:[#allocation6 + $0x1c0] sm:$0xff] }
 0x15f   :  { %1402 = vmatprep.subr.mxu0 %v1277_v2  ;;  %1472 = vmatpush1.msra.mxu1 %v1342_v6  ;;  %v1376_v2 = vld [vmem:[#allocation6 + $0x3d0] sm:$0xff]  ;;  %v1309_v4 = vld [vmem:[#allocation6 + $0x1b8] sm:$0xff] }
 0x160   :  { %1403 = vmatpush1.msra.mxu0 %v1276_v5  ;;  %1473 = vmatprep.subr.mxu1 %v1341_v9  ;;  %v1375_v5 = vld [vmem:[#allocation6 + $0x3c8] sm:$0xff]  ;;  %v1308_v6 = vld [vmem:[#allocation6 + $0x1b0] sm:$0xff] }
 0x161   :  { %1404 = vmatprep.subr.mxu0 %v1275_v7  ;;  %1474 = vmatpush1.msra.mxu1 %v1340_v12  ;;  %v1374_v7 = vld [vmem:[#allocation6 + $0x3c0] sm:$0xff]  ;;  %v1307_v9 = vld [vmem:[#allocation6 + $0x1a8] sm:$0xff] }
 0x162   :  { %1405 = vmatpush1.msra.mxu0 %v1274_v10  ;;  %1475 = vmatprep.subr.mxu1 %v1339_v14  ;;  %v1373_v10 = vld [vmem:[#allocation6 + $0x3b8] sm:$0xff]  ;;  %v1306_v12 = vld [vmem:[#allocation6 + $0x1a0] sm:$0xff] }
 0x163   :  { %1406 = vmatprep.subr.mxu0 %v1273_v13  ;;  %1476 = vmatpush1.msra.mxu1 %v1338_v17  ;;  %v1372_v13 = vld [vmem:[#allocation6 + $0x3b0] sm:$0xff]  ;;  %v1305_v14 = vld [vmem:[#allocation6 + $0x198] sm:$0xff] }
 0x164   :  { %1407 = vmatpush1.msra.mxu0 %v1272_v15  ;;  %1477 = vmatprep.subr.mxu1 %v1337_v19  ;;  %v1371_v15 = vld [vmem:[#allocation6 + $0x3a8] sm:$0xff]  ;;  %v1304_v17 = vld [vmem:[#allocation6 + $0x190] sm:$0xff] }
 0x165   :  { %1408 = vmatprep.subr.mxu0 %v1271_v18  ;;  %1478 = vmatpush1.msra.mxu1 %v1336_v22  ;;  %v1370_v18 = vld [vmem:[#allocation6 + $0x3a0] sm:$0xff]  ;;  %v1303_v19 = vld [vmem:[#allocation6 + $0x188] sm:$0xff] }
 0x166   :  { %1409 = vmatpush1.msra.mxu0 %v1270_v20  ;;  %1479 = vmatprep.subr.mxu1 %v1335_v24  ;;  %v1369_v20 = vld [vmem:[#allocation6 + $0x398] sm:$0xff]  ;;  %v1302_v22 = vld [vmem:[#allocation6 + $0x180] sm:$0xff]  ;;  %v620_v24 = vsub.s32 0, %v1906_v41 }
 0x167   :  { %1410 = vmatprep.subr.mxu0 %v1269_v23  ;;  %1480 = vmatpush1.msra.mxu1 %v1334_v27  ;;  %v1368_v23 = vld [vmem:[#allocation6 + $0x390] sm:$0xff]  ;;  %v1367_v27 = vld [vmem:[#allocation6 + $0x388] sm:$0xff] }
 0x168   :  { %1411 = vmatpush1.msra.mxu0 %v1268_v25  ;;  %1481 = vmatprep.subr.mxu1 %v1333_v29  ;;  %v1301_v25 = vld [vmem:[#allocation6 + $0x178] sm:$0xff]  ;;  %v1300_v29 = vld [vmem:[#allocation6 + $0x170] sm:$0xff] }
 0x169   :  { %1412 = vmatprep.subr.mxu0 %v1267_v28  ;;  %1482 = vmatpush1.msra.mxu1 %v1332_v31  ;;  %v1962_v28 = vld [vmem:[#allocation4] sm:$0xf]  ;;  %v624_v31 = vsub.s32 1, %v1906_v41 }
 0x16a   :  { %1413 = vmatpush1.msra.mxu0 %v1266_v30  ;;  %1483 = vmatprep.subr.mxu1 %v1331_v33  ;;  %v1366_v30 = vld [vmem:[#allocation6 + $0x380] sm:$0xff]  ;;  %v1365_v33 = vld [vmem:[#allocation6 + $0x378] sm:$0xff] }
 0x16b   :  { %1414 = vmatprep.subr.mxu0 %v1265_v32  ;;  %1484 = vmatpush1.msra.mxu1 %v1330_v35  ;;  %v1299_v32 = vld [vmem:[#allocation6 + $0x168] sm:$0xff]  ;;  %v1298_v35 = vld [vmem:[#allocation6 + $0x160] sm:$0xff] }
 0x16c   :  { %1415 = vmatpush1.msra.mxu0 %v1264_v34  ;;  %1485 = vmatprep.subr.mxu1 %v1329_v37  ;;  %v748_v34 = vpop.f32.mrf.mxu0  ;;  %v621_v37 = vrot.slane %v1962_v28, %v620_v24 }
 0x16d   :  { %1416 = vmatprep.subr.mxu0 %v1263_v36  ;;  %1486 = vmatpush1.msra.mxu1 %v1328_v39  ;;  %v1364_v36 = vld [vmem:[#allocation6 + $0x370] sm:$0xff]  ;;  %v1363_v39 = vld [vmem:[#allocation6 + $0x368] sm:$0xff] }
 0x16e   :  { %1417 = vmatpush1.msra.mxu0 %v1262_v38  ;;  %1487 = vmatprep.subr.mxu1 %v1327_v42  ;;  %v1297_v38 = vld [vmem:[#allocation6 + $0x158] sm:$0xff]  ;;  %v1362_v42 = vld [vmem:[#allocation6 + $0x360] sm:$0xff] }
 0x16f   :  { %1418 = vmatprep.subr.mxu0 %v1261_v40  ;;  %1488 = vmatpush1.msra.mxu1 %v1326_v44  ;;  %v1296_v40 = vld [vmem:[#allocation6 + $0x150] sm:$0xff]  ;;  %v1295_v44 = vld [vmem:[#allocation6 + $0x148] sm:$0xff] }
 0x170   :  { %1419 = vmatpush1.msra.mxu0 %v1260_v43  ;;  %1489 = vmatprep.subr.mxu1 %v1325_v46  ;;  %v625_v43 = vrot.slane %v1962_v28, %v624_v31  ;;  %v819_v46 = vpop.f32.mrf.mxu1 }
 0x171   :  { %1420 = vmatprep.subr.mxu0 %v1259_v45  ;;  %1490 = vmatpush1.msra.mxu1 %v1324_v48  ;;  %v1361_v45 = vld [vmem:[#allocation6 + $0x358] sm:$0xff]  ;;  %v1294_v48 = vld [vmem:[#allocation6 + $0x140] sm:$0xff] }
 0x172   :  { %1421 = vmatpush1.msra.mxu0 %v1258_v47  ;;  %1491 = vmatprep.subr.mxu1 %v1323_v50  ;;  %v750_v47 = vpop.f32.mrf.mxu0  ;;  %v749_v50 = vadd.f32 %v748_v34, %v621_v37  ;;  %v1563_v34 = vld [vmem:[#allocation9 + $0xc8] sm:$0xff]  ;;  %v1546_v37 = vld [vmem:[#allocation9 + $0x40] sm:$0xff] }
 0x173   :  { %1422 = vmatprep.subr.mxu0 %v1257_v49  ;;  %1492 = vmatpush1.msra.mxu1 %v1322_v53  ;;  %v1360_v49 = vld [vmem:[#allocation6 + $0x350] sm:$0xff] }
 0x174   :  { %1423 = vmatpush1.msra.mxu0 %v1256_v51  ;;  %1493 = vmatprep.subr.mxu1 %v1321_v55  ;;  %v1293_v51 = vld [vmem:[#allocation6 + $0x138] sm:$0xff]  ;;  %v1292_v53 = vld [vmem:[#allocation6 + $0x130] sm:$0xff]  ;;  %v1291_v55 = vld [vmem:[#allocation6 + $0x128] sm:$0xff] }
 0x175   :  { %1424 = vmatprep.subr.mxu0 %v1255_v54  ;;  %1494 = vmatpush1.msra.mxu1 %v1320_v57  ;;  %v751_v54 = vadd.f32 %v750_v47, %v625_v43  ;;  %v1290_v57 = vld [vmem:[#allocation6 + $0x120] sm:$0xff]  ;;  %v1559_v43 = vld [vmem:[#allocation9 + $0xa8] sm:$0xff]  ;;  %v628_v47 = vsub.s32 2, %v1906_v41 }
 0x176   :  { %1425 = vmatpush1.msra.mxu0 %v1254_v56  ;;  %1495 = vmatprep.subr.mxu1 %v1319_v58  ;;  %v821_v56 = vpop.f32.mrf.mxu1  ;;  %v1289_v58 = vld [vmem:[#allocation6 + $0x118] sm:$0xff] }
 0x177   :  { %1426 = vmatprep.subr.mxu0 %v1317_v8  ;;  %1496 = vmatpush1.msra.mxu1 %v1318_v59  ;;  %v820_v8 = vadd.f32 %v819_v46, %v749_v50  ;;  %v1288_v59 = vld [vmem:[#allocation6 + $0x110] sm:$0xff]  ;;  %v1542_v46 = vld [vmem:[#allocation9 + $0x20] sm:$0xff]  ;;  %v629_v50 = vrot.slane %v1962_v28, %v628_v47 }
 0x178   :  { %1427 = vmatpush2.msra.mxu0 %v1316_v62  ;;  %1497 = vmatprep.subr.mxu1 %v1381_v60 }
 0x179   :  { %1428 = vmatprep.subr.mxu0 %v1315_v11  ;;  %1498 = vmatpush2.msra.mxu1 %v1380_v3  ;;  %v822_v11 = vadd.f32 %v821_v56, %v751_v54 }
 0x17a   :  { %1429 = vmatpush2.msra.mxu0 %v1314_v61  ;;  %1499 = vmatprep.subr.mxu1 %v1379_v0  ;;  %v1287_v61 = vld [vmem:[#allocation6 + $0x108] sm:$0xff]  ;;  %v1286_v0 = vld [vmem:[#allocation6 + $0x100] sm:$0xff] }
 0x17b   :  { %1430 = vmatprep.subr.mxu0 %v1313_v63  ;;  %1500 = vmatpush2.msra.mxu1 %v1378_v1 }
 0x17c   :  { %1431 = vmatpush2.msra.mxu0 %v1312_v26  ;;  %1501 = vmatprep.subr.mxu1 %v1377_v16  ;;  %v1359_v16 = vld [vmem:[#allocation6 + $0x348] sm:$0xff] }
 0x17d   :  { %1432 = vmatprep.subr.mxu0 %v1311_v52  ;;  %1502 = vmatpush2.msra.mxu1 %v1376_v2  ;;  %v1358_v2 = vld [vmem:[#allocation6 + $0x340] sm:$0xff] }
 0x17e   :  { %1433 = vmatpush2.msra.mxu0 %v1310_v21  ;;  %1503 = vmatprep.subr.mxu1 %v1375_v5 }
 0x17f   :  { %1434 = vmatprep.subr.mxu0 %v1309_v4  ;;  %1504 = vmatpush2.msra.mxu1 %v1374_v7  ;;  %v1357_v4 = vld [vmem:[#allocation6 + $0x338] sm:$0xff] }
 0x180   :  { %1435 = vmatpush2.msra.mxu0 %v1308_v6  ;;  %1505 = vmatprep.subr.mxu1 %v1373_v10  ;;  %v1356_v6 = vld [vmem:[#allocation6 + $0x330] sm:$0xff]  ;;  %v1354_v10 = vld [vmem:[#allocation6 + $0x320] sm:$0xff] }
 0x181   :  { %1436 = vmatprep.subr.mxu0 %v1307_v9  ;;  %1506 = vmatpush2.msra.mxu1 %v1372_v13  ;;  %v1355_v9 = vld [vmem:[#allocation6 + $0x328] sm:$0xff]  ;;  %v1352_v13 = vld [vmem:[#allocation6 + $0x310] sm:$0xff] }
 0x182   :  { %1437 = vmatpush2.msra.mxu0 %v1306_v12  ;;  %1507 = vmatprep.subr.mxu1 %v1371_v15  ;;  %v1353_v12 = vld [vmem:[#allocation6 + $0x318] sm:$0xff]  ;;  %v1350_v15 = vld [vmem:[#allocation6 + $0x300] sm:$0xff] }
 0x183   :  { %1438 = vmatprep.subr.mxu0 %v1305_v14  ;;  %1508 = vmatpush2.msra.mxu1 %v1370_v18  ;;  %v1351_v14 = vld [vmem:[#allocation6 + $0x308] sm:$0xff]  ;;  %v1553_v18 = vld [vmem:[#allocation9 + $0x78] sm:$0xff] }
 0x184   :  { %1439 = vmatpush2.msra.mxu0 %v1304_v17  ;;  %1509 = vmatprep.subr.mxu1 %v1369_v20  ;;  %v1569_v17 = vld [vmem:[#allocation9 + $0xf8] sm:$0xff]  ;;  %v1552_v20 = vld [vmem:[#allocation9 + $0x70] sm:$0xff] }
 0x185   :  { %1440 = vmatprep.subr.mxu0 %v1303_v19  ;;  %1510 = vmatpush2.msra.mxu1 %v1368_v23  ;;  %v1568_v19 = vld [vmem:[#allocation9 + $0xf0] sm:$0xff]  ;;  %v1551_v23 = vld [vmem:[#allocation9 + $0x68] sm:$0xff] }
 0x186   :  { %1441 = vmatpush2.msra.mxu0 %v1302_v22  ;;  %1511 = vmatprep.subr.mxu1 %v1367_v27  ;;  %v1567_v22 = vld [vmem:[#allocation9 + $0xe8] sm:$0xff]  ;;  %v1550_v27 = vld [vmem:[#allocation9 + $0x60] sm:$0xff] }
 0x187   :  { %1442 = vmatprep.subr.mxu0 %v1301_v25  ;;  %1512 = vmatpush2.msra.mxu1 %v1366_v30  ;;  %v1566_v25 = vld [vmem:[#allocation9 + $0xe0] sm:$0xff]  ;;  %v1549_v30 = vld [vmem:[#allocation9 + $0x58] sm:$0xff] }
 0x188   :  { %1443 = vmatpush2.msra.mxu0 %v1300_v29  ;;  %1513 = vmatprep.subr.mxu1 %v1365_v33  ;;  %v1565_v29 = vld [vmem:[#allocation9 + $0xd8] sm:$0xff]  ;;  %v1548_v33 = vld [vmem:[#allocation9 + $0x50] sm:$0xff] }
 0x189   :  { %1444 = vmatprep.subr.mxu0 %v1299_v32  ;;  %1514 = vmatpush2.msra.mxu1 %v1364_v36  ;;  %v1564_v32 = vld [vmem:[#allocation9 + $0xd0] sm:$0xff]  ;;  %v1562_v36 = vld [vmem:[#allocation9 + $0xc0] sm:$0xff] }
 0x18a   :  { %1445 = vmatpush2.msra.mxu0 %v1298_v35  ;;  %1515 = vmatprep.subr.mxu1 %v1363_v39  ;;  %v1547_v35 = vld [vmem:[#allocation9 + $0x48] sm:$0xff]  ;;  %v1545_v39 = vld [vmem:[#allocation9 + $0x38] sm:$0xff] }
 0x18b   :  { %1446 = vmatprep.subr.mxu0 %v1297_v38  ;;  %1516 = vmatpush2.msra.mxu1 %v1362_v42  ;;  %v1561_v38 = vld [vmem:[#allocation9 + $0xb8] sm:$0xff]  ;;  %v1544_v42 = vld [vmem:[#allocation9 + $0x30] sm:$0xff] }
 0x18c   :  { %1447 = vmatpush2.msra.mxu0 %v1296_v40  ;;  %1517 = vmatprep.subr.mxu1 %v1361_v45  ;;  %v1560_v40 = vld [vmem:[#allocation9 + $0xb0] sm:$0xff]  ;;  %v1558_v45 = vld [vmem:[#allocation9 + $0xa0] sm:$0xff] }
 0x18d   :  { %1448 = vmatprep.subr.mxu0 %v1295_v44  ;;  %1518 = vmatpush2.msra.mxu1 %v1360_v49  ;;  %v1543_v44 = vld [vmem:[#allocation9 + $0x28] sm:$0xff] }
 0x18e   :  { %1449 = vmatpush2.msra.mxu0 %v1294_v48  ;;  %1519 = vmatprep.subr.mxu1 %v1359_v16  ;;  %v632_v48 = vsub.s32 3, %v1906_v41  ;;  %v1556_v16 = vld [vmem:[#allocation9 + $0x90] sm:$0xff] }
 0x18f   :  { %1450 = vmatprep.subr.mxu0 %v1293_v51  ;;  %1520 = vmatpush2.msra.mxu1 %v1358_v2  ;;  %v1555_v2 = vld [vmem:[#allocation9 + $0x88] sm:$0xff] }
 0x190   :  { %1451 = vmatpush2.msra.mxu0 %v1292_v53  ;;  %1521 = vmatprep.subr.mxu1 %v1357_v4  ;;  %v633_v51 = vrot.slane %v1962_v28, %v632_v48  ;;  %v1557_v28 = vld [vmem:[#allocation9 + $0x98] sm:$0xff]  ;;  %v1539_v4 = vld [vmem:[#allocation9 + $0x8] sm:$0xff] }
 0x191   :  { %1452 = vmatprep.subr.mxu0 %v1291_v55  ;;  %1522 = vmatpush2.msra.mxu1 %v1356_v6  ;;  %v1538_v6 = vld [vmem:[#allocation9] sm:$0xff] }
 0x192   :  { %v890_v62 = vpop.f32.mrf.mxu0  ;;  %1453 = vmatpush2.msra.mxu0 %v1290_v57  ;;  %1523 = vmatprep.subr.mxu1 %v1355_v9 }
 0x193   :  { %v891_v60 = vadd.f32 %v890_v62, %v820_v8  ;;  %1454 = vmatprep.subr.mxu0 %v1289_v58  ;;  %1524 = vmatpush2.msra.mxu1 %v1354_v10 }
 0x194   :  { %v961_v3 = vpop.f32.mrf.mxu1  ;;  %v892_v63 = vpop.f32.mrf.mxu0  ;;  %1455 = vmatpush2.msra.mxu0 %v1288_v59  ;;  %1525 = vmatprep.subr.mxu1 %v1353_v12 }
 0x195   :  { %v893_v26 = vadd.f32 %v892_v63, %v822_v11  ;;  %v962_v1 = vadd.f32 %v961_v3, %v891_v60  ;;  %1456 = vmatprep.subr.mxu0 %v1287_v61  ;;  %1526 = vmatpush2.msra.mxu1 %v1352_v13 }
 0x196   :  { %v963_v52 = vpop.f32.mrf.mxu1  ;;  %1457 = vmatpush2.msra.mxu0 %v1286_v0  ;;  %1527 = vmatprep.subr.mxu1 %v1351_v14 }
 0x197   :  { %v964_v21 = vadd.f32 %v963_v52, %v893_v26  ;;  %v1250_v7 = vmax.f32 %v962_v1, 0.0  ;;  %1528 = vmatpush2.msra.mxu1 %v1350_v15  ;;  %1657 = vmatprep.subr.mxu0 %v1569_v17  ;;  %v1541_v52 = vld [vmem:[#allocation9 + $0x18] sm:$0xff] }
 0x199   :  { %v1251_v5 = vmax.f32 %v964_v21, 0.0  ;;  %v1540_v21 = vld [vmem:[#allocation9 + $0x10] sm:$0xff] }
 0x19b   :  { %1458 = vmatprep.mubr.f32.mxu0 %v1251_v5  ;;  %v1554_v5 = vld [vmem:[#allocation9 + $0x80] sm:$0xff] }
 0x19c   :  { %1459 = vmatmul.mubr.f32.vlgmr.msra.gmra.mxu0 %v1250_v7  ;;  %v1382_v7 = vld [vmem:[#allocation7] sm:$0x3] }
 0x19d   :  { %1658 = vmatpush3.msra.mxu0 %v1553_v18  ;;  %v1387_v10 = vrot.slane %v1382_v7, %v620_v24  ;;  %v1391_v12 = vrot.slane %v1382_v7, %v624_v31 }
 0x19e   :  { %1659 = vmatprep.subr.mxu0 %v1568_v19 }
 0x19f   :  { %1660 = vmatpush3.msra.mxu0 %v1552_v20 }
 0x1a0   :  { %1661 = vmatprep.subr.mxu0 %v1567_v22 }
 0x1a1   :  { %1662 = vmatpush3.msra.mxu0 %v1551_v23 }
 0x1a2   :  { %1663 = vmatprep.subr.mxu0 %v1566_v25 }
 0x1a3   :  { %1664 = vmatpush3.msra.mxu0 %v1550_v27  ;;  %v1656_v27 = vld [vmem:[#allocation10] ss:$0 sm:$0xff] }
 0x1a4   :  { %1665 = vmatprep.subr.mxu0 %v1565_v29 }
 0x1a5   :  { %1666 = vmatpush3.msra.mxu0 %v1549_v30 }
 0x1a6   :  { %1667 = vmatprep.subr.mxu0 %v1564_v32 }
 0x1a7   :  { %1668 = vmatpush3.msra.mxu0 %v1548_v33 }
 0x1a8   :  { %1669 = vmatprep.subr.mxu0 %v1563_v34 }
 0x1a9   :  { %1670 = vmatpush3.msra.mxu0 %v1547_v35 }
 0x1aa   :  { %1671 = vmatprep.subr.mxu0 %v1562_v36 }
 0x1ab   :  { %1672 = vmatpush3.msra.mxu0 %v1546_v37 }
 0x1ac   :  { %1673 = vmatprep.subr.mxu0 %v1561_v38 }
 0x1ad   :  { %1674 = vmatpush3.msra.mxu0 %v1545_v39 }
 0x1ae   :  { %1675 = vmatprep.subr.mxu0 %v1560_v40 }
 0x1af   :  { %1676 = vmatpush3.msra.mxu0 %v1544_v42 }
 0x1b0   :  { %1677 = vmatprep.subr.mxu0 %v1559_v43 }
 0x1b1   :  { %1678 = vmatpush3.msra.mxu0 %v1543_v44 }
 0x1b2   :  { %1679 = vmatprep.subr.mxu0 %v1558_v45 }
 0x1b3   :  { %1680 = vmatpush3.msra.mxu0 %v1542_v46 }
 0x1b4   :  { %1681 = vmatprep.subr.mxu0 %v1557_v28 }
 0x1b5   :  { %1682 = vmatpush3.msra.mxu0 %v1541_v52 }
 0x1b6   :  { %1683 = vmatprep.subr.mxu0 %v1556_v16 }
 0x1b7   :  { %1684 = vmatpush3.msra.mxu0 %v1540_v21 }
 0x1b8   :  { %1685 = vmatprep.subr.mxu0 %v1555_v2 }
 0x1b9   :  { %1686 = vmatpush3.msra.mxu0 %v1539_v4 }
 0x1ba   :  { %1687 = vmatprep.subr.mxu0 %v1554_v5 }
 0x1bb   :  { %1688 = vmatpush3.msra.mxu0 %v1538_v6 }
 0x1d4   :  { %v1032_v49 = vpop.f32.mrf.mxu0 }
 0x1d5   :  { %v1033_v55 = vadd.f32 %v1032_v49, %v629_v50 }
 0x1d6   :  { %v1103_v53 = vpop.f32.mrf.mxu1  ;;  %v1034_v54 = vpop.f32.mrf.mxu0 }
 0x1d7   :  { %v1035_v56 = vadd.f32 %v1034_v54, %v633_v51  ;;  %v1104_v8 = vadd.f32 %v1103_v53, %v1033_v55 }
 0x1d8   :  { %v1105_v57 = vpop.f32.mrf.mxu1 }
 0x1d9   :  { %v1106_v59 = vadd.f32 %v1105_v57, %v1035_v56 }
 0x216   :  { %v1174_v58 = vpop.f32.mrf.mxu0 }
 0x217   :  { %v1245_v62 = vpop.f32.mrf.mxu1  ;;  %v1175_v11 = vadd.f32 %v1174_v58, %v1104_v8 }
 0x218   :  { %v1176_v60 = vpop.f32.mrf.mxu0 }
 0x219   :  { %v1177_v61 = vadd.f32 %v1176_v60, %v1106_v59  ;;  %v1246_v3 = vadd.f32 %v1245_v62, %v1175_v11  ;;  %v1247_v63 = vpop.f32.mrf.mxu1 }
 0x21b   :  { %v1248_v0 = vadd.f32 %v1247_v63, %v1177_v61  ;;  %v1252_v1 = vmax.f32 %v1246_v3, 0.0 }
 0x21d   :  { %v1253_v26 = vmax.f32 %v1248_v0, 0.0 }
 0x21f   :  { %1529 = vmatprep.mubr.f32.mxu1 %v1253_v26 }
 0x220   :  { %1530 = vmatmul.mubr.f32.vlgmr.msra.gmra.mxu1 %v1252_v1 }
 0x25c   :  { %v1460_v9 = vpop.f32.mrf.mxu0 }
 0x25d   :  { %v1461_v14 = vadd.f32 %v1460_v9, %v1387_v10 }
 0x25e   :  { %v1462_v13 = vpop.f32.mrf.mxu0 }
 0x25f   :  { %v1463_v17 = vadd.f32 %v1462_v13, %v1391_v12 }
 0x2e0   :  { %v1531_v15 = vpop.f32.mrf.mxu1 }
 0x2e1   :  { %v1532_v18 = vadd.f32 %v1531_v15, %v1461_v14 }
 0x2e2   :  { %v1533_v19 = vpop.f32.mrf.mxu1 }
 0x2e3   :  { %v1534_v20 = vadd.f32 %v1533_v19, %v1463_v17  ;;  %v1536_v23 = vmax.f32 %v1532_v18, 0.0 }
 0x2e5   :  { %v1537_v22 = vmax.f32 %v1534_v20, 0.0 }
 0x2e7   :  { %1641 = vmatprep.mubr.f32.mxu0 %v1537_v22 }
 0x2e8   :  { %1642 = vmatmul.mubr.f32.vlgmr.msra.gmra.mxu0 %v1536_v23 }
 0x3a8   :  { %v1689_v25 = vpop.f32.mrf.mxu0 }
 0x3aa   :  { %v1690_v29 = vpop.f32.mrf.mxu0 }
 0x3ab   :  { %v1691_v30 = vadd.f32 %v1690_v29, %v1689_v25 }
 0x3ad   :  { %v1644_v32 = vadd.f32 %v1691_v30, %v1656_v27 }
 0x3af   :  { %1647 = vst [vmem:[%s1989_s7] sm:$0x3] %v1644_v32 }
 0x3b0   :  { %1652 = vsyncpa [#allocation3], 1 }
 0x3b1   :  { %1653 = vsyncpa [#allocation5], 1 }
 0x3b2   :  { %1654 = vsyncpa [#allocation8], 1 }
 0x3b3   :  { %1655 = vsyncpa [#allocation11], 1 }

// kernel: transform_net_forward.9
= control target key start
LH: loop header
LB: loop body
LE: loop exit
PB: predicated region body
PF: predicated region fallthrough
CT: control target
= control target key end

     0   :  { %s1555_s24 = smov 0   ;;  %s1557_s25 = smov 0   ;;  %s1818_s0 = inlined_call_operand.vmem [shape: f32[2,16,3], index: 0, kind: input, shape index: {}]   ;;  %s1819_s1 = inlined_call_operand.vmem [shape: f32[2,3,64], index: 1, kind: input, shape index: {}]   ;;  %s1820_s2 = inlined_call_operand.vmem [shape: f32[1,64], index: 2, kind: input, shape index: {}]   ;;  %s1821_s3 = inlined_call_operand.vmem [shape: bf16[2,64,128], index: 3, kind: input, shape index: {}]   ;;  %s1822_s4 = inlined_call_operand.vmem [shape: f32[1,128], index: 4, kind: input, shape index: {}]   ;;  %s1823_s5 = inlined_call_operand.vmem [shape: bf16[128,1024], index: 5, kind: input, shape index: {}]   ;;  %s1824_s6 = inlined_call_operand.vmem [shape: f32[1,1024], index: 6, kind: input, shape index: {}]   ;;  %s1825_s7 = inlined_call_operand.vmem [shape: f32[2,1,1024], index: 7, kind: output, shape index: {}]  }
   0x1   :  { %s1559_s26 = smov 0  }
   0x2 LB: > { %s29_s27 = sadd.s32 1, %s1505_s25  ;;  %p1344_p0 = scmp.ge.s32.totalorder %s1509_s26, 1  ;;  %s1509_s26 = sphi %s1559_s26, %s17_s26   ;;  %s1505_s25 = sphi %s1557_s25, %s1827_s25   ;;  %s1501_s24 = sphi %s1555_s24, %s1826_s24  }
   0x3   : > { %p31_p1 = scmp.ge.s32.totalorder %s29_s27, 2  ;;  %p275_p2 = scmp.lt.s32.totalorder %s1509_s26, 3 }
   0x5   : > { %s1829_s27 = smov (%p31_p1, %s29_s27), 0  ;;  %p276_p3 = pnand %p1344_p0, %p275_p2 }
   0x6   : > { %p320_p4 = scmp.lt.s32.totalorder (!%p276_p3), %s1501_s24, 1 }
   0x7   : > { %279 = sbr.rel (%p276_p3) target bundleno = 681 (0x2a9), region = 48 }
   0xc   : > { %v1511_v0 = vmov 0.0   ;;  %s1831_s24 = smov (!%p320_p4, %s1501_s24), 1  ;;  %vm365_vm0 = vcmask 1042432   ;;  %vm358_vm1 = vcmask 23552   ;;  %vm1512_vm2 = vmmov 0   ;;  %v590_v8 = vld [vmem:[%s1823_s5 + $0x1c0] sm:$0xff] }
   0xd   : > { %1442 = vmatprep.subr.bf16.mxu1 %v1511_v0  ;;  %s1347_s28 = sshll.u32 %s1831_s24, 2  ;;  %s1428_s29 = sshll.u32 %s1831_s24, 5  ;;  %1450 = vmatprep.mubr.msk.bf16.mxu1 %vm1512_vm2, %v1511_v0  ;;  %v594_v9 = vld [vmem:[%s1823_s5 + $0x1e0] sm:$0xff]  ;;  %v591_v10 = vld [vmem:[%s1823_s5 + $0x1c8] sm:$0xff]  ;;  %vm486_vm3 = vcmask 523264  }
   0xe   : > { %s332_s9 = scalar_lea.vmem %s1819_s1, %s1347_s28  ;;  %s337_s12 = scalar_lea.vmem %s1821_s3, %s1428_s29  ;;  %v1417_v11 = vcombine.low %v590_v8, %v594_v9  ;;  %v1418_v12 = vcombine.high %v590_v8, %v594_v9  ;;  %v595_v13 = vld [vmem:[%s1823_s5 + $0x1e8] sm:$0xff]  ;;  %v582_v14 = vld [vmem:[%s1823_s5 + $0x180] sm:$0xff] }
   0xf   : > { %v350_v1 = vld [vmem:[%s332_s9] sm:$0x7]  ;;  %s1427_s13 = sshll.u32 %s1831_s24, 4  ;;  %v1483_v2 = vld [vmem:[%s337_s12 + $0x18] sm:$0xff]   ;;  %v1484_v5 = vld [vmem:[%s337_s12 + $0x10] sm:$0xff]   ;;  %v1419_v16 = vcombine.low %v591_v10, %v595_v13  ;;  %v1420_v17 = vcombine.high %v591_v10, %v595_v13  ;;  %s1350_s18 = sshll.u32 %s1831_s24, 3 }
  0x10   : > { %1437 = vmatprep.subr.msk.mxu0 %vm365_vm0, %v350_v1  ;;  %s327_s16 = scalar_lea.vmem %s1818_s0, %s1427_s13  ;;  %1443 = vmatpush3.bf16.msra.mxu1 %v1483_v2  ;;  %v1485_v6 = vld [vmem:[%s337_s12 + $0x8] sm:$0xff]   ;;  %v1486_v7 = vld [vmem:[%s337_s12] sm:$0xff]   ;;  %s341_s21 = scalar_lea.vmem %s1825_s7, %s1350_s18 }
  0x11   : > { %1438 = vmatpush3.msk.msra.mxu0 %vm365_vm0, %v350_v1  ;;  %v348_v3 = vld [vmem:[%s327_s16] sm:$0xff]  ;;  %v349_v4 = vld [vmem:[%s327_s16 + $0x8] sm:$0xff]  ;;  %1444 = vmatprep.subr.bf16.mxu1 %v1511_v0 }
  0x12   : > { %1439 = vmatprep.mubr.msk.f32.mxu0 %vm358_vm1, %v348_v3  ;;  %v586_v15 = vld [vmem:[%s1823_s5 + $0x1a0] sm:$0xff]  ;;  %960 = vmatprep.subr.bf16.mxu0 %v1418_v12  ;;  %v583_v41 = vld [vmem:[%s1823_s5 + $0x188] sm:$0xff] }
  0x13   : > { %1440 = vmatmul.mubr.msk.f32.vlgmr.msra.gmra.mxu0 %vm358_vm1, %v349_v4  ;;  %v1410_v18 = vcombine.high %v582_v14, %v586_v15  ;;  %v1409_v19 = vcombine.low %v582_v14, %v586_v15  ;;  %v574_v20 = vld [vmem:[%s1823_s5 + $0x140] sm:$0xff]  ;;  %v587_v42 = vld [vmem:[%s1823_s5 + $0x1a8] sm:$0xff] }
  0x14   : > { %1445 = vmatpush3.bf16.msra.mxu1 %v1484_v5  ;;  %961 = vmatpush1.bf16.msra.mxu0 %v1417_v11  ;;  %v578_v21 = vld [vmem:[%s1823_s5 + $0x160] sm:$0xff]  ;;  %v1412_v46 = vcombine.high %v583_v41, %v587_v42  ;;  %v575_v47 = vld [vmem:[%s1823_s5 + $0x148] sm:$0xff]  ;;  %v1411_v49 = vcombine.low %v583_v41, %v587_v42  ;;  %v576_v41 = vld [vmem:[%s1823_s5 + $0x150] sm:$0xff] }
  0x15   : > { %1446 = vmatprep.subr.bf16.mxu1 %v1511_v0  ;;  %962 = vmatprep.subr.bf16.mxu0 %v1410_v18  ;;  %v1402_v22 = vcombine.high %v574_v20, %v578_v21  ;;  %v1401_v23 = vcombine.low %v574_v20, %v578_v21  ;;  %v566_v24 = vld [vmem:[%s1823_s5 + $0x100] sm:$0xff]  ;;  %v579_v48 = vld [vmem:[%s1823_s5 + $0x168] sm:$0xff]  ;;  %v593_v18 = vld [vmem:[%s1823_s5 + $0x1d8] sm:$0xff] }
  0x16   : > { %v570_v25 = vld [vmem:[%s1823_s5 + $0x120] sm:$0xff]  ;;  %v1404_v50 = vcombine.high %v575_v47, %v579_v48  ;;  %v567_v51 = vld [vmem:[%s1823_s5 + $0x108] sm:$0xff]  ;;  %v1403_v53 = vcombine.low %v575_v47, %v579_v48  ;;  %v597_v20 = vld [vmem:[%s1823_s5 + $0x1f8] sm:$0xff] }
  0x17   : > { %v1394_v26 = vcombine.high %v566_v24, %v570_v25  ;;  %v1393_v27 = vcombine.low %v566_v24, %v570_v25  ;;  %v558_v28 = vld [vmem:[%s1823_s5 + $0xc0] sm:$0xff]  ;;  %v571_v52 = vld [vmem:[%s1823_s5 + $0x128] sm:$0xff]  ;;  %v1513_v24 = vmov 0   ;;  %v580_v42 = vld [vmem:[%s1823_s5 + $0x170] sm:$0xff] }
  0x18   : > { %1447 = vmatpush3.bf16.msra.mxu1 %v1485_v6  ;;  %963 = vmatpush1.bf16.msra.mxu0 %v1409_v19  ;;  %v562_v29 = vld [vmem:[%s1823_s5 + $0xe0] sm:$0xff]  ;;  %v1396_v54 = vcombine.high %v567_v51, %v571_v52  ;;  %v559_v55 = vld [vmem:[%s1823_s5 + $0xc8] sm:$0xff]  ;;  %v1395_v57 = vcombine.low %v567_v51, %v571_v52  ;;  %v1406_v47 = vcombine.high %v576_v41, %v580_v42  ;;  %v569_v51 = vld [vmem:[%s1823_s5 + $0x118] sm:$0xff] }
  0x19   : > { %1448 = vmatprep.subr.bf16.mxu1 %v1511_v0  ;;  %964 = vmatprep.subr.bf16.mxu0 %v1402_v22  ;;  %v1386_v30 = vcombine.high %v558_v28, %v562_v29  ;;  %v1385_v31 = vcombine.low %v558_v28, %v562_v29  ;;  %v550_v32 = vld [vmem:[%s1823_s5 + $0x80] sm:$0xff]  ;;  %v563_v56 = vld [vmem:[%s1823_s5 + $0xe8] sm:$0xff]  ;;  %v1423_v22 = vcombine.low %v593_v18, %v597_v20  ;;  %v573_v52 = vld [vmem:[%s1823_s5 + $0x138] sm:$0xff] }
  0x1a   : > { %v554_v33 = vld [vmem:[%s1823_s5 + $0xa0] sm:$0xff]  ;;  %v1388_v58 = vcombine.high %v559_v55, %v563_v56  ;;  %v551_v59 = vld [vmem:[%s1823_s5 + $0x88] sm:$0xff]  ;;  %v1387_v61 = vcombine.low %v559_v55, %v563_v56  ;;  %992 = vmatprep.mubr.bf16.mxu0 %v1513_v24  ;;  %v1400_v56 = vcombine.high %v569_v51, %v573_v52 }
  0x1b   : > { %v1378_v34 = vcombine.high %v550_v32, %v554_v33  ;;  %v1377_v35 = vcombine.low %v550_v32, %v554_v33  ;;  %v1351_v36 = vld [vmem:[%s1820_s2] ss:$0 sm:$0xff]  ;;  %v555_v60 = vld [vmem:[%s1823_s5 + $0xa8] sm:$0xff]  ;;  %v588_v33 = vld [vmem:[%s1823_s5 + $0x1b0] sm:$0xff] }
  0x1c   : > { %1449 = vmatpush3.bf16.msra.mxu1 %v1486_v7  ;;  %965 = vmatpush1.bf16.msra.mxu0 %v1401_v23  ;;  %v1380_v62 = vcombine.high %v551_v59, %v555_v60  ;;  %v1379_v63 = vcombine.low %v551_v59, %v555_v60  ;;  %v542_v0 = vld [vmem:[%s1823_s5 + $0x40] sm:$0xff]  ;;  %v543_v2 = vld [vmem:[%s1823_s5 + $0x48] sm:$0xff]  ;;  %v1424_v23 = vcombine.high %v593_v18, %v597_v20  ;;  %v561_v59 = vld [vmem:[%s1823_s5 + $0xd8] sm:$0xff] }
  0x1d   : > { %1003 = vmatprep.subr.bf16.mxu1 %v1420_v17  ;;  %966 = vmatprep.subr.bf16.mxu0 %v1394_v26  ;;  %v546_v1 = vld [vmem:[%s1823_s5 + $0x60] sm:$0xff]  ;;  %v547_v4 = vld [vmem:[%s1823_s5 + $0x68] sm:$0xff]  ;;  %v596_v17 = vld [vmem:[%s1823_s5 + $0x1f0] sm:$0xff] }
  0x1e   : > { %v1370_v3 = vcombine.high %v542_v0, %v546_v1  ;;  %v1369_v5 = vcombine.low %v542_v0, %v546_v1  ;;  %v1371_v6 = vcombine.low %v543_v2, %v547_v4  ;;  %v1372_v7 = vcombine.high %v543_v2, %v547_v4  ;;  %v534_v8 = vld [vmem:[%s1823_s5] sm:$0xff]  ;;  %v535_v10 = vld [vmem:[%s1823_s5 + $0x8] sm:$0xff]  ;;  %v565_v60 = vld [vmem:[%s1823_s5 + $0xf8] sm:$0xff] }
  0x1f   : > { %v538_v9 = vld [vmem:[%s1823_s5 + $0x20] sm:$0xff]  ;;  %v539_v12 = vld [vmem:[%s1823_s5 + $0x28] sm:$0xff]  ;;  %v1392_v0 = vcombine.high %v561_v59, %v565_v60  ;;  %v552_v1 = vld [vmem:[%s1823_s5 + $0x90] sm:$0xff] }
  0x20   : > { %967 = vmatpush1.bf16.msra.mxu0 %v1393_v27  ;;  %v1362_v11 = vcombine.high %v534_v8, %v538_v9  ;;  %v1361_v13 = vcombine.low %v534_v8, %v538_v9  ;;  %v1363_v14 = vcombine.low %v535_v10, %v539_v12  ;;  %v1364_v15 = vcombine.high %v535_v10, %v539_v12  ;;  %v1355_v25 = vld [vmem:[%s1822_s4] ss:$0 sm:$0xff]  ;;  %v556_v2 = vld [vmem:[%s1823_s5 + $0xb0] sm:$0xff]  ;;  %v557_v4 = vld [vmem:[%s1823_s5 + $0xb8] sm:$0xff] }
  0x21   : > { %968 = vmatprep.subr.bf16.mxu0 %v1386_v30  ;;  %v544_v9 = vld [vmem:[%s1823_s5 + $0x50] sm:$0xff]  ;;  %v549_v12 = vld [vmem:[%s1823_s5 + $0x78] sm:$0xff] }
  0x22   : > { %v548_v10 = vld [vmem:[%s1823_s5 + $0x70] sm:$0xff]  ;;  %v541_v20 = vld [vmem:[%s1823_s5 + $0x38] sm:$0xff] }
  0x23   : > { %v540_v18 = vld [vmem:[%s1823_s5 + $0x30] sm:$0xff] }
  0x24   : > { %969 = vmatpush1.bf16.msra.mxu0 %v1385_v31  ;;  %v584_v31 = vld [vmem:[%s1823_s5 + $0x190] sm:$0xff] }
  0x25   : > { %970 = vmatprep.subr.bf16.mxu0 %v1378_v34  ;;  %v585_v34 = vld [vmem:[%s1823_s5 + $0x198] sm:$0xff] }
  0x28   : > { %971 = vmatpush1.bf16.msra.mxu0 %v1377_v35  ;;  %v589_v35 = vld [vmem:[%s1823_s5 + $0x1b8] sm:$0xff] }
  0x29   : > { %972 = vmatprep.subr.bf16.mxu0 %v1370_v3  ;;  %v553_v3 = vld [vmem:[%s1823_s5 + $0x98] sm:$0xff] }
  0x2a   : > { %v1384_v8 = vcombine.high %v553_v3, %v557_v4 }
  0x2c   : > { %973 = vmatpush1.bf16.msra.mxu0 %v1369_v5 }
  0x2d   : > { %974 = vmatprep.subr.bf16.mxu0 %v1362_v11  ;;  %v545_v11 = vld [vmem:[%s1823_s5 + $0x58] sm:$0xff] }
  0x30   : > { %975 = vmatpush1.bf16.msra.mxu0 %v1361_v13  ;;  %v1381_v13 = vcombine.low %v552_v1, %v556_v2 }
  0xd3   : > { %v1441_v37 = vpop.f32.mrf.mxu0 }
  0xd4   : > { %v441_v38 = vadd.f32 %v1441_v37, %v1351_v36 }
  0xd5   : > { %v435_v39 = vpop.f32.mrf.mxu0 }
  0xd6   : > { %v436_v40 = vadd.f32 %v1351_v36, %v435_v39  ;;  %v445_v43 = vmax.f32 %v441_v38, 0.0  ;;  %v1414_v39 = vcombine.high %v584_v31, %v588_v33 }
  0xd8   : > { %v444_v44 = vmax.f32 %v436_v40, 0.0  ;;  %v1416_v40 = vcombine.high %v585_v34, %v589_v35 }
  0xda   : > { %v446_v45 = vpack.c.bf16 %v445_v43, %v444_v44  ;;  %v577_v43 = vld [vmem:[%s1823_s5 + $0x158] sm:$0xff] }
  0xdb   : > { %v581_v44 = vld [vmem:[%s1823_s5 + $0x178] sm:$0xff] }
  0xdc   : > { %1451 = vmatmul.mubr.msk.bf16.vlgmr.msra.gmra.mxu1 %vm486_vm3, %v446_v45  ;;  %v1413_v45 = vcombine.low %v584_v31, %v588_v33  ;;  %v1408_v48 = vcombine.high %v577_v43, %v581_v44 }
  0xdd   : > { %1004 = vmatpush1.bf16.msra.mxu1 %v1419_v16  ;;  %v592_v16 = vld [vmem:[%s1823_s5 + $0x1d0] sm:$0xff]  ;;  %1035 = vmatprep.mubr.bf16.mxu1 %v1513_v24 }
  0xde   : > { %1005 = vmatprep.subr.bf16.mxu1 %v1412_v46  ;;  %v1422_v19 = vcombine.high %v592_v16, %v596_v17  ;;  %v1421_v21 = vcombine.low %v592_v16, %v596_v17  ;;  %v1415_v46 = vcombine.low %v585_v34, %v589_v35  ;;  %v1376_v16 = vcombine.high %v545_v11, %v549_v12  ;;  %v536_v17 = vld [vmem:[%s1823_s5 + $0x10] sm:$0xff] }
  0xe0   : > { %1046 = vmatprep.subr.bf16.mxu0 %v1422_v19  ;;  %v537_v19 = vld [vmem:[%s1823_s5 + $0x18] sm:$0xff] }
  0xe1   : > { %1006 = vmatpush1.bf16.msra.mxu1 %v1411_v49  ;;  %v568_v49 = vld [vmem:[%s1823_s5 + $0x110] sm:$0xff] }
  0xe2   : > { %1007 = vmatprep.subr.bf16.mxu1 %v1404_v50  ;;  %v572_v50 = vld [vmem:[%s1823_s5 + $0x130] sm:$0xff] }
  0xe3   : > { %v1398_v55 = vcombine.high %v568_v49, %v572_v50 }
  0xe5   : > { %1008 = vmatpush1.bf16.msra.mxu1 %v1403_v53  ;;  %v1405_v53 = vcombine.low %v576_v41, %v580_v42 }
  0xe6   : > { %1009 = vmatprep.subr.bf16.mxu1 %v1396_v54  ;;  %v1407_v54 = vcombine.low %v577_v43, %v581_v44 }
  0xe9   : > { %1010 = vmatpush1.bf16.msra.mxu1 %v1395_v57  ;;  %v560_v57 = vld [vmem:[%s1823_s5 + $0xd0] sm:$0xff] }
  0xea   : > { %1011 = vmatprep.subr.bf16.mxu1 %v1388_v58  ;;  %v564_v58 = vld [vmem:[%s1823_s5 + $0xf0] sm:$0xff] }
  0xeb   : > { %v1389_v5 = vcombine.low %v560_v57, %v564_v58 }
  0xed   : > { %1012 = vmatpush1.bf16.msra.mxu1 %v1387_v61  ;;  %v1397_v61 = vcombine.low %v568_v49, %v572_v50 }
  0xee   : > { %1013 = vmatprep.subr.bf16.mxu1 %v1380_v62  ;;  %v1399_v62 = vcombine.low %v569_v51, %v573_v52 }
  0xf1   : > { %1014 = vmatpush1.bf16.msra.mxu1 %v1379_v63  ;;  %v1390_v63 = vcombine.high %v560_v57, %v564_v58 }
  0xf2   : > { %1015 = vmatprep.subr.bf16.mxu1 %v1372_v7  ;;  %v1382_v7 = vcombine.high %v552_v1, %v556_v2 }
  0xf5   : > { %1016 = vmatpush1.bf16.msra.mxu1 %v1371_v6  ;;  %v1391_v6 = vcombine.low %v561_v59, %v565_v60 }
  0xf6   : > { %1017 = vmatprep.subr.bf16.mxu1 %v1364_v15  ;;  %v1374_v15 = vcombine.high %v544_v9, %v548_v10 }
  0xf9   : > { %1018 = vmatpush1.bf16.msra.mxu1 %v1363_v14  ;;  %v1383_v14 = vcombine.low %v553_v3, %v557_v4 }
  0xfa   : > { %1089 = vmatprep.subr.bf16.mxu1 %v1424_v23  ;;  %v1366_v23 = vcombine.high %v536_v17, %v540_v18 }
 0x19c   : > { %v524_v26 = vpop.f32.mrf.mxu1 }
 0x19d   : > { %v525_v28 = vadd.f32 %v1355_v25, %v524_v26  ;;  %v1367_v26 = vcombine.low %v537_v19, %v541_v20 }
 0x19e   : > { %v1452_v27 = vpop.f32.mrf.mxu1 }
 0x19f   : > { %v531_v36 = vmax.f32 %v525_v28, 0.0 }
 0x1a0   : > { %v527_v29 = vpop.f32.mrf.mxu1 }
 0x1a1   : > { %v528_v30 = vadd.f32 %v1355_v25, %v527_v29  ;;  %v1365_v25 = vcombine.low %v536_v17, %v540_v18  ;;  %v600_v29 = vlaneseq }
 0x1a2   : > { %v1453_v32 = vpop.f32.mrf.mxu1 }
 0x1a3   : > { %v532_v37 = vmax.f32 %v528_v30, 0.0  ;;  %v1791_v32 = vshrl.u32 %v600_v29, 7 }
 0x1a5   : > { %v1713_v38 = vpack.c.bf16 %v532_v37, %v531_v36  ;;  %v606_v35 = vsub.s32 1, %v1791_v32  ;;  %v614_v36 = vsub.s32 3, %v1791_v32  ;;  %v602_v37 = vsub.s32 0, %v1791_v32 }
 0x1a6   : > { %v626_v1 = vsub.s32 6, %v1791_v32  ;;  %v622_v4 = vsub.s32 5, %v1791_v32 }
 0x1a7   : > { %993 = vmatmul.mubr.bf16.vlgmr.msra.gmra.mxu0 %v1713_v38  ;;  %1036 = vmatmul.mubr.bf16.vlgmr.msra.gmra.mxu1 %v1713_v38 }
 0x1a8   : > { %1047 = vmatpush1.bf16.msra.mxu0 %v1421_v21  ;;  %1090 = vmatpush1.bf16.msra.mxu1 %v1423_v22  ;;  %v1373_v21 = vcombine.low %v544_v9, %v548_v10  ;;  %v1375_v22 = vcombine.low %v545_v11, %v549_v12 }
 0x1a9   : > { %1048 = vmatprep.subr.bf16.mxu0 %v1414_v39  ;;  %1091 = vmatprep.subr.bf16.mxu1 %v1416_v40  ;;  %v610_v39 = vsub.s32 2, %v1791_v32 }
 0x1aa   : > { %1078 = vmatprep.mubr.bf16.mxu0 %v1513_v24  ;;  %1121 = vmatprep.mubr.bf16.mxu1 %v1513_v24  ;;  %v1368_v24 = vcombine.high %v537_v19, %v541_v20 }
 0x1ac   : > { %1049 = vmatpush1.bf16.msra.mxu0 %v1413_v45  ;;  %1092 = vmatpush1.bf16.msra.mxu1 %v1415_v46 }
 0x1ad   : > { %1050 = vmatprep.subr.bf16.mxu0 %v1406_v47  ;;  %1093 = vmatprep.subr.bf16.mxu1 %v1408_v48 }
 0x1b0   : > { %1051 = vmatpush1.bf16.msra.mxu0 %v1405_v53  ;;  %1094 = vmatpush1.bf16.msra.mxu1 %v1407_v54 }
 0x1b1   : > { %1052 = vmatprep.subr.bf16.mxu0 %v1398_v55  ;;  %1095 = vmatprep.subr.bf16.mxu1 %v1400_v56 }
 0x1b4   : > { %1053 = vmatpush1.bf16.msra.mxu0 %v1397_v61  ;;  %1096 = vmatpush1.bf16.msra.mxu1 %v1399_v62 }
 0x1b5   : > { %1054 = vmatprep.subr.bf16.mxu0 %v1390_v63  ;;  %1097 = vmatprep.subr.bf16.mxu1 %v1392_v0  ;;  %v618_v0 = vsub.s32 4, %v1791_v32 }
 0x1b8   : > { %1055 = vmatpush1.bf16.msra.mxu0 %v1389_v5  ;;  %1098 = vmatpush1.bf16.msra.mxu1 %v1391_v6  ;;  %v630_v5 = vsub.s32 7, %v1791_v32 }
 0x1b9   : > { %1056 = vmatprep.subr.bf16.mxu0 %v1382_v7  ;;  %1099 = vmatprep.subr.bf16.mxu1 %v1384_v8 }
 0x1bc   : > { %1057 = vmatpush1.bf16.msra.mxu0 %v1381_v13  ;;  %1100 = vmatpush1.bf16.msra.mxu1 %v1383_v14 }
 0x1bd   : > { %1058 = vmatprep.subr.bf16.mxu0 %v1374_v15  ;;  %1101 = vmatprep.subr.bf16.mxu1 %v1376_v16 }
 0x1c0   : > { %1059 = vmatpush1.bf16.msra.mxu0 %v1373_v21  ;;  %1102 = vmatpush1.bf16.msra.mxu1 %v1375_v22 }
 0x1c1   : > { %1060 = vmatprep.subr.bf16.mxu0 %v1366_v23  ;;  %1103 = vmatprep.subr.bf16.mxu1 %v1368_v24 }
 0x1c4   : > { %1061 = vmatpush1.bf16.msra.mxu0 %v1365_v25  ;;  %1104 = vmatpush1.bf16.msra.mxu1 %v1367_v26 }
 0x1c7   : > { %1079 = vmatmul.mubr.bf16.vlgmr.msra.gmra.mxu0 %v1713_v38  ;;  %1122 = vmatmul.mubr.bf16.vlgmr.msra.gmra.mxu1 %v1713_v38  ;;  %v598_v38 = vld [vmem:[%s1824_s6] sm:$0xff] }
 0x1c8   : > { %v607_v42 = vrot.slane %v598_v38, %v606_v35  ;;  %v615_v43 = vrot.slane %v598_v38, %v614_v36  ;;  %v603_v44 = vrot.slane %v598_v38, %v602_v37  ;;  %v611_v45 = vrot.slane %v598_v38, %v610_v39 }
 0x1c9   : > { %v619_v10 = vrot.slane %v598_v38, %v618_v0  ;;  %v627_v11 = vrot.slane %v598_v38, %v626_v1  ;;  %v623_v14 = vrot.slane %v598_v38, %v622_v4  ;;  %v631_v16 = vrot.slane %v598_v38, %v630_v5 }
 0x1ca   : > { %v1514_v39 = vmov 1966171168  }
 0x1cb   : > { %v1202_v38 = vunpack.c.l.s4 %v1514_v39 }
 0x267   : > { %v994_v27 = vpop.f32.mrf.mxu0  ;;  %v1037_v28 = vpop.f32.mrf.mxu1 }
 0x268   : > { %v995_v52 = vadd.f32 %v994_v27, %v603_v44  ;;  %v1038_v53 = vadd.f32 %v1037_v28, %v611_v45 }
 0x269   : > { %v996_v30 = vpop.f32.mrf.mxu0  ;;  %v1039_v31 = vpop.f32.mrf.mxu1 }
 0x26a   : > { %v997_v48 = vadd.f32 %v996_v30, %v607_v42  ;;  %v1040_v49 = vadd.f32 %v1039_v31, %v615_v43 }
 0x26b   : > { %v998_v33 = vpop.f32.mrf.mxu0  ;;  %v1041_v34 = vpop.f32.mrf.mxu1 }
 0x26c   : > { %v999_v50 = vadd.f32 %v998_v33, %v603_v44  ;;  %v1042_v51 = vadd.f32 %v1041_v34, %v611_v45 }
 0x26d   : > { %v1000_v40 = vpop.f32.mrf.mxu0  ;;  %v1043_v41 = vpop.f32.mrf.mxu1 }
 0x26e   : > { %v1001_v46 = vadd.f32 %v1000_v40, %v607_v42  ;;  %v1044_v47 = vadd.f32 %v1043_v41, %v615_v43  ;;  %v1133_v56 = vmax.f32 %v995_v52, %v999_v50  ;;  %v1147_v57 = vmax.f32 %v1038_v53, %v1042_v51 }
 0x26f   : > { %v1203_v52 = vunpack.c.0.s8 %v1202_v38 }
 0x270   : > { %v1140_v54 = vmax.f32 %v997_v48, %v1001_v46  ;;  %v1154_v55 = vmax.f32 %v1040_v49, %v1044_v47  ;;  %v1134_v60 = vrot.slane %v1133_v56, 4  ;;  %v1148_v61 = vrot.slane %v1147_v57, 4 }
 0x271   : > { %v1206_v1 = vsub.s32 %v1203_v52, %v1791_v32 }
 0x272   : > { %v1141_v58 = vrot.slane %v1140_v54, 4  ;;  %v1155_v59 = vrot.slane %v1154_v55, 4  ;;  %v1135_v2 = vmax.f32 %v1133_v56, %v1134_v60  ;;  %v1149_v3 = vmax.f32 %v1147_v57, %v1148_v61 }
 0x274   : > { %v1142_v62 = vmax.f32 %v1140_v54, %v1141_v58  ;;  %v1156_v63 = vmax.f32 %v1154_v55, %v1155_v59  ;;  %v1136_v12 = vrot.slane %v1135_v2, 2  ;;  %v1150_v13 = vrot.slane %v1149_v3, 2 }
 0x276   : > { %v1143_v6 = vrot.slane %v1142_v62, 2  ;;  %v1157_v7 = vrot.slane %v1156_v63, 2  ;;  %v1137_v26 = vmax.f32 %v1135_v2, %v1136_v12  ;;  %v1151_v27 = vmax.f32 %v1149_v3, %v1150_v13 }
 0x278   : > { %v1144_v18 = vmax.f32 %v1142_v62, %v1143_v6  ;;  %v1158_v19 = vmax.f32 %v1156_v63, %v1157_v7  ;;  %v1138_v45 = vrot.slane %v1137_v26, 1  ;;  %v1152_v46 = vrot.slane %v1151_v27, 1 }
 0x27a   : > { %v1145_v37 = vrot.slane %v1144_v18, 1  ;;  %v1159_v40 = vrot.slane %v1158_v19, 1  ;;  %v1139_v58 = vmax.f32 %v1137_v26, %v1138_v45  ;;  %v1153_v59 = vmax.f32 %v1151_v27, %v1152_v46 }
 0x27c   : > { %v1146_v51 = vmax.f32 %v1144_v18, %v1145_v37  ;;  %v1160_v53 = vmax.f32 %v1158_v19, %v1159_v40 }
 0x27e   : > { %v1197_v0 = vcombine.low %v1139_v58, %v1146_v51  ;;  %v1198_v2 = vcombine.low %v1153_v59, %v1160_v53 }
 0x287   : > { %v1080_v8 = vpop.f32.mrf.mxu0  ;;  %v1123_v9 = vpop.f32.mrf.mxu1 }
 0x288   : > { %v1081_v22 = vadd.f32 %v1080_v8, %v619_v10  ;;  %v1124_v23 = vadd.f32 %v1123_v9, %v627_v11  ;;  %v1207_v9 = vrot.slane %v1197_v0, %v1206_v1 }
 0x289   : > { %v1082_v15 = vpop.f32.mrf.mxu0  ;;  %v1125_v17 = vpop.f32.mrf.mxu1 }
 0x28a   : > { %v1083_v28 = vadd.f32 %v1082_v15, %v623_v14  ;;  %v1126_v29 = vadd.f32 %v1125_v17, %v631_v16 }
 0x28b   : > { %v1084_v20 = vpop.f32.mrf.mxu0  ;;  %v1127_v21 = vpop.f32.mrf.mxu1 }
 0x28c   : > { %v1085_v24 = vadd.f32 %v1084_v20, %v619_v10  ;;  %v1128_v25 = vadd.f32 %v1127_v21, %v627_v11  ;;  %v1214_v10 = vrot.slane %v1198_v2, %v1206_v1 }
 0x28d   : > { %v1086_v30 = vpop.f32.mrf.mxu0  ;;  %v1129_v31 = vpop.f32.mrf.mxu1 }
 0x28e   : > { %v1161_v33 = vmax.f32 %v1081_v22, %v1085_v24  ;;  %v1175_v34 = vmax.f32 %v1124_v23, %v1128_v25  ;;  %v1087_v35 = vadd.f32 %v1086_v30, %v623_v14  ;;  %v1130_v36 = vadd.f32 %v1129_v31, %v631_v16 }
 0x28f   : > { %v1229_v17 = vcombine.low %v1207_v9, %v1214_v10 }
 0x290   : > { %v1162_v41 = vrot.slane %v1161_v33, 4  ;;  %v1176_v42 = vrot.slane %v1175_v34, 4  ;;  %v1168_v43 = vmax.f32 %v1083_v28, %v1087_v35  ;;  %v1182_v44 = vmax.f32 %v1126_v29, %v1130_v36 }
 0x291   : > { %v1237_v20 = vrot.slane %v1229_v17, %v1206_v1 }
 0x292   : > { %v1163_v47 = vmax.f32 %v1161_v33, %v1162_v41  ;;  %v1177_v48 = vmax.f32 %v1175_v34, %v1176_v42  ;;  %v1169_v49 = vrot.slane %v1168_v43, 4  ;;  %v1183_v50 = vrot.slane %v1182_v44, 4 }
 0x294   : > { %v1164_v54 = vrot.slane %v1163_v47, 2  ;;  %v1178_v55 = vrot.slane %v1177_v48, 2  ;;  %v1170_v56 = vmax.f32 %v1168_v43, %v1169_v49  ;;  %v1184_v57 = vmax.f32 %v1182_v44, %v1183_v50 }
 0x296   : > { %v1165_v60 = vmax.f32 %v1163_v47, %v1164_v54  ;;  %v1179_v61 = vmax.f32 %v1177_v48, %v1178_v55  ;;  %v1171_v62 = vrot.slane %v1170_v56, 2  ;;  %v1185_v63 = vrot.slane %v1184_v57, 2 }
 0x298   : > { %v1166_v3 = vrot.slane %v1165_v60, 1  ;;  %v1180_v4 = vrot.slane %v1179_v61, 1  ;;  %v1172_v5 = vmax.f32 %v1170_v56, %v1171_v62  ;;  %v1186_v6 = vmax.f32 %v1184_v57, %v1185_v63 }
 0x29a   : > { %v1173_v7 = vrot.slane %v1172_v5, 1  ;;  %v1187_v8 = vrot.slane %v1186_v6, 1  ;;  %v1167_v11 = vmax.f32 %v1165_v60, %v1166_v3  ;;  %v1181_v12 = vmax.f32 %v1179_v61, %v1180_v4 }
 0x29c   : > { %v1174_v13 = vmax.f32 %v1172_v5, %v1173_v7  ;;  %v1188_v14 = vmax.f32 %v1186_v6, %v1187_v8 }
 0x29e   : > { %v1199_v15 = vcombine.low %v1167_v11, %v1174_v13  ;;  %v1200_v16 = vcombine.low %v1181_v12, %v1188_v14 }
 0x2a0   : > { %v1221_v18 = vrot.slane %v1199_v15, %v1206_v1  ;;  %v1228_v19 = vrot.slane %v1200_v16, %v1206_v1 }
 0x2a2   : > { %v1230_v32 = vcombine.low %v1221_v18, %v1228_v19 }
 0x2a4   : > { %v1244_v21 = vrot.slane %v1230_v32, %v1206_v1 }
 0x2a6   : > { %v1245_v22 = vcombine.low %v1237_v20, %v1244_v21 }
 0x2a8   : > { %1248 = vst [vmem:[%s341_s21] sm:$0xff] %v1245_v22 }
 0x2a9 PF: > { %s17_s26 = sadd.s32 1, %s1509_s26   ;;  %s1826_s24 = smov %s1505_s25 }
 0x2aa   : > { %p14_p5 = scmp.ge.s32.totalorder %s17_s26, 4   ;;  %s1827_s25 = smov %s1829_s27 }
 0x2ac   :  { %16 = sbr.rel (!%p14_p5) target bundleno = 2 (0x2), region = 88 }

// kernel: transform_net_forward.8
= control target key start
LH: loop header
LB: loop body
LE: loop exit
PB: predicated region body
PF: predicated region fallthrough
CT: control target
= control target key end

     0   :  { %12 = vsyncpa [#allocation3], 0  ;;  %s4021_s24 = smov [#allocation2]   ;;  %s6235_s0 = inlined_call_operand.vmem [shape: f32[2,1024], index: 0, kind: input, shape index: {}]   ;;  %s6236_s1 = inlined_call_operand.vmem [shape: f32[1024,512], index: 1, kind: input, shape index: {}]   ;;  %s6237_s2 = inlined_call_operand.vmem [shape: f32[1,512], index: 2, kind: input, shape index: {}]   ;;  %s6238_s3 = inlined_call_operand.vmem [shape: f32[512,256], index: 3, kind: input, shape index: {}]   ;;  %s6239_s4 = inlined_call_operand.vmem [shape: f32[1,256], index: 4, kind: input, shape index: {}]   ;;  %s6240_s5 = inlined_call_operand.hbm [shape: f32[256,4096], index: 5, kind: input, shape index: {}]   ;;  %s6241_s6 = inlined_call_operand.vmem [shape: f32[1,4096], index: 6, kind: input, shape index: {}]   ;;  %s6242_s7 = inlined_call_operand.vmem [shape: f32[2,4096], index: 7, kind: output, shape index: {}]  }
   0x1   :  { %s28_s25 = sshll.u32 %s4021_s24, 4  ;;  %s29_s25 = int_to_ptr.vmem [resolvable:$true] %s28_s25 }
   0x2   :  { %s4007_s26 = scalar_lea.vmem %s29_s25, 131072  ;;  %p4012_p1 = scmp.lt.s32.totalorder %s29_s25, %s29_s25 }
   0x3   :  { %p4008_p0 = scmp.ne.s32.totalorder %s29_s25, %s4007_s26  ;;  %p4013_p2 = scmp.lt.s32.totalorder %s4007_s26, %s4007_s26 }
   0x5   :  { %p4014_p3 = por %p4013_p2, %p4012_p1 }
   0x7   :  { %p4015_p4 = pnand %p4014_p3, %p4008_p0 }
   0x9   :  { %4018 = shalt.err (!%p4015_p4)
}
   0xa   :  { %s4022_s27 = smov 4096   ;;  %s4023_s28 = smov 256  }
   0xb   :  { %34 = dma.hbm_to_vmem [thread:$0]  %s6240_s5, 131072, %s29_s25, [#allocation3], %s4022_s27, %s4022_s27, %s4023_s28  }
   0xc   :  { %4019 = dma.done.wait [#allocation3], 131072  }
   0xd   :  { %4020 = vsyncadd [#allocation3], 4294836224  ;;  %v103_v0 = vld [vmem:[%s6236_s1 + $0x1e8] sm:$0xff]  ;;  %v102_v2 = vld [vmem:[%s6236_s1 + $0x1e0] sm:$0xff] }
   0xe   :  { %v231_v1 = vld [vmem:[%s6236_s1 + $0x5e8] sm:$0xff]  ;;  %620 = vmatprep.subr.mxu0 %v103_v0  ;;  %v230_v3 = vld [vmem:[%s6236_s1 + $0x5e0] sm:$0xff] }
   0xf   :  { %691 = vmatprep.subr.mxu1 %v231_v1  ;;  %v99_v4 = vld [vmem:[%s6236_s1 + $0x1c8] sm:$0xff]  ;;  %621 = vmatpush1.msra.mxu0 %v102_v2  ;;  %v98_v6 = vld [vmem:[%s6236_s1 + $0x1c0] sm:$0xff] }
  0x10   :  { %v227_v5 = vld [vmem:[%s6236_s1 + $0x5c8] sm:$0xff]  ;;  %692 = vmatpush1.msra.mxu1 %v230_v3  ;;  %v226_v7 = vld [vmem:[%s6236_s1 + $0x5c0] sm:$0xff]  ;;  %622 = vmatprep.subr.mxu0 %v99_v4 }
  0x11   :  { %v95_v8 = vld [vmem:[%s6236_s1 + $0x1a8] sm:$0xff]  ;;  %693 = vmatprep.subr.mxu1 %v227_v5  ;;  %v94_v10 = vld [vmem:[%s6236_s1 + $0x1a0] sm:$0xff]  ;;  %623 = vmatpush1.msra.mxu0 %v98_v6 }
  0x12   :  { %v223_v9 = vld [vmem:[%s6236_s1 + $0x5a8] sm:$0xff]  ;;  %v222_v11 = vld [vmem:[%s6236_s1 + $0x5a0] sm:$0xff]  ;;  %694 = vmatpush1.msra.mxu1 %v226_v7  ;;  %624 = vmatprep.subr.mxu0 %v95_v8 }
  0x13   :  { %v91_v12 = vld [vmem:[%s6236_s1 + $0x188] sm:$0xff]  ;;  %695 = vmatprep.subr.mxu1 %v223_v9  ;;  %v90_v14 = vld [vmem:[%s6236_s1 + $0x180] sm:$0xff]  ;;  %625 = vmatpush1.msra.mxu0 %v94_v10 }
  0x14   :  { %v219_v13 = vld [vmem:[%s6236_s1 + $0x588] sm:$0xff]  ;;  %v218_v15 = vld [vmem:[%s6236_s1 + $0x580] sm:$0xff]  ;;  %696 = vmatpush1.msra.mxu1 %v222_v11  ;;  %626 = vmatprep.subr.mxu0 %v91_v12 }
  0x15   :  { %v87_v16 = vld [vmem:[%s6236_s1 + $0x168] sm:$0xff]  ;;  %697 = vmatprep.subr.mxu1 %v219_v13  ;;  %v86_v18 = vld [vmem:[%s6236_s1 + $0x160] sm:$0xff]  ;;  %627 = vmatpush1.msra.mxu0 %v90_v14 }
  0x16   :  { %v215_v17 = vld [vmem:[%s6236_s1 + $0x568] sm:$0xff]  ;;  %v214_v19 = vld [vmem:[%s6236_s1 + $0x560] sm:$0xff]  ;;  %698 = vmatpush1.msra.mxu1 %v218_v15  ;;  %628 = vmatprep.subr.mxu0 %v87_v16 }
  0x17   :  { %v83_v20 = vld [vmem:[%s6236_s1 + $0x148] sm:$0xff]  ;;  %699 = vmatprep.subr.mxu1 %v215_v17  ;;  %v82_v22 = vld [vmem:[%s6236_s1 + $0x140] sm:$0xff]  ;;  %629 = vmatpush1.msra.mxu0 %v86_v18 }
  0x18   :  { %v211_v21 = vld [vmem:[%s6236_s1 + $0x548] sm:$0xff]  ;;  %v210_v23 = vld [vmem:[%s6236_s1 + $0x540] sm:$0xff]  ;;  %700 = vmatpush1.msra.mxu1 %v214_v19  ;;  %630 = vmatprep.subr.mxu0 %v83_v20 }
  0x19   :  { %v79_v24 = vld [vmem:[%s6236_s1 + $0x128] sm:$0xff]  ;;  %701 = vmatprep.subr.mxu1 %v211_v21  ;;  %v78_v26 = vld [vmem:[%s6236_s1 + $0x120] sm:$0xff]  ;;  %631 = vmatpush1.msra.mxu0 %v82_v22 }
  0x1a   :  { %v207_v25 = vld [vmem:[%s6236_s1 + $0x528] sm:$0xff]  ;;  %v206_v27 = vld [vmem:[%s6236_s1 + $0x520] sm:$0xff]  ;;  %702 = vmatpush1.msra.mxu1 %v210_v23  ;;  %632 = vmatprep.subr.mxu0 %v79_v24 }
  0x1b   :  { %v75_v28 = vld [vmem:[%s6236_s1 + $0x108] sm:$0xff]  ;;  %703 = vmatprep.subr.mxu1 %v207_v25  ;;  %v74_v30 = vld [vmem:[%s6236_s1 + $0x100] sm:$0xff]  ;;  %633 = vmatpush1.msra.mxu0 %v78_v26 }
  0x1c   :  { %v203_v29 = vld [vmem:[%s6236_s1 + $0x508] sm:$0xff]  ;;  %v202_v31 = vld [vmem:[%s6236_s1 + $0x500] sm:$0xff]  ;;  %704 = vmatpush1.msra.mxu1 %v206_v27  ;;  %634 = vmatprep.subr.mxu0 %v75_v28 }
  0x1d   :  { %v71_v32 = vld [vmem:[%s6236_s1 + $0xe8] sm:$0xff]  ;;  %705 = vmatprep.subr.mxu1 %v203_v29  ;;  %v70_v34 = vld [vmem:[%s6236_s1 + $0xe0] sm:$0xff]  ;;  %635 = vmatpush1.msra.mxu0 %v74_v30  ;;  %v556_v30 = vlaneseq }
  0x1e   :  { %v199_v33 = vld [vmem:[%s6236_s1 + $0x4e8] sm:$0xff]  ;;  %v198_v35 = vld [vmem:[%s6236_s1 + $0x4e0] sm:$0xff]  ;;  %706 = vmatpush1.msra.mxu1 %v202_v31  ;;  %636 = vmatprep.subr.mxu0 %v71_v32  ;;  %v4024_v31 = vmov 1983009808  }
  0x1f   :  { %v67_v36 = vld [vmem:[%s6236_s1 + $0xc8] sm:$0xff]  ;;  %707 = vmatprep.subr.mxu1 %v199_v33  ;;  %v66_v38 = vld [vmem:[%s6236_s1 + $0xc0] sm:$0xff]  ;;  %637 = vmatpush1.msra.mxu0 %v70_v34  ;;  %v580_v32 = vunpack.c.l.s4 %v4024_v31 }
  0x20   :  { %v195_v37 = vld [vmem:[%s6236_s1 + $0x4c8] sm:$0xff]  ;;  %v194_v39 = vld [vmem:[%s6236_s1 + $0x4c0] sm:$0xff]  ;;  %708 = vmatpush1.msra.mxu1 %v198_v35  ;;  %638 = vmatprep.subr.mxu0 %v67_v36 }
  0x21   :  { %v63_v40 = vld [vmem:[%s6236_s1 + $0xa8] sm:$0xff]  ;;  %709 = vmatprep.subr.mxu1 %v195_v37  ;;  %v62_v42 = vld [vmem:[%s6236_s1 + $0xa0] sm:$0xff]  ;;  %639 = vmatpush1.msra.mxu0 %v66_v38 }
  0x22   :  { %v191_v41 = vld [vmem:[%s6236_s1 + $0x4a8] sm:$0xff]  ;;  %v190_v43 = vld [vmem:[%s6236_s1 + $0x4a0] sm:$0xff]  ;;  %710 = vmatpush1.msra.mxu1 %v194_v39  ;;  %640 = vmatprep.subr.mxu0 %v63_v40 }
  0x23   :  { %v59_v44 = vld [vmem:[%s6236_s1 + $0x88] sm:$0xff]  ;;  %711 = vmatprep.subr.mxu1 %v191_v41  ;;  %v58_v46 = vld [vmem:[%s6236_s1 + $0x80] sm:$0xff]  ;;  %641 = vmatpush1.msra.mxu0 %v62_v42  ;;  %v4374_v41 = vshrl.u32 %v556_v30, 7  ;;  %v581_v42 = vunpack.c.0.s8 %v580_v32 }
  0x24   :  { %v187_v45 = vld [vmem:[%s6236_s1 + $0x488] sm:$0xff]  ;;  %v186_v47 = vld [vmem:[%s6236_s1 + $0x480] sm:$0xff]  ;;  %712 = vmatpush1.msra.mxu1 %v190_v43  ;;  %642 = vmatprep.subr.mxu0 %v59_v44 }
  0x25   :  { %v55_v48 = vld [vmem:[%s6236_s1 + $0x68] sm:$0xff]  ;;  %713 = vmatprep.subr.mxu1 %v187_v45  ;;  %v54_v50 = vld [vmem:[%s6236_s1 + $0x60] sm:$0xff]  ;;  %643 = vmatpush1.msra.mxu0 %v58_v46 }
  0x26   :  { %v183_v49 = vld [vmem:[%s6236_s1 + $0x468] sm:$0xff]  ;;  %v182_v51 = vld [vmem:[%s6236_s1 + $0x460] sm:$0xff]  ;;  %714 = vmatpush1.msra.mxu1 %v186_v47  ;;  %644 = vmatprep.subr.mxu0 %v55_v48 }
  0x27   :  { %v51_v52 = vld [vmem:[%s6236_s1 + $0x48] sm:$0xff]  ;;  %715 = vmatprep.subr.mxu1 %v183_v49  ;;  %v50_v54 = vld [vmem:[%s6236_s1 + $0x40] sm:$0xff]  ;;  %645 = vmatpush1.msra.mxu0 %v54_v50 }
  0x28   :  { %v179_v53 = vld [vmem:[%s6236_s1 + $0x448] sm:$0xff]  ;;  %v178_v55 = vld [vmem:[%s6236_s1 + $0x440] sm:$0xff]  ;;  %716 = vmatpush1.msra.mxu1 %v182_v51  ;;  %646 = vmatprep.subr.mxu0 %v51_v52  ;;  %v4404_v52 = vsub.s32 %v581_v42, %v4374_v41 }
  0x29   :  { %v47_v56 = vld [vmem:[%s6236_s1 + $0x28] sm:$0xff]  ;;  %717 = vmatprep.subr.mxu1 %v179_v53  ;;  %v46_v58 = vld [vmem:[%s6236_s1 + $0x20] sm:$0xff]  ;;  %647 = vmatpush1.msra.mxu0 %v50_v54 }
  0x2a   :  { %v175_v57 = vld [vmem:[%s6236_s1 + $0x428] sm:$0xff]  ;;  %v174_v59 = vld [vmem:[%s6236_s1 + $0x420] sm:$0xff]  ;;  %718 = vmatpush1.msra.mxu1 %v178_v55  ;;  %648 = vmatprep.subr.mxu0 %v47_v56 }
  0x2b   :  { %v43_v60 = vld [vmem:[%s6236_s1 + $0x8] sm:$0xff]  ;;  %719 = vmatprep.subr.mxu1 %v175_v57  ;;  %v42_v62 = vld [vmem:[%s6236_s1] sm:$0xff]  ;;  %649 = vmatpush1.msra.mxu0 %v46_v58 }
  0x2c   :  { %v171_v61 = vld [vmem:[%s6236_s1 + $0x408] sm:$0xff]  ;;  %v170_v63 = vld [vmem:[%s6236_s1 + $0x400] sm:$0xff]  ;;  %720 = vmatpush1.msra.mxu1 %v174_v59  ;;  %650 = vmatprep.subr.mxu0 %v43_v60 }
  0x2d   :  { %v167_v0 = vld [vmem:[%s6236_s1 + $0x3e8] sm:$0xff]  ;;  %721 = vmatprep.subr.mxu1 %v171_v61  ;;  %v166_v2 = vld [vmem:[%s6236_s1 + $0x3e0] sm:$0xff]  ;;  %651 = vmatpush1.msra.mxu0 %v42_v62 }
  0x2e   :  { %v295_v1 = vld [vmem:[%s6236_s1 + $0x7e8] sm:$0xff]  ;;  %v294_v3 = vld [vmem:[%s6236_s1 + $0x7e0] sm:$0xff]  ;;  %722 = vmatpush1.msra.mxu1 %v170_v63  ;;  %652 = vmatprep.subr.mxu0 %v167_v0 }
  0x2f   :  { %v163_v4 = vld [vmem:[%s6236_s1 + $0x3c8] sm:$0xff]  ;;  %723 = vmatprep.subr.mxu1 %v295_v1  ;;  %v162_v6 = vld [vmem:[%s6236_s1 + $0x3c0] sm:$0xff]  ;;  %653 = vmatpush2.msra.mxu0 %v166_v2 }
  0x30   :  { %v291_v5 = vld [vmem:[%s6236_s1 + $0x7c8] sm:$0xff]  ;;  %v290_v7 = vld [vmem:[%s6236_s1 + $0x7c0] sm:$0xff]  ;;  %724 = vmatpush2.msra.mxu1 %v294_v3  ;;  %654 = vmatprep.subr.mxu0 %v163_v4 }
  0x31   :  { %v159_v8 = vld [vmem:[%s6236_s1 + $0x3a8] sm:$0xff]  ;;  %725 = vmatprep.subr.mxu1 %v291_v5  ;;  %v158_v10 = vld [vmem:[%s6236_s1 + $0x3a0] sm:$0xff]  ;;  %655 = vmatpush2.msra.mxu0 %v162_v6 }
  0x32   :  { %v287_v9 = vld [vmem:[%s6236_s1 + $0x7a8] sm:$0xff]  ;;  %v286_v11 = vld [vmem:[%s6236_s1 + $0x7a0] sm:$0xff]  ;;  %726 = vmatpush2.msra.mxu1 %v290_v7  ;;  %656 = vmatprep.subr.mxu0 %v159_v8 }
  0x33   :  { %v155_v12 = vld [vmem:[%s6236_s1 + $0x388] sm:$0xff]  ;;  %727 = vmatprep.subr.mxu1 %v287_v9  ;;  %v154_v14 = vld [vmem:[%s6236_s1 + $0x380] sm:$0xff]  ;;  %657 = vmatpush2.msra.mxu0 %v158_v10 }
  0x34   :  { %v283_v13 = vld [vmem:[%s6236_s1 + $0x788] sm:$0xff]  ;;  %v282_v15 = vld [vmem:[%s6236_s1 + $0x780] sm:$0xff]  ;;  %728 = vmatpush2.msra.mxu1 %v286_v11  ;;  %658 = vmatprep.subr.mxu0 %v155_v12 }
  0x35   :  { %v151_v16 = vld [vmem:[%s6236_s1 + $0x368] sm:$0xff]  ;;  %729 = vmatprep.subr.mxu1 %v283_v13  ;;  %v150_v18 = vld [vmem:[%s6236_s1 + $0x360] sm:$0xff]  ;;  %659 = vmatpush2.msra.mxu0 %v154_v14 }
  0x36   :  { %v279_v17 = vld [vmem:[%s6236_s1 + $0x768] sm:$0xff]  ;;  %v278_v19 = vld [vmem:[%s6236_s1 + $0x760] sm:$0xff]  ;;  %730 = vmatpush2.msra.mxu1 %v282_v15  ;;  %660 = vmatprep.subr.mxu0 %v151_v16 }
  0x37   :  { %v147_v20 = vld [vmem:[%s6236_s1 + $0x348] sm:$0xff]  ;;  %731 = vmatprep.subr.mxu1 %v279_v17  ;;  %v146_v22 = vld [vmem:[%s6236_s1 + $0x340] sm:$0xff]  ;;  %661 = vmatpush2.msra.mxu0 %v150_v18 }
  0x38   :  { %v275_v21 = vld [vmem:[%s6236_s1 + $0x748] sm:$0xff]  ;;  %v274_v23 = vld [vmem:[%s6236_s1 + $0x740] sm:$0xff]  ;;  %732 = vmatpush2.msra.mxu1 %v278_v19  ;;  %662 = vmatprep.subr.mxu0 %v147_v20 }
  0x39   :  { %v143_v24 = vld [vmem:[%s6236_s1 + $0x328] sm:$0xff]  ;;  %733 = vmatprep.subr.mxu1 %v275_v21  ;;  %v142_v26 = vld [vmem:[%s6236_s1 + $0x320] sm:$0xff]  ;;  %663 = vmatpush2.msra.mxu0 %v146_v22 }
  0x3a   :  { %v271_v25 = vld [vmem:[%s6236_s1 + $0x728] sm:$0xff]  ;;  %v270_v27 = vld [vmem:[%s6236_s1 + $0x720] sm:$0xff]  ;;  %734 = vmatpush2.msra.mxu1 %v274_v23  ;;  %664 = vmatprep.subr.mxu0 %v143_v24 }
  0x3b   :  { %v139_v28 = vld [vmem:[%s6236_s1 + $0x308] sm:$0xff]  ;;  %735 = vmatprep.subr.mxu1 %v271_v25  ;;  %v138_v33 = vld [vmem:[%s6236_s1 + $0x300] sm:$0xff]  ;;  %665 = vmatpush2.msra.mxu0 %v142_v26 }
  0x3c   :  { %v267_v29 = vld [vmem:[%s6236_s1 + $0x708] sm:$0xff]  ;;  %v266_v34 = vld [vmem:[%s6236_s1 + $0x700] sm:$0xff]  ;;  %736 = vmatpush2.msra.mxu1 %v270_v27  ;;  %666 = vmatprep.subr.mxu0 %v139_v28 }
  0x3d   :  { %v135_v35 = vld [vmem:[%s6236_s1 + $0x2e8] sm:$0xff]  ;;  %737 = vmatprep.subr.mxu1 %v267_v29  ;;  %v134_v37 = vld [vmem:[%s6236_s1 + $0x2e0] sm:$0xff]  ;;  %667 = vmatpush2.msra.mxu0 %v138_v33 }
  0x3e   :  { %v263_v36 = vld [vmem:[%s6236_s1 + $0x6e8] sm:$0xff]  ;;  %v262_v38 = vld [vmem:[%s6236_s1 + $0x6e0] sm:$0xff]  ;;  %738 = vmatpush2.msra.mxu1 %v266_v34  ;;  %668 = vmatprep.subr.mxu0 %v135_v35 }
  0x3f   :  { %v131_v39 = vld [vmem:[%s6236_s1 + $0x2c8] sm:$0xff]  ;;  %739 = vmatprep.subr.mxu1 %v263_v36  ;;  %v130_v43 = vld [vmem:[%s6236_s1 + $0x2c0] sm:$0xff]  ;;  %669 = vmatpush2.msra.mxu0 %v134_v37 }
  0x40   :  { %v259_v40 = vld [vmem:[%s6236_s1 + $0x6c8] sm:$0xff]  ;;  %v258_v44 = vld [vmem:[%s6236_s1 + $0x6c0] sm:$0xff]  ;;  %740 = vmatpush2.msra.mxu1 %v262_v38  ;;  %670 = vmatprep.subr.mxu0 %v131_v39 }
  0x41   :  { %v127_v45 = vld [vmem:[%s6236_s1 + $0x2a8] sm:$0xff]  ;;  %741 = vmatprep.subr.mxu1 %v259_v40  ;;  %v126_v47 = vld [vmem:[%s6236_s1 + $0x2a0] sm:$0xff]  ;;  %671 = vmatpush2.msra.mxu0 %v130_v43 }
  0x42   :  { %v255_v46 = vld [vmem:[%s6236_s1 + $0x6a8] sm:$0xff]  ;;  %v254_v48 = vld [vmem:[%s6236_s1 + $0x6a0] sm:$0xff]  ;;  %742 = vmatpush2.msra.mxu1 %v258_v44  ;;  %672 = vmatprep.subr.mxu0 %v127_v45 }
  0x43   :  { %v40_v49 = vld [vmem:[%s6235_s0] sm:$0xff]  ;;  %v123_v50 = vld [vmem:[%s6236_s1 + $0x288] sm:$0xff]  ;;  %743 = vmatprep.subr.mxu1 %v255_v46  ;;  %673 = vmatpush2.msra.mxu0 %v126_v47 }
  0x44   :  { %v251_v51 = vld [vmem:[%s6236_s1 + $0x688] sm:$0xff]  ;;  %v122_v53 = vld [vmem:[%s6236_s1 + $0x280] sm:$0xff]  ;;  %744 = vmatpush2.msra.mxu1 %v254_v48  ;;  %v578_v57 = vcombine.high %v40_v49, %v40_v49  ;;  %674 = vmatprep.subr.mxu0 %v123_v50  ;;  %v4431_v62 = vrot.slane %v40_v49, %v4404_v52 }
  0x45   :  { %v250_v54 = vld [vmem:[%s6236_s1 + $0x680] sm:$0xff]  ;;  %v119_v55 = vld [vmem:[%s6236_s1 + $0x268] sm:$0xff]  ;;  %745 = vmatprep.subr.mxu1 %v251_v51  ;;  %675 = vmatpush2.msra.mxu0 %v122_v53 }
  0x46   :  { %v247_v56 = vld [vmem:[%s6236_s1 + $0x668] sm:$0xff]  ;;  %v118_v58 = vld [vmem:[%s6236_s1 + $0x260] sm:$0xff]  ;;  %746 = vmatpush2.msra.mxu1 %v250_v54  ;;  %676 = vmatprep.subr.mxu0 %v119_v55  ;;  %v4446_v3 = vrot.slane %v578_v57, %v4404_v52  ;;  %v4462_v8 = vcombine.high %v4431_v62, %v4431_v62 }
  0x47   :  { %v246_v59 = vld [vmem:[%s6236_s1 + $0x660] sm:$0xff]  ;;  %v115_v60 = vld [vmem:[%s6236_s1 + $0x248] sm:$0xff]  ;;  %747 = vmatprep.subr.mxu1 %v247_v56  ;;  %677 = vmatpush2.msra.mxu0 %v118_v58 }
  0x48   :  { %v243_v61 = vld [vmem:[%s6236_s1 + $0x648] sm:$0xff]  ;;  %v114_v63 = vld [vmem:[%s6236_s1 + $0x240] sm:$0xff]  ;;  %748 = vmatpush2.msra.mxu1 %v246_v59  ;;  %678 = vmatprep.subr.mxu0 %v115_v60  ;;  %v4472_v11 = vcombine.high %v4446_v3, %v4446_v3 }
  0x49   :  { %v242_v0 = vld [vmem:[%s6236_s1 + $0x640] sm:$0xff]  ;;  %v111_v1 = vld [vmem:[%s6236_s1 + $0x228] sm:$0xff]  ;;  %749 = vmatprep.subr.mxu1 %v243_v61  ;;  %679 = vmatpush2.msra.mxu0 %v114_v63 }
  0x4a   :  { %v239_v2 = vld [vmem:[%s6236_s1 + $0x628] sm:$0xff]  ;;  %v110_v4 = vld [vmem:[%s6236_s1 + $0x220] sm:$0xff]  ;;  %750 = vmatpush2.msra.mxu1 %v242_v0  ;;  %680 = vmatprep.subr.mxu0 %v111_v1 }
  0x4b   :  { %v238_v5 = vld [vmem:[%s6236_s1 + $0x620] sm:$0xff]  ;;  %v107_v6 = vld [vmem:[%s6236_s1 + $0x208] sm:$0xff]  ;;  %751 = vmatprep.subr.mxu1 %v239_v2  ;;  %681 = vmatpush2.msra.mxu0 %v110_v4 }
  0x4c   :  { %v235_v7 = vld [vmem:[%s6236_s1 + $0x608] sm:$0xff]  ;;  %v106_v9 = vld [vmem:[%s6236_s1 + $0x200] sm:$0xff]  ;;  %752 = vmatpush2.msra.mxu1 %v238_v5  ;;  %682 = vmatprep.subr.mxu0 %v107_v6 }
  0x4d   :  { %v234_v10 = vld [vmem:[%s6236_s1 + $0x600] sm:$0xff]  ;;  %753 = vmatprep.subr.mxu1 %v235_v7  ;;  %v359_v12 = vld [vmem:[%s6236_s1 + $0x9e8] sm:$0xff]  ;;  %683 = vmatpush2.msra.mxu0 %v106_v9 }
  0x4e   :  { %684 = vmatprep.mubr.f32.mxu0 %v4462_v8  ;;  %v487_v13 = vld [vmem:[%s6236_s1 + $0xde8] sm:$0xff]  ;;  %754 = vmatpush2.msra.mxu1 %v234_v10  ;;  %v358_v14 = vld [vmem:[%s6236_s1 + $0x9e0] sm:$0xff] }
  0x4f   :  { %685 = vmatmul.mubr.f32.vlgmr.msra.gmra.mxu0 %v4431_v62  ;;  %v486_v15 = vld [vmem:[%s6236_s1 + $0xde0] sm:$0xff]  ;;  %755 = vmatprep.mubr.f32.mxu1 %v4472_v11  ;;  %v355_v16 = vld [vmem:[%s6236_s1 + $0x9c8] sm:$0xff] }
  0x50   :  { %762 = vmatprep.subr.mxu0 %v359_v12  ;;  %v483_v17 = vld [vmem:[%s6236_s1 + $0xdc8] sm:$0xff]  ;;  %833 = vmatprep.subr.mxu1 %v487_v13  ;;  %v354_v18 = vld [vmem:[%s6236_s1 + $0x9c0] sm:$0xff] }
  0x51   :  { %756 = vmatmul.mubr.f32.vlgmr.msra.gmra.mxu1 %v4446_v3  ;;  %v482_v19 = vld [vmem:[%s6236_s1 + $0xdc0] sm:$0xff]  ;;  %763 = vmatpush1.msra.mxu0 %v358_v14  ;;  %v351_v20 = vld [vmem:[%s6236_s1 + $0x9a8] sm:$0xff] }
  0x52   :  { %834 = vmatpush1.msra.mxu1 %v486_v15  ;;  %v479_v21 = vld [vmem:[%s6236_s1 + $0xda8] sm:$0xff]  ;;  %764 = vmatprep.subr.mxu0 %v355_v16  ;;  %v350_v22 = vld [vmem:[%s6236_s1 + $0x9a0] sm:$0xff] }
  0x53   :  { %835 = vmatprep.subr.mxu1 %v483_v17  ;;  %v478_v23 = vld [vmem:[%s6236_s1 + $0xda0] sm:$0xff]  ;;  %765 = vmatpush1.msra.mxu0 %v354_v18  ;;  %v347_v24 = vld [vmem:[%s6236_s1 + $0x988] sm:$0xff] }
  0x54   :  { %836 = vmatpush1.msra.mxu1 %v482_v19  ;;  %v475_v25 = vld [vmem:[%s6236_s1 + $0xd88] sm:$0xff]  ;;  %766 = vmatprep.subr.mxu0 %v351_v20  ;;  %v346_v26 = vld [vmem:[%s6236_s1 + $0x980] sm:$0xff] }
  0x55   :  { %837 = vmatprep.subr.mxu1 %v479_v21  ;;  %v474_v27 = vld [vmem:[%s6236_s1 + $0xd80] sm:$0xff]  ;;  %767 = vmatpush1.msra.mxu0 %v350_v22  ;;  %v343_v28 = vld [vmem:[%s6236_s1 + $0x968] sm:$0xff] }
  0x56   :  { %838 = vmatpush1.msra.mxu1 %v478_v23  ;;  %v471_v29 = vld [vmem:[%s6236_s1 + $0xd68] sm:$0xff]  ;;  %768 = vmatprep.subr.mxu0 %v347_v24  ;;  %v342_v30 = vld [vmem:[%s6236_s1 + $0x960] sm:$0xff] }
  0x57   :  { %839 = vmatprep.subr.mxu1 %v475_v25  ;;  %v470_v31 = vld [vmem:[%s6236_s1 + $0xd60] sm:$0xff]  ;;  %769 = vmatpush1.msra.mxu0 %v346_v26  ;;  %v339_v32 = vld [vmem:[%s6236_s1 + $0x948] sm:$0xff] }
  0x58   :  { %840 = vmatpush1.msra.mxu1 %v474_v27  ;;  %v467_v33 = vld [vmem:[%s6236_s1 + $0xd48] sm:$0xff]  ;;  %770 = vmatprep.subr.mxu0 %v343_v28  ;;  %v338_v34 = vld [vmem:[%s6236_s1 + $0x940] sm:$0xff] }
  0x59   :  { %841 = vmatprep.subr.mxu1 %v471_v29  ;;  %v466_v35 = vld [vmem:[%s6236_s1 + $0xd40] sm:$0xff]  ;;  %771 = vmatpush1.msra.mxu0 %v342_v30  ;;  %v335_v36 = vld [vmem:[%s6236_s1 + $0x928] sm:$0xff] }
  0x5a   :  { %842 = vmatpush1.msra.mxu1 %v470_v31  ;;  %v463_v37 = vld [vmem:[%s6236_s1 + $0xd28] sm:$0xff]  ;;  %772 = vmatprep.subr.mxu0 %v339_v32  ;;  %v334_v38 = vld [vmem:[%s6236_s1 + $0x920] sm:$0xff] }
  0x5b   :  { %843 = vmatprep.subr.mxu1 %v467_v33  ;;  %v462_v39 = vld [vmem:[%s6236_s1 + $0xd20] sm:$0xff]  ;;  %773 = vmatpush1.msra.mxu0 %v338_v34  ;;  %v331_v40 = vld [vmem:[%s6236_s1 + $0x908] sm:$0xff] }
  0x5c   :  { %844 = vmatpush1.msra.mxu1 %v466_v35  ;;  %v459_v42 = vld [vmem:[%s6236_s1 + $0xd08] sm:$0xff]  ;;  %774 = vmatprep.subr.mxu0 %v335_v36  ;;  %v330_v43 = vld [vmem:[%s6236_s1 + $0x900] sm:$0xff] }
  0x5d   :  { %845 = vmatprep.subr.mxu1 %v463_v37  ;;  %v458_v44 = vld [vmem:[%s6236_s1 + $0xd00] sm:$0xff]  ;;  %775 = vmatpush1.msra.mxu0 %v334_v38  ;;  %v327_v45 = vld [vmem:[%s6236_s1 + $0x8e8] sm:$0xff] }
  0x5e   :  { %846 = vmatpush1.msra.mxu1 %v462_v39  ;;  %v455_v46 = vld [vmem:[%s6236_s1 + $0xce8] sm:$0xff]  ;;  %776 = vmatprep.subr.mxu0 %v331_v40  ;;  %v326_v47 = vld [vmem:[%s6236_s1 + $0x8e0] sm:$0xff] }
  0x5f   :  { %847 = vmatprep.subr.mxu1 %v459_v42  ;;  %v454_v48 = vld [vmem:[%s6236_s1 + $0xce0] sm:$0xff]  ;;  %777 = vmatpush1.msra.mxu0 %v330_v43  ;;  %v323_v49 = vld [vmem:[%s6236_s1 + $0x8c8] sm:$0xff] }
  0x60   :  { %848 = vmatpush1.msra.mxu1 %v458_v44  ;;  %v451_v50 = vld [vmem:[%s6236_s1 + $0xcc8] sm:$0xff]  ;;  %778 = vmatprep.subr.mxu0 %v327_v45  ;;  %v322_v51 = vld [vmem:[%s6236_s1 + $0x8c0] sm:$0xff] }
  0x61   :  { %849 = vmatprep.subr.mxu1 %v455_v46  ;;  %v450_v53 = vld [vmem:[%s6236_s1 + $0xcc0] sm:$0xff]  ;;  %779 = vmatpush1.msra.mxu0 %v326_v47  ;;  %v319_v54 = vld [vmem:[%s6236_s1 + $0x8a8] sm:$0xff] }
  0x62   :  { %850 = vmatpush1.msra.mxu1 %v454_v48  ;;  %v447_v55 = vld [vmem:[%s6236_s1 + $0xca8] sm:$0xff]  ;;  %780 = vmatprep.subr.mxu0 %v323_v49  ;;  %v318_v56 = vld [vmem:[%s6236_s1 + $0x8a0] sm:$0xff] }
  0x63   :  { %851 = vmatprep.subr.mxu1 %v451_v50  ;;  %v446_v57 = vld [vmem:[%s6236_s1 + $0xca0] sm:$0xff]  ;;  %781 = vmatpush1.msra.mxu0 %v322_v51  ;;  %v315_v58 = vld [vmem:[%s6236_s1 + $0x888] sm:$0xff] }
  0x64   :  { %852 = vmatpush1.msra.mxu1 %v450_v53  ;;  %v443_v59 = vld [vmem:[%s6236_s1 + $0xc88] sm:$0xff]  ;;  %782 = vmatprep.subr.mxu0 %v319_v54  ;;  %v314_v60 = vld [vmem:[%s6236_s1 + $0x880] sm:$0xff] }
  0x65   :  { %853 = vmatprep.subr.mxu1 %v447_v55  ;;  %v442_v61 = vld [vmem:[%s6236_s1 + $0xc80] sm:$0xff]  ;;  %783 = vmatpush1.msra.mxu0 %v318_v56  ;;  %v311_v63 = vld [vmem:[%s6236_s1 + $0x868] sm:$0xff] }
  0x66   :  { %854 = vmatpush1.msra.mxu1 %v446_v57  ;;  %v439_v0 = vld [vmem:[%s6236_s1 + $0xc68] sm:$0xff]  ;;  %784 = vmatprep.subr.mxu0 %v315_v58  ;;  %v310_v1 = vld [vmem:[%s6236_s1 + $0x860] sm:$0xff] }
  0x67   :  { %855 = vmatprep.subr.mxu1 %v443_v59  ;;  %v438_v2 = vld [vmem:[%s6236_s1 + $0xc60] sm:$0xff]  ;;  %785 = vmatpush1.msra.mxu0 %v314_v60  ;;  %v307_v4 = vld [vmem:[%s6236_s1 + $0x848] sm:$0xff] }
  0x68   :  { %856 = vmatpush1.msra.mxu1 %v442_v61  ;;  %v435_v5 = vld [vmem:[%s6236_s1 + $0xc48] sm:$0xff]  ;;  %786 = vmatprep.subr.mxu0 %v311_v63  ;;  %v306_v6 = vld [vmem:[%s6236_s1 + $0x840] sm:$0xff] }
  0x69   :  { %857 = vmatprep.subr.mxu1 %v439_v0  ;;  %v434_v7 = vld [vmem:[%s6236_s1 + $0xc40] sm:$0xff]  ;;  %787 = vmatpush1.msra.mxu0 %v310_v1  ;;  %v303_v9 = vld [vmem:[%s6236_s1 + $0x828] sm:$0xff] }
  0x6a   :  { %858 = vmatpush1.msra.mxu1 %v438_v2  ;;  %v431_v10 = vld [vmem:[%s6236_s1 + $0xc28] sm:$0xff]  ;;  %788 = vmatprep.subr.mxu0 %v307_v4  ;;  %v302_v12 = vld [vmem:[%s6236_s1 + $0x820] sm:$0xff] }
  0x6b   :  { %859 = vmatprep.subr.mxu1 %v435_v5  ;;  %v430_v13 = vld [vmem:[%s6236_s1 + $0xc20] sm:$0xff]  ;;  %789 = vmatpush1.msra.mxu0 %v306_v6  ;;  %v299_v14 = vld [vmem:[%s6236_s1 + $0x808] sm:$0xff] }
  0x6c   :  { %860 = vmatpush1.msra.mxu1 %v434_v7  ;;  %v427_v15 = vld [vmem:[%s6236_s1 + $0xc08] sm:$0xff]  ;;  %790 = vmatprep.subr.mxu0 %v303_v9  ;;  %v298_v16 = vld [vmem:[%s6236_s1 + $0x800] sm:$0xff] }
  0x6d   :  { %861 = vmatprep.subr.mxu1 %v431_v10  ;;  %v426_v17 = vld [vmem:[%s6236_s1 + $0xc00] sm:$0xff]  ;;  %791 = vmatpush1.msra.mxu0 %v302_v12  ;;  %v423_v18 = vld [vmem:[%s6236_s1 + $0xbe8] sm:$0xff] }
  0x6e   :  { %862 = vmatpush1.msra.mxu1 %v430_v13  ;;  %v551_v19 = vld [vmem:[%s6236_s1 + $0xfe8] sm:$0xff]  ;;  %792 = vmatprep.subr.mxu0 %v299_v14  ;;  %v422_v20 = vld [vmem:[%s6236_s1 + $0xbe0] sm:$0xff] }
  0x6f   :  { %863 = vmatprep.subr.mxu1 %v427_v15  ;;  %v550_v21 = vld [vmem:[%s6236_s1 + $0xfe0] sm:$0xff]  ;;  %793 = vmatpush1.msra.mxu0 %v298_v16  ;;  %v419_v22 = vld [vmem:[%s6236_s1 + $0xbc8] sm:$0xff] }
  0x70   :  { %864 = vmatpush1.msra.mxu1 %v426_v17  ;;  %v547_v23 = vld [vmem:[%s6236_s1 + $0xfc8] sm:$0xff]  ;;  %794 = vmatprep.subr.mxu0 %v423_v18  ;;  %v418_v24 = vld [vmem:[%s6236_s1 + $0xbc0] sm:$0xff] }
  0x71   :  { %865 = vmatprep.subr.mxu1 %v551_v19  ;;  %v546_v25 = vld [vmem:[%s6236_s1 + $0xfc0] sm:$0xff]  ;;  %795 = vmatpush2.msra.mxu0 %v422_v20  ;;  %v415_v26 = vld [vmem:[%s6236_s1 + $0xba8] sm:$0xff] }
  0x72   :  { %866 = vmatpush2.msra.mxu1 %v550_v21  ;;  %v543_v27 = vld [vmem:[%s6236_s1 + $0xfa8] sm:$0xff]  ;;  %796 = vmatprep.subr.mxu0 %v419_v22  ;;  %v414_v28 = vld [vmem:[%s6236_s1 + $0xba0] sm:$0xff] }
  0x73   :  { %867 = vmatprep.subr.mxu1 %v547_v23  ;;  %v542_v29 = vld [vmem:[%s6236_s1 + $0xfa0] sm:$0xff]  ;;  %797 = vmatpush2.msra.mxu0 %v418_v24  ;;  %v411_v30 = vld [vmem:[%s6236_s1 + $0xb88] sm:$0xff] }
  0x74   :  { %868 = vmatpush2.msra.mxu1 %v546_v25  ;;  %v539_v31 = vld [vmem:[%s6236_s1 + $0xf88] sm:$0xff]  ;;  %798 = vmatprep.subr.mxu0 %v415_v26  ;;  %v410_v32 = vld [vmem:[%s6236_s1 + $0xb80] sm:$0xff] }
  0x75   :  { %869 = vmatprep.subr.mxu1 %v543_v27  ;;  %v538_v33 = vld [vmem:[%s6236_s1 + $0xf80] sm:$0xff]  ;;  %799 = vmatpush2.msra.mxu0 %v414_v28  ;;  %v407_v34 = vld [vmem:[%s6236_s1 + $0xb68] sm:$0xff] }
  0x76   :  { %870 = vmatpush2.msra.mxu1 %v542_v29  ;;  %v535_v35 = vld [vmem:[%s6236_s1 + $0xf68] sm:$0xff]  ;;  %800 = vmatprep.subr.mxu0 %v411_v30  ;;  %v406_v36 = vld [vmem:[%s6236_s1 + $0xb60] sm:$0xff]  ;;  %v105_v30 = vld [vmem:[%s6236_s1 + $0x1f8] sm:$0xff] }
  0x77   :  { %871 = vmatprep.subr.mxu1 %v539_v31  ;;  %v534_v37 = vld [vmem:[%s6236_s1 + $0xf60] sm:$0xff]  ;;  %801 = vmatpush2.msra.mxu0 %v410_v32  ;;  %v403_v38 = vld [vmem:[%s6236_s1 + $0xb48] sm:$0xff]  ;;  %v233_v31 = vld [vmem:[%s6236_s1 + $0x5f8] sm:$0xff] }
  0x78   :  { %872 = vmatpush2.msra.mxu1 %v538_v33  ;;  %v531_v39 = vld [vmem:[%s6236_s1 + $0xf48] sm:$0xff]  ;;  %802 = vmatprep.subr.mxu0 %v407_v34  ;;  %v402_v40 = vld [vmem:[%s6236_s1 + $0xb40] sm:$0xff]  ;;  %v104_v32 = vld [vmem:[%s6236_s1 + $0x1f0] sm:$0xff] }
  0x79   :  { %873 = vmatprep.subr.mxu1 %v535_v35  ;;  %v530_v42 = vld [vmem:[%s6236_s1 + $0xf40] sm:$0xff]  ;;  %803 = vmatpush2.msra.mxu0 %v406_v36  ;;  %v399_v43 = vld [vmem:[%s6236_s1 + $0xb28] sm:$0xff]  ;;  %v232_v33 = vld [vmem:[%s6236_s1 + $0x5f0] sm:$0xff] }
  0x7a   :  { %874 = vmatpush2.msra.mxu1 %v534_v37  ;;  %v527_v44 = vld [vmem:[%s6236_s1 + $0xf28] sm:$0xff]  ;;  %804 = vmatprep.subr.mxu0 %v403_v38  ;;  %v398_v45 = vld [vmem:[%s6236_s1 + $0xb20] sm:$0xff]  ;;  %v101_v34 = vld [vmem:[%s6236_s1 + $0x1d8] sm:$0xff] }
  0x7b   :  { %875 = vmatprep.subr.mxu1 %v531_v39  ;;  %v526_v46 = vld [vmem:[%s6236_s1 + $0xf20] sm:$0xff]  ;;  %805 = vmatpush2.msra.mxu0 %v402_v40  ;;  %v395_v47 = vld [vmem:[%s6236_s1 + $0xb08] sm:$0xff]  ;;  %v229_v35 = vld [vmem:[%s6236_s1 + $0x5d8] sm:$0xff] }
  0x7c   :  { %876 = vmatpush2.msra.mxu1 %v530_v42  ;;  %v523_v48 = vld [vmem:[%s6236_s1 + $0xf08] sm:$0xff]  ;;  %806 = vmatprep.subr.mxu0 %v399_v43  ;;  %v394_v49 = vld [vmem:[%s6236_s1 + $0xb00] sm:$0xff]  ;;  %v100_v36 = vld [vmem:[%s6236_s1 + $0x1d0] sm:$0xff] }
  0x7d   :  { %877 = vmatprep.subr.mxu1 %v527_v44  ;;  %v522_v50 = vld [vmem:[%s6236_s1 + $0xf00] sm:$0xff]  ;;  %807 = vmatpush2.msra.mxu0 %v398_v45  ;;  %v391_v51 = vld [vmem:[%s6236_s1 + $0xae8] sm:$0xff]  ;;  %v228_v37 = vld [vmem:[%s6236_s1 + $0x5d0] sm:$0xff] }
  0x7e   :  { %878 = vmatpush2.msra.mxu1 %v526_v46  ;;  %v519_v53 = vld [vmem:[%s6236_s1 + $0xee8] sm:$0xff]  ;;  %808 = vmatprep.subr.mxu0 %v395_v47  ;;  %v390_v54 = vld [vmem:[%s6236_s1 + $0xae0] sm:$0xff]  ;;  %v97_v38 = vld [vmem:[%s6236_s1 + $0x1b8] sm:$0xff] }
  0x7f   :  { %879 = vmatprep.subr.mxu1 %v523_v48  ;;  %v518_v55 = vld [vmem:[%s6236_s1 + $0xee0] sm:$0xff]  ;;  %809 = vmatpush2.msra.mxu0 %v394_v49  ;;  %v387_v56 = vld [vmem:[%s6236_s1 + $0xac8] sm:$0xff]  ;;  %v225_v39 = vld [vmem:[%s6236_s1 + $0x5b8] sm:$0xff] }
  0x80   :  { %880 = vmatpush2.msra.mxu1 %v522_v50  ;;  %v515_v57 = vld [vmem:[%s6236_s1 + $0xec8] sm:$0xff]  ;;  %810 = vmatprep.subr.mxu0 %v391_v51  ;;  %v386_v58 = vld [vmem:[%s6236_s1 + $0xac0] sm:$0xff]  ;;  %v96_v40 = vld [vmem:[%s6236_s1 + $0x1b0] sm:$0xff] }
  0x81   :  { %881 = vmatprep.subr.mxu1 %v519_v53  ;;  %v514_v59 = vld [vmem:[%s6236_s1 + $0xec0] sm:$0xff]  ;;  %811 = vmatpush2.msra.mxu0 %v390_v54  ;;  %v383_v60 = vld [vmem:[%s6236_s1 + $0xaa8] sm:$0xff]  ;;  %v224_v42 = vld [vmem:[%s6236_s1 + $0x5b0] sm:$0xff] }
  0x82   :  { %882 = vmatpush2.msra.mxu1 %v518_v55  ;;  %v511_v61 = vld [vmem:[%s6236_s1 + $0xea8] sm:$0xff]  ;;  %812 = vmatprep.subr.mxu0 %v387_v56  ;;  %v382_v63 = vld [vmem:[%s6236_s1 + $0xaa0] sm:$0xff]  ;;  %v93_v43 = vld [vmem:[%s6236_s1 + $0x198] sm:$0xff] }
  0x83   :  { %883 = vmatprep.subr.mxu1 %v515_v57  ;;  %v510_v0 = vld [vmem:[%s6236_s1 + $0xea0] sm:$0xff]  ;;  %v41_v1 = vld [vmem:[%s6235_s0 + $0x8] sm:$0xff]  ;;  %813 = vmatpush2.msra.mxu0 %v386_v58  ;;  %v221_v44 = vld [vmem:[%s6236_s1 + $0x598] sm:$0xff] }
  0x84   :  { %884 = vmatpush2.msra.mxu1 %v514_v59  ;;  %v379_v2 = vld [vmem:[%s6236_s1 + $0xa88] sm:$0xff]  ;;  %814 = vmatprep.subr.mxu0 %v383_v60  ;;  %v378_v5 = vld [vmem:[%s6236_s1 + $0xa80] sm:$0xff]  ;;  %v595_v10 = vcombine.high %v41_v1, %v41_v1  ;;  %v4836_v16 = vrot.slane %v41_v1, %v4404_v52  ;;  %v92_v45 = vld [vmem:[%s6236_s1 + $0x190] sm:$0xff] }
  0x85   :  { %v507_v4 = vld [vmem:[%s6236_s1 + $0xe88] sm:$0xff]  ;;  %885 = vmatprep.subr.mxu1 %v511_v61  ;;  %v506_v6 = vld [vmem:[%s6236_s1 + $0xe80] sm:$0xff]  ;;  %815 = vmatpush2.msra.mxu0 %v382_v63  ;;  %v220_v46 = vld [vmem:[%s6236_s1 + $0x590] sm:$0xff] }
  0x86   :  { %886 = vmatpush2.msra.mxu1 %v510_v0  ;;  %v375_v7 = vld [vmem:[%s6236_s1 + $0xa68] sm:$0xff]  ;;  %816 = vmatprep.subr.mxu0 %v379_v2  ;;  %v374_v12 = vld [vmem:[%s6236_s1 + $0xa60] sm:$0xff]  ;;  %v4851_v21 = vrot.slane %v595_v10, %v4404_v52  ;;  %v4867_v26 = vcombine.high %v4836_v16, %v4836_v16  ;;  %v89_v47 = vld [vmem:[%s6236_s1 + $0x178] sm:$0xff] }
  0x87   :  { %v503_v9 = vld [vmem:[%s6236_s1 + $0xe68] sm:$0xff]  ;;  %887 = vmatprep.subr.mxu1 %v507_v4  ;;  %v502_v13 = vld [vmem:[%s6236_s1 + $0xe60] sm:$0xff]  ;;  %817 = vmatpush2.msra.mxu0 %v378_v5  ;;  %v217_v48 = vld [vmem:[%s6236_s1 + $0x578] sm:$0xff] }
  0x88   :  { %888 = vmatpush2.msra.mxu1 %v506_v6  ;;  %v371_v14 = vld [vmem:[%s6236_s1 + $0xa48] sm:$0xff]  ;;  %818 = vmatprep.subr.mxu0 %v375_v7  ;;  %v370_v17 = vld [vmem:[%s6236_s1 + $0xa40] sm:$0xff]  ;;  %v4877_v29 = vcombine.high %v4851_v21, %v4851_v21  ;;  %v88_v49 = vld [vmem:[%s6236_s1 + $0x170] sm:$0xff] }
  0x89   :  { %v499_v15 = vld [vmem:[%s6236_s1 + $0xe48] sm:$0xff]  ;;  %889 = vmatprep.subr.mxu1 %v503_v9  ;;  %v498_v18 = vld [vmem:[%s6236_s1 + $0xe40] sm:$0xff]  ;;  %819 = vmatpush2.msra.mxu0 %v374_v12  ;;  %v216_v50 = vld [vmem:[%s6236_s1 + $0x570] sm:$0xff] }
  0x8a   :  { %890 = vmatpush2.msra.mxu1 %v502_v13  ;;  %v367_v19 = vld [vmem:[%s6236_s1 + $0xa28] sm:$0xff]  ;;  %820 = vmatprep.subr.mxu0 %v371_v14  ;;  %v366_v22 = vld [vmem:[%s6236_s1 + $0xa20] sm:$0xff]  ;;  %v85_v51 = vld [vmem:[%s6236_s1 + $0x158] sm:$0xff] }
  0x8b   :  { %v495_v20 = vld [vmem:[%s6236_s1 + $0xe28] sm:$0xff]  ;;  %891 = vmatprep.subr.mxu1 %v499_v15  ;;  %v494_v23 = vld [vmem:[%s6236_s1 + $0xe20] sm:$0xff]  ;;  %821 = vmatpush2.msra.mxu0 %v370_v17  ;;  %v213_v53 = vld [vmem:[%s6236_s1 + $0x558] sm:$0xff] }
  0x8c   :  { %892 = vmatpush2.msra.mxu1 %v498_v18  ;;  %v363_v24 = vld [vmem:[%s6236_s1 + $0xa08] sm:$0xff]  ;;  %822 = vmatprep.subr.mxu0 %v367_v19  ;;  %v362_v27 = vld [vmem:[%s6236_s1 + $0xa00] sm:$0xff]  ;;  %v84_v54 = vld [vmem:[%s6236_s1 + $0x150] sm:$0xff] }
  0x8d   :  { %v491_v25 = vld [vmem:[%s6236_s1 + $0xe08] sm:$0xff]  ;;  %893 = vmatprep.subr.mxu1 %v495_v20  ;;  %823 = vmatpush2.msra.mxu0 %v366_v22  ;;  %v490_v28 = vld [vmem:[%s6236_s1 + $0xe00] sm:$0xff]  ;;  %v212_v55 = vld [vmem:[%s6236_s1 + $0x550] sm:$0xff] }
  0x8e   :  { %894 = vmatpush2.msra.mxu1 %v494_v23  ;;  %824 = vmatprep.subr.mxu0 %v363_v24  ;;  %v81_v56 = vld [vmem:[%s6236_s1 + $0x138] sm:$0xff]  ;;  %v80_v58 = vld [vmem:[%s6236_s1 + $0x130] sm:$0xff] }
  0x8f   :  { %895 = vmatprep.subr.mxu1 %v491_v25  ;;  %825 = vmatpush2.msra.mxu0 %v362_v27  ;;  %v209_v57 = vld [vmem:[%s6236_s1 + $0x538] sm:$0xff]  ;;  %v208_v59 = vld [vmem:[%s6236_s1 + $0x530] sm:$0xff] }
  0x90   :  { %826 = vmatprep.mubr.f32.mxu0 %v4867_v26  ;;  %896 = vmatpush2.msra.mxu1 %v490_v28  ;;  %v77_v60 = vld [vmem:[%s6236_s1 + $0x118] sm:$0xff]  ;;  %v76_v63 = vld [vmem:[%s6236_s1 + $0x110] sm:$0xff] }
  0x91   :  { %827 = vmatmul.mubr.f32.vlgmr.msra.gmra.mxu0 %v4836_v16  ;;  %897 = vmatprep.mubr.f32.mxu1 %v4877_v29  ;;  %v205_v61 = vld [vmem:[%s6236_s1 + $0x518] sm:$0xff]  ;;  %v204_v0 = vld [vmem:[%s6236_s1 + $0x510] sm:$0xff] }
  0x92   :  { %904 = vmatprep.subr.mxu0 %v105_v30  ;;  %975 = vmatprep.subr.mxu1 %v233_v31  ;;  %v73_v1 = vld [vmem:[%s6236_s1 + $0xf8] sm:$0xff]  ;;  %v72_v4 = vld [vmem:[%s6236_s1 + $0xf0] sm:$0xff] }
  0x93   :  { %898 = vmatmul.mubr.f32.vlgmr.msra.gmra.mxu1 %v4851_v21  ;;  %905 = vmatpush1.msra.mxu0 %v104_v32  ;;  %v201_v2 = vld [vmem:[%s6236_s1 + $0x4f8] sm:$0xff]  ;;  %v200_v5 = vld [vmem:[%s6236_s1 + $0x4f0] sm:$0xff] }
  0x94   :  { %976 = vmatpush1.msra.mxu1 %v232_v33  ;;  %906 = vmatprep.subr.mxu0 %v101_v34  ;;  %v69_v6 = vld [vmem:[%s6236_s1 + $0xd8] sm:$0xff]  ;;  %v68_v9 = vld [vmem:[%s6236_s1 + $0xd0] sm:$0xff] }
  0x95   :  { %977 = vmatprep.subr.mxu1 %v229_v35  ;;  %907 = vmatpush1.msra.mxu0 %v100_v36  ;;  %v197_v7 = vld [vmem:[%s6236_s1 + $0x4d8] sm:$0xff]  ;;  %v196_v10 = vld [vmem:[%s6236_s1 + $0x4d0] sm:$0xff] }
  0x96   :  { %978 = vmatpush1.msra.mxu1 %v228_v37  ;;  %908 = vmatprep.subr.mxu0 %v97_v38  ;;  %v65_v12 = vld [vmem:[%s6236_s1 + $0xb8] sm:$0xff]  ;;  %v64_v14 = vld [vmem:[%s6236_s1 + $0xb0] sm:$0xff] }
  0x97   :  { %979 = vmatprep.subr.mxu1 %v225_v39  ;;  %909 = vmatpush1.msra.mxu0 %v96_v40  ;;  %v193_v13 = vld [vmem:[%s6236_s1 + $0x4b8] sm:$0xff]  ;;  %v192_v15 = vld [vmem:[%s6236_s1 + $0x4b0] sm:$0xff] }
  0x98   :  { %980 = vmatpush1.msra.mxu1 %v224_v42  ;;  %910 = vmatprep.subr.mxu0 %v93_v43  ;;  %v61_v17 = vld [vmem:[%s6236_s1 + $0x98] sm:$0xff]  ;;  %v60_v19 = vld [vmem:[%s6236_s1 + $0x90] sm:$0xff] }
  0x99   :  { %981 = vmatprep.subr.mxu1 %v221_v44  ;;  %911 = vmatpush1.msra.mxu0 %v92_v45  ;;  %v189_v18 = vld [vmem:[%s6236_s1 + $0x498] sm:$0xff]  ;;  %v188_v20 = vld [vmem:[%s6236_s1 + $0x490] sm:$0xff] }
  0x9a   :  { %982 = vmatpush1.msra.mxu1 %v220_v46  ;;  %912 = vmatprep.subr.mxu0 %v89_v47  ;;  %v57_v22 = vld [vmem:[%s6236_s1 + $0x78] sm:$0xff]  ;;  %v56_v24 = vld [vmem:[%s6236_s1 + $0x70] sm:$0xff] }
  0x9b   :  { %983 = vmatprep.subr.mxu1 %v217_v48  ;;  %913 = vmatpush1.msra.mxu0 %v88_v49  ;;  %v185_v23 = vld [vmem:[%s6236_s1 + $0x478] sm:$0xff]  ;;  %v184_v25 = vld [vmem:[%s6236_s1 + $0x470] sm:$0xff] }
  0x9c   :  { %984 = vmatpush1.msra.mxu1 %v216_v50  ;;  %914 = vmatprep.subr.mxu0 %v85_v51  ;;  %v53_v27 = vld [vmem:[%s6236_s1 + $0x58] sm:$0xff]  ;;  %v52_v30 = vld [vmem:[%s6236_s1 + $0x50] sm:$0xff] }
  0x9d   :  { %985 = vmatprep.subr.mxu1 %v213_v53  ;;  %915 = vmatpush1.msra.mxu0 %v84_v54  ;;  %v181_v28 = vld [vmem:[%s6236_s1 + $0x458] sm:$0xff]  ;;  %v180_v31 = vld [vmem:[%s6236_s1 + $0x450] sm:$0xff] }
  0x9e   :  { %986 = vmatpush1.msra.mxu1 %v212_v55  ;;  %916 = vmatprep.subr.mxu0 %v81_v56  ;;  %v49_v32 = vld [vmem:[%s6236_s1 + $0x38] sm:$0xff]  ;;  %v48_v34 = vld [vmem:[%s6236_s1 + $0x30] sm:$0xff] }
  0x9f   :  { %987 = vmatprep.subr.mxu1 %v209_v57  ;;  %917 = vmatpush1.msra.mxu0 %v80_v58  ;;  %v177_v33 = vld [vmem:[%s6236_s1 + $0x438] sm:$0xff]  ;;  %v176_v35 = vld [vmem:[%s6236_s1 + $0x430] sm:$0xff] }
  0xa0   :  { %988 = vmatpush1.msra.mxu1 %v208_v59  ;;  %918 = vmatprep.subr.mxu0 %v77_v60  ;;  %v45_v36 = vld [vmem:[%s6236_s1 + $0x18] sm:$0xff]  ;;  %v44_v38 = vld [vmem:[%s6236_s1 + $0x10] sm:$0xff] }
  0xa1   :  { %989 = vmatprep.subr.mxu1 %v205_v61  ;;  %919 = vmatpush1.msra.mxu0 %v76_v63  ;;  %v173_v37 = vld [vmem:[%s6236_s1 + $0x418] sm:$0xff]  ;;  %v172_v39 = vld [vmem:[%s6236_s1 + $0x410] sm:$0xff] }
  0xa2   :  { %990 = vmatpush1.msra.mxu1 %v204_v0  ;;  %920 = vmatprep.subr.mxu0 %v73_v1  ;;  %v169_v40 = vld [vmem:[%s6236_s1 + $0x3f8] sm:$0xff]  ;;  %v168_v43 = vld [vmem:[%s6236_s1 + $0x3f0] sm:$0xff] }
  0xa3   :  { %991 = vmatprep.subr.mxu1 %v201_v2  ;;  %921 = vmatpush1.msra.mxu0 %v72_v4  ;;  %v297_v42 = vld [vmem:[%s6236_s1 + $0x7f8] sm:$0xff]  ;;  %v296_v44 = vld [vmem:[%s6236_s1 + $0x7f0] sm:$0xff] }
  0xa4   :  { %992 = vmatpush1.msra.mxu1 %v200_v5  ;;  %922 = vmatprep.subr.mxu0 %v69_v6  ;;  %v165_v45 = vld [vmem:[%s6236_s1 + $0x3d8] sm:$0xff]  ;;  %v164_v47 = vld [vmem:[%s6236_s1 + $0x3d0] sm:$0xff] }
  0xa5   :  { %993 = vmatprep.subr.mxu1 %v197_v7  ;;  %923 = vmatpush1.msra.mxu0 %v68_v9  ;;  %v293_v46 = vld [vmem:[%s6236_s1 + $0x7d8] sm:$0xff]  ;;  %v292_v48 = vld [vmem:[%s6236_s1 + $0x7d0] sm:$0xff] }
  0xa6   :  { %994 = vmatpush1.msra.mxu1 %v196_v10  ;;  %924 = vmatprep.subr.mxu0 %v65_v12  ;;  %v161_v49 = vld [vmem:[%s6236_s1 + $0x3b8] sm:$0xff]  ;;  %v160_v51 = vld [vmem:[%s6236_s1 + $0x3b0] sm:$0xff] }
  0xa7   :  { %995 = vmatprep.subr.mxu1 %v193_v13  ;;  %925 = vmatpush1.msra.mxu0 %v64_v14  ;;  %v289_v50 = vld [vmem:[%s6236_s1 + $0x7b8] sm:$0xff]  ;;  %v288_v53 = vld [vmem:[%s6236_s1 + $0x7b0] sm:$0xff] }
  0xa8   :  { %996 = vmatpush1.msra.mxu1 %v192_v15  ;;  %926 = vmatprep.subr.mxu0 %v61_v17  ;;  %v157_v54 = vld [vmem:[%s6236_s1 + $0x398] sm:$0xff]  ;;  %v156_v56 = vld [vmem:[%s6236_s1 + $0x390] sm:$0xff] }
  0xa9   :  { %997 = vmatprep.subr.mxu1 %v189_v18  ;;  %927 = vmatpush1.msra.mxu0 %v60_v19  ;;  %v285_v55 = vld [vmem:[%s6236_s1 + $0x798] sm:$0xff]  ;;  %v284_v57 = vld [vmem:[%s6236_s1 + $0x790] sm:$0xff] }
  0xaa   :  { %998 = vmatpush1.msra.mxu1 %v188_v20  ;;  %928 = vmatprep.subr.mxu0 %v57_v22  ;;  %v153_v58 = vld [vmem:[%s6236_s1 + $0x378] sm:$0xff]  ;;  %v152_v60 = vld [vmem:[%s6236_s1 + $0x370] sm:$0xff] }
  0xab   :  { %999 = vmatprep.subr.mxu1 %v185_v23  ;;  %929 = vmatpush1.msra.mxu0 %v56_v24  ;;  %v281_v59 = vld [vmem:[%s6236_s1 + $0x778] sm:$0xff]  ;;  %v280_v61 = vld [vmem:[%s6236_s1 + $0x770] sm:$0xff] }
  0xac   :  { %1000 = vmatpush1.msra.mxu1 %v184_v25  ;;  %930 = vmatprep.subr.mxu0 %v53_v27  ;;  %v149_v63 = vld [vmem:[%s6236_s1 + $0x358] sm:$0xff]  ;;  %v148_v1 = vld [vmem:[%s6236_s1 + $0x350] sm:$0xff] }
  0xad   :  { %1001 = vmatprep.subr.mxu1 %v181_v28  ;;  %931 = vmatpush1.msra.mxu0 %v52_v30  ;;  %v277_v0 = vld [vmem:[%s6236_s1 + $0x758] sm:$0xff]  ;;  %v276_v2 = vld [vmem:[%s6236_s1 + $0x750] sm:$0xff] }
  0xae   :  { %1002 = vmatpush1.msra.mxu1 %v180_v31  ;;  %932 = vmatprep.subr.mxu0 %v49_v32  ;;  %v145_v4 = vld [vmem:[%s6236_s1 + $0x338] sm:$0xff]  ;;  %v144_v6 = vld [vmem:[%s6236_s1 + $0x330] sm:$0xff] }
  0xaf   :  { %1003 = vmatprep.subr.mxu1 %v177_v33  ;;  %933 = vmatpush1.msra.mxu0 %v48_v34  ;;  %v273_v5 = vld [vmem:[%s6236_s1 + $0x738] sm:$0xff]  ;;  %v272_v7 = vld [vmem:[%s6236_s1 + $0x730] sm:$0xff] }
  0xb0   :  { %1004 = vmatpush1.msra.mxu1 %v176_v35  ;;  %934 = vmatprep.subr.mxu0 %v45_v36  ;;  %v141_v9 = vld [vmem:[%s6236_s1 + $0x318] sm:$0xff]  ;;  %v140_v12 = vld [vmem:[%s6236_s1 + $0x310] sm:$0xff] }
  0xb1   :  { %1005 = vmatprep.subr.mxu1 %v173_v37  ;;  %935 = vmatpush1.msra.mxu0 %v44_v38  ;;  %v269_v10 = vld [vmem:[%s6236_s1 + $0x718] sm:$0xff]  ;;  %v268_v13 = vld [vmem:[%s6236_s1 + $0x710] sm:$0xff] }
  0xb2   :  { %1006 = vmatpush1.msra.mxu1 %v172_v39  ;;  %936 = vmatprep.subr.mxu0 %v169_v40  ;;  %v137_v14 = vld [vmem:[%s6236_s1 + $0x2f8] sm:$0xff]  ;;  %v136_v17 = vld [vmem:[%s6236_s1 + $0x2f0] sm:$0xff] }
  0xb3   :  { %1007 = vmatprep.subr.mxu1 %v297_v42  ;;  %937 = vmatpush2.msra.mxu0 %v168_v43  ;;  %v265_v15 = vld [vmem:[%s6236_s1 + $0x6f8] sm:$0xff]  ;;  %v264_v18 = vld [vmem:[%s6236_s1 + $0x6f0] sm:$0xff] }
  0xb4   :  { %1008 = vmatpush2.msra.mxu1 %v296_v44  ;;  %938 = vmatprep.subr.mxu0 %v165_v45  ;;  %v133_v19 = vld [vmem:[%s6236_s1 + $0x2d8] sm:$0xff]  ;;  %v132_v22 = vld [vmem:[%s6236_s1 + $0x2d0] sm:$0xff] }
  0xb5   :  { %1009 = vmatprep.subr.mxu1 %v293_v46  ;;  %939 = vmatpush2.msra.mxu0 %v164_v47  ;;  %v261_v20 = vld [vmem:[%s6236_s1 + $0x6d8] sm:$0xff]  ;;  %v260_v23 = vld [vmem:[%s6236_s1 + $0x6d0] sm:$0xff] }
  0xb6   :  { %1010 = vmatpush2.msra.mxu1 %v292_v48  ;;  %940 = vmatprep.subr.mxu0 %v161_v49  ;;  %v129_v24 = vld [vmem:[%s6236_s1 + $0x2b8] sm:$0xff]  ;;  %v128_v27 = vld [vmem:[%s6236_s1 + $0x2b0] sm:$0xff] }
  0xb7   :  { %1011 = vmatprep.subr.mxu1 %v289_v50  ;;  %941 = vmatpush2.msra.mxu0 %v160_v51  ;;  %v257_v25 = vld [vmem:[%s6236_s1 + $0x6b8] sm:$0xff]  ;;  %v256_v28 = vld [vmem:[%s6236_s1 + $0x6b0] sm:$0xff] }
  0xb8   :  { %1012 = vmatpush2.msra.mxu1 %v288_v53  ;;  %942 = vmatprep.subr.mxu0 %v157_v54  ;;  %v125_v30 = vld [vmem:[%s6236_s1 + $0x298] sm:$0xff]  ;;  %v124_v32 = vld [vmem:[%s6236_s1 + $0x290] sm:$0xff] }
  0xb9   :  { %1013 = vmatprep.subr.mxu1 %v285_v55  ;;  %943 = vmatpush2.msra.mxu0 %v156_v56  ;;  %v253_v31 = vld [vmem:[%s6236_s1 + $0x698] sm:$0xff]  ;;  %v252_v33 = vld [vmem:[%s6236_s1 + $0x690] sm:$0xff] }
  0xba   :  { %1014 = vmatpush2.msra.mxu1 %v284_v57  ;;  %944 = vmatprep.subr.mxu0 %v153_v58  ;;  %v121_v34 = vld [vmem:[%s6236_s1 + $0x278] sm:$0xff]  ;;  %v120_v36 = vld [vmem:[%s6236_s1 + $0x270] sm:$0xff] }
  0xbb   :  { %1015 = vmatprep.subr.mxu1 %v281_v59  ;;  %945 = vmatpush2.msra.mxu0 %v152_v60  ;;  %v249_v35 = vld [vmem:[%s6236_s1 + $0x678] sm:$0xff]  ;;  %v248_v37 = vld [vmem:[%s6236_s1 + $0x670] sm:$0xff] }
  0xbc   :  { %1016 = vmatpush2.msra.mxu1 %v280_v61  ;;  %946 = vmatprep.subr.mxu0 %v149_v63  ;;  %v117_v38 = vld [vmem:[%s6236_s1 + $0x258] sm:$0xff]  ;;  %v116_v40 = vld [vmem:[%s6236_s1 + $0x250] sm:$0xff] }
  0xbd   :  { %1017 = vmatprep.subr.mxu1 %v277_v0  ;;  %947 = vmatpush2.msra.mxu0 %v148_v1  ;;  %v245_v39 = vld [vmem:[%s6236_s1 + $0x658] sm:$0xff]  ;;  %v244_v42 = vld [vmem:[%s6236_s1 + $0x650] sm:$0xff] }
  0xbe   :  { %1018 = vmatpush2.msra.mxu1 %v276_v2  ;;  %948 = vmatprep.subr.mxu0 %v145_v4  ;;  %v113_v43 = vld [vmem:[%s6236_s1 + $0x238] sm:$0xff]  ;;  %v112_v45 = vld [vmem:[%s6236_s1 + $0x230] sm:$0xff] }
  0xbf   :  { %1019 = vmatprep.subr.mxu1 %v273_v5  ;;  %949 = vmatpush2.msra.mxu0 %v144_v6  ;;  %v241_v44 = vld [vmem:[%s6236_s1 + $0x638] sm:$0xff]  ;;  %v240_v46 = vld [vmem:[%s6236_s1 + $0x630] sm:$0xff] }
  0xc0   :  { %1020 = vmatpush2.msra.mxu1 %v272_v7  ;;  %950 = vmatprep.subr.mxu0 %v141_v9  ;;  %v109_v47 = vld [vmem:[%s6236_s1 + $0x218] sm:$0xff]  ;;  %v108_v49 = vld [vmem:[%s6236_s1 + $0x210] sm:$0xff] }
  0xc1   :  { %1021 = vmatprep.subr.mxu1 %v269_v10  ;;  %951 = vmatpush2.msra.mxu0 %v140_v12  ;;  %v237_v48 = vld [vmem:[%s6236_s1 + $0x618] sm:$0xff]  ;;  %v236_v50 = vld [vmem:[%s6236_s1 + $0x610] sm:$0xff] }
  0xc2   :  { %1022 = vmatpush2.msra.mxu1 %v268_v13  ;;  %952 = vmatprep.subr.mxu0 %v137_v14  ;;  %v361_v51 = vld [vmem:[%s6236_s1 + $0x9f8] sm:$0xff]  ;;  %v360_v54 = vld [vmem:[%s6236_s1 + $0x9f0] sm:$0xff] }
  0xc3   :  { %1023 = vmatprep.subr.mxu1 %v265_v15  ;;  %953 = vmatpush2.msra.mxu0 %v136_v17  ;;  %v489_v53 = vld [vmem:[%s6236_s1 + $0xdf8] sm:$0xff]  ;;  %v488_v55 = vld [vmem:[%s6236_s1 + $0xdf0] sm:$0xff] }
  0xc4   :  { %1024 = vmatpush2.msra.mxu1 %v264_v18  ;;  %954 = vmatprep.subr.mxu0 %v133_v19  ;;  %v485_v56 = vld [vmem:[%s6236_s1 + $0xdd8] sm:$0xff]  ;;  %v480_v59 = vld [vmem:[%s6236_s1 + $0xdb0] sm:$0xff] }
  0xc5   :  { %1025 = vmatprep.subr.mxu1 %v261_v20  ;;  %955 = vmatpush2.msra.mxu0 %v132_v22  ;;  %v353_v57 = vld [vmem:[%s6236_s1 + $0x9b8] sm:$0xff]  ;;  %v348_v63 = vld [vmem:[%s6236_s1 + $0x990] sm:$0xff] }
  0xc6   :  { %1026 = vmatpush2.msra.mxu1 %v260_v23  ;;  %956 = vmatprep.subr.mxu0 %v129_v24  ;;  %v481_v58 = vld [vmem:[%s6236_s1 + $0xdb8] sm:$0xff]  ;;  %v476_v0 = vld [vmem:[%s6236_s1 + $0xd90] sm:$0xff] }
  0xc7   :  { %1027 = vmatprep.subr.mxu1 %v257_v25  ;;  %957 = vmatpush2.msra.mxu0 %v128_v27  ;;  %v349_v60 = vld [vmem:[%s6236_s1 + $0x998] sm:$0xff]  ;;  %v344_v4 = vld [vmem:[%s6236_s1 + $0x970] sm:$0xff] }
  0xc8   :  { %1028 = vmatpush2.msra.mxu1 %v256_v28  ;;  %958 = vmatprep.subr.mxu0 %v125_v30  ;;  %v477_v61 = vld [vmem:[%s6236_s1 + $0xd98] sm:$0xff]  ;;  %v472_v5 = vld [vmem:[%s6236_s1 + $0xd70] sm:$0xff] }
  0xc9   :  { %1029 = vmatprep.subr.mxu1 %v253_v31  ;;  %959 = vmatpush2.msra.mxu0 %v124_v32  ;;  %v345_v1 = vld [vmem:[%s6236_s1 + $0x978] sm:$0xff]  ;;  %v340_v9 = vld [vmem:[%s6236_s1 + $0x950] sm:$0xff] }
  0xca   :  { %1030 = vmatpush2.msra.mxu1 %v252_v33  ;;  %960 = vmatprep.subr.mxu0 %v121_v34  ;;  %v473_v2 = vld [vmem:[%s6236_s1 + $0xd78] sm:$0xff]  ;;  %v468_v10 = vld [vmem:[%s6236_s1 + $0xd50] sm:$0xff] }
  0xcb   :  { %1031 = vmatprep.subr.mxu1 %v249_v35  ;;  %961 = vmatpush2.msra.mxu0 %v120_v36  ;;  %v341_v6 = vld [vmem:[%s6236_s1 + $0x958] sm:$0xff]  ;;  %v336_v14 = vld [vmem:[%s6236_s1 + $0x930] sm:$0xff] }
  0xcc   :  { %1032 = vmatpush2.msra.mxu1 %v248_v37  ;;  %962 = vmatprep.subr.mxu0 %v117_v38  ;;  %v469_v7 = vld [vmem:[%s6236_s1 + $0xd58] sm:$0xff]  ;;  %v464_v15 = vld [vmem:[%s6236_s1 + $0xd30] sm:$0xff] }
  0xcd   :  { %1033 = vmatprep.subr.mxu1 %v245_v39  ;;  %963 = vmatpush2.msra.mxu0 %v116_v40  ;;  %v337_v12 = vld [vmem:[%s6236_s1 + $0x938] sm:$0xff]  ;;  %v332_v19 = vld [vmem:[%s6236_s1 + $0x910] sm:$0xff] }
  0xce   :  { %1034 = vmatpush2.msra.mxu1 %v244_v42  ;;  %964 = vmatprep.subr.mxu0 %v113_v43  ;;  %v465_v13 = vld [vmem:[%s6236_s1 + $0xd38] sm:$0xff]  ;;  %v460_v20 = vld [vmem:[%s6236_s1 + $0xd10] sm:$0xff] }
  0xcf   :  { %1035 = vmatprep.subr.mxu1 %v241_v44  ;;  %965 = vmatpush2.msra.mxu0 %v112_v45  ;;  %v333_v17 = vld [vmem:[%s6236_s1 + $0x918] sm:$0xff]  ;;  %v328_v24 = vld [vmem:[%s6236_s1 + $0x8f0] sm:$0xff] }
  0xd0   :  { %1036 = vmatpush2.msra.mxu1 %v240_v46  ;;  %966 = vmatprep.subr.mxu0 %v109_v47  ;;  %v461_v18 = vld [vmem:[%s6236_s1 + $0xd18] sm:$0xff]  ;;  %v456_v25 = vld [vmem:[%s6236_s1 + $0xcf0] sm:$0xff] }
  0xd1   :  { %1037 = vmatprep.subr.mxu1 %v237_v48  ;;  %967 = vmatpush2.msra.mxu0 %v108_v49  ;;  %v329_v22 = vld [vmem:[%s6236_s1 + $0x8f8] sm:$0xff]  ;;  %v324_v30 = vld [vmem:[%s6236_s1 + $0x8d0] sm:$0xff] }
  0xd2   :  { %968 = vmatprep.mubr.f32.mxu0 %v4462_v8  ;;  %1038 = vmatpush2.msra.mxu1 %v236_v50  ;;  %v357_v8 = vld [vmem:[%s6236_s1 + $0x9d8] sm:$0xff]  ;;  %v452_v31 = vld [vmem:[%s6236_s1 + $0xcd0] sm:$0xff] }
  0xd3   :  { %969 = vmatmul.mubr.f32.vlgmr.msra.gmra.mxu0 %v4431_v62  ;;  %1039 = vmatprep.mubr.f32.mxu1 %v4472_v11  ;;  %v356_v62 = vld [vmem:[%s6236_s1 + $0x9d0] sm:$0xff]  ;;  %v457_v23 = vld [vmem:[%s6236_s1 + $0xcf8] sm:$0xff] }
  0xd4   :  { %1046 = vmatprep.subr.mxu0 %v361_v51  ;;  %1117 = vmatprep.subr.mxu1 %v489_v53  ;;  %v484_v11 = vld [vmem:[%s6236_s1 + $0xdd0] sm:$0xff]  ;;  %v325_v27 = vld [vmem:[%s6236_s1 + $0x8d8] sm:$0xff] }
  0xd5   :  { %1040 = vmatmul.mubr.f32.vlgmr.msra.gmra.mxu1 %v4446_v3  ;;  %1047 = vmatpush1.msra.mxu0 %v360_v54  ;;  %v352_v3 = vld [vmem:[%s6236_s1 + $0x9b0] sm:$0xff]  ;;  %v453_v28 = vld [vmem:[%s6236_s1 + $0xcd8] sm:$0xff] }
  0xd6   :  { %1118 = vmatpush1.msra.mxu1 %v488_v55  ;;  %1048 = vmatprep.subr.mxu0 %v357_v8  ;;  %v321_v32 = vld [vmem:[%s6236_s1 + $0x8b8] sm:$0xff]  ;;  %v320_v34 = vld [vmem:[%s6236_s1 + $0x8b0] sm:$0xff] }
  0xd7   :  { %1119 = vmatprep.subr.mxu1 %v485_v56  ;;  %1049 = vmatpush1.msra.mxu0 %v356_v62  ;;  %v449_v33 = vld [vmem:[%s6236_s1 + $0xcb8] sm:$0xff]  ;;  %v448_v35 = vld [vmem:[%s6236_s1 + $0xcb0] sm:$0xff] }
  0xd8   :  { %1120 = vmatpush1.msra.mxu1 %v484_v11  ;;  %1050 = vmatprep.subr.mxu0 %v353_v57  ;;  %v317_v36 = vld [vmem:[%s6236_s1 + $0x898] sm:$0xff]  ;;  %v316_v38 = vld [vmem:[%s6236_s1 + $0x890] sm:$0xff] }
  0xd9   :  { %1121 = vmatprep.subr.mxu1 %v481_v58  ;;  %1051 = vmatpush1.msra.mxu0 %v352_v3  ;;  %v445_v37 = vld [vmem:[%s6236_s1 + $0xc98] sm:$0xff]  ;;  %v444_v39 = vld [vmem:[%s6236_s1 + $0xc90] sm:$0xff] }
  0xda   :  { %1122 = vmatpush1.msra.mxu1 %v480_v59  ;;  %1052 = vmatprep.subr.mxu0 %v349_v60  ;;  %v313_v40 = vld [vmem:[%s6236_s1 + $0x878] sm:$0xff]  ;;  %v312_v43 = vld [vmem:[%s6236_s1 + $0x870] sm:$0xff] }
  0xdb   :  { %1123 = vmatprep.subr.mxu1 %v477_v61  ;;  %1053 = vmatpush1.msra.mxu0 %v348_v63  ;;  %v441_v42 = vld [vmem:[%s6236_s1 + $0xc78] sm:$0xff]  ;;  %v440_v44 = vld [vmem:[%s6236_s1 + $0xc70] sm:$0xff] }
  0xdc   :  { %1124 = vmatpush1.msra.mxu1 %v476_v0  ;;  %1054 = vmatprep.subr.mxu0 %v345_v1  ;;  %v309_v45 = vld [vmem:[%s6236_s1 + $0x858] sm:$0xff]  ;;  %v308_v47 = vld [vmem:[%s6236_s1 + $0x850] sm:$0xff] }
  0xdd   :  { %1125 = vmatprep.subr.mxu1 %v473_v2  ;;  %1055 = vmatpush1.msra.mxu0 %v344_v4  ;;  %v437_v46 = vld [vmem:[%s6236_s1 + $0xc58] sm:$0xff]  ;;  %v436_v48 = vld [vmem:[%s6236_s1 + $0xc50] sm:$0xff] }
  0xde   :  { %1126 = vmatpush1.msra.mxu1 %v472_v5  ;;  %1056 = vmatprep.subr.mxu0 %v341_v6  ;;  %v305_v49 = vld [vmem:[%s6236_s1 + $0x838] sm:$0xff]  ;;  %v304_v51 = vld [vmem:[%s6236_s1 + $0x830] sm:$0xff] }
  0xdf   :  { %1127 = vmatprep.subr.mxu1 %v469_v7  ;;  %1057 = vmatpush1.msra.mxu0 %v340_v9  ;;  %v433_v50 = vld [vmem:[%s6236_s1 + $0xc38] sm:$0xff]  ;;  %v432_v53 = vld [vmem:[%s6236_s1 + $0xc30] sm:$0xff] }
  0xe0   :  { %1128 = vmatpush1.msra.mxu1 %v468_v10  ;;  %1058 = vmatprep.subr.mxu0 %v337_v12  ;;  %v301_v54 = vld [vmem:[%s6236_s1 + $0x818] sm:$0xff]  ;;  %v300_v8 = vld [vmem:[%s6236_s1 + $0x810] sm:$0xff] }
  0xe1   :  { %1129 = vmatprep.subr.mxu1 %v465_v13  ;;  %1059 = vmatpush1.msra.mxu0 %v336_v14  ;;  %v429_v55 = vld [vmem:[%s6236_s1 + $0xc18] sm:$0xff]  ;;  %v428_v56 = vld [vmem:[%s6236_s1 + $0xc10] sm:$0xff] }
  0xe2   :  { %1130 = vmatpush1.msra.mxu1 %v464_v15  ;;  %1060 = vmatprep.subr.mxu0 %v333_v17  ;;  %v425_v62 = vld [vmem:[%s6236_s1 + $0xbf8] sm:$0xff]  ;;  %v424_v57 = vld [vmem:[%s6236_s1 + $0xbf0] sm:$0xff] }
  0xe3   :  { %1131 = vmatprep.subr.mxu1 %v461_v18  ;;  %1061 = vmatpush1.msra.mxu0 %v332_v19  ;;  %v553_v11 = vld [vmem:[%s6236_s1 + $0xff8] sm:$0xff]  ;;  %v552_v58 = vld [vmem:[%s6236_s1 + $0xff0] sm:$0xff] }
  0xe4   :  { %1132 = vmatpush1.msra.mxu1 %v460_v20  ;;  %1062 = vmatprep.subr.mxu0 %v329_v22  ;;  %v421_v3 = vld [vmem:[%s6236_s1 + $0xbd8] sm:$0xff]  ;;  %v420_v60 = vld [vmem:[%s6236_s1 + $0xbd0] sm:$0xff] }
  0xe5   :  { %1133 = vmatprep.subr.mxu1 %v457_v23  ;;  %1063 = vmatpush1.msra.mxu0 %v328_v24  ;;  %v549_v59 = vld [vmem:[%s6236_s1 + $0xfd8] sm:$0xff]  ;;  %v548_v61 = vld [vmem:[%s6236_s1 + $0xfd0] sm:$0xff] }
  0xe6   :  { %1134 = vmatpush1.msra.mxu1 %v456_v25  ;;  %1064 = vmatprep.subr.mxu0 %v325_v27  ;;  %v417_v63 = vld [vmem:[%s6236_s1 + $0xbb8] sm:$0xff]  ;;  %v416_v1 = vld [vmem:[%s6236_s1 + $0xbb0] sm:$0xff] }
  0xe7   :  { %1135 = vmatprep.subr.mxu1 %v453_v28  ;;  %1065 = vmatpush1.msra.mxu0 %v324_v30  ;;  %v545_v0 = vld [vmem:[%s6236_s1 + $0xfb8] sm:$0xff]  ;;  %v544_v2 = vld [vmem:[%s6236_s1 + $0xfb0] sm:$0xff] }
  0xe8   :  { %1136 = vmatpush1.msra.mxu1 %v452_v31  ;;  %1066 = vmatprep.subr.mxu0 %v321_v32  ;;  %v413_v4 = vld [vmem:[%s6236_s1 + $0xb98] sm:$0xff]  ;;  %v412_v6 = vld [vmem:[%s6236_s1 + $0xb90] sm:$0xff] }
  0xe9   :  { %1137 = vmatprep.subr.mxu1 %v449_v33  ;;  %1067 = vmatpush1.msra.mxu0 %v320_v34  ;;  %v541_v5 = vld [vmem:[%s6236_s1 + $0xf98] sm:$0xff]  ;;  %v540_v7 = vld [vmem:[%s6236_s1 + $0xf90] sm:$0xff] }
  0xea   :  { %1138 = vmatpush1.msra.mxu1 %v448_v35  ;;  %1068 = vmatprep.subr.mxu0 %v317_v36  ;;  %v409_v9 = vld [vmem:[%s6236_s1 + $0xb78] sm:$0xff]  ;;  %v408_v12 = vld [vmem:[%s6236_s1 + $0xb70] sm:$0xff] }
  0xeb   :  { %1139 = vmatprep.subr.mxu1 %v445_v37  ;;  %1069 = vmatpush1.msra.mxu0 %v316_v38  ;;  %v537_v10 = vld [vmem:[%s6236_s1 + $0xf78] sm:$0xff]  ;;  %v536_v13 = vld [vmem:[%s6236_s1 + $0xf70] sm:$0xff] }
  0xec   :  { %1140 = vmatpush1.msra.mxu1 %v444_v39  ;;  %1070 = vmatprep.subr.mxu0 %v313_v40  ;;  %v405_v14 = vld [vmem:[%s6236_s1 + $0xb58] sm:$0xff]  ;;  %v404_v17 = vld [vmem:[%s6236_s1 + $0xb50] sm:$0xff] }
  0xed   :  { %1141 = vmatprep.subr.mxu1 %v441_v42  ;;  %1071 = vmatpush1.msra.mxu0 %v312_v43  ;;  %v533_v15 = vld [vmem:[%s6236_s1 + $0xf58] sm:$0xff]  ;;  %v532_v18 = vld [vmem:[%s6236_s1 + $0xf50] sm:$0xff] }
  0xee   :  { %1142 = vmatpush1.msra.mxu1 %v440_v44  ;;  %1072 = vmatprep.subr.mxu0 %v309_v45  ;;  %v401_v19 = vld [vmem:[%s6236_s1 + $0xb38] sm:$0xff]  ;;  %v400_v22 = vld [vmem:[%s6236_s1 + $0xb30] sm:$0xff] }
  0xef   :  { %1143 = vmatprep.subr.mxu1 %v437_v46  ;;  %1073 = vmatpush1.msra.mxu0 %v308_v47  ;;  %v529_v20 = vld [vmem:[%s6236_s1 + $0xf38] sm:$0xff]  ;;  %v528_v23 = vld [vmem:[%s6236_s1 + $0xf30] sm:$0xff] }
  0xf0   :  { %1144 = vmatpush1.msra.mxu1 %v436_v48  ;;  %1074 = vmatprep.subr.mxu0 %v305_v49  ;;  %v397_v24 = vld [vmem:[%s6236_s1 + $0xb18] sm:$0xff]  ;;  %v396_v27 = vld [vmem:[%s6236_s1 + $0xb10] sm:$0xff] }
  0xf1   :  { %1145 = vmatprep.subr.mxu1 %v433_v50  ;;  %1075 = vmatpush1.msra.mxu0 %v304_v51  ;;  %v525_v25 = vld [vmem:[%s6236_s1 + $0xf18] sm:$0xff]  ;;  %v524_v28 = vld [vmem:[%s6236_s1 + $0xf10] sm:$0xff] }
  0xf2   :  { %1146 = vmatpush1.msra.mxu1 %v432_v53  ;;  %1076 = vmatprep.subr.mxu0 %v301_v54  ;;  %v393_v30 = vld [vmem:[%s6236_s1 + $0xaf8] sm:$0xff]  ;;  %v392_v32 = vld [vmem:[%s6236_s1 + $0xaf0] sm:$0xff] }
  0xf3   :  { %1147 = vmatprep.subr.mxu1 %v429_v55  ;;  %1077 = vmatpush1.msra.mxu0 %v300_v8  ;;  %v521_v31 = vld [vmem:[%s6236_s1 + $0xef8] sm:$0xff]  ;;  %v520_v33 = vld [vmem:[%s6236_s1 + $0xef0] sm:$0xff] }
  0xf4   :  { %1148 = vmatpush1.msra.mxu1 %v428_v56  ;;  %1078 = vmatprep.subr.mxu0 %v425_v62  ;;  %v389_v34 = vld [vmem:[%s6236_s1 + $0xad8] sm:$0xff]  ;;  %v388_v36 = vld [vmem:[%s6236_s1 + $0xad0] sm:$0xff] }
  0xf5   :  { %1149 = vmatprep.subr.mxu1 %v553_v11  ;;  %1079 = vmatpush2.msra.mxu0 %v424_v57  ;;  %v517_v35 = vld [vmem:[%s6236_s1 + $0xed8] sm:$0xff]  ;;  %v516_v37 = vld [vmem:[%s6236_s1 + $0xed0] sm:$0xff] }
  0xf6   :  { %1150 = vmatpush2.msra.mxu1 %v552_v58  ;;  %1080 = vmatprep.subr.mxu0 %v421_v3  ;;  %v385_v38 = vld [vmem:[%s6236_s1 + $0xab8] sm:$0xff]  ;;  %v384_v40 = vld [vmem:[%s6236_s1 + $0xab0] sm:$0xff] }
  0xf7   :  { %1151 = vmatprep.subr.mxu1 %v549_v59  ;;  %1081 = vmatpush2.msra.mxu0 %v420_v60  ;;  %v513_v39 = vld [vmem:[%s6236_s1 + $0xeb8] sm:$0xff]  ;;  %v512_v42 = vld [vmem:[%s6236_s1 + $0xeb0] sm:$0xff] }
  0xf8   :  { %1152 = vmatpush2.msra.mxu1 %v548_v61  ;;  %1082 = vmatprep.subr.mxu0 %v417_v63  ;;  %v381_v43 = vld [vmem:[%s6236_s1 + $0xa98] sm:$0xff]  ;;  %v380_v45 = vld [vmem:[%s6236_s1 + $0xa90] sm:$0xff]  ;;  %v1221_v63 = vld [vmem:[%s6238_s3 + $0xe8] sm:$0xff] }
  0xf9   :  { %1153 = vmatprep.subr.mxu1 %v545_v0  ;;  %1083 = vmatpush2.msra.mxu0 %v416_v1  ;;  %v509_v44 = vld [vmem:[%s6236_s1 + $0xe98] sm:$0xff]  ;;  %v508_v46 = vld [vmem:[%s6236_s1 + $0xe90] sm:$0xff]  ;;  %v1285_v0 = vld [vmem:[%s6238_s3 + $0x2e8] sm:$0xff] }
  0xfa   :  { %1154 = vmatpush2.msra.mxu1 %v544_v2  ;;  %1084 = vmatprep.subr.mxu0 %v413_v4  ;;  %v377_v47 = vld [vmem:[%s6236_s1 + $0xa78] sm:$0xff]  ;;  %v376_v49 = vld [vmem:[%s6236_s1 + $0xa70] sm:$0xff]  ;;  %v1284_v2 = vld [vmem:[%s6238_s3 + $0x2e0] sm:$0xff] }
  0xfb   :  { %1155 = vmatprep.subr.mxu1 %v541_v5  ;;  %1085 = vmatpush2.msra.mxu0 %v412_v6  ;;  %v505_v48 = vld [vmem:[%s6236_s1 + $0xe78] sm:$0xff]  ;;  %v504_v50 = vld [vmem:[%s6236_s1 + $0xe70] sm:$0xff]  ;;  %v1217_v4 = vld [vmem:[%s6238_s3 + $0xc8] sm:$0xff] }
  0xfc   :  { %1156 = vmatpush2.msra.mxu1 %v540_v7  ;;  %1086 = vmatprep.subr.mxu0 %v409_v9  ;;  %v373_v51 = vld [vmem:[%s6236_s1 + $0xa58] sm:$0xff]  ;;  %v372_v54 = vld [vmem:[%s6236_s1 + $0xa50] sm:$0xff]  ;;  %v1216_v6 = vld [vmem:[%s6238_s3 + $0xc0] sm:$0xff] }
  0xfd   :  { %1157 = vmatprep.subr.mxu1 %v537_v10  ;;  %1087 = vmatpush2.msra.mxu0 %v408_v12  ;;  %v501_v53 = vld [vmem:[%s6236_s1 + $0xe58] sm:$0xff]  ;;  %v500_v55 = vld [vmem:[%s6236_s1 + $0xe50] sm:$0xff]  ;;  %v1281_v10 = vld [vmem:[%s6238_s3 + $0x2c8] sm:$0xff] }
  0xfe   :  { %1158 = vmatpush2.msra.mxu1 %v536_v13  ;;  %1088 = vmatprep.subr.mxu0 %v405_v14  ;;  %v369_v8 = vld [vmem:[%s6236_s1 + $0xa38] sm:$0xff]  ;;  %v368_v62 = vld [vmem:[%s6236_s1 + $0xa30] sm:$0xff]  ;;  %v1280_v13 = vld [vmem:[%s6238_s3 + $0x2c0] sm:$0xff] }
  0xff   :  { %1159 = vmatprep.subr.mxu1 %v533_v15  ;;  %1089 = vmatpush2.msra.mxu0 %v404_v17  ;;  %v497_v56 = vld [vmem:[%s6236_s1 + $0xe38] sm:$0xff]  ;;  %v496_v11 = vld [vmem:[%s6236_s1 + $0xe30] sm:$0xff]  ;;  %v1213_v14 = vld [vmem:[%s6238_s3 + $0xa8] sm:$0xff] }
 0x100   :  { %1160 = vmatpush2.msra.mxu1 %v532_v18  ;;  %1090 = vmatprep.subr.mxu0 %v401_v19  ;;  %v365_v57 = vld [vmem:[%s6236_s1 + $0xa18] sm:$0xff]  ;;  %v364_v3 = vld [vmem:[%s6236_s1 + $0xa10] sm:$0xff]  ;;  %v1212_v17 = vld [vmem:[%s6238_s3 + $0xa0] sm:$0xff] }
 0x101   :  { %1161 = vmatprep.subr.mxu1 %v529_v20  ;;  %1091 = vmatpush2.msra.mxu0 %v400_v22  ;;  %v493_v58 = vld [vmem:[%s6236_s1 + $0xe18] sm:$0xff]  ;;  %v492_v59 = vld [vmem:[%s6236_s1 + $0xe10] sm:$0xff]  ;;  %v1277_v20 = vld [vmem:[%s6238_s3 + $0x2a8] sm:$0xff] }
 0x102   :  { %1162 = vmatpush2.msra.mxu1 %v528_v23  ;;  %1092 = vmatprep.subr.mxu0 %v397_v24  ;;  %v1223_v60 = vld [vmem:[%s6238_s3 + $0xf8] sm:$0xff]  ;;  %v1222_v61 = vld [vmem:[%s6238_s3 + $0xf0] sm:$0xff]  ;;  %v1276_v23 = vld [vmem:[%s6238_s3 + $0x2a0] sm:$0xff] }
 0x103   :  { %1163 = vmatprep.subr.mxu1 %v525_v25  ;;  %1093 = vmatpush2.msra.mxu0 %v396_v27  ;;  %v1218_v1 = vld [vmem:[%s6238_s3 + $0xd0] sm:$0xff]  ;;  %v1283_v5 = vld [vmem:[%s6238_s3 + $0x2d8] sm:$0xff]  ;;  %v1209_v24 = vld [vmem:[%s6238_s3 + $0x88] sm:$0xff] }
 0x104   :  { %1164 = vmatpush2.msra.mxu1 %v524_v28  ;;  %1094 = vmatprep.subr.mxu0 %v393_v30  ;;  %v1282_v7 = vld [vmem:[%s6238_s3 + $0x2d0] sm:$0xff]  ;;  %v1215_v9 = vld [vmem:[%s6238_s3 + $0xb8] sm:$0xff]  ;;  %v1208_v27 = vld [vmem:[%s6238_s3 + $0x80] sm:$0xff] }
 0x105   :  { %1165 = vmatprep.subr.mxu1 %v521_v31  ;;  %1095 = vmatpush2.msra.mxu0 %v392_v32  ;;  %v1214_v12 = vld [vmem:[%s6238_s3 + $0xb0] sm:$0xff]  ;;  %v1279_v15 = vld [vmem:[%s6238_s3 + $0x2b8] sm:$0xff]  ;;  %v1273_v31 = vld [vmem:[%s6238_s3 + $0x288] sm:$0xff] }
 0x106   :  { %1166 = vmatpush2.msra.mxu1 %v520_v33  ;;  %1096 = vmatprep.subr.mxu0 %v389_v34  ;;  %v1278_v18 = vld [vmem:[%s6238_s3 + $0x2b0] sm:$0xff]  ;;  %v1211_v19 = vld [vmem:[%s6238_s3 + $0x98] sm:$0xff]  ;;  %v1272_v33 = vld [vmem:[%s6238_s3 + $0x280] sm:$0xff] }
 0x107   :  { %1167 = vmatprep.subr.mxu1 %v517_v35  ;;  %1097 = vmatpush2.msra.mxu0 %v388_v36  ;;  %v1210_v22 = vld [vmem:[%s6238_s3 + $0x90] sm:$0xff]  ;;  %v1275_v25 = vld [vmem:[%s6238_s3 + $0x298] sm:$0xff]  ;;  %v1205_v34 = vld [vmem:[%s6238_s3 + $0x68] sm:$0xff] }
 0x108   :  { %1168 = vmatpush2.msra.mxu1 %v516_v37  ;;  %1098 = vmatprep.subr.mxu0 %v385_v38  ;;  %v1274_v28 = vld [vmem:[%s6238_s3 + $0x290] sm:$0xff]  ;;  %v1207_v30 = vld [vmem:[%s6238_s3 + $0x78] sm:$0xff]  ;;  %v1204_v36 = vld [vmem:[%s6238_s3 + $0x60] sm:$0xff] }
 0x109   :  { %1169 = vmatprep.subr.mxu1 %v513_v39  ;;  %1099 = vmatpush2.msra.mxu0 %v384_v40  ;;  %v1206_v32 = vld [vmem:[%s6238_s3 + $0x70] sm:$0xff]  ;;  %v1271_v35 = vld [vmem:[%s6238_s3 + $0x278] sm:$0xff]  ;;  %v1269_v39 = vld [vmem:[%s6238_s3 + $0x268] sm:$0xff] }
 0x10a   :  { %1170 = vmatpush2.msra.mxu1 %v512_v42  ;;  %1100 = vmatprep.subr.mxu0 %v381_v43  ;;  %v1270_v37 = vld [vmem:[%s6238_s3 + $0x270] sm:$0xff]  ;;  %v1203_v38 = vld [vmem:[%s6238_s3 + $0x58] sm:$0xff]  ;;  %v1268_v42 = vld [vmem:[%s6238_s3 + $0x260] sm:$0xff] }
 0x10b   :  { %1171 = vmatprep.subr.mxu1 %v509_v44  ;;  %1101 = vmatpush2.msra.mxu0 %v380_v45  ;;  %v1202_v40 = vld [vmem:[%s6238_s3 + $0x50] sm:$0xff]  ;;  %v1201_v43 = vld [vmem:[%s6238_s3 + $0x48] sm:$0xff]  ;;  %v1267_v44 = vld [vmem:[%s6238_s3 + $0x258] sm:$0xff] }
 0x10c   :  { %1172 = vmatpush2.msra.mxu1 %v508_v46  ;;  %1102 = vmatprep.subr.mxu0 %v377_v47  ;;  %v1200_v45 = vld [vmem:[%s6238_s3 + $0x40] sm:$0xff]  ;;  %v1266_v46 = vld [vmem:[%s6238_s3 + $0x250] sm:$0xff]  ;;  %v1199_v47 = vld [vmem:[%s6238_s3 + $0x38] sm:$0xff] }
 0x10d   :  { %1173 = vmatprep.subr.mxu1 %v505_v48  ;;  %1103 = vmatpush2.msra.mxu0 %v376_v49  ;;  %v1265_v48 = vld [vmem:[%s6238_s3 + $0x248] sm:$0xff]  ;;  %v1198_v49 = vld [vmem:[%s6238_s3 + $0x30] sm:$0xff] }
 0x10e   :  { %1174 = vmatpush2.msra.mxu1 %v504_v50  ;;  %1104 = vmatprep.subr.mxu0 %v373_v51  ;;  %v1264_v50 = vld [vmem:[%s6238_s3 + $0x240] sm:$0xff]  ;;  %v1197_v51 = vld [vmem:[%s6238_s3 + $0x28] sm:$0xff] }
 0x10f   :  { %1175 = vmatprep.subr.mxu1 %v501_v53  ;;  %1105 = vmatpush2.msra.mxu0 %v372_v54  ;;  %v1263_v53 = vld [vmem:[%s6238_s3 + $0x238] sm:$0xff]  ;;  %v1196_v54 = vld [vmem:[%s6238_s3 + $0x20] sm:$0xff] }
 0x110   :  { %1176 = vmatpush2.msra.mxu1 %v500_v55  ;;  %1106 = vmatprep.subr.mxu0 %v369_v8  ;;  %v1262_v55 = vld [vmem:[%s6238_s3 + $0x230] sm:$0xff]  ;;  %v1195_v8 = vld [vmem:[%s6238_s3 + $0x18] sm:$0xff] }
 0x111   :  { %1177 = vmatprep.subr.mxu1 %v497_v56  ;;  %1107 = vmatpush2.msra.mxu0 %v368_v62  ;;  %v1261_v56 = vld [vmem:[%s6238_s3 + $0x228] sm:$0xff]  ;;  %v1194_v62 = vld [vmem:[%s6238_s3 + $0x10] sm:$0xff] }
 0x112   :  { %1178 = vmatpush2.msra.mxu1 %v496_v11  ;;  %1108 = vmatprep.subr.mxu0 %v365_v57  ;;  %v1260_v11 = vld [vmem:[%s6238_s3 + $0x220] sm:$0xff]  ;;  %v1193_v57 = vld [vmem:[%s6238_s3 + $0x8] sm:$0xff] }
 0x113   :  { %1179 = vmatprep.subr.mxu1 %v493_v58  ;;  %1109 = vmatpush2.msra.mxu0 %v364_v3  ;;  %v1259_v58 = vld [vmem:[%s6238_s3 + $0x218] sm:$0xff]  ;;  %v1192_v3 = vld [vmem:[%s6238_s3] sm:$0xff] }
 0x114   :  { %1110 = vmatprep.mubr.f32.mxu0 %v4867_v26  ;;  %1180 = vmatpush2.msra.mxu1 %v492_v59  ;;  %v1220_v26 = vld [vmem:[%s6238_s3 + $0xe0] sm:$0xff]  ;;  %v1258_v59 = vld [vmem:[%s6238_s3 + $0x210] sm:$0xff] }
 0x115   :  { %1181 = vmatprep.mubr.f32.mxu1 %v4877_v29  ;;  %1111 = vmatmul.mubr.f32.vlgmr.msra.gmra.mxu0 %v4836_v16  ;;  %v1219_v29 = vld [vmem:[%s6238_s3 + $0xd8] sm:$0xff] }
 0x116   :  { %1182 = vmatmul.mubr.f32.vlgmr.msra.gmra.mxu1 %v4851_v21  ;;  %1332 = vmatprep.subr.mxu0 %v1223_v60  ;;  %v1287_v16 = vld [vmem:[%s6238_s3 + $0x2f8] sm:$0xff]  ;;  %v1286_v21 = vld [vmem:[%s6238_s3 + $0x2f0] sm:$0xff] }
 0x117   :  { %1333 = vmatpush1.msra.mxu0 %v1222_v61  ;;  %1403 = vmatprep.subr.mxu1 %v1287_v16  ;;  %v1255_v60 = vld [vmem:[%s6238_s3 + $0x1f8] sm:$0xff]  ;;  %v1257_v61 = vld [vmem:[%s6238_s3 + $0x208] sm:$0xff] }
 0x118   :  { %1334 = vmatprep.subr.mxu0 %v1221_v63  ;;  %1404 = vmatpush1.msra.mxu1 %v1286_v21  ;;  %v1254_v63 = vld [vmem:[%s6238_s3 + $0x1f0] sm:$0xff]  ;;  %v1319_v16 = vld [vmem:[%s6238_s3 + $0x3f8] sm:$0xff]  ;;  %v1252_v21 = vld [vmem:[%s6238_s3 + $0x1e0] sm:$0xff] }
 0x119   :  { %1335 = vmatpush1.msra.mxu0 %v1220_v26  ;;  %1405 = vmatprep.subr.mxu1 %v1285_v0  ;;  %v1256_v26 = vld [vmem:[%s6238_s3 + $0x200] sm:$0xff]  ;;  %v1318_v0 = vld [vmem:[%s6238_s3 + $0x3f0] sm:$0xff] }
 0x11a   :  { %1336 = vmatprep.subr.mxu0 %v1219_v29  ;;  %1406 = vmatpush1.msra.mxu1 %v1284_v2  ;;  %v1253_v29 = vld [vmem:[%s6238_s3 + $0x1e8] sm:$0xff] }
 0x11b   :  { %1337 = vmatpush1.msra.mxu0 %v1218_v1  ;;  %1407 = vmatprep.subr.mxu1 %v1283_v5  ;;  %v1251_v1 = vld [vmem:[%s6238_s3 + $0x1d8] sm:$0xff]  ;;  %v1317_v2 = vld [vmem:[%s6238_s3 + $0x3e8] sm:$0xff]  ;;  %v1316_v5 = vld [vmem:[%s6238_s3 + $0x3e0] sm:$0xff] }
 0x11c   :  { %1338 = vmatprep.subr.mxu0 %v1217_v4  ;;  %1408 = vmatpush1.msra.mxu1 %v1282_v7  ;;  %v1250_v4 = vld [vmem:[%s6238_s3 + $0x1d0] sm:$0xff]  ;;  %v1315_v7 = vld [vmem:[%s6238_s3 + $0x3d8] sm:$0xff] }
 0x11d   :  { %1339 = vmatpush1.msra.mxu0 %v1216_v6  ;;  %1409 = vmatprep.subr.mxu1 %v1281_v10  ;;  %v1249_v6 = vld [vmem:[%s6238_s3 + $0x1c8] sm:$0xff]  ;;  %v1314_v10 = vld [vmem:[%s6238_s3 + $0x3d0] sm:$0xff] }
 0x11e   :  { %1340 = vmatprep.subr.mxu0 %v1215_v9  ;;  %1410 = vmatpush1.msra.mxu1 %v1280_v13  ;;  %v1248_v9 = vld [vmem:[%s6238_s3 + $0x1c0] sm:$0xff]  ;;  %v1313_v13 = vld [vmem:[%s6238_s3 + $0x3c8] sm:$0xff] }
 0x11f   :  { %1341 = vmatpush1.msra.mxu0 %v1214_v12  ;;  %1411 = vmatprep.subr.mxu1 %v1279_v15  ;;  %v1247_v12 = vld [vmem:[%s6238_s3 + $0x1b8] sm:$0xff]  ;;  %v1312_v15 = vld [vmem:[%s6238_s3 + $0x3c0] sm:$0xff] }
 0x120   :  { %1342 = vmatprep.subr.mxu0 %v1213_v14  ;;  %1412 = vmatpush1.msra.mxu1 %v1278_v18  ;;  %v1246_v14 = vld [vmem:[%s6238_s3 + $0x1b0] sm:$0xff]  ;;  %v1311_v18 = vld [vmem:[%s6238_s3 + $0x3b8] sm:$0xff] }
 0x121   :  { %1343 = vmatpush1.msra.mxu0 %v1212_v17  ;;  %1413 = vmatprep.subr.mxu1 %v1277_v20  ;;  %v1245_v17 = vld [vmem:[%s6238_s3 + $0x1a8] sm:$0xff]  ;;  %v1310_v20 = vld [vmem:[%s6238_s3 + $0x3b0] sm:$0xff] }
 0x122   :  { %1344 = vmatprep.subr.mxu0 %v1211_v19  ;;  %1414 = vmatpush1.msra.mxu1 %v1276_v23  ;;  %v1244_v19 = vld [vmem:[%s6238_s3 + $0x1a0] sm:$0xff]  ;;  %v1309_v23 = vld [vmem:[%s6238_s3 + $0x3a8] sm:$0xff] }
 0x123   :  { %1345 = vmatpush1.msra.mxu0 %v1210_v22  ;;  %1415 = vmatprep.subr.mxu1 %v1275_v25  ;;  %v1243_v22 = vld [vmem:[%s6238_s3 + $0x198] sm:$0xff]  ;;  %v1308_v25 = vld [vmem:[%s6238_s3 + $0x3a0] sm:$0xff] }
 0x124   :  { %1346 = vmatprep.subr.mxu0 %v1209_v24  ;;  %1416 = vmatpush1.msra.mxu1 %v1274_v28  ;;  %v1242_v24 = vld [vmem:[%s6238_s3 + $0x190] sm:$0xff]  ;;  %v1307_v28 = vld [vmem:[%s6238_s3 + $0x398] sm:$0xff] }
 0x125   :  { %1347 = vmatpush1.msra.mxu0 %v1208_v27  ;;  %1417 = vmatprep.subr.mxu1 %v1273_v31  ;;  %v1241_v27 = vld [vmem:[%s6238_s3 + $0x188] sm:$0xff]  ;;  %v1306_v31 = vld [vmem:[%s6238_s3 + $0x390] sm:$0xff] }
 0x126   :  { %1348 = vmatprep.subr.mxu0 %v1207_v30  ;;  %1418 = vmatpush1.msra.mxu1 %v1272_v33  ;;  %v1240_v30 = vld [vmem:[%s6238_s3 + $0x180] sm:$0xff]  ;;  %v1239_v33 = vld [vmem:[%s6238_s3 + $0x178] sm:$0xff] }
 0x127   :  { %1349 = vmatpush1.msra.mxu0 %v1206_v32  ;;  %1419 = vmatprep.subr.mxu1 %v1271_v35  ;;  %v5942_v32 = vsub.s32 0, %v4374_v41  ;;  %v5953_v35 = vld [vmem:[%s6237_s2] sm:$0xf] }
 0x128   :  { %1350 = vmatprep.subr.mxu0 %v1205_v34  ;;  %1420 = vmatpush1.msra.mxu1 %v1270_v37  ;;  %v1305_v34 = vld [vmem:[%s6238_s3 + $0x388] sm:$0xff]  ;;  %v1304_v37 = vld [vmem:[%s6238_s3 + $0x380] sm:$0xff] }
 0x129   :  { %1351 = vmatpush1.msra.mxu0 %v1204_v36  ;;  %1421 = vmatprep.subr.mxu1 %v1269_v39  ;;  %v1238_v36 = vld [vmem:[%s6238_s3 + $0x170] sm:$0xff]  ;;  %v1237_v39 = vld [vmem:[%s6238_s3 + $0x168] sm:$0xff] }
 0x12a   :  { %1352 = vmatprep.subr.mxu0 %v1203_v38  ;;  %1422 = vmatpush1.msra.mxu1 %v1268_v42  ;;  %v5962_v38 = vsub.s32 1, %v4374_v41  ;;  %v686_v42 = vpop.f32.mrf.mxu0 }
 0x12b   :  { %1353 = vmatpush1.msra.mxu0 %v1202_v40  ;;  %1423 = vmatprep.subr.mxu1 %v1267_v44  ;;  %v1303_v40 = vld [vmem:[%s6238_s3 + $0x378] sm:$0xff]  ;;  %v1302_v44 = vld [vmem:[%s6238_s3 + $0x370] sm:$0xff] }
 0x12c   :  { %1354 = vmatprep.subr.mxu0 %v1201_v43  ;;  %1424 = vmatpush1.msra.mxu1 %v1266_v46  ;;  %v1236_v43 = vld [vmem:[%s6238_s3 + $0x160] sm:$0xff]  ;;  %v1235_v46 = vld [vmem:[%s6238_s3 + $0x158] sm:$0xff] }
 0x12d   :  { %1355 = vmatpush1.msra.mxu0 %v1200_v45  ;;  %1425 = vmatprep.subr.mxu1 %v1265_v48  ;;  %v559_v45 = vrot.slane %v5953_v35, %v5942_v32  ;;  %v1234_v48 = vld [vmem:[%s6238_s3 + $0x150] sm:$0xff] }
 0x12e   :  { %1356 = vmatprep.subr.mxu0 %v1199_v47  ;;  %1426 = vmatpush1.msra.mxu1 %v1264_v50  ;;  %v1301_v47 = vld [vmem:[%s6238_s3 + $0x368] sm:$0xff]  ;;  %v563_v50 = vrot.slane %v5953_v35, %v5962_v38 }
 0x12f   :  { %1357 = vmatpush1.msra.mxu0 %v1198_v49  ;;  %1427 = vmatprep.subr.mxu1 %v1263_v53  ;;  %v1300_v49 = vld [vmem:[%s6238_s3 + $0x360] sm:$0xff]  ;;  %v1299_v53 = vld [vmem:[%s6238_s3 + $0x358] sm:$0xff] }
 0x130   :  { %1358 = vmatprep.subr.mxu0 %v1197_v51  ;;  %1428 = vmatpush1.msra.mxu1 %v1262_v55  ;;  %v1233_v51 = vld [vmem:[%s6238_s3 + $0x148] sm:$0xff]  ;;  %v688_v55 = vpop.f32.mrf.mxu0 }
 0x131   :  { %1359 = vmatpush1.msra.mxu0 %v1196_v54  ;;  %1429 = vmatprep.subr.mxu1 %v1261_v56  ;;  %v757_v54 = vpop.f32.mrf.mxu1  ;;  %v1298_v56 = vld [vmem:[%s6238_s3 + $0x350] sm:$0xff] }
 0x132   :  { %1360 = vmatprep.subr.mxu0 %v1195_v8  ;;  %1430 = vmatpush1.msra.mxu1 %v1260_v11  ;;  %v1232_v8 = vld [vmem:[%s6238_s3 + $0x140] sm:$0xff]  ;;  %v1231_v11 = vld [vmem:[%s6238_s3 + $0x138] sm:$0xff] }
 0x133   :  { %1361 = vmatpush1.msra.mxu0 %v1194_v62  ;;  %1431 = vmatprep.subr.mxu1 %v1259_v58  ;;  %v687_v62 = vadd.f32 %v686_v42, %v559_v45  ;;  %v689_v58 = vadd.f32 %v688_v55, %v563_v50  ;;  %v1797_v42 = vld [vmem:[#allocation2 + $0xa08] sm:$0xff]  ;;  %v1764_v45 = vld [vmem:[#allocation2 + $0x900] sm:$0xff] }
 0x134   :  { %1362 = vmatprep.subr.mxu0 %v1193_v57  ;;  %1432 = vmatpush1.msra.mxu1 %v1258_v59  ;;  %v1230_v57 = vld [vmem:[%s6238_s3 + $0x130] sm:$0xff]  ;;  %v759_v59 = vpop.f32.mrf.mxu1  ;;  %v1669_v50 = vld [vmem:[#allocation2 + $0x608] sm:$0xff] }
 0x135   :  { %1363 = vmatpush1.msra.mxu0 %v1192_v3  ;;  %1433 = vmatprep.subr.mxu1 %v1257_v61  ;;  %v1229_v3 = vld [vmem:[%s6238_s3 + $0x128] sm:$0xff]  ;;  %v758_v61 = vadd.f32 %v757_v54, %v687_v62  ;;  %v1636_v54 = vld [vmem:[#allocation2 + $0x500] sm:$0xff] }
 0x136   :  { %1364 = vmatprep.subr.mxu0 %v1255_v60  ;;  %1434 = vmatpush1.msra.mxu1 %v1256_v26  ;;  %v1228_v60 = vld [vmem:[%s6238_s3 + $0x120] sm:$0xff]  ;;  %v1605_v55 = vld [vmem:[#allocation2 + $0x408] sm:$0xff] }
 0x137   :  { %1365 = vmatpush2.msra.mxu0 %v1254_v63  ;;  %1435 = vmatprep.subr.mxu1 %v1319_v16  ;;  %v1227_v63 = vld [vmem:[%s6238_s3 + $0x118] sm:$0xff]  ;;  %v760_v16 = vadd.f32 %v759_v59, %v689_v58  ;;  %v1572_v62 = vld [vmem:[#allocation2 + $0x300] sm:$0xff]  ;;  %v1509_v58 = vld [vmem:[#allocation2 + $0x108] sm:$0xff] }
 0x138   :  { %1366 = vmatprep.subr.mxu0 %v1253_v29  ;;  %1436 = vmatpush2.msra.mxu1 %v1318_v0  ;;  %v1226_v29 = vld [vmem:[%s6238_s3 + $0x110] sm:$0xff]  ;;  %v1225_v0 = vld [vmem:[%s6238_s3 + $0x108] sm:$0xff] }
 0x139   :  { %1367 = vmatpush2.msra.mxu0 %v1252_v21  ;;  %1437 = vmatprep.subr.mxu1 %v1317_v2  ;;  %v1477_v59 = vld [vmem:[#allocation2 + $0x8] sm:$0xff] }
 0x13a   :  { %1368 = vmatprep.subr.mxu0 %v1251_v1  ;;  %1438 = vmatpush2.msra.mxu1 %v1316_v5 }
 0x13b   :  { %1369 = vmatpush2.msra.mxu0 %v1250_v4  ;;  %1439 = vmatprep.subr.mxu1 %v1315_v7  ;;  %v1224_v4 = vld [vmem:[%s6238_s3 + $0x100] sm:$0xff] }
 0x13c   :  { %1370 = vmatprep.subr.mxu0 %v1249_v6  ;;  %1440 = vmatpush2.msra.mxu1 %v1314_v10 }
 0x13d   :  { %1371 = vmatpush2.msra.mxu0 %v1248_v9  ;;  %1441 = vmatprep.subr.mxu1 %v1313_v13  ;;  %v1297_v9 = vld [vmem:[%s6238_s3 + $0x348] sm:$0xff]  ;;  %v1295_v13 = vld [vmem:[%s6238_s3 + $0x338] sm:$0xff] }
 0x13e   :  { %1372 = vmatprep.subr.mxu0 %v1247_v12  ;;  %1442 = vmatpush2.msra.mxu1 %v1312_v15  ;;  %v1296_v12 = vld [vmem:[%s6238_s3 + $0x340] sm:$0xff]  ;;  %v1294_v15 = vld [vmem:[%s6238_s3 + $0x330] sm:$0xff] }
 0x13f   :  { %1373 = vmatpush2.msra.mxu0 %v1246_v14  ;;  %1443 = vmatprep.subr.mxu1 %v1311_v18  ;;  %v1293_v18 = vld [vmem:[%s6238_s3 + $0x328] sm:$0xff] }
 0x140   :  { %1374 = vmatprep.subr.mxu0 %v1245_v17  ;;  %1444 = vmatpush2.msra.mxu1 %v1310_v20  ;;  %v1291_v20 = vld [vmem:[%s6238_s3 + $0x318] sm:$0xff] }
 0x141   :  { %1375 = vmatpush2.msra.mxu0 %v1244_v19  ;;  %1445 = vmatprep.subr.mxu1 %v1309_v23  ;;  %v1292_v19 = vld [vmem:[%s6238_s3 + $0x320] sm:$0xff]  ;;  %v1289_v23 = vld [vmem:[%s6238_s3 + $0x308] sm:$0xff] }
 0x142   :  { %1376 = vmatprep.subr.mxu0 %v1243_v22  ;;  %1446 = vmatpush2.msra.mxu1 %v1308_v25  ;;  %v1290_v22 = vld [vmem:[%s6238_s3 + $0x310] sm:$0xff]  ;;  %v1957_v25 = vld [vmem:[#allocation2 + $0xf08] sm:$0xff] }
 0x143   :  { %1377 = vmatpush2.msra.mxu0 %v1242_v24  ;;  %1447 = vmatprep.subr.mxu1 %v1307_v28  ;;  %v1288_v24 = vld [vmem:[%s6238_s3 + $0x300] sm:$0xff] }
 0x144   :  { %1378 = vmatprep.subr.mxu0 %v1241_v27  ;;  %1448 = vmatpush2.msra.mxu1 %v1306_v31  ;;  %v1959_v27 = vld [vmem:[#allocation2 + $0xf18] sm:$0xff]  ;;  %v1956_v28 = vld [vmem:[#allocation2 + $0xf00] sm:$0xff] }
 0x145   :  { %1379 = vmatpush2.msra.mxu0 %v1240_v30  ;;  %1449 = vmatprep.subr.mxu1 %v1305_v34  ;;  %v1925_v30 = vld [vmem:[#allocation2 + $0xe08] sm:$0xff]  ;;  %v1924_v31 = vld [vmem:[#allocation2 + $0xe00] sm:$0xff] }
 0x146   :  { %1380 = vmatprep.subr.mxu0 %v1239_v33  ;;  %1450 = vmatpush2.msra.mxu1 %v1304_v37  ;;  %v1893_v33 = vld [vmem:[#allocation2 + $0xd08] sm:$0xff]  ;;  %v1892_v34 = vld [vmem:[#allocation2 + $0xd00] sm:$0xff] }
 0x147   :  { %1381 = vmatpush2.msra.mxu0 %v1238_v36  ;;  %1451 = vmatprep.subr.mxu1 %v1303_v40  ;;  %v1861_v36 = vld [vmem:[#allocation2 + $0xc08] sm:$0xff]  ;;  %v1860_v37 = vld [vmem:[#allocation2 + $0xc00] sm:$0xff] }
 0x148   :  { %1382 = vmatprep.subr.mxu0 %v1237_v39  ;;  %1452 = vmatpush2.msra.mxu1 %v1302_v44  ;;  %v1829_v39 = vld [vmem:[#allocation2 + $0xb08] sm:$0xff]  ;;  %v1828_v40 = vld [vmem:[#allocation2 + $0xb00] sm:$0xff] }
 0x149   :  { %1383 = vmatpush2.msra.mxu0 %v1236_v43  ;;  %1453 = vmatprep.subr.mxu1 %v1301_v47  ;;  %v1796_v43 = vld [vmem:[#allocation2 + $0xa00] sm:$0xff]  ;;  %v1765_v44 = vld [vmem:[#allocation2 + $0x908] sm:$0xff] }
 0x14a   :  { %1384 = vmatprep.subr.mxu0 %v1235_v46  ;;  %1454 = vmatpush2.msra.mxu1 %v1300_v49  ;;  %v1733_v46 = vld [vmem:[#allocation2 + $0x808] sm:$0xff]  ;;  %v1732_v47 = vld [vmem:[#allocation2 + $0x800] sm:$0xff] }
 0x14b   :  { %1385 = vmatpush2.msra.mxu0 %v1234_v48  ;;  %1455 = vmatprep.subr.mxu1 %v1299_v53  ;;  %v1701_v48 = vld [vmem:[#allocation2 + $0x708] sm:$0xff]  ;;  %v1700_v49 = vld [vmem:[#allocation2 + $0x700] sm:$0xff] }
 0x14c   :  { %1386 = vmatprep.subr.mxu0 %v1233_v51  ;;  %1456 = vmatpush2.msra.mxu1 %v1298_v56  ;;  %v1668_v51 = vld [vmem:[#allocation2 + $0x600] sm:$0xff]  ;;  %v1637_v53 = vld [vmem:[#allocation2 + $0x508] sm:$0xff] }
 0x14d   :  { %1387 = vmatpush2.msra.mxu0 %v1232_v8  ;;  %1457 = vmatprep.subr.mxu1 %v1297_v9  ;;  %v1604_v8 = vld [vmem:[#allocation2 + $0x400] sm:$0xff]  ;;  %v1573_v56 = vld [vmem:[#allocation2 + $0x308] sm:$0xff]  ;;  %v6059_v9 = vsub.s32 2, %v4374_v41 }
 0x14e   :  { %1388 = vmatprep.subr.mxu0 %v1231_v11  ;;  %1458 = vmatpush2.msra.mxu1 %v1296_v12  ;;  %v1541_v11 = vld [vmem:[#allocation2 + $0x208] sm:$0xff] }
 0x14f   :  { %1389 = vmatpush2.msra.mxu0 %v1230_v57  ;;  %1459 = vmatprep.subr.mxu1 %v1295_v13  ;;  %v1540_v57 = vld [vmem:[#allocation2 + $0x200] sm:$0xff]  ;;  %v2245_v12 = vld [vmem:[#allocation2 + $0x1808] sm:$0xff]  ;;  %v6062_v13 = vsub.s32 3, %v4374_v41 }
 0x150   :  { %1390 = vmatprep.subr.mxu0 %v1229_v3  ;;  %1460 = vmatpush2.msra.mxu1 %v1294_v15  ;;  %v1508_v3 = vld [vmem:[#allocation2 + $0x100] sm:$0xff] }
 0x151   :  { %v828_v26 = vpop.f32.mrf.mxu0  ;;  %1391 = vmatpush2.msra.mxu0 %v1228_v60  ;;  %1461 = vmatprep.subr.mxu1 %v1293_v18  ;;  %v1476_v60 = vld [vmem:[#allocation2] sm:$0xff]  ;;  %v567_v18 = vrot.slane %v5953_v35, %v6059_v9 }
 0x152   :  { %v829_v21 = vadd.f32 %v828_v26, %v758_v61  ;;  %1392 = vmatprep.subr.mxu0 %v1227_v63  ;;  %1462 = vmatpush2.msra.mxu1 %v1292_v19  ;;  %v2469_v61 = vld [vmem:[#allocation2 + $0x1f08] sm:$0xff]  ;;  %v2468_v63 = vld [vmem:[#allocation2 + $0x1f00] sm:$0xff] }
 0x153   :  { %v899_v1 = vpop.f32.mrf.mxu1  ;;  %v830_v2 = vpop.f32.mrf.mxu0  ;;  %1393 = vmatpush2.msra.mxu0 %v1226_v29  ;;  %1463 = vmatprep.subr.mxu1 %v1291_v20  ;;  %v2437_v26 = vld [vmem:[#allocation2 + $0x1e08] sm:$0xff]  ;;  %v2436_v29 = vld [vmem:[#allocation2 + $0x1e00] sm:$0xff] }
 0x154   :  { %v831_v5 = vadd.f32 %v830_v2, %v760_v16  ;;  %v900_v6 = vadd.f32 %v899_v1, %v829_v21  ;;  %1394 = vmatprep.subr.mxu0 %v1225_v0  ;;  %1464 = vmatpush2.msra.mxu1 %v1290_v22  ;;  %v2405_v16 = vld [vmem:[#allocation2 + $0x1d08] sm:$0xff]  ;;  %v2404_v21 = vld [vmem:[#allocation2 + $0x1d00] sm:$0xff]  ;;  %v571_v22 = vrot.slane %v5953_v35, %v6062_v13 }
 0x155   :  { %v901_v7 = vpop.f32.mrf.mxu1  ;;  %1395 = vmatpush2.msra.mxu0 %v1224_v4  ;;  %1465 = vmatprep.subr.mxu1 %v1289_v23  ;;  %v2373_v0 = vld [vmem:[#allocation2 + $0x1c08] sm:$0xff]  ;;  %v2372_v1 = vld [vmem:[#allocation2 + $0x1c00] sm:$0xff] }
 0x156   :  { %v902_v10 = vadd.f32 %v901_v7, %v831_v5  ;;  %v1188_v17 = vmax.f32 %v900_v6, 0.0  ;;  %1466 = vmatpush2.msra.mxu1 %v1288_v24  ;;  %2668 = vmatprep.subr.mxu0 %v1957_v25  ;;  %v2341_v2 = vld [vmem:[#allocation2 + $0x1b08] sm:$0xff]  ;;  %v2340_v4 = vld [vmem:[#allocation2 + $0x1b00] sm:$0xff] }
 0x157   :  { %2739 = vmatprep.subr.mxu1 %v1959_v27  ;;  %v2309_v5 = vld [vmem:[#allocation2 + $0x1a08] sm:$0xff]  ;;  %v2308_v6 = vld [vmem:[#allocation2 + $0x1a00] sm:$0xff] }
 0x158   :  { %v1189_v14 = vmax.f32 %v902_v10, 0.0  ;;  %v2277_v7 = vld [vmem:[#allocation2 + $0x1908] sm:$0xff]  ;;  %v2276_v10 = vld [vmem:[#allocation2 + $0x1900] sm:$0xff] }
 0x159   :  { %v2212_v19 = vld [vmem:[#allocation2 + $0x1700] sm:$0xff]  ;;  %v2181_v20 = vld [vmem:[#allocation2 + $0x1608] sm:$0xff] }
 0x15a   :  { %1396 = vmatprep.mubr.f32.mxu0 %v1189_v14  ;;  %v2244_v14 = vld [vmem:[#allocation2 + $0x1800] sm:$0xff]  ;;  %v2149_v27 = vld [vmem:[#allocation2 + $0x1508] sm:$0xff] }
 0x15b   :  { %1397 = vmatmul.mubr.f32.vlgmr.msra.gmra.mxu0 %v1188_v17  ;;  %v2213_v17 = vld [vmem:[#allocation2 + $0x1708] sm:$0xff]  ;;  %v2180_v23 = vld [vmem:[#allocation2 + $0x1600] sm:$0xff] }
 0x15c   :  { %2669 = vmatpush1.msra.mxu0 %v1956_v28 }
 0x15d   :  { %2670 = vmatprep.subr.mxu0 %v1925_v30  ;;  %v2148_v30 = vld [vmem:[#allocation2 + $0x1500] sm:$0xff] }
 0x15e   :  { %2671 = vmatpush1.msra.mxu0 %v1924_v31  ;;  %v2117_v31 = vld [vmem:[#allocation2 + $0x1408] sm:$0xff] }
 0x15f   :  { %2672 = vmatprep.subr.mxu0 %v1893_v33 }
 0x160   :  { %2673 = vmatpush1.msra.mxu0 %v1892_v34  ;;  %v2116_v34 = vld [vmem:[#allocation2 + $0x1400] sm:$0xff] }
 0x161   :  { %2674 = vmatprep.subr.mxu0 %v1861_v36 }
 0x162   :  { %2675 = vmatpush1.msra.mxu0 %v1860_v37  ;;  %v2085_v37 = vld [vmem:[#allocation2 + $0x1308] sm:$0xff] }
 0x163   :  { %2676 = vmatprep.subr.mxu0 %v1829_v39 }
 0x164   :  { %2677 = vmatpush1.msra.mxu0 %v1828_v40 }
 0x165   :  { %2678 = vmatprep.subr.mxu0 %v1797_v42 }
 0x166   :  { %2679 = vmatpush1.msra.mxu0 %v1796_v43 }
 0x167   :  { %2680 = vmatprep.subr.mxu0 %v1765_v44 }
 0x168   :  { %2681 = vmatpush1.msra.mxu0 %v1764_v45 }
 0x169   :  { %2682 = vmatprep.subr.mxu0 %v1733_v46 }
 0x16a   :  { %2683 = vmatpush1.msra.mxu0 %v1732_v47 }
 0x16b   :  { %2684 = vmatprep.subr.mxu0 %v1701_v48 }
 0x16c   :  { %2685 = vmatpush1.msra.mxu0 %v1700_v49 }
 0x16d   :  { %2686 = vmatprep.subr.mxu0 %v1669_v50 }
 0x16e   :  { %2687 = vmatpush1.msra.mxu0 %v1668_v51  ;;  %v1958_v51 = vld [vmem:[#allocation2 + $0xf10] sm:$0xff] }
 0x16f   :  { %2688 = vmatprep.subr.mxu0 %v1637_v53  ;;  %v1927_v53 = vld [vmem:[#allocation2 + $0xe18] sm:$0xff] }
 0x170   :  { %2689 = vmatpush1.msra.mxu0 %v1636_v54  ;;  %v1926_v54 = vld [vmem:[#allocation2 + $0xe10] sm:$0xff] }
 0x171   :  { %2690 = vmatprep.subr.mxu0 %v1605_v55  ;;  %v1895_v55 = vld [vmem:[#allocation2 + $0xd18] sm:$0xff] }
 0x172   :  { %2691 = vmatpush1.msra.mxu0 %v1604_v8  ;;  %v1894_v8 = vld [vmem:[#allocation2 + $0xd10] sm:$0xff] }
 0x173   :  { %2692 = vmatprep.subr.mxu0 %v1573_v56  ;;  %v1863_v56 = vld [vmem:[#allocation2 + $0xc18] sm:$0xff] }
 0x174   :  { %2693 = vmatpush1.msra.mxu0 %v1572_v62  ;;  %v1862_v62 = vld [vmem:[#allocation2 + $0xc10] sm:$0xff] }
 0x175   :  { %2694 = vmatprep.subr.mxu0 %v1541_v11  ;;  %v1831_v11 = vld [vmem:[#allocation2 + $0xb18] sm:$0xff] }
 0x176   :  { %2695 = vmatpush1.msra.mxu0 %v1540_v57  ;;  %v1830_v57 = vld [vmem:[#allocation2 + $0xb10] sm:$0xff] }
 0x177   :  { %2696 = vmatprep.subr.mxu0 %v1509_v58  ;;  %v1799_v58 = vld [vmem:[#allocation2 + $0xa18] sm:$0xff] }
 0x178   :  { %2697 = vmatpush1.msra.mxu0 %v1508_v3  ;;  %v1798_v3 = vld [vmem:[#allocation2 + $0xa10] sm:$0xff] }
 0x179   :  { %2698 = vmatprep.subr.mxu0 %v1477_v59  ;;  %v1767_v59 = vld [vmem:[#allocation2 + $0x918] sm:$0xff] }
 0x17a   :  { %2699 = vmatpush1.msra.mxu0 %v1476_v60  ;;  %v1766_v60 = vld [vmem:[#allocation2 + $0x910] sm:$0xff] }
 0x17b   :  { %2700 = vmatprep.subr.mxu0 %v2469_v61  ;;  %v1735_v61 = vld [vmem:[#allocation2 + $0x818] sm:$0xff] }
 0x17c   :  { %2701 = vmatpush2.msra.mxu0 %v2468_v63  ;;  %v1734_v63 = vld [vmem:[#allocation2 + $0x810] sm:$0xff] }
 0x17d   :  { %2702 = vmatprep.subr.mxu0 %v2437_v26  ;;  %v1703_v26 = vld [vmem:[#allocation2 + $0x718] sm:$0xff] }
 0x17e   :  { %2703 = vmatpush2.msra.mxu0 %v2436_v29  ;;  %v1702_v29 = vld [vmem:[#allocation2 + $0x710] sm:$0xff] }
 0x17f   :  { %2704 = vmatprep.subr.mxu0 %v2405_v16  ;;  %v1671_v16 = vld [vmem:[#allocation2 + $0x618] sm:$0xff] }
 0x180   :  { %2705 = vmatpush2.msra.mxu0 %v2404_v21  ;;  %v1670_v21 = vld [vmem:[#allocation2 + $0x610] sm:$0xff] }
 0x181   :  { %2706 = vmatprep.subr.mxu0 %v2373_v0  ;;  %v1639_v0 = vld [vmem:[#allocation2 + $0x518] sm:$0xff] }
 0x182   :  { %2707 = vmatpush2.msra.mxu0 %v2372_v1  ;;  %v1638_v1 = vld [vmem:[#allocation2 + $0x510] sm:$0xff] }
 0x183   :  { %2708 = vmatprep.subr.mxu0 %v2341_v2  ;;  %v1607_v2 = vld [vmem:[#allocation2 + $0x418] sm:$0xff] }
 0x184   :  { %2709 = vmatpush2.msra.mxu0 %v2340_v4  ;;  %v1606_v4 = vld [vmem:[#allocation2 + $0x410] sm:$0xff] }
 0x185   :  { %2710 = vmatprep.subr.mxu0 %v2309_v5  ;;  %v1575_v5 = vld [vmem:[#allocation2 + $0x318] sm:$0xff] }
 0x186   :  { %2711 = vmatpush2.msra.mxu0 %v2308_v6  ;;  %v1574_v6 = vld [vmem:[#allocation2 + $0x310] sm:$0xff] }
 0x187   :  { %2712 = vmatprep.subr.mxu0 %v2277_v7  ;;  %v1543_v7 = vld [vmem:[#allocation2 + $0x218] sm:$0xff] }
 0x188   :  { %2713 = vmatpush2.msra.mxu0 %v2276_v10  ;;  %v1542_v10 = vld [vmem:[#allocation2 + $0x210] sm:$0xff] }
 0x189   :  { %2714 = vmatprep.subr.mxu0 %v2245_v12  ;;  %v1511_v12 = vld [vmem:[#allocation2 + $0x118] sm:$0xff] }
 0x18a   :  { %2715 = vmatpush2.msra.mxu0 %v2244_v14  ;;  %v1510_v14 = vld [vmem:[#allocation2 + $0x110] sm:$0xff] }
 0x18b   :  { %2716 = vmatprep.subr.mxu0 %v2213_v17  ;;  %v1478_v17 = vld [vmem:[#allocation2 + $0x10] sm:$0xff] }
 0x18c   :  { %2717 = vmatpush2.msra.mxu0 %v2212_v19  ;;  %v2470_v19 = vld [vmem:[#allocation2 + $0x1f10] sm:$0xff] }
 0x18d   :  { %2718 = vmatprep.subr.mxu0 %v2181_v20  ;;  %v2439_v20 = vld [vmem:[#allocation2 + $0x1e18] sm:$0xff] }
 0x18e   :  { %2719 = vmatpush2.msra.mxu0 %v2180_v23  ;;  %v2407_v23 = vld [vmem:[#allocation2 + $0x1d18] sm:$0xff] }
 0x18f   :  { %2720 = vmatprep.subr.mxu0 %v2149_v27  ;;  %v2374_v27 = vld [vmem:[#allocation2 + $0x1c10] sm:$0xff] }
 0x190   :  { %2721 = vmatpush2.msra.mxu0 %v2148_v30  ;;  %v2342_v30 = vld [vmem:[#allocation2 + $0x1b10] sm:$0xff] }
 0x191   :  { %2722 = vmatprep.subr.mxu0 %v2117_v31  ;;  %v2311_v31 = vld [vmem:[#allocation2 + $0x1a18] sm:$0xff] }
 0x192   :  { %2723 = vmatpush2.msra.mxu0 %v2116_v34  ;;  %v2279_v34 = vld [vmem:[#allocation2 + $0x1918] sm:$0xff] }
 0x193   :  { %v970_v15 = vpop.f32.mrf.mxu0  ;;  %2724 = vmatprep.subr.mxu0 %v2085_v37  ;;  %v2247_v37 = vld [vmem:[#allocation2 + $0x1818] sm:$0xff] }
 0x194   :  { %v971_v28 = vadd.f32 %v970_v15, %v567_v18  ;;  %v1479_v15 = vld [vmem:[#allocation2 + $0x18] sm:$0xff] }
 0x195   :  { %v1041_v24 = vpop.f32.mrf.mxu1  ;;  %v972_v25 = vpop.f32.mrf.mxu0  ;;  %v2471_v18 = vld [vmem:[#allocation2 + $0x1f18] sm:$0xff] }
 0x196   :  { %v973_v33 = vadd.f32 %v972_v25, %v571_v22  ;;  %v1042_v39 = vadd.f32 %v1041_v24, %v971_v28  ;;  %v2438_v22 = vld [vmem:[#allocation2 + $0x1e10] sm:$0xff]  ;;  %v2375_v25 = vld [vmem:[#allocation2 + $0x1c18] sm:$0xff] }
 0x197   :  { %v1043_v36 = vpop.f32.mrf.mxu1  ;;  %v2406_v24 = vld [vmem:[#allocation2 + $0x1d10] sm:$0xff]  ;;  %v2343_v28 = vld [vmem:[#allocation2 + $0x1b18] sm:$0xff] }
 0x198   :  { %v1044_v42 = vadd.f32 %v1043_v36, %v973_v33  ;;  %v2310_v33 = vld [vmem:[#allocation2 + $0x1a10] sm:$0xff] }
 0x199   :  { %v2278_v36 = vld [vmem:[#allocation2 + $0x1910] sm:$0xff] }
 0x1d5   :  { %v1112_v35 = vpop.f32.mrf.mxu0 }
 0x1d6   :  { %v1183_v40 = vpop.f32.mrf.mxu1  ;;  %v1113_v43 = vadd.f32 %v1112_v35, %v1042_v39  ;;  %v2246_v39 = vld [vmem:[#allocation2 + $0x1810] sm:$0xff]  ;;  %v2215_v35 = vld [vmem:[#allocation2 + $0x1718] sm:$0xff] }
 0x1d7   :  { %v1114_v44 = vpop.f32.mrf.mxu0 }
 0x1d8   :  { %v1115_v45 = vadd.f32 %v1114_v44, %v1044_v42  ;;  %v1184_v46 = vadd.f32 %v1183_v40, %v1113_v43  ;;  %v1185_v47 = vpop.f32.mrf.mxu1  ;;  %v2214_v40 = vld [vmem:[#allocation2 + $0x1710] sm:$0xff]  ;;  %v2183_v42 = vld [vmem:[#allocation2 + $0x1618] sm:$0xff] }
 0x1d9   :  { %v2182_v43 = vld [vmem:[#allocation2 + $0x1610] sm:$0xff]  ;;  %v2151_v44 = vld [vmem:[#allocation2 + $0x1518] sm:$0xff] }
 0x1da   :  { %v1186_v48 = vadd.f32 %v1185_v47, %v1115_v45  ;;  %v1190_v50 = vmax.f32 %v1184_v46, 0.0  ;;  %v2150_v45 = vld [vmem:[#allocation2 + $0x1510] sm:$0xff]  ;;  %v2119_v46 = vld [vmem:[#allocation2 + $0x1418] sm:$0xff] }
 0x1db   :  { %v2118_v47 = vld [vmem:[#allocation2 + $0x1410] sm:$0xff] }
 0x1dc   :  { %v1191_v49 = vmax.f32 %v1186_v48, 0.0  ;;  %v2087_v48 = vld [vmem:[#allocation2 + $0x1318] sm:$0xff] }
 0x1de   :  { %1467 = vmatprep.mubr.f32.mxu1 %v1191_v49  ;;  %v2084_v49 = vld [vmem:[#allocation2 + $0x1300] sm:$0xff] }
 0x1df   :  { %1468 = vmatmul.mubr.f32.vlgmr.msra.gmra.mxu1 %v1190_v50  ;;  %v2086_v50 = vld [vmem:[#allocation2 + $0x1310] sm:$0xff]  ;;  %2725 = vmatpush2.msra.mxu0 %v2084_v49 }
 0x1e0   :  { %2740 = vmatpush1.msra.mxu1 %v1958_v51  ;;  %v2053_v51 = vld [vmem:[#allocation2 + $0x1208] sm:$0xff]  ;;  %v1738_v49 = vld [vmem:[#allocation2 + $0x830] sm:$0xff] }
 0x1e1   :  { %2741 = vmatprep.subr.mxu1 %v1927_v53  ;;  %v2055_v53 = vld [vmem:[#allocation2 + $0x1218] sm:$0xff]  ;;  %2726 = vmatprep.subr.mxu0 %v2053_v51 }
 0x1e2   :  { %2742 = vmatpush1.msra.mxu1 %v1926_v54  ;;  %v2052_v54 = vld [vmem:[#allocation2 + $0x1200] sm:$0xff]  ;;  %v1707_v51 = vld [vmem:[#allocation2 + $0x738] sm:$0xff] }
 0x1e3   :  { %2743 = vmatprep.subr.mxu1 %v1895_v55  ;;  %v2054_v55 = vld [vmem:[#allocation2 + $0x1210] sm:$0xff]  ;;  %2727 = vmatpush2.msra.mxu0 %v2052_v54 }
 0x1e4   :  { %2744 = vmatpush1.msra.mxu1 %v1894_v8  ;;  %v2021_v8 = vld [vmem:[#allocation2 + $0x1108] sm:$0xff]  ;;  %v1706_v54 = vld [vmem:[#allocation2 + $0x730] sm:$0xff] }
 0x1e5   :  { %2745 = vmatprep.subr.mxu1 %v1863_v56  ;;  %v2023_v56 = vld [vmem:[#allocation2 + $0x1118] sm:$0xff]  ;;  %2728 = vmatprep.subr.mxu0 %v2021_v8 }
 0x1e6   :  { %2746 = vmatpush1.msra.mxu1 %v1862_v62  ;;  %v2020_v62 = vld [vmem:[#allocation2 + $0x1100] sm:$0xff]  ;;  %v1675_v8 = vld [vmem:[#allocation2 + $0x638] sm:$0xff] }
 0x1e7   :  { %2747 = vmatprep.subr.mxu1 %v1831_v11  ;;  %v2022_v11 = vld [vmem:[#allocation2 + $0x1110] sm:$0xff]  ;;  %2729 = vmatpush2.msra.mxu0 %v2020_v62 }
 0x1e8   :  { %2748 = vmatpush1.msra.mxu1 %v1830_v57  ;;  %v1989_v57 = vld [vmem:[#allocation2 + $0x1008] sm:$0xff]  ;;  %v1674_v62 = vld [vmem:[#allocation2 + $0x630] sm:$0xff] }
 0x1e9   :  { %2749 = vmatprep.subr.mxu1 %v1799_v58  ;;  %v1991_v58 = vld [vmem:[#allocation2 + $0x1018] sm:$0xff]  ;;  %2730 = vmatprep.subr.mxu0 %v1989_v57 }
 0x1ea   :  { %2750 = vmatpush1.msra.mxu1 %v1798_v3  ;;  %v1988_v3 = vld [vmem:[#allocation2 + $0x1000] sm:$0xff]  ;;  %v1643_v57 = vld [vmem:[#allocation2 + $0x538] sm:$0xff] }
 0x1eb   :  { %2751 = vmatprep.subr.mxu1 %v1767_v59  ;;  %v1990_v59 = vld [vmem:[#allocation2 + $0x1010] sm:$0xff]  ;;  %2731 = vmatpush2.msra.mxu0 %v1988_v3 }
 0x1ec   :  { %2752 = vmatpush1.msra.mxu1 %v1766_v60  ;;  %v1961_v60 = vld [vmem:[#allocation2 + $0xf28] sm:$0xff]  ;;  %v1642_v3 = vld [vmem:[#allocation2 + $0x530] sm:$0xff] }
 0x1ed   :  { %2753 = vmatprep.subr.mxu1 %v1735_v61  ;;  %v1963_v61 = vld [vmem:[#allocation2 + $0xf38] sm:$0xff]  ;;  %2810 = vmatprep.subr.mxu0 %v1961_v60 }
 0x1ee   :  { %2754 = vmatpush1.msra.mxu1 %v1734_v63  ;;  %v1320_v63 = vld [vmem:[%s6239_s4] sm:$0x3]  ;;  %v1611_v60 = vld [vmem:[#allocation2 + $0x438] sm:$0xff] }
 0x1ef   :  { %2755 = vmatprep.subr.mxu1 %v1703_v26 }
 0x1f0   :  { %2756 = vmatpush1.msra.mxu1 %v1702_v29  ;;  %v1325_v29 = vrot.slane %v1320_v63, %v5942_v32 }
 0x1f1   :  { %2757 = vmatprep.subr.mxu1 %v1671_v16  ;;  %v1329_v16 = vrot.slane %v1320_v63, %v5962_v38  ;;  %v1610_v63 = vld [vmem:[#allocation2 + $0x430] sm:$0xff] }
 0x1f2   :  { %2758 = vmatpush1.msra.mxu1 %v1670_v21 }
 0x1f3   :  { %2759 = vmatprep.subr.mxu1 %v1639_v0 }
 0x1f4   :  { %2760 = vmatpush1.msra.mxu1 %v1638_v1 }
 0x1f5   :  { %2761 = vmatprep.subr.mxu1 %v1607_v2 }
 0x1f6   :  { %2762 = vmatpush1.msra.mxu1 %v1606_v4 }
 0x1f7   :  { %2763 = vmatprep.subr.mxu1 %v1575_v5 }
 0x1f8   :  { %2764 = vmatpush1.msra.mxu1 %v1574_v6 }
 0x1f9   :  { %2765 = vmatprep.subr.mxu1 %v1543_v7 }
 0x1fa   :  { %2766 = vmatpush1.msra.mxu1 %v1542_v10 }
 0x1fb   :  { %2767 = vmatprep.subr.mxu1 %v1511_v12  ;;  %v1960_v12 = vld [vmem:[#allocation2 + $0xf20] sm:$0xff] }
 0x1fc   :  { %2768 = vmatpush1.msra.mxu1 %v1510_v14  ;;  %v1962_v14 = vld [vmem:[#allocation2 + $0xf30] sm:$0xff] }
 0x1fd   :  { %2769 = vmatprep.subr.mxu1 %v1479_v15  ;;  %v1929_v15 = vld [vmem:[#allocation2 + $0xe28] sm:$0xff] }
 0x1fe   :  { %2770 = vmatpush1.msra.mxu1 %v1478_v17  ;;  %v1931_v17 = vld [vmem:[#allocation2 + $0xe38] sm:$0xff] }
 0x1ff   :  { %2771 = vmatprep.subr.mxu1 %v2471_v18  ;;  %v1928_v18 = vld [vmem:[#allocation2 + $0xe20] sm:$0xff] }
 0x200   :  { %2772 = vmatpush2.msra.mxu1 %v2470_v19  ;;  %v1930_v19 = vld [vmem:[#allocation2 + $0xe30] sm:$0xff] }
 0x201   :  { %2773 = vmatprep.subr.mxu1 %v2439_v20  ;;  %v1897_v20 = vld [vmem:[#allocation2 + $0xd28] sm:$0xff] }
 0x202   :  { %2774 = vmatpush2.msra.mxu1 %v2438_v22  ;;  %v1899_v22 = vld [vmem:[#allocation2 + $0xd38] sm:$0xff] }
 0x203   :  { %2775 = vmatprep.subr.mxu1 %v2407_v23  ;;  %v1896_v23 = vld [vmem:[#allocation2 + $0xd20] sm:$0xff] }
 0x204   :  { %2776 = vmatpush2.msra.mxu1 %v2406_v24  ;;  %v1898_v24 = vld [vmem:[#allocation2 + $0xd30] sm:$0xff] }
 0x205   :  { %2777 = vmatprep.subr.mxu1 %v2375_v25  ;;  %v1865_v25 = vld [vmem:[#allocation2 + $0xc28] sm:$0xff] }
 0x206   :  { %2778 = vmatpush2.msra.mxu1 %v2374_v27  ;;  %v1867_v27 = vld [vmem:[#allocation2 + $0xc38] sm:$0xff] }
 0x207   :  { %2779 = vmatprep.subr.mxu1 %v2343_v28  ;;  %v1864_v28 = vld [vmem:[#allocation2 + $0xc20] sm:$0xff] }
 0x208   :  { %2780 = vmatpush2.msra.mxu1 %v2342_v30  ;;  %v1866_v30 = vld [vmem:[#allocation2 + $0xc30] sm:$0xff] }
 0x209   :  { %2781 = vmatprep.subr.mxu1 %v2311_v31  ;;  %v1833_v31 = vld [vmem:[#allocation2 + $0xb28] sm:$0xff] }
 0x20a   :  { %2782 = vmatpush2.msra.mxu1 %v2310_v33  ;;  %v1835_v33 = vld [vmem:[#allocation2 + $0xb38] sm:$0xff] }
 0x20b   :  { %2783 = vmatprep.subr.mxu1 %v2279_v34  ;;  %v1832_v34 = vld [vmem:[#allocation2 + $0xb20] sm:$0xff] }
 0x20c   :  { %2784 = vmatpush2.msra.mxu1 %v2278_v36  ;;  %v1834_v36 = vld [vmem:[#allocation2 + $0xb30] sm:$0xff] }
 0x20d   :  { %2785 = vmatprep.subr.mxu1 %v2247_v37  ;;  %v1801_v37 = vld [vmem:[#allocation2 + $0xa28] sm:$0xff] }
 0x20e   :  { %2786 = vmatpush2.msra.mxu1 %v2246_v39  ;;  %v1803_v39 = vld [vmem:[#allocation2 + $0xa38] sm:$0xff] }
 0x20f   :  { %2787 = vmatprep.subr.mxu1 %v2215_v35  ;;  %v1800_v35 = vld [vmem:[#allocation2 + $0xa20] sm:$0xff] }
 0x210   :  { %2788 = vmatpush2.msra.mxu1 %v2214_v40  ;;  %v1802_v40 = vld [vmem:[#allocation2 + $0xa30] sm:$0xff] }
 0x211   :  { %2789 = vmatprep.subr.mxu1 %v2183_v42  ;;  %v1769_v42 = vld [vmem:[#allocation2 + $0x928] sm:$0xff] }
 0x212   :  { %2790 = vmatpush2.msra.mxu1 %v2182_v43  ;;  %v1771_v43 = vld [vmem:[#allocation2 + $0x938] sm:$0xff] }
 0x213   :  { %2791 = vmatprep.subr.mxu1 %v2151_v44  ;;  %v1768_v44 = vld [vmem:[#allocation2 + $0x920] sm:$0xff] }
 0x214   :  { %2792 = vmatpush2.msra.mxu1 %v2150_v45  ;;  %v1770_v45 = vld [vmem:[#allocation2 + $0x930] sm:$0xff] }
 0x215   :  { %2793 = vmatprep.subr.mxu1 %v2119_v46  ;;  %v1737_v46 = vld [vmem:[#allocation2 + $0x828] sm:$0xff] }
 0x216   :  { %2794 = vmatpush2.msra.mxu1 %v2118_v47  ;;  %v1739_v47 = vld [vmem:[#allocation2 + $0x838] sm:$0xff] }
 0x217   :  { %2795 = vmatprep.subr.mxu1 %v2087_v48  ;;  %v1736_v48 = vld [vmem:[#allocation2 + $0x820] sm:$0xff] }
 0x218   :  { %2796 = vmatpush2.msra.mxu1 %v2086_v50  ;;  %v1705_v50 = vld [vmem:[#allocation2 + $0x728] sm:$0xff] }
 0x219   :  { %2797 = vmatprep.subr.mxu1 %v2055_v53  ;;  %v1704_v53 = vld [vmem:[#allocation2 + $0x720] sm:$0xff] }
 0x21a   :  { %2798 = vmatpush2.msra.mxu1 %v2054_v55  ;;  %v1673_v55 = vld [vmem:[#allocation2 + $0x628] sm:$0xff] }
 0x21b   :  { %2799 = vmatprep.subr.mxu1 %v2023_v56  ;;  %v1398_v26 = vpop.f32.mrf.mxu0  ;;  %v1672_v56 = vld [vmem:[#allocation2 + $0x620] sm:$0xff] }
 0x21c   :  { %2800 = vmatpush2.msra.mxu1 %v2022_v11  ;;  %v1399_v0 = vadd.f32 %v1398_v26, %v1325_v29  ;;  %v1641_v11 = vld [vmem:[#allocation2 + $0x528] sm:$0xff]  ;;  %v1579_v29 = vld [vmem:[#allocation2 + $0x338] sm:$0xff] }
 0x21d   :  { %2801 = vmatprep.subr.mxu1 %v1991_v58  ;;  %v1400_v21 = vpop.f32.mrf.mxu0  ;;  %v1640_v58 = vld [vmem:[#allocation2 + $0x520] sm:$0xff]  ;;  %v1577_v26 = vld [vmem:[#allocation2 + $0x328] sm:$0xff] }
 0x21e   :  { %2802 = vmatpush2.msra.mxu1 %v1990_v59  ;;  %v1401_v2 = vadd.f32 %v1400_v21, %v1329_v16  ;;  %v1609_v59 = vld [vmem:[#allocation2 + $0x428] sm:$0xff]  ;;  %v1576_v16 = vld [vmem:[#allocation2 + $0x320] sm:$0xff]  ;;  %v1578_v21 = vld [vmem:[#allocation2 + $0x330] sm:$0xff] }
 0x21f   :  { %2881 = vmatprep.subr.mxu1 %v1963_v61  ;;  %v1608_v61 = vld [vmem:[#allocation2 + $0x420] sm:$0xff] }
 0x29f   :  { %v1469_v1 = vpop.f32.mrf.mxu1 }
 0x2a0   :  { %v1470_v4 = vadd.f32 %v1469_v1, %v1399_v0  ;;  %v1545_v0 = vld [vmem:[#allocation2 + $0x228] sm:$0xff]  ;;  %v1547_v1 = vld [vmem:[#allocation2 + $0x238] sm:$0xff] }
 0x2a1   :  { %v1471_v5 = vpop.f32.mrf.mxu1 }
 0x2a2   :  { %v1472_v6 = vadd.f32 %v1471_v5, %v1401_v2  ;;  %v6075_v10 = vmax.f32 %v1470_v4, 0.0  ;;  %v1544_v2 = vld [vmem:[#allocation2 + $0x220] sm:$0xff]  ;;  %v1546_v4 = vld [vmem:[#allocation2 + $0x230] sm:$0xff]  ;;  %v1513_v5 = vld [vmem:[#allocation2 + $0x128] sm:$0xff] }
 0x2a4   :  { %v6073_v7 = vmax.f32 %v1472_v6, 0.0  ;;  %v1515_v6 = vld [vmem:[#allocation2 + $0x138] sm:$0xff] }
 0x2a6   :  { %2732 = vmatprep.mubr.f32.mxu0 %v6073_v7  ;;  %2803 = vmatprep.mubr.f32.mxu1 %v6073_v7 }
 0x2a7   :  { %2733 = vmatmul.mubr.f32.vlgmr.msra.gmra.mxu0 %v6075_v10  ;;  %2804 = vmatmul.mubr.f32.vlgmr.msra.gmra.mxu1 %v6075_v10 }
 0x2a8   :  { %2811 = vmatpush1.msra.mxu0 %v1960_v12  ;;  %2882 = vmatpush1.msra.mxu1 %v1962_v14  ;;  %v1512_v12 = vld [vmem:[#allocation2 + $0x120] sm:$0xff]  ;;  %v1514_v14 = vld [vmem:[#allocation2 + $0x130] sm:$0xff] }
 0x2a9   :  { %2812 = vmatprep.subr.mxu0 %v1929_v15  ;;  %2874 = vmatprep.mubr.f32.mxu0 %v6073_v7  ;;  %v1481_v15 = vld [vmem:[#allocation2 + $0x28] sm:$0xff] }
 0x2aa   :  { %2883 = vmatprep.subr.mxu1 %v1931_v17  ;;  %2945 = vmatprep.mubr.f32.mxu1 %v6073_v7  ;;  %v1483_v17 = vld [vmem:[#allocation2 + $0x38] sm:$0xff] }
 0x2ab   :  { %2813 = vmatpush1.msra.mxu0 %v1928_v18  ;;  %2884 = vmatpush1.msra.mxu1 %v1930_v19  ;;  %v1480_v18 = vld [vmem:[#allocation2 + $0x20] sm:$0xff]  ;;  %v1482_v19 = vld [vmem:[#allocation2 + $0x30] sm:$0xff] }
 0x2ac   :  { %2814 = vmatprep.subr.mxu0 %v1897_v20  ;;  %2885 = vmatprep.subr.mxu1 %v1899_v22  ;;  %v2473_v20 = vld [vmem:[#allocation2 + $0x1f28] sm:$0xff]  ;;  %v2475_v22 = vld [vmem:[#allocation2 + $0x1f38] sm:$0xff] }
 0x2ad   :  { %2815 = vmatpush1.msra.mxu0 %v1896_v23  ;;  %2886 = vmatpush1.msra.mxu1 %v1898_v24  ;;  %v2472_v23 = vld [vmem:[#allocation2 + $0x1f20] sm:$0xff]  ;;  %v2474_v24 = vld [vmem:[#allocation2 + $0x1f30] sm:$0xff] }
 0x2ae   :  { %2816 = vmatprep.subr.mxu0 %v1865_v25  ;;  %2887 = vmatprep.subr.mxu1 %v1867_v27  ;;  %v2441_v25 = vld [vmem:[#allocation2 + $0x1e28] sm:$0xff]  ;;  %v2443_v27 = vld [vmem:[#allocation2 + $0x1e38] sm:$0xff] }
 0x2af   :  { %2817 = vmatpush1.msra.mxu0 %v1864_v28  ;;  %2888 = vmatpush1.msra.mxu1 %v1866_v30  ;;  %v2440_v28 = vld [vmem:[#allocation2 + $0x1e20] sm:$0xff]  ;;  %v2442_v30 = vld [vmem:[#allocation2 + $0x1e30] sm:$0xff] }
 0x2b0   :  { %2818 = vmatprep.subr.mxu0 %v1833_v31  ;;  %2889 = vmatprep.subr.mxu1 %v1835_v33  ;;  %v2409_v31 = vld [vmem:[#allocation2 + $0x1d28] sm:$0xff]  ;;  %v2411_v33 = vld [vmem:[#allocation2 + $0x1d38] sm:$0xff] }
 0x2b1   :  { %2819 = vmatpush1.msra.mxu0 %v1832_v34  ;;  %2890 = vmatpush1.msra.mxu1 %v1834_v36  ;;  %v2408_v34 = vld [vmem:[#allocation2 + $0x1d20] sm:$0xff]  ;;  %v2410_v36 = vld [vmem:[#allocation2 + $0x1d30] sm:$0xff] }
 0x2b2   :  { %2820 = vmatprep.subr.mxu0 %v1801_v37  ;;  %2891 = vmatprep.subr.mxu1 %v1803_v39  ;;  %v2377_v37 = vld [vmem:[#allocation2 + $0x1c28] sm:$0xff]  ;;  %v2379_v39 = vld [vmem:[#allocation2 + $0x1c38] sm:$0xff] }
 0x2b3   :  { %2821 = vmatpush1.msra.mxu0 %v1800_v35  ;;  %2892 = vmatpush1.msra.mxu1 %v1802_v40  ;;  %v2376_v35 = vld [vmem:[#allocation2 + $0x1c20] sm:$0xff]  ;;  %v2378_v40 = vld [vmem:[#allocation2 + $0x1c30] sm:$0xff] }
 0x2b4   :  { %2822 = vmatprep.subr.mxu0 %v1769_v42  ;;  %2893 = vmatprep.subr.mxu1 %v1771_v43  ;;  %v2345_v42 = vld [vmem:[#allocation2 + $0x1b28] sm:$0xff]  ;;  %v2347_v43 = vld [vmem:[#allocation2 + $0x1b38] sm:$0xff] }
 0x2b5   :  { %2823 = vmatpush1.msra.mxu0 %v1768_v44  ;;  %2894 = vmatpush1.msra.mxu1 %v1770_v45  ;;  %v2344_v44 = vld [vmem:[#allocation2 + $0x1b20] sm:$0xff]  ;;  %v2346_v45 = vld [vmem:[#allocation2 + $0x1b30] sm:$0xff] }
 0x2b6   :  { %2824 = vmatprep.subr.mxu0 %v1737_v46  ;;  %2895 = vmatprep.subr.mxu1 %v1739_v47  ;;  %v2313_v46 = vld [vmem:[#allocation2 + $0x1a28] sm:$0xff]  ;;  %v2315_v47 = vld [vmem:[#allocation2 + $0x1a38] sm:$0xff] }
 0x2b7   :  { %2825 = vmatpush1.msra.mxu0 %v1736_v48  ;;  %2896 = vmatpush1.msra.mxu1 %v1738_v49  ;;  %v2312_v48 = vld [vmem:[#allocation2 + $0x1a20] sm:$0xff]  ;;  %v2314_v49 = vld [vmem:[#allocation2 + $0x1a30] sm:$0xff] }
 0x2b8   :  { %2826 = vmatprep.subr.mxu0 %v1705_v50  ;;  %2897 = vmatprep.subr.mxu1 %v1707_v51  ;;  %v2281_v50 = vld [vmem:[#allocation2 + $0x1928] sm:$0xff]  ;;  %v2283_v51 = vld [vmem:[#allocation2 + $0x1938] sm:$0xff] }
 0x2b9   :  { %2827 = vmatpush1.msra.mxu0 %v1704_v53  ;;  %2898 = vmatpush1.msra.mxu1 %v1706_v54  ;;  %v2280_v53 = vld [vmem:[#allocation2 + $0x1920] sm:$0xff]  ;;  %v2282_v54 = vld [vmem:[#allocation2 + $0x1930] sm:$0xff] }
 0x2ba   :  { %2828 = vmatprep.subr.mxu0 %v1673_v55  ;;  %2899 = vmatprep.subr.mxu1 %v1675_v8  ;;  %v2249_v55 = vld [vmem:[#allocation2 + $0x1828] sm:$0xff]  ;;  %v2251_v8 = vld [vmem:[#allocation2 + $0x1838] sm:$0xff] }
 0x2bb   :  { %2829 = vmatpush1.msra.mxu0 %v1672_v56  ;;  %2900 = vmatpush1.msra.mxu1 %v1674_v62  ;;  %v2248_v56 = vld [vmem:[#allocation2 + $0x1820] sm:$0xff]  ;;  %v2250_v62 = vld [vmem:[#allocation2 + $0x1830] sm:$0xff] }
 0x2bc   :  { %2830 = vmatprep.subr.mxu0 %v1641_v11  ;;  %2901 = vmatprep.subr.mxu1 %v1643_v57  ;;  %v2217_v11 = vld [vmem:[#allocation2 + $0x1728] sm:$0xff]  ;;  %v2219_v57 = vld [vmem:[#allocation2 + $0x1738] sm:$0xff] }
 0x2bd   :  { %2831 = vmatpush1.msra.mxu0 %v1640_v58  ;;  %2902 = vmatpush1.msra.mxu1 %v1642_v3  ;;  %v2216_v58 = vld [vmem:[#allocation2 + $0x1720] sm:$0xff]  ;;  %v2218_v3 = vld [vmem:[#allocation2 + $0x1730] sm:$0xff] }
 0x2be   :  { %2832 = vmatprep.subr.mxu0 %v1609_v59  ;;  %2903 = vmatprep.subr.mxu1 %v1611_v60  ;;  %v2185_v59 = vld [vmem:[#allocation2 + $0x1628] sm:$0xff]  ;;  %v2187_v60 = vld [vmem:[#allocation2 + $0x1638] sm:$0xff] }
 0x2bf   :  { %2833 = vmatpush1.msra.mxu0 %v1608_v61  ;;  %2904 = vmatpush1.msra.mxu1 %v1610_v63  ;;  %v2184_v61 = vld [vmem:[#allocation2 + $0x1620] sm:$0xff]  ;;  %v2186_v63 = vld [vmem:[#allocation2 + $0x1630] sm:$0xff] }
 0x2c0   :  { %2834 = vmatprep.subr.mxu0 %v1577_v26  ;;  %2905 = vmatprep.subr.mxu1 %v1579_v29  ;;  %v2153_v26 = vld [vmem:[#allocation2 + $0x1528] sm:$0xff]  ;;  %v2155_v29 = vld [vmem:[#allocation2 + $0x1538] sm:$0xff] }
 0x2c1   :  { %2835 = vmatpush1.msra.mxu0 %v1576_v16  ;;  %2906 = vmatpush1.msra.mxu1 %v1578_v21  ;;  %v2152_v16 = vld [vmem:[#allocation2 + $0x1520] sm:$0xff]  ;;  %v2154_v21 = vld [vmem:[#allocation2 + $0x1530] sm:$0xff] }
 0x2c2   :  { %2836 = vmatprep.subr.mxu0 %v1545_v0  ;;  %2907 = vmatprep.subr.mxu1 %v1547_v1  ;;  %v2121_v0 = vld [vmem:[#allocation2 + $0x1428] sm:$0xff]  ;;  %v2123_v1 = vld [vmem:[#allocation2 + $0x1438] sm:$0xff] }
 0x2c3   :  { %2837 = vmatpush1.msra.mxu0 %v1544_v2  ;;  %2908 = vmatpush1.msra.mxu1 %v1546_v4  ;;  %v2120_v2 = vld [vmem:[#allocation2 + $0x1420] sm:$0xff]  ;;  %v2122_v4 = vld [vmem:[#allocation2 + $0x1430] sm:$0xff] }
 0x2c4   :  { %2838 = vmatprep.subr.mxu0 %v1513_v5  ;;  %2909 = vmatprep.subr.mxu1 %v1515_v6  ;;  %v2089_v5 = vld [vmem:[#allocation2 + $0x1328] sm:$0xff]  ;;  %v2091_v6 = vld [vmem:[#allocation2 + $0x1338] sm:$0xff] }
 0x2c5   :  { %2839 = vmatpush1.msra.mxu0 %v1512_v12  ;;  %2910 = vmatpush1.msra.mxu1 %v1514_v14  ;;  %v2088_v12 = vld [vmem:[#allocation2 + $0x1320] sm:$0xff]  ;;  %v2090_v14 = vld [vmem:[#allocation2 + $0x1330] sm:$0xff] }
 0x2c6   :  { %2840 = vmatprep.subr.mxu0 %v1481_v15  ;;  %2911 = vmatprep.subr.mxu1 %v1483_v17  ;;  %v2057_v15 = vld [vmem:[#allocation2 + $0x1228] sm:$0xff]  ;;  %v2059_v17 = vld [vmem:[#allocation2 + $0x1238] sm:$0xff] }
 0x2c7   :  { %2841 = vmatpush1.msra.mxu0 %v1480_v18  ;;  %2912 = vmatpush1.msra.mxu1 %v1482_v19  ;;  %v2056_v18 = vld [vmem:[#allocation2 + $0x1220] sm:$0xff]  ;;  %v2058_v19 = vld [vmem:[#allocation2 + $0x1230] sm:$0xff] }
 0x2c8   :  { %2842 = vmatprep.subr.mxu0 %v2473_v20  ;;  %2913 = vmatprep.subr.mxu1 %v2475_v22  ;;  %v2025_v20 = vld [vmem:[#allocation2 + $0x1128] sm:$0xff]  ;;  %v2027_v22 = vld [vmem:[#allocation2 + $0x1138] sm:$0xff] }
 0x2c9   :  { %2843 = vmatpush2.msra.mxu0 %v2472_v23  ;;  %2914 = vmatpush2.msra.mxu1 %v2474_v24  ;;  %v2024_v23 = vld [vmem:[#allocation2 + $0x1120] sm:$0xff]  ;;  %v2026_v24 = vld [vmem:[#allocation2 + $0x1130] sm:$0xff] }
 0x2ca   :  { %2844 = vmatprep.subr.mxu0 %v2441_v25  ;;  %2915 = vmatprep.subr.mxu1 %v2443_v27  ;;  %v1993_v25 = vld [vmem:[#allocation2 + $0x1028] sm:$0xff]  ;;  %v1995_v27 = vld [vmem:[#allocation2 + $0x1038] sm:$0xff] }
 0x2cb   :  { %2845 = vmatpush2.msra.mxu0 %v2440_v28  ;;  %2916 = vmatpush2.msra.mxu1 %v2442_v30  ;;  %v1992_v28 = vld [vmem:[#allocation2 + $0x1020] sm:$0xff]  ;;  %v1994_v30 = vld [vmem:[#allocation2 + $0x1030] sm:$0xff] }
 0x2cc   :  { %2846 = vmatprep.subr.mxu0 %v2409_v31  ;;  %2917 = vmatprep.subr.mxu1 %v2411_v33  ;;  %v1965_v31 = vld [vmem:[#allocation2 + $0xf48] sm:$0xff]  ;;  %v1967_v33 = vld [vmem:[#allocation2 + $0xf58] sm:$0xff] }
 0x2cd   :  { %2847 = vmatpush2.msra.mxu0 %v2408_v34  ;;  %2918 = vmatpush2.msra.mxu1 %v2410_v36  ;;  %v1964_v34 = vld [vmem:[#allocation2 + $0xf40] sm:$0xff]  ;;  %v1966_v36 = vld [vmem:[#allocation2 + $0xf50] sm:$0xff] }
 0x2ce   :  { %2848 = vmatprep.subr.mxu0 %v2377_v37  ;;  %2919 = vmatprep.subr.mxu1 %v2379_v39  ;;  %v1933_v37 = vld [vmem:[#allocation2 + $0xe48] sm:$0xff]  ;;  %v1935_v39 = vld [vmem:[#allocation2 + $0xe58] sm:$0xff] }
 0x2cf   :  { %2849 = vmatpush2.msra.mxu0 %v2376_v35  ;;  %2920 = vmatpush2.msra.mxu1 %v2378_v40  ;;  %v1932_v35 = vld [vmem:[#allocation2 + $0xe40] sm:$0xff]  ;;  %v1934_v40 = vld [vmem:[#allocation2 + $0xe50] sm:$0xff] }
 0x2d0   :  { %2850 = vmatprep.subr.mxu0 %v2345_v42  ;;  %2921 = vmatprep.subr.mxu1 %v2347_v43  ;;  %v1901_v42 = vld [vmem:[#allocation2 + $0xd48] sm:$0xff]  ;;  %v1903_v43 = vld [vmem:[#allocation2 + $0xd58] sm:$0xff] }
 0x2d1   :  { %2851 = vmatpush2.msra.mxu0 %v2344_v44  ;;  %2922 = vmatpush2.msra.mxu1 %v2346_v45  ;;  %v1900_v44 = vld [vmem:[#allocation2 + $0xd40] sm:$0xff]  ;;  %v1902_v45 = vld [vmem:[#allocation2 + $0xd50] sm:$0xff] }
 0x2d2   :  { %2852 = vmatprep.subr.mxu0 %v2313_v46  ;;  %2923 = vmatprep.subr.mxu1 %v2315_v47  ;;  %v1869_v46 = vld [vmem:[#allocation2 + $0xc48] sm:$0xff]  ;;  %v1871_v47 = vld [vmem:[#allocation2 + $0xc58] sm:$0xff] }
 0x2d3   :  { %2853 = vmatpush2.msra.mxu0 %v2312_v48  ;;  %2924 = vmatpush2.msra.mxu1 %v2314_v49  ;;  %v1868_v48 = vld [vmem:[#allocation2 + $0xc40] sm:$0xff]  ;;  %v1870_v49 = vld [vmem:[#allocation2 + $0xc50] sm:$0xff] }
 0x2d4   :  { %2854 = vmatprep.subr.mxu0 %v2281_v50  ;;  %2925 = vmatprep.subr.mxu1 %v2283_v51  ;;  %v1837_v50 = vld [vmem:[#allocation2 + $0xb48] sm:$0xff]  ;;  %v1839_v51 = vld [vmem:[#allocation2 + $0xb58] sm:$0xff] }
 0x2d5   :  { %2855 = vmatpush2.msra.mxu0 %v2280_v53  ;;  %2926 = vmatpush2.msra.mxu1 %v2282_v54  ;;  %v1836_v53 = vld [vmem:[#allocation2 + $0xb40] sm:$0xff]  ;;  %v1838_v54 = vld [vmem:[#allocation2 + $0xb50] sm:$0xff] }
 0x2d6   :  { %2856 = vmatprep.subr.mxu0 %v2249_v55  ;;  %2927 = vmatprep.subr.mxu1 %v2251_v8  ;;  %v1805_v55 = vld [vmem:[#allocation2 + $0xa48] sm:$0xff]  ;;  %v1807_v8 = vld [vmem:[#allocation2 + $0xa58] sm:$0xff] }
 0x2d7   :  { %2857 = vmatpush2.msra.mxu0 %v2248_v56  ;;  %2928 = vmatpush2.msra.mxu1 %v2250_v62  ;;  %v1804_v56 = vld [vmem:[#allocation2 + $0xa40] sm:$0xff]  ;;  %v1806_v62 = vld [vmem:[#allocation2 + $0xa50] sm:$0xff] }
 0x2d8   :  { %2858 = vmatprep.subr.mxu0 %v2217_v11  ;;  %2929 = vmatprep.subr.mxu1 %v2219_v57  ;;  %v1773_v11 = vld [vmem:[#allocation2 + $0x948] sm:$0xff]  ;;  %v1775_v57 = vld [vmem:[#allocation2 + $0x958] sm:$0xff] }
 0x2d9   :  { %2859 = vmatpush2.msra.mxu0 %v2216_v58  ;;  %2930 = vmatpush2.msra.mxu1 %v2218_v3  ;;  %v1772_v58 = vld [vmem:[#allocation2 + $0x940] sm:$0xff]  ;;  %v1774_v3 = vld [vmem:[#allocation2 + $0x950] sm:$0xff] }
 0x2da   :  { %2860 = vmatprep.subr.mxu0 %v2185_v59  ;;  %2931 = vmatprep.subr.mxu1 %v2187_v60  ;;  %v1741_v59 = vld [vmem:[#allocation2 + $0x848] sm:$0xff]  ;;  %v1743_v60 = vld [vmem:[#allocation2 + $0x858] sm:$0xff] }
 0x2db   :  { %2861 = vmatpush2.msra.mxu0 %v2184_v61  ;;  %2932 = vmatpush2.msra.mxu1 %v2186_v63  ;;  %v1740_v61 = vld [vmem:[#allocation2 + $0x840] sm:$0xff]  ;;  %v1742_v63 = vld [vmem:[#allocation2 + $0x850] sm:$0xff] }
 0x2dc   :  { %2862 = vmatprep.subr.mxu0 %v2153_v26  ;;  %2933 = vmatprep.subr.mxu1 %v2155_v29  ;;  %v1709_v26 = vld [vmem:[#allocation2 + $0x748] sm:$0xff]  ;;  %v1711_v29 = vld [vmem:[#allocation2 + $0x758] sm:$0xff] }
 0x2dd   :  { %2863 = vmatpush2.msra.mxu0 %v2152_v16  ;;  %2934 = vmatpush2.msra.mxu1 %v2154_v21  ;;  %v1708_v16 = vld [vmem:[#allocation2 + $0x740] sm:$0xff]  ;;  %v1710_v21 = vld [vmem:[#allocation2 + $0x750] sm:$0xff] }
 0x2de   :  { %2864 = vmatprep.subr.mxu0 %v2121_v0  ;;  %2935 = vmatprep.subr.mxu1 %v2123_v1  ;;  %v1677_v0 = vld [vmem:[#allocation2 + $0x648] sm:$0xff]  ;;  %v1679_v1 = vld [vmem:[#allocation2 + $0x658] sm:$0xff] }
 0x2df   :  { %2865 = vmatpush2.msra.mxu0 %v2120_v2  ;;  %2936 = vmatpush2.msra.mxu1 %v2122_v4  ;;  %v1676_v2 = vld [vmem:[#allocation2 + $0x640] sm:$0xff]  ;;  %v1678_v4 = vld [vmem:[#allocation2 + $0x650] sm:$0xff] }
 0x2e0   :  { %2866 = vmatprep.subr.mxu0 %v2089_v5  ;;  %2937 = vmatprep.subr.mxu1 %v2091_v6  ;;  %v1645_v5 = vld [vmem:[#allocation2 + $0x548] sm:$0xff]  ;;  %v1647_v6 = vld [vmem:[#allocation2 + $0x558] sm:$0xff] }
 0x2e1   :  { %2867 = vmatpush2.msra.mxu0 %v2088_v12  ;;  %2938 = vmatpush2.msra.mxu1 %v2090_v14  ;;  %v1644_v12 = vld [vmem:[#allocation2 + $0x540] sm:$0xff]  ;;  %v1646_v14 = vld [vmem:[#allocation2 + $0x550] sm:$0xff] }
 0x2e2   :  { %2868 = vmatprep.subr.mxu0 %v2057_v15  ;;  %2939 = vmatprep.subr.mxu1 %v2059_v17  ;;  %v1613_v15 = vld [vmem:[#allocation2 + $0x448] sm:$0xff]  ;;  %v1615_v17 = vld [vmem:[#allocation2 + $0x458] sm:$0xff] }
 0x2e3   :  { %2869 = vmatpush2.msra.mxu0 %v2056_v18  ;;  %2940 = vmatpush2.msra.mxu1 %v2058_v19  ;;  %v1612_v18 = vld [vmem:[#allocation2 + $0x440] sm:$0xff]  ;;  %v1614_v19 = vld [vmem:[#allocation2 + $0x450] sm:$0xff] }
 0x2e4   :  { %2870 = vmatprep.subr.mxu0 %v2025_v20  ;;  %2941 = vmatprep.subr.mxu1 %v2027_v22  ;;  %v1581_v20 = vld [vmem:[#allocation2 + $0x348] sm:$0xff]  ;;  %v1583_v22 = vld [vmem:[#allocation2 + $0x358] sm:$0xff] }
 0x2e5   :  { %2871 = vmatpush2.msra.mxu0 %v2024_v23  ;;  %2942 = vmatpush2.msra.mxu1 %v2026_v24  ;;  %v1580_v23 = vld [vmem:[#allocation2 + $0x340] sm:$0xff]  ;;  %v1582_v24 = vld [vmem:[#allocation2 + $0x350] sm:$0xff] }
 0x2e6   :  { %2872 = vmatprep.subr.mxu0 %v1993_v25  ;;  %2943 = vmatprep.subr.mxu1 %v1995_v27  ;;  %v1549_v25 = vld [vmem:[#allocation2 + $0x248] sm:$0xff]  ;;  %v1551_v27 = vld [vmem:[#allocation2 + $0x258] sm:$0xff] }
 0x2e7   :  { %2873 = vmatpush2.msra.mxu0 %v1992_v28  ;;  %2944 = vmatpush2.msra.mxu1 %v1994_v30  ;;  %v1548_v28 = vld [vmem:[#allocation2 + $0x240] sm:$0xff]  ;;  %v1550_v30 = vld [vmem:[#allocation2 + $0x250] sm:$0xff] }
 0x2e8   :  { %2875 = vmatmul.mubr.f32.vlgmr.msra.gmra.mxu0 %v6075_v10  ;;  %2946 = vmatmul.mubr.f32.vlgmr.msra.gmra.mxu1 %v6075_v10 }
 0x2e9   :  { %2952 = vmatprep.subr.mxu0 %v1965_v31  ;;  %3023 = vmatprep.subr.mxu1 %v1967_v33  ;;  %v1517_v31 = vld [vmem:[#allocation2 + $0x148] sm:$0xff]  ;;  %v1519_v33 = vld [vmem:[#allocation2 + $0x158] sm:$0xff] }
 0x2ea   :  { %2953 = vmatpush1.msra.mxu0 %v1964_v34  ;;  %3016 = vmatprep.mubr.f32.mxu0 %v6073_v7  ;;  %v1516_v34 = vld [vmem:[#allocation2 + $0x140] sm:$0xff] }
 0x2eb   :  { %3024 = vmatpush1.msra.mxu1 %v1966_v36  ;;  %3087 = vmatprep.mubr.f32.mxu1 %v6073_v7  ;;  %v1518_v36 = vld [vmem:[#allocation2 + $0x150] sm:$0xff] }
 0x2ec   :  { %2954 = vmatprep.subr.mxu0 %v1933_v37  ;;  %3025 = vmatprep.subr.mxu1 %v1935_v39  ;;  %v1485_v37 = vld [vmem:[#allocation2 + $0x48] sm:$0xff]  ;;  %v1487_v39 = vld [vmem:[#allocation2 + $0x58] sm:$0xff] }
 0x2ed   :  { %2955 = vmatpush1.msra.mxu0 %v1932_v35  ;;  %3026 = vmatpush1.msra.mxu1 %v1934_v40  ;;  %v1484_v35 = vld [vmem:[#allocation2 + $0x40] sm:$0xff]  ;;  %v1486_v40 = vld [vmem:[#allocation2 + $0x50] sm:$0xff] }
 0x2ee   :  { %2956 = vmatprep.subr.mxu0 %v1901_v42  ;;  %3027 = vmatprep.subr.mxu1 %v1903_v43  ;;  %v2477_v42 = vld [vmem:[#allocation2 + $0x1f48] sm:$0xff]  ;;  %v2479_v43 = vld [vmem:[#allocation2 + $0x1f58] sm:$0xff] }
 0x2ef   :  { %2957 = vmatpush1.msra.mxu0 %v1900_v44  ;;  %3028 = vmatpush1.msra.mxu1 %v1902_v45  ;;  %v2476_v44 = vld [vmem:[#allocation2 + $0x1f40] sm:$0xff]  ;;  %v2478_v45 = vld [vmem:[#allocation2 + $0x1f50] sm:$0xff] }
 0x2f0   :  { %2958 = vmatprep.subr.mxu0 %v1869_v46  ;;  %3029 = vmatprep.subr.mxu1 %v1871_v47  ;;  %v2445_v46 = vld [vmem:[#allocation2 + $0x1e48] sm:$0xff]  ;;  %v2447_v47 = vld [vmem:[#allocation2 + $0x1e58] sm:$0xff] }
 0x2f1   :  { %2959 = vmatpush1.msra.mxu0 %v1868_v48  ;;  %3030 = vmatpush1.msra.mxu1 %v1870_v49  ;;  %v2444_v48 = vld [vmem:[#allocation2 + $0x1e40] sm:$0xff]  ;;  %v2446_v49 = vld [vmem:[#allocation2 + $0x1e50] sm:$0xff] }
 0x2f2   :  { %2960 = vmatprep.subr.mxu0 %v1837_v50  ;;  %3031 = vmatprep.subr.mxu1 %v1839_v51  ;;  %v2413_v50 = vld [vmem:[#allocation2 + $0x1d48] sm:$0xff]  ;;  %v2415_v51 = vld [vmem:[#allocation2 + $0x1d58] sm:$0xff] }
 0x2f3   :  { %2961 = vmatpush1.msra.mxu0 %v1836_v53  ;;  %3032 = vmatpush1.msra.mxu1 %v1838_v54  ;;  %v2412_v53 = vld [vmem:[#allocation2 + $0x1d40] sm:$0xff]  ;;  %v2414_v54 = vld [vmem:[#allocation2 + $0x1d50] sm:$0xff] }
 0x2f4   :  { %2962 = vmatprep.subr.mxu0 %v1805_v55  ;;  %3033 = vmatprep.subr.mxu1 %v1807_v8  ;;  %v2381_v55 = vld [vmem:[#allocation2 + $0x1c48] sm:$0xff]  ;;  %v2383_v8 = vld [vmem:[#allocation2 + $0x1c58] sm:$0xff] }
 0x2f5   :  { %2963 = vmatpush1.msra.mxu0 %v1804_v56  ;;  %3034 = vmatpush1.msra.mxu1 %v1806_v62  ;;  %v2380_v56 = vld [vmem:[#allocation2 + $0x1c40] sm:$0xff]  ;;  %v2382_v62 = vld [vmem:[#allocation2 + $0x1c50] sm:$0xff] }
 0x2f6   :  { %2964 = vmatprep.subr.mxu0 %v1773_v11  ;;  %3035 = vmatprep.subr.mxu1 %v1775_v57  ;;  %v2349_v11 = vld [vmem:[#allocation2 + $0x1b48] sm:$0xff]  ;;  %v2351_v57 = vld [vmem:[#allocation2 + $0x1b58] sm:$0xff] }
 0x2f7   :  { %2965 = vmatpush1.msra.mxu0 %v1772_v58  ;;  %3036 = vmatpush1.msra.mxu1 %v1774_v3  ;;  %v2348_v58 = vld [vmem:[#allocation2 + $0x1b40] sm:$0xff]  ;;  %v2350_v3 = vld [vmem:[#allocation2 + $0x1b50] sm:$0xff] }
 0x2f8   :  { %2966 = vmatprep.subr.mxu0 %v1741_v59  ;;  %3037 = vmatprep.subr.mxu1 %v1743_v60  ;;  %v2317_v59 = vld [vmem:[#allocation2 + $0x1a48] sm:$0xff]  ;;  %v2319_v60 = vld [vmem:[#allocation2 + $0x1a58] sm:$0xff] }
 0x2f9   :  { %2967 = vmatpush1.msra.mxu0 %v1740_v61  ;;  %3038 = vmatpush1.msra.mxu1 %v1742_v63  ;;  %v2316_v61 = vld [vmem:[#allocation2 + $0x1a40] sm:$0xff]  ;;  %v2318_v63 = vld [vmem:[#allocation2 + $0x1a50] sm:$0xff] }
 0x2fa   :  { %2968 = vmatprep.subr.mxu0 %v1709_v26  ;;  %3039 = vmatprep.subr.mxu1 %v1711_v29  ;;  %v2285_v26 = vld [vmem:[#allocation2 + $0x1948] sm:$0xff]  ;;  %v2287_v29 = vld [vmem:[#allocation2 + $0x1958] sm:$0xff] }
 0x2fb   :  { %2969 = vmatpush1.msra.mxu0 %v1708_v16  ;;  %3040 = vmatpush1.msra.mxu1 %v1710_v21  ;;  %v2284_v16 = vld [vmem:[#allocation2 + $0x1940] sm:$0xff]  ;;  %v2286_v21 = vld [vmem:[#allocation2 + $0x1950] sm:$0xff] }
 0x2fc   :  { %2970 = vmatprep.subr.mxu0 %v1677_v0  ;;  %3041 = vmatprep.subr.mxu1 %v1679_v1  ;;  %v2253_v0 = vld [vmem:[#allocation2 + $0x1848] sm:$0xff]  ;;  %v2255_v1 = vld [vmem:[#allocation2 + $0x1858] sm:$0xff] }
 0x2fd   :  { %2971 = vmatpush1.msra.mxu0 %v1676_v2  ;;  %3042 = vmatpush1.msra.mxu1 %v1678_v4  ;;  %v2252_v2 = vld [vmem:[#allocation2 + $0x1840] sm:$0xff]  ;;  %v2254_v4 = vld [vmem:[#allocation2 + $0x1850] sm:$0xff] }
 0x2fe   :  { %2972 = vmatprep.subr.mxu0 %v1645_v5  ;;  %3043 = vmatprep.subr.mxu1 %v1647_v6  ;;  %v2221_v5 = vld [vmem:[#allocation2 + $0x1748] sm:$0xff]  ;;  %v2223_v6 = vld [vmem:[#allocation2 + $0x1758] sm:$0xff] }
 0x2ff   :  { %2973 = vmatpush1.msra.mxu0 %v1644_v12  ;;  %3044 = vmatpush1.msra.mxu1 %v1646_v14  ;;  %v2220_v12 = vld [vmem:[#allocation2 + $0x1740] sm:$0xff]  ;;  %v2222_v14 = vld [vmem:[#allocation2 + $0x1750] sm:$0xff] }
 0x300   :  { %2974 = vmatprep.subr.mxu0 %v1613_v15  ;;  %3045 = vmatprep.subr.mxu1 %v1615_v17  ;;  %v2189_v15 = vld [vmem:[#allocation2 + $0x1648] sm:$0xff]  ;;  %v2191_v17 = vld [vmem:[#allocation2 + $0x1658] sm:$0xff] }
 0x301   :  { %2975 = vmatpush1.msra.mxu0 %v1612_v18  ;;  %3046 = vmatpush1.msra.mxu1 %v1614_v19  ;;  %v2188_v18 = vld [vmem:[#allocation2 + $0x1640] sm:$0xff]  ;;  %v2190_v19 = vld [vmem:[#allocation2 + $0x1650] sm:$0xff] }
 0x302   :  { %2976 = vmatprep.subr.mxu0 %v1581_v20  ;;  %3047 = vmatprep.subr.mxu1 %v1583_v22  ;;  %v2157_v20 = vld [vmem:[#allocation2 + $0x1548] sm:$0xff]  ;;  %v2159_v22 = vld [vmem:[#allocation2 + $0x1558] sm:$0xff] }
 0x303   :  { %2977 = vmatpush1.msra.mxu0 %v1580_v23  ;;  %3048 = vmatpush1.msra.mxu1 %v1582_v24  ;;  %v2156_v23 = vld [vmem:[#allocation2 + $0x1540] sm:$0xff]  ;;  %v2158_v24 = vld [vmem:[#allocation2 + $0x1550] sm:$0xff] }
 0x304   :  { %2978 = vmatprep.subr.mxu0 %v1549_v25  ;;  %3049 = vmatprep.subr.mxu1 %v1551_v27  ;;  %v2125_v25 = vld [vmem:[#allocation2 + $0x1448] sm:$0xff]  ;;  %v2127_v27 = vld [vmem:[#allocation2 + $0x1458] sm:$0xff] }
 0x305   :  { %2979 = vmatpush1.msra.mxu0 %v1548_v28  ;;  %3050 = vmatpush1.msra.mxu1 %v1550_v30  ;;  %v2124_v28 = vld [vmem:[#allocation2 + $0x1440] sm:$0xff]  ;;  %v2126_v30 = vld [vmem:[#allocation2 + $0x1450] sm:$0xff] }
 0x306   :  { %2980 = vmatprep.subr.mxu0 %v1517_v31  ;;  %3051 = vmatprep.subr.mxu1 %v1519_v33  ;;  %v2093_v31 = vld [vmem:[#allocation2 + $0x1348] sm:$0xff]  ;;  %v2095_v33 = vld [vmem:[#allocation2 + $0x1358] sm:$0xff] }
 0x307   :  { %2981 = vmatpush1.msra.mxu0 %v1516_v34  ;;  %3052 = vmatpush1.msra.mxu1 %v1518_v36  ;;  %v2092_v34 = vld [vmem:[#allocation2 + $0x1340] sm:$0xff]  ;;  %v2094_v36 = vld [vmem:[#allocation2 + $0x1350] sm:$0xff] }
 0x308   :  { %2982 = vmatprep.subr.mxu0 %v1485_v37  ;;  %3053 = vmatprep.subr.mxu1 %v1487_v39  ;;  %v2061_v37 = vld [vmem:[#allocation2 + $0x1248] sm:$0xff]  ;;  %v2063_v39 = vld [vmem:[#allocation2 + $0x1258] sm:$0xff] }
 0x309   :  { %2983 = vmatpush1.msra.mxu0 %v1484_v35  ;;  %3054 = vmatpush1.msra.mxu1 %v1486_v40  ;;  %v2060_v35 = vld [vmem:[#allocation2 + $0x1240] sm:$0xff]  ;;  %v2062_v40 = vld [vmem:[#allocation2 + $0x1250] sm:$0xff] }
 0x30a   :  { %2984 = vmatprep.subr.mxu0 %v2477_v42  ;;  %3055 = vmatprep.subr.mxu1 %v2479_v43  ;;  %v2029_v42 = vld [vmem:[#allocation2 + $0x1148] sm:$0xff]  ;;  %v2031_v43 = vld [vmem:[#allocation2 + $0x1158] sm:$0xff] }
 0x30b   :  { %2985 = vmatpush2.msra.mxu0 %v2476_v44  ;;  %3056 = vmatpush2.msra.mxu1 %v2478_v45  ;;  %v2028_v44 = vld [vmem:[#allocation2 + $0x1140] sm:$0xff]  ;;  %v2030_v45 = vld [vmem:[#allocation2 + $0x1150] sm:$0xff] }
 0x30c   :  { %2986 = vmatprep.subr.mxu0 %v2445_v46  ;;  %3057 = vmatprep.subr.mxu1 %v2447_v47  ;;  %v1997_v46 = vld [vmem:[#allocation2 + $0x1048] sm:$0xff]  ;;  %v1999_v47 = vld [vmem:[#allocation2 + $0x1058] sm:$0xff] }
 0x30d   :  { %2987 = vmatpush2.msra.mxu0 %v2444_v48  ;;  %3058 = vmatpush2.msra.mxu1 %v2446_v49  ;;  %v1996_v48 = vld [vmem:[#allocation2 + $0x1040] sm:$0xff]  ;;  %v1998_v49 = vld [vmem:[#allocation2 + $0x1050] sm:$0xff] }
 0x30e   :  { %2988 = vmatprep.subr.mxu0 %v2413_v50  ;;  %3059 = vmatprep.subr.mxu1 %v2415_v51  ;;  %v1969_v50 = vld [vmem:[#allocation2 + $0xf68] sm:$0xff]  ;;  %v1971_v51 = vld [vmem:[#allocation2 + $0xf78] sm:$0xff] }
 0x30f   :  { %2989 = vmatpush2.msra.mxu0 %v2412_v53  ;;  %3060 = vmatpush2.msra.mxu1 %v2414_v54  ;;  %v1968_v53 = vld [vmem:[#allocation2 + $0xf60] sm:$0xff]  ;;  %v1970_v54 = vld [vmem:[#allocation2 + $0xf70] sm:$0xff] }
 0x310   :  { %2990 = vmatprep.subr.mxu0 %v2381_v55  ;;  %3061 = vmatprep.subr.mxu1 %v2383_v8  ;;  %v1937_v55 = vld [vmem:[#allocation2 + $0xe68] sm:$0xff]  ;;  %v1939_v8 = vld [vmem:[#allocation2 + $0xe78] sm:$0xff] }
 0x311   :  { %2991 = vmatpush2.msra.mxu0 %v2380_v56  ;;  %3062 = vmatpush2.msra.mxu1 %v2382_v62  ;;  %v1936_v56 = vld [vmem:[#allocation2 + $0xe60] sm:$0xff]  ;;  %v1938_v62 = vld [vmem:[#allocation2 + $0xe70] sm:$0xff] }
 0x312   :  { %2992 = vmatprep.subr.mxu0 %v2349_v11  ;;  %3063 = vmatprep.subr.mxu1 %v2351_v57  ;;  %v1905_v11 = vld [vmem:[#allocation2 + $0xd68] sm:$0xff]  ;;  %v1907_v57 = vld [vmem:[#allocation2 + $0xd78] sm:$0xff] }
 0x313   :  { %2993 = vmatpush2.msra.mxu0 %v2348_v58  ;;  %3064 = vmatpush2.msra.mxu1 %v2350_v3  ;;  %v1904_v58 = vld [vmem:[#allocation2 + $0xd60] sm:$0xff]  ;;  %v1906_v3 = vld [vmem:[#allocation2 + $0xd70] sm:$0xff] }
 0x314   :  { %2994 = vmatprep.subr.mxu0 %v2317_v59  ;;  %3065 = vmatprep.subr.mxu1 %v2319_v60  ;;  %v1873_v59 = vld [vmem:[#allocation2 + $0xc68] sm:$0xff]  ;;  %v1875_v60 = vld [vmem:[#allocation2 + $0xc78] sm:$0xff] }
 0x315   :  { %2995 = vmatpush2.msra.mxu0 %v2316_v61  ;;  %3066 = vmatpush2.msra.mxu1 %v2318_v63  ;;  %v1872_v61 = vld [vmem:[#allocation2 + $0xc60] sm:$0xff]  ;;  %v1874_v63 = vld [vmem:[#allocation2 + $0xc70] sm:$0xff] }
 0x316   :  { %2996 = vmatprep.subr.mxu0 %v2285_v26  ;;  %3067 = vmatprep.subr.mxu1 %v2287_v29  ;;  %v1841_v26 = vld [vmem:[#allocation2 + $0xb68] sm:$0xff]  ;;  %v1843_v29 = vld [vmem:[#allocation2 + $0xb78] sm:$0xff] }
 0x317   :  { %2997 = vmatpush2.msra.mxu0 %v2284_v16  ;;  %3068 = vmatpush2.msra.mxu1 %v2286_v21  ;;  %v1840_v16 = vld [vmem:[#allocation2 + $0xb60] sm:$0xff]  ;;  %v1842_v21 = vld [vmem:[#allocation2 + $0xb70] sm:$0xff] }
 0x318   :  { %2998 = vmatprep.subr.mxu0 %v2253_v0  ;;  %3069 = vmatprep.subr.mxu1 %v2255_v1  ;;  %v1809_v0 = vld [vmem:[#allocation2 + $0xa68] sm:$0xff]  ;;  %v1811_v1 = vld [vmem:[#allocation2 + $0xa78] sm:$0xff] }
 0x319   :  { %2999 = vmatpush2.msra.mxu0 %v2252_v2  ;;  %3070 = vmatpush2.msra.mxu1 %v2254_v4  ;;  %v1808_v2 = vld [vmem:[#allocation2 + $0xa60] sm:$0xff]  ;;  %v1810_v4 = vld [vmem:[#allocation2 + $0xa70] sm:$0xff] }
 0x31a   :  { %3000 = vmatprep.subr.mxu0 %v2221_v5  ;;  %3071 = vmatprep.subr.mxu1 %v2223_v6  ;;  %v1777_v5 = vld [vmem:[#allocation2 + $0x968] sm:$0xff]  ;;  %v1779_v6 = vld [vmem:[#allocation2 + $0x978] sm:$0xff] }
 0x31b   :  { %3001 = vmatpush2.msra.mxu0 %v2220_v12  ;;  %3072 = vmatpush2.msra.mxu1 %v2222_v14  ;;  %v1776_v12 = vld [vmem:[#allocation2 + $0x960] sm:$0xff]  ;;  %v1778_v14 = vld [vmem:[#allocation2 + $0x970] sm:$0xff] }
 0x31c   :  { %3002 = vmatprep.subr.mxu0 %v2189_v15  ;;  %3073 = vmatprep.subr.mxu1 %v2191_v17  ;;  %v1745_v15 = vld [vmem:[#allocation2 + $0x868] sm:$0xff]  ;;  %v1747_v17 = vld [vmem:[#allocation2 + $0x878] sm:$0xff] }
 0x31d   :  { %3003 = vmatpush2.msra.mxu0 %v2188_v18  ;;  %3074 = vmatpush2.msra.mxu1 %v2190_v19  ;;  %v1744_v18 = vld [vmem:[#allocation2 + $0x860] sm:$0xff]  ;;  %v1746_v19 = vld [vmem:[#allocation2 + $0x870] sm:$0xff] }
 0x31e   :  { %3004 = vmatprep.subr.mxu0 %v2157_v20  ;;  %3075 = vmatprep.subr.mxu1 %v2159_v22  ;;  %v1713_v20 = vld [vmem:[#allocation2 + $0x768] sm:$0xff]  ;;  %v1715_v22 = vld [vmem:[#allocation2 + $0x778] sm:$0xff] }
 0x31f   :  { %3005 = vmatpush2.msra.mxu0 %v2156_v23  ;;  %3076 = vmatpush2.msra.mxu1 %v2158_v24  ;;  %v1712_v23 = vld [vmem:[#allocation2 + $0x760] sm:$0xff]  ;;  %v1714_v24 = vld [vmem:[#allocation2 + $0x770] sm:$0xff] }
 0x320   :  { %3006 = vmatprep.subr.mxu0 %v2125_v25  ;;  %3077 = vmatprep.subr.mxu1 %v2127_v27  ;;  %v1681_v25 = vld [vmem:[#allocation2 + $0x668] sm:$0xff]  ;;  %v1683_v27 = vld [vmem:[#allocation2 + $0x678] sm:$0xff] }
 0x321   :  { %3007 = vmatpush2.msra.mxu0 %v2124_v28  ;;  %3078 = vmatpush2.msra.mxu1 %v2126_v30  ;;  %v1680_v28 = vld [vmem:[#allocation2 + $0x660] sm:$0xff]  ;;  %v1682_v30 = vld [vmem:[#allocation2 + $0x670] sm:$0xff] }
 0x322   :  { %3008 = vmatprep.subr.mxu0 %v2093_v31  ;;  %3079 = vmatprep.subr.mxu1 %v2095_v33  ;;  %v1649_v31 = vld [vmem:[#allocation2 + $0x568] sm:$0xff]  ;;  %v1651_v33 = vld [vmem:[#allocation2 + $0x578] sm:$0xff] }
 0x323   :  { %3009 = vmatpush2.msra.mxu0 %v2092_v34  ;;  %3080 = vmatpush2.msra.mxu1 %v2094_v36  ;;  %v1648_v34 = vld [vmem:[#allocation2 + $0x560] sm:$0xff]  ;;  %v1650_v36 = vld [vmem:[#allocation2 + $0x570] sm:$0xff] }
 0x324   :  { %3010 = vmatprep.subr.mxu0 %v2061_v37  ;;  %3081 = vmatprep.subr.mxu1 %v2063_v39  ;;  %v1617_v37 = vld [vmem:[#allocation2 + $0x468] sm:$0xff]  ;;  %v1619_v39 = vld [vmem:[#allocation2 + $0x478] sm:$0xff] }
 0x325   :  { %3011 = vmatpush2.msra.mxu0 %v2060_v35  ;;  %3082 = vmatpush2.msra.mxu1 %v2062_v40  ;;  %v1616_v35 = vld [vmem:[#allocation2 + $0x460] sm:$0xff]  ;;  %v1618_v40 = vld [vmem:[#allocation2 + $0x470] sm:$0xff] }
 0x326   :  { %3012 = vmatprep.subr.mxu0 %v2029_v42  ;;  %3083 = vmatprep.subr.mxu1 %v2031_v43  ;;  %v1585_v42 = vld [vmem:[#allocation2 + $0x368] sm:$0xff]  ;;  %v1587_v43 = vld [vmem:[#allocation2 + $0x378] sm:$0xff] }
 0x327   :  { %3013 = vmatpush2.msra.mxu0 %v2028_v44  ;;  %3084 = vmatpush2.msra.mxu1 %v2030_v45  ;;  %v1584_v44 = vld [vmem:[#allocation2 + $0x360] sm:$0xff]  ;;  %v1586_v45 = vld [vmem:[#allocation2 + $0x370] sm:$0xff] }
 0x328   :  { %3014 = vmatprep.subr.mxu0 %v1997_v46  ;;  %3085 = vmatprep.subr.mxu1 %v1999_v47  ;;  %v1553_v46 = vld [vmem:[#allocation2 + $0x268] sm:$0xff]  ;;  %v1555_v47 = vld [vmem:[#allocation2 + $0x278] sm:$0xff] }
 0x329   :  { %3015 = vmatpush2.msra.mxu0 %v1996_v48  ;;  %3086 = vmatpush2.msra.mxu1 %v1998_v49  ;;  %v1552_v48 = vld [vmem:[#allocation2 + $0x260] sm:$0xff]  ;;  %v1554_v49 = vld [vmem:[#allocation2 + $0x270] sm:$0xff] }
 0x32a   :  { %3017 = vmatmul.mubr.f32.vlgmr.msra.gmra.mxu0 %v6075_v10  ;;  %3088 = vmatmul.mubr.f32.vlgmr.msra.gmra.mxu1 %v6075_v10 }
 0x32b   :  { %3094 = vmatprep.subr.mxu0 %v1969_v50  ;;  %3165 = vmatprep.subr.mxu1 %v1971_v51  ;;  %v1521_v50 = vld [vmem:[#allocation2 + $0x168] sm:$0xff]  ;;  %v1523_v51 = vld [vmem:[#allocation2 + $0x178] sm:$0xff] }
 0x32c   :  { %3095 = vmatpush1.msra.mxu0 %v1968_v53  ;;  %3158 = vmatprep.mubr.f32.mxu0 %v6073_v7  ;;  %v1520_v53 = vld [vmem:[#allocation2 + $0x160] sm:$0xff] }
 0x32d   :  { %3166 = vmatpush1.msra.mxu1 %v1970_v54  ;;  %3229 = vmatprep.mubr.f32.mxu1 %v6073_v7  ;;  %v1522_v54 = vld [vmem:[#allocation2 + $0x170] sm:$0xff] }
 0x32e   :  { %3096 = vmatprep.subr.mxu0 %v1937_v55  ;;  %3167 = vmatprep.subr.mxu1 %v1939_v8  ;;  %v1489_v55 = vld [vmem:[#allocation2 + $0x68] sm:$0xff]  ;;  %v1491_v8 = vld [vmem:[#allocation2 + $0x78] sm:$0xff] }
 0x32f   :  { %3097 = vmatpush1.msra.mxu0 %v1936_v56  ;;  %3168 = vmatpush1.msra.mxu1 %v1938_v62  ;;  %v1488_v56 = vld [vmem:[#allocation2 + $0x60] sm:$0xff]  ;;  %v1490_v62 = vld [vmem:[#allocation2 + $0x70] sm:$0xff] }
 0x330   :  { %3098 = vmatprep.subr.mxu0 %v1905_v11  ;;  %3169 = vmatprep.subr.mxu1 %v1907_v57  ;;  %v2481_v11 = vld [vmem:[#allocation2 + $0x1f68] sm:$0xff]  ;;  %v2483_v57 = vld [vmem:[#allocation2 + $0x1f78] sm:$0xff] }
 0x331   :  { %3099 = vmatpush1.msra.mxu0 %v1904_v58  ;;  %3170 = vmatpush1.msra.mxu1 %v1906_v3  ;;  %v2480_v58 = vld [vmem:[#allocation2 + $0x1f60] sm:$0xff]  ;;  %v2482_v3 = vld [vmem:[#allocation2 + $0x1f70] sm:$0xff] }
 0x332   :  { %3100 = vmatprep.subr.mxu0 %v1873_v59  ;;  %3171 = vmatprep.subr.mxu1 %v1875_v60  ;;  %v2449_v59 = vld [vmem:[#allocation2 + $0x1e68] sm:$0xff]  ;;  %v2451_v60 = vld [vmem:[#allocation2 + $0x1e78] sm:$0xff] }
 0x333   :  { %3101 = vmatpush1.msra.mxu0 %v1872_v61  ;;  %3172 = vmatpush1.msra.mxu1 %v1874_v63  ;;  %v2448_v61 = vld [vmem:[#allocation2 + $0x1e60] sm:$0xff]  ;;  %v2450_v63 = vld [vmem:[#allocation2 + $0x1e70] sm:$0xff] }
 0x334   :  { %3102 = vmatprep.subr.mxu0 %v1841_v26  ;;  %3173 = vmatprep.subr.mxu1 %v1843_v29  ;;  %v2417_v26 = vld [vmem:[#allocation2 + $0x1d68] sm:$0xff]  ;;  %v2419_v29 = vld [vmem:[#allocation2 + $0x1d78] sm:$0xff] }
 0x335   :  { %3103 = vmatpush1.msra.mxu0 %v1840_v16  ;;  %3174 = vmatpush1.msra.mxu1 %v1842_v21  ;;  %v2416_v16 = vld [vmem:[#allocation2 + $0x1d60] sm:$0xff]  ;;  %v2418_v21 = vld [vmem:[#allocation2 + $0x1d70] sm:$0xff] }
 0x336   :  { %3104 = vmatprep.subr.mxu0 %v1809_v0  ;;  %3175 = vmatprep.subr.mxu1 %v1811_v1  ;;  %v2385_v0 = vld [vmem:[#allocation2 + $0x1c68] sm:$0xff]  ;;  %v2387_v1 = vld [vmem:[#allocation2 + $0x1c78] sm:$0xff] }
 0x337   :  { %3105 = vmatpush1.msra.mxu0 %v1808_v2  ;;  %3176 = vmatpush1.msra.mxu1 %v1810_v4  ;;  %v2384_v2 = vld [vmem:[#allocation2 + $0x1c60] sm:$0xff]  ;;  %v2386_v4 = vld [vmem:[#allocation2 + $0x1c70] sm:$0xff] }
 0x338   :  { %3106 = vmatprep.subr.mxu0 %v1777_v5  ;;  %3177 = vmatprep.subr.mxu1 %v1779_v6  ;;  %v2353_v5 = vld [vmem:[#allocation2 + $0x1b68] sm:$0xff]  ;;  %v2355_v6 = vld [vmem:[#allocation2 + $0x1b78] sm:$0xff] }
 0x339   :  { %3107 = vmatpush1.msra.mxu0 %v1776_v12  ;;  %3178 = vmatpush1.msra.mxu1 %v1778_v14  ;;  %v2352_v12 = vld [vmem:[#allocation2 + $0x1b60] sm:$0xff]  ;;  %v2354_v14 = vld [vmem:[#allocation2 + $0x1b70] sm:$0xff] }
 0x33a   :  { %3108 = vmatprep.subr.mxu0 %v1745_v15  ;;  %3179 = vmatprep.subr.mxu1 %v1747_v17  ;;  %v2321_v15 = vld [vmem:[#allocation2 + $0x1a68] sm:$0xff]  ;;  %v2323_v17 = vld [vmem:[#allocation2 + $0x1a78] sm:$0xff] }
 0x33b   :  { %3109 = vmatpush1.msra.mxu0 %v1744_v18  ;;  %3180 = vmatpush1.msra.mxu1 %v1746_v19  ;;  %v2320_v18 = vld [vmem:[#allocation2 + $0x1a60] sm:$0xff]  ;;  %v2322_v19 = vld [vmem:[#allocation2 + $0x1a70] sm:$0xff] }
 0x33c   :  { %3110 = vmatprep.subr.mxu0 %v1713_v20  ;;  %3181 = vmatprep.subr.mxu1 %v1715_v22  ;;  %v2289_v20 = vld [vmem:[#allocation2 + $0x1968] sm:$0xff]  ;;  %v2291_v22 = vld [vmem:[#allocation2 + $0x1978] sm:$0xff] }
 0x33d   :  { %3111 = vmatpush1.msra.mxu0 %v1712_v23  ;;  %3182 = vmatpush1.msra.mxu1 %v1714_v24  ;;  %v2288_v23 = vld [vmem:[#allocation2 + $0x1960] sm:$0xff]  ;;  %v2290_v24 = vld [vmem:[#allocation2 + $0x1970] sm:$0xff] }
 0x33e   :  { %3112 = vmatprep.subr.mxu0 %v1681_v25  ;;  %3183 = vmatprep.subr.mxu1 %v1683_v27  ;;  %v2257_v25 = vld [vmem:[#allocation2 + $0x1868] sm:$0xff]  ;;  %v2259_v27 = vld [vmem:[#allocation2 + $0x1878] sm:$0xff] }
 0x33f   :  { %3113 = vmatpush1.msra.mxu0 %v1680_v28  ;;  %3184 = vmatpush1.msra.mxu1 %v1682_v30  ;;  %v2256_v28 = vld [vmem:[#allocation2 + $0x1860] sm:$0xff]  ;;  %v2258_v30 = vld [vmem:[#allocation2 + $0x1870] sm:$0xff] }
 0x340   :  { %3114 = vmatprep.subr.mxu0 %v1649_v31  ;;  %3185 = vmatprep.subr.mxu1 %v1651_v33  ;;  %v2225_v31 = vld [vmem:[#allocation2 + $0x1768] sm:$0xff]  ;;  %v2227_v33 = vld [vmem:[#allocation2 + $0x1778] sm:$0xff] }
 0x341   :  { %3115 = vmatpush1.msra.mxu0 %v1648_v34  ;;  %3186 = vmatpush1.msra.mxu1 %v1650_v36  ;;  %v2224_v34 = vld [vmem:[#allocation2 + $0x1760] sm:$0xff]  ;;  %v2226_v36 = vld [vmem:[#allocation2 + $0x1770] sm:$0xff] }
 0x342   :  { %3116 = vmatprep.subr.mxu0 %v1617_v37  ;;  %3187 = vmatprep.subr.mxu1 %v1619_v39  ;;  %v2193_v37 = vld [vmem:[#allocation2 + $0x1668] sm:$0xff]  ;;  %v2195_v39 = vld [vmem:[#allocation2 + $0x1678] sm:$0xff] }
 0x343   :  { %3117 = vmatpush1.msra.mxu0 %v1616_v35  ;;  %3188 = vmatpush1.msra.mxu1 %v1618_v40  ;;  %v2192_v35 = vld [vmem:[#allocation2 + $0x1660] sm:$0xff]  ;;  %v2194_v40 = vld [vmem:[#allocation2 + $0x1670] sm:$0xff] }
 0x344   :  { %3118 = vmatprep.subr.mxu0 %v1585_v42  ;;  %3189 = vmatprep.subr.mxu1 %v1587_v43  ;;  %v2161_v42 = vld [vmem:[#allocation2 + $0x1568] sm:$0xff]  ;;  %v2163_v43 = vld [vmem:[#allocation2 + $0x1578] sm:$0xff] }
 0x345   :  { %3119 = vmatpush1.msra.mxu0 %v1584_v44  ;;  %3190 = vmatpush1.msra.mxu1 %v1586_v45  ;;  %v2160_v44 = vld [vmem:[#allocation2 + $0x1560] sm:$0xff]  ;;  %v2162_v45 = vld [vmem:[#allocation2 + $0x1570] sm:$0xff] }
 0x346   :  { %3120 = vmatprep.subr.mxu0 %v1553_v46  ;;  %3191 = vmatprep.subr.mxu1 %v1555_v47  ;;  %v2129_v46 = vld [vmem:[#allocation2 + $0x1468] sm:$0xff]  ;;  %v2131_v47 = vld [vmem:[#allocation2 + $0x1478] sm:$0xff] }
 0x347   :  { %3121 = vmatpush1.msra.mxu0 %v1552_v48  ;;  %3192 = vmatpush1.msra.mxu1 %v1554_v49  ;;  %v2128_v48 = vld [vmem:[#allocation2 + $0x1460] sm:$0xff]  ;;  %v2130_v49 = vld [vmem:[#allocation2 + $0x1470] sm:$0xff] }
 0x348   :  { %3122 = vmatprep.subr.mxu0 %v1521_v50  ;;  %3193 = vmatprep.subr.mxu1 %v1523_v51  ;;  %v2097_v50 = vld [vmem:[#allocation2 + $0x1368] sm:$0xff]  ;;  %v2099_v51 = vld [vmem:[#allocation2 + $0x1378] sm:$0xff] }
 0x349   :  { %3123 = vmatpush1.msra.mxu0 %v1520_v53  ;;  %3194 = vmatpush1.msra.mxu1 %v1522_v54  ;;  %v2096_v53 = vld [vmem:[#allocation2 + $0x1360] sm:$0xff]  ;;  %v2098_v54 = vld [vmem:[#allocation2 + $0x1370] sm:$0xff] }
 0x34a   :  { %3124 = vmatprep.subr.mxu0 %v1489_v55  ;;  %3195 = vmatprep.subr.mxu1 %v1491_v8  ;;  %v6094_v55 = vld [vmem:[%s6241_s6] sm:$0xff]  ;;  %v2065_v8 = vld [vmem:[#allocation2 + $0x1268] sm:$0xff] }
 0x34b   :  { %3125 = vmatpush1.msra.mxu0 %v1488_v56  ;;  %3196 = vmatpush1.msra.mxu1 %v1490_v62  ;;  %v2067_v56 = vld [vmem:[#allocation2 + $0x1278] sm:$0xff]  ;;  %v2064_v62 = vld [vmem:[#allocation2 + $0x1260] sm:$0xff] }
 0x34c   :  { %3126 = vmatprep.subr.mxu0 %v2481_v11  ;;  %3197 = vmatprep.subr.mxu1 %v2483_v57  ;;  %v2066_v11 = vld [vmem:[#allocation2 + $0x1270] sm:$0xff]  ;;  %v2033_v57 = vld [vmem:[#allocation2 + $0x1168] sm:$0xff] }
 0x34d   :  { %3127 = vmatpush2.msra.mxu0 %v2480_v58  ;;  %3198 = vmatpush2.msra.mxu1 %v2482_v3  ;;  %v2035_v58 = vld [vmem:[#allocation2 + $0x1178] sm:$0xff]  ;;  %v2511_v3 = vrot.slane %v6094_v55, %v5942_v32 }
 0x34e   :  { %3128 = vmatprep.subr.mxu0 %v2449_v59  ;;  %3199 = vmatprep.subr.mxu1 %v2451_v60  ;;  %v2032_v59 = vld [vmem:[#allocation2 + $0x1160] sm:$0xff]  ;;  %v2034_v60 = vld [vmem:[#allocation2 + $0x1170] sm:$0xff] }
 0x34f   :  { %3129 = vmatpush2.msra.mxu0 %v2448_v61  ;;  %3200 = vmatpush2.msra.mxu1 %v2450_v63  ;;  %v2519_v61 = vrot.slane %v6094_v55, %v6059_v9  ;;  %v2515_v63 = vrot.slane %v6094_v55, %v5962_v38 }
 0x350   :  { %3130 = vmatprep.subr.mxu0 %v2417_v26  ;;  %3201 = vmatprep.subr.mxu1 %v2419_v29  ;;  %v2523_v26 = vrot.slane %v6094_v55, %v6062_v13  ;;  %v2001_v29 = vld [vmem:[#allocation2 + $0x1068] sm:$0xff] }
 0x351   :  { %3131 = vmatpush2.msra.mxu0 %v2416_v16  ;;  %3202 = vmatpush2.msra.mxu1 %v2418_v21  ;;  %v2003_v16 = vld [vmem:[#allocation2 + $0x1078] sm:$0xff] }
 0x352   :  { %3132 = vmatprep.subr.mxu0 %v2385_v0  ;;  %3203 = vmatprep.subr.mxu1 %v2387_v1  ;;  %v2000_v1 = vld [vmem:[#allocation2 + $0x1060] sm:$0xff] }
 0x353   :  { %3133 = vmatpush2.msra.mxu0 %v2384_v2  ;;  %3204 = vmatpush2.msra.mxu1 %v2386_v4  ;;  %v2002_v2 = vld [vmem:[#allocation2 + $0x1070] sm:$0xff] }
 0x354   :  { %3134 = vmatprep.subr.mxu0 %v2353_v5  ;;  %3205 = vmatprep.subr.mxu1 %v2355_v6 }
 0x355   :  { %3135 = vmatpush2.msra.mxu0 %v2352_v12  ;;  %3206 = vmatpush2.msra.mxu1 %v2354_v14  ;;  %v1973_v12 = vld [vmem:[#allocation2 + $0xf88] sm:$0xff]  ;;  %v1975_v14 = vld [vmem:[#allocation2 + $0xf98] sm:$0xff] }
 0x356   :  { %3136 = vmatprep.subr.mxu0 %v2321_v15  ;;  %3207 = vmatprep.subr.mxu1 %v2323_v17 }
 0x357   :  { %3137 = vmatpush2.msra.mxu0 %v2320_v18  ;;  %3208 = vmatpush2.msra.mxu1 %v2322_v19  ;;  %v1972_v19 = vld [vmem:[#allocation2 + $0xf80] sm:$0xff] }
 0x358   :  { %3138 = vmatprep.subr.mxu0 %v2289_v20  ;;  %3209 = vmatprep.subr.mxu1 %v2291_v22  ;;  %v1974_v20 = vld [vmem:[#allocation2 + $0xf90] sm:$0xff] }
 0x359   :  { %3139 = vmatpush2.msra.mxu0 %v2288_v23  ;;  %3210 = vmatpush2.msra.mxu1 %v2290_v24  ;;  %v1941_v24 = vld [vmem:[#allocation2 + $0xe88] sm:$0xff] }
 0x35a   :  { %3140 = vmatprep.subr.mxu0 %v2257_v25  ;;  %3211 = vmatprep.subr.mxu1 %v2259_v27  ;;  %v1943_v25 = vld [vmem:[#allocation2 + $0xe98] sm:$0xff] }
 0x35b   :  { %3141 = vmatpush2.msra.mxu0 %v2256_v28  ;;  %3212 = vmatpush2.msra.mxu1 %v2258_v30  ;;  %v1940_v30 = vld [vmem:[#allocation2 + $0xe80] sm:$0xff] }
 0x35c   :  { %3142 = vmatprep.subr.mxu0 %v2225_v31  ;;  %3213 = vmatprep.subr.mxu1 %v2227_v33  ;;  %v1942_v31 = vld [vmem:[#allocation2 + $0xe90] sm:$0xff]  ;;  %v1909_v33 = vld [vmem:[#allocation2 + $0xd88] sm:$0xff] }
 0x35d   :  { %3143 = vmatpush2.msra.mxu0 %v2224_v34  ;;  %3214 = vmatpush2.msra.mxu1 %v2226_v36  ;;  %v1911_v34 = vld [vmem:[#allocation2 + $0xd98] sm:$0xff] }
 0x35e   :  { %3144 = vmatprep.subr.mxu0 %v2193_v37  ;;  %3215 = vmatprep.subr.mxu1 %v2195_v39  ;;  %v1908_v37 = vld [vmem:[#allocation2 + $0xd80] sm:$0xff]  ;;  %v1910_v39 = vld [vmem:[#allocation2 + $0xd90] sm:$0xff] }
 0x35f   :  { %3145 = vmatpush2.msra.mxu0 %v2192_v35  ;;  %3216 = vmatpush2.msra.mxu1 %v2194_v40  ;;  %v1877_v35 = vld [vmem:[#allocation2 + $0xc88] sm:$0xff]  ;;  %v1879_v40 = vld [vmem:[#allocation2 + $0xc98] sm:$0xff] }
 0x360   :  { %3146 = vmatprep.subr.mxu0 %v2161_v42  ;;  %3217 = vmatprep.subr.mxu1 %v2163_v43  ;;  %v1876_v42 = vld [vmem:[#allocation2 + $0xc80] sm:$0xff]  ;;  %v1878_v43 = vld [vmem:[#allocation2 + $0xc90] sm:$0xff] }
 0x361   :  { %3147 = vmatpush2.msra.mxu0 %v2160_v44  ;;  %3218 = vmatpush2.msra.mxu1 %v2162_v45  ;;  %v1845_v44 = vld [vmem:[#allocation2 + $0xb88] sm:$0xff]  ;;  %v1847_v45 = vld [vmem:[#allocation2 + $0xb98] sm:$0xff] }
 0x362   :  { %3148 = vmatprep.subr.mxu0 %v2129_v46  ;;  %3219 = vmatprep.subr.mxu1 %v2131_v47  ;;  %v1844_v46 = vld [vmem:[#allocation2 + $0xb80] sm:$0xff]  ;;  %v1846_v47 = vld [vmem:[#allocation2 + $0xb90] sm:$0xff] }
 0x363   :  { %3149 = vmatpush2.msra.mxu0 %v2128_v48  ;;  %3220 = vmatpush2.msra.mxu1 %v2130_v49  ;;  %v1813_v48 = vld [vmem:[#allocation2 + $0xa88] sm:$0xff]  ;;  %v1815_v49 = vld [vmem:[#allocation2 + $0xa98] sm:$0xff] }
 0x364   :  { %3150 = vmatprep.subr.mxu0 %v2097_v50  ;;  %3221 = vmatprep.subr.mxu1 %v2099_v51  ;;  %v1812_v50 = vld [vmem:[#allocation2 + $0xa80] sm:$0xff]  ;;  %v1814_v51 = vld [vmem:[#allocation2 + $0xa90] sm:$0xff] }
 0x365   :  { %3151 = vmatpush2.msra.mxu0 %v2096_v53  ;;  %3222 = vmatpush2.msra.mxu1 %v2098_v54  ;;  %v1781_v53 = vld [vmem:[#allocation2 + $0x988] sm:$0xff]  ;;  %v1783_v54 = vld [vmem:[#allocation2 + $0x998] sm:$0xff] }
 0x366   :  { %3152 = vmatprep.subr.mxu0 %v2065_v8  ;;  %3223 = vmatprep.subr.mxu1 %v2067_v56  ;;  %v1780_v8 = vld [vmem:[#allocation2 + $0x980] sm:$0xff]  ;;  %v1782_v56 = vld [vmem:[#allocation2 + $0x990] sm:$0xff] }
 0x367   :  { %3153 = vmatpush2.msra.mxu0 %v2064_v62  ;;  %3224 = vmatpush2.msra.mxu1 %v2066_v11  ;;  %v2734_v21 = vpop.f32.mrf.mxu0  ;;  %v2805_v0 = vpop.f32.mrf.mxu1  ;;  %v1749_v62 = vld [vmem:[#allocation2 + $0x888] sm:$0xff]  ;;  %v1751_v11 = vld [vmem:[#allocation2 + $0x898] sm:$0xff] }
 0x368   :  { %3154 = vmatprep.subr.mxu0 %v2033_v57  ;;  %3225 = vmatprep.subr.mxu1 %v2035_v58  ;;  %v2735_v4 = vadd.f32 %v2734_v21, %v2511_v3  ;;  %v2806_v15 = vadd.f32 %v2805_v0, %v2519_v61  ;;  %v1748_v57 = vld [vmem:[#allocation2 + $0x880] sm:$0xff]  ;;  %v1750_v58 = vld [vmem:[#allocation2 + $0x890] sm:$0xff]  ;;  %v1717_v3 = vld [vmem:[#allocation2 + $0x788] sm:$0xff] }
 0x369   :  { %3155 = vmatpush2.msra.mxu0 %v2032_v59  ;;  %3226 = vmatpush2.msra.mxu1 %v2034_v60  ;;  %v2736_v5 = vpop.f32.mrf.mxu0  ;;  %v2807_v6 = vpop.f32.mrf.mxu1  ;;  %v1719_v59 = vld [vmem:[#allocation2 + $0x798] sm:$0xff]  ;;  %v1716_v60 = vld [vmem:[#allocation2 + $0x780] sm:$0xff]  ;;  %v1718_v61 = vld [vmem:[#allocation2 + $0x790] sm:$0xff] }
 0x36a   :  { %3156 = vmatprep.subr.mxu0 %v2001_v29  ;;  %3227 = vmatprep.subr.mxu1 %v2003_v16  ;;  %v2737_v17 = vadd.f32 %v2736_v5, %v2515_v63  ;;  %v2808_v18 = vadd.f32 %v2807_v6, %v2523_v26  ;;  %v1685_v63 = vld [vmem:[#allocation2 + $0x688] sm:$0xff]  ;;  %v1687_v26 = vld [vmem:[#allocation2 + $0x698] sm:$0xff]  ;;  %v1684_v29 = vld [vmem:[#allocation2 + $0x680] sm:$0xff] }
 0x36b   :  { %3157 = vmatpush2.msra.mxu0 %v2000_v1  ;;  %3228 = vmatpush2.msra.mxu1 %v2002_v2  ;;  %v1686_v16 = vld [vmem:[#allocation2 + $0x690] sm:$0xff]  ;;  %v1653_v21 = vld [vmem:[#allocation2 + $0x588] sm:$0xff]  ;;  %v1655_v0 = vld [vmem:[#allocation2 + $0x598] sm:$0xff] }
 0x36c   :  { %3159 = vmatmul.mubr.f32.vlgmr.msra.gmra.mxu0 %v6075_v10  ;;  %3230 = vmatmul.mubr.f32.vlgmr.msra.gmra.mxu1 %v6075_v10  ;;  %v3836_v22 = vcombine.low %v2735_v4, %v2737_v17  ;;  %v3837_v23 = vcombine.low %v2806_v15, %v2808_v18  ;;  %v1652_v1 = vld [vmem:[#allocation2 + $0x580] sm:$0xff]  ;;  %v1654_v2 = vld [vmem:[#allocation2 + $0x590] sm:$0xff]  ;;  %v1621_v4 = vld [vmem:[#allocation2 + $0x488] sm:$0xff] }
 0x36d   :  { %3236 = vmatprep.subr.mxu0 %v1973_v12  ;;  %3307 = vmatprep.subr.mxu1 %v1975_v14  ;;  %v1623_v5 = vld [vmem:[#allocation2 + $0x498] sm:$0xff]  ;;  %v1620_v6 = vld [vmem:[#allocation2 + $0x480] sm:$0xff]  ;;  %v1622_v12 = vld [vmem:[#allocation2 + $0x490] sm:$0xff] }
 0x36e   :  { %3237 = vmatpush1.msra.mxu0 %v1972_v19  ;;  %3300 = vmatprep.mubr.f32.mxu0 %v6073_v7  ;;  %v3844_v27 = vrot.slane %v3836_v22, %v4404_v52  ;;  %v3851_v28 = vrot.slane %v3837_v23, %v4404_v52  ;;  %v1589_v14 = vld [vmem:[#allocation2 + $0x388] sm:$0xff]  ;;  %v1591_v15 = vld [vmem:[#allocation2 + $0x398] sm:$0xff]  ;;  %v1588_v17 = vld [vmem:[#allocation2 + $0x380] sm:$0xff] }
 0x36f   :  { %3308 = vmatpush1.msra.mxu1 %v1974_v20  ;;  %3371 = vmatprep.mubr.f32.mxu1 %v6073_v7  ;;  %v1590_v18 = vld [vmem:[#allocation2 + $0x390] sm:$0xff]  ;;  %v1557_v19 = vld [vmem:[#allocation2 + $0x288] sm:$0xff]  ;;  %v1559_v20 = vld [vmem:[#allocation2 + $0x298] sm:$0xff] }
 0x370   :  { %3238 = vmatprep.subr.mxu0 %v1941_v24  ;;  %3309 = vmatprep.subr.mxu1 %v1943_v25  ;;  %v3852_v36 = vcombine.low %v3844_v27, %v3851_v28  ;;  %v1556_v22 = vld [vmem:[#allocation2 + $0x280] sm:$0xff]  ;;  %v1558_v23 = vld [vmem:[#allocation2 + $0x290] sm:$0xff]  ;;  %v1525_v24 = vld [vmem:[#allocation2 + $0x188] sm:$0xff] }
 0x371   :  { %3239 = vmatpush1.msra.mxu0 %v1940_v30  ;;  %3310 = vmatpush1.msra.mxu1 %v1942_v31  ;;  %v1527_v25 = vld [vmem:[#allocation2 + $0x198] sm:$0xff]  ;;  %v1524_v27 = vld [vmem:[#allocation2 + $0x180] sm:$0xff]  ;;  %v1526_v28 = vld [vmem:[#allocation2 + $0x190] sm:$0xff] }
 0x372   :  { %3980 = vst [vmem:[%s6242_s7] sm:$0xff] %v3852_v36  ;;  %3240 = vmatprep.subr.mxu0 %v1909_v33  ;;  %3311 = vmatprep.subr.mxu1 %v1911_v34  ;;  %v1493_v30 = vld [vmem:[#allocation2 + $0x88] sm:$0xff]  ;;  %v1495_v31 = vld [vmem:[#allocation2 + $0x98] sm:$0xff]  ;;  %v1492_v33 = vld [vmem:[#allocation2 + $0x80] sm:$0xff] }
 0x373   :  { %3241 = vmatpush1.msra.mxu0 %v1908_v37  ;;  %3312 = vmatpush1.msra.mxu1 %v1910_v39  ;;  %v1494_v34 = vld [vmem:[#allocation2 + $0x90] sm:$0xff]  ;;  %v2485_v36 = vld [vmem:[#allocation2 + $0x1f88] sm:$0xff]  ;;  %v2487_v37 = vld [vmem:[#allocation2 + $0x1f98] sm:$0xff] }
 0x374   :  { %3242 = vmatprep.subr.mxu0 %v1877_v35  ;;  %3313 = vmatprep.subr.mxu1 %v1879_v40  ;;  %v2484_v39 = vld [vmem:[#allocation2 + $0x1f80] sm:$0xff]  ;;  %v2486_v35 = vld [vmem:[#allocation2 + $0x1f90] sm:$0xff]  ;;  %v2453_v40 = vld [vmem:[#allocation2 + $0x1e88] sm:$0xff] }
 0x375   :  { %3243 = vmatpush1.msra.mxu0 %v1876_v42  ;;  %3314 = vmatpush1.msra.mxu1 %v1878_v43  ;;  %v2455_v42 = vld [vmem:[#allocation2 + $0x1e98] sm:$0xff]  ;;  %v2452_v43 = vld [vmem:[#allocation2 + $0x1e80] sm:$0xff] }
 0x376   :  { %3244 = vmatprep.subr.mxu0 %v1845_v44  ;;  %3315 = vmatprep.subr.mxu1 %v1847_v45  ;;  %v2454_v44 = vld [vmem:[#allocation2 + $0x1e90] sm:$0xff]  ;;  %v2421_v45 = vld [vmem:[#allocation2 + $0x1d88] sm:$0xff] }
 0x377   :  { %3245 = vmatpush1.msra.mxu0 %v1844_v46  ;;  %3316 = vmatpush1.msra.mxu1 %v1846_v47  ;;  %v2423_v46 = vld [vmem:[#allocation2 + $0x1d98] sm:$0xff]  ;;  %v2420_v47 = vld [vmem:[#allocation2 + $0x1d80] sm:$0xff] }
 0x378   :  { %3246 = vmatprep.subr.mxu0 %v1813_v48  ;;  %3317 = vmatprep.subr.mxu1 %v1815_v49  ;;  %v2422_v48 = vld [vmem:[#allocation2 + $0x1d90] sm:$0xff]  ;;  %v2389_v49 = vld [vmem:[#allocation2 + $0x1c88] sm:$0xff] }
 0x379   :  { %3247 = vmatpush1.msra.mxu0 %v1812_v50  ;;  %3318 = vmatpush1.msra.mxu1 %v1814_v51  ;;  %v2391_v50 = vld [vmem:[#allocation2 + $0x1c98] sm:$0xff]  ;;  %v2388_v51 = vld [vmem:[#allocation2 + $0x1c80] sm:$0xff] }
 0x37a   :  { %3248 = vmatprep.subr.mxu0 %v1781_v53  ;;  %3319 = vmatprep.subr.mxu1 %v1783_v54  ;;  %v2390_v53 = vld [vmem:[#allocation2 + $0x1c90] sm:$0xff]  ;;  %v2357_v54 = vld [vmem:[#allocation2 + $0x1b88] sm:$0xff] }
 0x37b   :  { %3249 = vmatpush1.msra.mxu0 %v1780_v8  ;;  %3320 = vmatpush1.msra.mxu1 %v1782_v56  ;;  %v2359_v8 = vld [vmem:[#allocation2 + $0x1b98] sm:$0xff]  ;;  %v2356_v56 = vld [vmem:[#allocation2 + $0x1b80] sm:$0xff] }
 0x37c   :  { %3250 = vmatprep.subr.mxu0 %v1749_v62  ;;  %3321 = vmatprep.subr.mxu1 %v1751_v11  ;;  %v2358_v62 = vld [vmem:[#allocation2 + $0x1b90] sm:$0xff]  ;;  %v2325_v11 = vld [vmem:[#allocation2 + $0x1a88] sm:$0xff] }
 0x37d   :  { %3251 = vmatpush1.msra.mxu0 %v1748_v57  ;;  %3322 = vmatpush1.msra.mxu1 %v1750_v58  ;;  %v2327_v57 = vld [vmem:[#allocation2 + $0x1a98] sm:$0xff]  ;;  %v2324_v58 = vld [vmem:[#allocation2 + $0x1a80] sm:$0xff] }
 0x37e   :  { %3252 = vmatprep.subr.mxu0 %v1717_v3  ;;  %3323 = vmatprep.subr.mxu1 %v1719_v59  ;;  %v2326_v3 = vld [vmem:[#allocation2 + $0x1a90] sm:$0xff]  ;;  %v2293_v59 = vld [vmem:[#allocation2 + $0x1988] sm:$0xff] }
 0x37f   :  { %3253 = vmatpush1.msra.mxu0 %v1716_v60  ;;  %3324 = vmatpush1.msra.mxu1 %v1718_v61  ;;  %v2295_v60 = vld [vmem:[#allocation2 + $0x1998] sm:$0xff]  ;;  %v2292_v61 = vld [vmem:[#allocation2 + $0x1980] sm:$0xff] }
 0x380   :  { %3254 = vmatprep.subr.mxu0 %v1685_v63  ;;  %3325 = vmatprep.subr.mxu1 %v1687_v26  ;;  %v2294_v63 = vld [vmem:[#allocation2 + $0x1990] sm:$0xff]  ;;  %v2261_v26 = vld [vmem:[#allocation2 + $0x1888] sm:$0xff] }
 0x381   :  { %3255 = vmatpush1.msra.mxu0 %v1684_v29  ;;  %3326 = vmatpush1.msra.mxu1 %v1686_v16  ;;  %v2263_v29 = vld [vmem:[#allocation2 + $0x1898] sm:$0xff]  ;;  %v2260_v16 = vld [vmem:[#allocation2 + $0x1880] sm:$0xff] }
 0x382   :  { %3256 = vmatprep.subr.mxu0 %v1653_v21  ;;  %3327 = vmatprep.subr.mxu1 %v1655_v0  ;;  %v2262_v21 = vld [vmem:[#allocation2 + $0x1890] sm:$0xff]  ;;  %v2229_v0 = vld [vmem:[#allocation2 + $0x1788] sm:$0xff] }
 0x383   :  { %3257 = vmatpush1.msra.mxu0 %v1652_v1  ;;  %3328 = vmatpush1.msra.mxu1 %v1654_v2  ;;  %v2231_v1 = vld [vmem:[#allocation2 + $0x1798] sm:$0xff]  ;;  %v2228_v2 = vld [vmem:[#allocation2 + $0x1780] sm:$0xff] }
 0x384   :  { %3258 = vmatprep.subr.mxu0 %v1621_v4  ;;  %3329 = vmatprep.subr.mxu1 %v1623_v5  ;;  %v2230_v4 = vld [vmem:[#allocation2 + $0x1790] sm:$0xff]  ;;  %v2197_v5 = vld [vmem:[#allocation2 + $0x1688] sm:$0xff] }
 0x385   :  { %3259 = vmatpush1.msra.mxu0 %v1620_v6  ;;  %3330 = vmatpush1.msra.mxu1 %v1622_v12  ;;  %v2199_v6 = vld [vmem:[#allocation2 + $0x1698] sm:$0xff]  ;;  %v2196_v12 = vld [vmem:[#allocation2 + $0x1680] sm:$0xff] }
 0x386   :  { %3260 = vmatprep.subr.mxu0 %v1589_v14  ;;  %3331 = vmatprep.subr.mxu1 %v1591_v15  ;;  %v2198_v14 = vld [vmem:[#allocation2 + $0x1690] sm:$0xff]  ;;  %v2165_v15 = vld [vmem:[#allocation2 + $0x1588] sm:$0xff] }
 0x387   :  { %3261 = vmatpush1.msra.mxu0 %v1588_v17  ;;  %3332 = vmatpush1.msra.mxu1 %v1590_v18  ;;  %v2167_v17 = vld [vmem:[#allocation2 + $0x1598] sm:$0xff]  ;;  %v2164_v18 = vld [vmem:[#allocation2 + $0x1580] sm:$0xff] }
 0x388   :  { %3262 = vmatprep.subr.mxu0 %v1557_v19  ;;  %3333 = vmatprep.subr.mxu1 %v1559_v20  ;;  %v2166_v19 = vld [vmem:[#allocation2 + $0x1590] sm:$0xff]  ;;  %v2133_v20 = vld [vmem:[#allocation2 + $0x1488] sm:$0xff] }
 0x389   :  { %3263 = vmatpush1.msra.mxu0 %v1556_v22  ;;  %3334 = vmatpush1.msra.mxu1 %v1558_v23  ;;  %v2135_v22 = vld [vmem:[#allocation2 + $0x1498] sm:$0xff]  ;;  %v2132_v23 = vld [vmem:[#allocation2 + $0x1480] sm:$0xff] }
 0x38a   :  { %3264 = vmatprep.subr.mxu0 %v1525_v24  ;;  %3335 = vmatprep.subr.mxu1 %v1527_v25  ;;  %v2134_v24 = vld [vmem:[#allocation2 + $0x1490] sm:$0xff]  ;;  %v6114_v25 = vsub.s32 4, %v4374_v41 }
 0x38b   :  { %3265 = vmatpush1.msra.mxu0 %v1524_v27  ;;  %3336 = vmatpush1.msra.mxu1 %v1526_v28  ;;  %v2101_v27 = vld [vmem:[#allocation2 + $0x1388] sm:$0xff]  ;;  %v2103_v28 = vld [vmem:[#allocation2 + $0x1398] sm:$0xff] }
 0x38c   :  { %3266 = vmatprep.subr.mxu0 %v1493_v30  ;;  %3337 = vmatprep.subr.mxu1 %v1495_v31  ;;  %v6117_v30 = vsub.s32 6, %v4374_v41  ;;  %v6120_v31 = vsub.s32 5, %v4374_v41 }
 0x38d   :  { %3267 = vmatpush1.msra.mxu0 %v1492_v33  ;;  %3338 = vmatpush1.msra.mxu1 %v1494_v34  ;;  %v6123_v33 = vsub.s32 7, %v4374_v41  ;;  %v2100_v34 = vld [vmem:[#allocation2 + $0x1380] sm:$0xff]  ;;  %v2039_v41 = vld [vmem:[#allocation2 + $0x1198] sm:$0xff] }
 0x38e   :  { %3268 = vmatprep.subr.mxu0 %v2485_v36  ;;  %3339 = vmatprep.subr.mxu1 %v2487_v37  ;;  %v2102_v36 = vld [vmem:[#allocation2 + $0x1390] sm:$0xff]  ;;  %v2069_v37 = vld [vmem:[#allocation2 + $0x1288] sm:$0xff] }
 0x38f   :  { %3269 = vmatpush2.msra.mxu0 %v2484_v39  ;;  %3340 = vmatpush2.msra.mxu1 %v2486_v35  ;;  %v2071_v39 = vld [vmem:[#allocation2 + $0x1298] sm:$0xff]  ;;  %v2068_v35 = vld [vmem:[#allocation2 + $0x1280] sm:$0xff] }
 0x390   :  { %3270 = vmatprep.subr.mxu0 %v2453_v40  ;;  %3341 = vmatprep.subr.mxu1 %v2455_v42  ;;  %v2070_v40 = vld [vmem:[#allocation2 + $0x1290] sm:$0xff]  ;;  %v2527_v42 = vrot.slane %v6094_v55, %v6114_v25 }
 0x391   :  { %3271 = vmatpush2.msra.mxu0 %v2452_v43  ;;  %3342 = vmatpush2.msra.mxu1 %v2454_v44  ;;  %v2037_v43 = vld [vmem:[#allocation2 + $0x1188] sm:$0xff]  ;;  %v2535_v44 = vrot.slane %v6094_v55, %v6117_v30 }
 0x392   :  { %3272 = vmatprep.subr.mxu0 %v2421_v45  ;;  %3343 = vmatprep.subr.mxu1 %v2423_v46  ;;  %v2531_v45 = vrot.slane %v6094_v55, %v6120_v31  ;;  %v2539_v46 = vrot.slane %v6094_v55, %v6123_v33 }
 0x393   :  { %3273 = vmatpush2.msra.mxu0 %v2420_v47  ;;  %3344 = vmatpush2.msra.mxu1 %v2422_v48  ;;  %v2036_v47 = vld [vmem:[#allocation2 + $0x1180] sm:$0xff]  ;;  %v2038_v48 = vld [vmem:[#allocation2 + $0x1190] sm:$0xff] }
 0x394   :  { %3274 = vmatprep.subr.mxu0 %v2389_v49  ;;  %3345 = vmatprep.subr.mxu1 %v2391_v50 }
 0x395   :  { %3275 = vmatpush2.msra.mxu0 %v2388_v51  ;;  %3346 = vmatpush2.msra.mxu1 %v2390_v53  ;;  %v2005_v51 = vld [vmem:[#allocation2 + $0x1088] sm:$0xff]  ;;  %v2007_v53 = vld [vmem:[#allocation2 + $0x1098] sm:$0xff] }
 0x396   :  { %3276 = vmatprep.subr.mxu0 %v2357_v54  ;;  %3347 = vmatprep.subr.mxu1 %v2359_v8  ;;  %v2004_v54 = vld [vmem:[#allocation2 + $0x1080] sm:$0xff]  ;;  %v2006_v8 = vld [vmem:[#allocation2 + $0x1090] sm:$0xff] }
 0x397   :  { %3277 = vmatpush2.msra.mxu0 %v2356_v56  ;;  %3348 = vmatpush2.msra.mxu1 %v2358_v62 }
 0x398   :  { %3278 = vmatprep.subr.mxu0 %v2325_v11  ;;  %3349 = vmatprep.subr.mxu1 %v2327_v57 }
 0x399   :  { %3279 = vmatpush2.msra.mxu0 %v2324_v58  ;;  %3350 = vmatpush2.msra.mxu1 %v2326_v3  ;;  %v1977_v3 = vld [vmem:[#allocation2 + $0xfa8] sm:$0xff] }
 0x39a   :  { %3280 = vmatprep.subr.mxu0 %v2293_v59  ;;  %3351 = vmatprep.subr.mxu1 %v2295_v60  ;;  %v1979_v59 = vld [vmem:[#allocation2 + $0xfb8] sm:$0xff]  ;;  %v1976_v60 = vld [vmem:[#allocation2 + $0xfa0] sm:$0xff] }
 0x39b   :  { %3281 = vmatpush2.msra.mxu0 %v2292_v61  ;;  %3352 = vmatpush2.msra.mxu1 %v2294_v63 }
 0x39c   :  { %3282 = vmatprep.subr.mxu0 %v2261_v26  ;;  %3353 = vmatprep.subr.mxu1 %v2263_v29  ;;  %v1978_v26 = vld [vmem:[#allocation2 + $0xfb0] sm:$0xff] }
 0x39d   :  { %3283 = vmatpush2.msra.mxu0 %v2260_v16  ;;  %3354 = vmatpush2.msra.mxu1 %v2262_v21  ;;  %v1945_v21 = vld [vmem:[#allocation2 + $0xea8] sm:$0xff] }
 0x39e   :  { %3284 = vmatprep.subr.mxu0 %v2229_v0  ;;  %3355 = vmatprep.subr.mxu1 %v2231_v1  ;;  %v1947_v0 = vld [vmem:[#allocation2 + $0xeb8] sm:$0xff]  ;;  %v1944_v1 = vld [vmem:[#allocation2 + $0xea0] sm:$0xff] }
 0x39f   :  { %3285 = vmatpush2.msra.mxu0 %v2228_v2  ;;  %3356 = vmatpush2.msra.mxu1 %v2230_v4  ;;  %v1946_v2 = vld [vmem:[#allocation2 + $0xeb0] sm:$0xff] }
 0x3a0   :  { %3286 = vmatprep.subr.mxu0 %v2197_v5  ;;  %3357 = vmatprep.subr.mxu1 %v2199_v6  ;;  %v1913_v5 = vld [vmem:[#allocation2 + $0xda8] sm:$0xff]  ;;  %v1915_v6 = vld [vmem:[#allocation2 + $0xdb8] sm:$0xff] }
 0x3a1   :  { %3287 = vmatpush2.msra.mxu0 %v2196_v12  ;;  %3358 = vmatpush2.msra.mxu1 %v2198_v14  ;;  %v1912_v12 = vld [vmem:[#allocation2 + $0xda0] sm:$0xff]  ;;  %v1914_v14 = vld [vmem:[#allocation2 + $0xdb0] sm:$0xff] }
 0x3a2   :  { %3288 = vmatprep.subr.mxu0 %v2165_v15  ;;  %3359 = vmatprep.subr.mxu1 %v2167_v17  ;;  %v1881_v15 = vld [vmem:[#allocation2 + $0xca8] sm:$0xff]  ;;  %v1883_v17 = vld [vmem:[#allocation2 + $0xcb8] sm:$0xff] }
 0x3a3   :  { %3289 = vmatpush2.msra.mxu0 %v2164_v18  ;;  %3360 = vmatpush2.msra.mxu1 %v2166_v19  ;;  %v1880_v18 = vld [vmem:[#allocation2 + $0xca0] sm:$0xff]  ;;  %v1882_v19 = vld [vmem:[#allocation2 + $0xcb0] sm:$0xff] }
 0x3a4   :  { %3290 = vmatprep.subr.mxu0 %v2133_v20  ;;  %3361 = vmatprep.subr.mxu1 %v2135_v22  ;;  %v1849_v20 = vld [vmem:[#allocation2 + $0xba8] sm:$0xff]  ;;  %v1851_v22 = vld [vmem:[#allocation2 + $0xbb8] sm:$0xff] }
 0x3a5   :  { %3291 = vmatpush2.msra.mxu0 %v2132_v23  ;;  %3362 = vmatpush2.msra.mxu1 %v2134_v24  ;;  %v1848_v23 = vld [vmem:[#allocation2 + $0xba0] sm:$0xff]  ;;  %v1850_v24 = vld [vmem:[#allocation2 + $0xbb0] sm:$0xff] }
 0x3a6   :  { %3292 = vmatprep.subr.mxu0 %v2101_v27  ;;  %3363 = vmatprep.subr.mxu1 %v2103_v28  ;;  %v1817_v27 = vld [vmem:[#allocation2 + $0xaa8] sm:$0xff]  ;;  %v1819_v28 = vld [vmem:[#allocation2 + $0xab8] sm:$0xff] }
 0x3a7   :  { %3293 = vmatpush2.msra.mxu0 %v2100_v34  ;;  %3364 = vmatpush2.msra.mxu1 %v2102_v36  ;;  %v1816_v34 = vld [vmem:[#allocation2 + $0xaa0] sm:$0xff]  ;;  %v1818_v36 = vld [vmem:[#allocation2 + $0xab0] sm:$0xff] }
 0x3a8   :  { %3294 = vmatprep.subr.mxu0 %v2069_v37  ;;  %3365 = vmatprep.subr.mxu1 %v2071_v39  ;;  %v2876_v49 = vpop.f32.mrf.mxu0  ;;  %v2947_v50 = vpop.f32.mrf.mxu1  ;;  %v1785_v37 = vld [vmem:[#allocation2 + $0x9a8] sm:$0xff]  ;;  %v1787_v39 = vld [vmem:[#allocation2 + $0x9b8] sm:$0xff] }
 0x3a9   :  { %3295 = vmatpush2.msra.mxu0 %v2068_v35  ;;  %3366 = vmatpush2.msra.mxu1 %v2070_v40  ;;  %v2877_v56 = vadd.f32 %v2876_v49, %v2527_v42  ;;  %v2948_v55 = vadd.f32 %v2947_v50, %v2535_v44  ;;  %v1784_v35 = vld [vmem:[#allocation2 + $0x9a0] sm:$0xff]  ;;  %v1786_v40 = vld [vmem:[#allocation2 + $0x9b0] sm:$0xff]  ;;  %v1753_v42 = vld [vmem:[#allocation2 + $0x8a8] sm:$0xff] }
 0x3aa   :  { %3296 = vmatprep.subr.mxu0 %v2037_v43  ;;  %3367 = vmatprep.subr.mxu1 %v2039_v41  ;;  %v2878_v62 = vpop.f32.mrf.mxu0  ;;  %v2949_v11 = vpop.f32.mrf.mxu1  ;;  %v1755_v43 = vld [vmem:[#allocation2 + $0x8b8] sm:$0xff]  ;;  %v1752_v41 = vld [vmem:[#allocation2 + $0x8a0] sm:$0xff]  ;;  %v1754_v44 = vld [vmem:[#allocation2 + $0x8b0] sm:$0xff] }
 0x3ab   :  { %3297 = vmatpush2.msra.mxu0 %v2036_v47  ;;  %3368 = vmatpush2.msra.mxu1 %v2038_v48  ;;  %v2879_v57 = vadd.f32 %v2878_v62, %v2531_v45  ;;  %v2950_v58 = vadd.f32 %v2949_v11, %v2539_v46  ;;  %v1721_v45 = vld [vmem:[#allocation2 + $0x7a8] sm:$0xff]  ;;  %v1723_v46 = vld [vmem:[#allocation2 + $0x7b8] sm:$0xff]  ;;  %v1720_v47 = vld [vmem:[#allocation2 + $0x7a0] sm:$0xff] }
 0x3ac   :  { %3298 = vmatprep.subr.mxu0 %v2005_v51  ;;  %3369 = vmatprep.subr.mxu1 %v2007_v53  ;;  %v1722_v48 = vld [vmem:[#allocation2 + $0x7b0] sm:$0xff]  ;;  %v1689_v49 = vld [vmem:[#allocation2 + $0x6a8] sm:$0xff]  ;;  %v1691_v50 = vld [vmem:[#allocation2 + $0x6b8] sm:$0xff] }
 0x3ad   :  { %3299 = vmatpush2.msra.mxu0 %v2004_v54  ;;  %3370 = vmatpush2.msra.mxu1 %v2006_v8  ;;  %v3853_v61 = vcombine.low %v2877_v56, %v2879_v57  ;;  %v3854_v63 = vcombine.low %v2948_v55, %v2950_v58  ;;  %v1688_v51 = vld [vmem:[#allocation2 + $0x6a0] sm:$0xff]  ;;  %v1690_v53 = vld [vmem:[#allocation2 + $0x6b0] sm:$0xff]  ;;  %v1657_v54 = vld [vmem:[#allocation2 + $0x5a8] sm:$0xff] }
 0x3ae   :  { %3301 = vmatmul.mubr.f32.vlgmr.msra.gmra.mxu0 %v6075_v10  ;;  %3372 = vmatmul.mubr.f32.vlgmr.msra.gmra.mxu1 %v6075_v10  ;;  %v1659_v8 = vld [vmem:[#allocation2 + $0x5b8] sm:$0xff]  ;;  %v1656_v56 = vld [vmem:[#allocation2 + $0x5a0] sm:$0xff]  ;;  %v1658_v62 = vld [vmem:[#allocation2 + $0x5b0] sm:$0xff] }
 0x3af   :  { %3378 = vmatprep.subr.mxu0 %v1977_v3  ;;  %3449 = vmatprep.subr.mxu1 %v1979_v59  ;;  %v3861_v29 = vrot.slane %v3853_v61, %v4404_v52  ;;  %v3868_v16 = vrot.slane %v3854_v63, %v4404_v52  ;;  %v1625_v11 = vld [vmem:[#allocation2 + $0x4a8] sm:$0xff]  ;;  %v1627_v55 = vld [vmem:[#allocation2 + $0x4b8] sm:$0xff]  ;;  %v1624_v57 = vld [vmem:[#allocation2 + $0x4a0] sm:$0xff] }
 0x3b0   :  { %3379 = vmatpush1.msra.mxu0 %v1976_v60  ;;  %3442 = vmatprep.mubr.f32.mxu0 %v6073_v7  ;;  %v1626_v58 = vld [vmem:[#allocation2 + $0x4b0] sm:$0xff]  ;;  %v1593_v3 = vld [vmem:[#allocation2 + $0x3a8] sm:$0xff]  ;;  %v1595_v59 = vld [vmem:[#allocation2 + $0x3b8] sm:$0xff] }
 0x3b1   :  { %3450 = vmatpush1.msra.mxu1 %v1978_v26  ;;  %3513 = vmatprep.mubr.f32.mxu1 %v6073_v7  ;;  %v3869_v4 = vcombine.low %v3861_v29, %v3868_v16  ;;  %v1592_v60 = vld [vmem:[#allocation2 + $0x3a0] sm:$0xff]  ;;  %v1594_v61 = vld [vmem:[#allocation2 + $0x3b0] sm:$0xff]  ;;  %v1561_v63 = vld [vmem:[#allocation2 + $0x2a8] sm:$0xff] }
 0x3b2   :  { %3380 = vmatprep.subr.mxu0 %v1945_v21  ;;  %3451 = vmatprep.subr.mxu1 %v1947_v0  ;;  %v1563_v26 = vld [vmem:[#allocation2 + $0x2b8] sm:$0xff]  ;;  %v1560_v29 = vld [vmem:[#allocation2 + $0x2a0] sm:$0xff]  ;;  %v1562_v16 = vld [vmem:[#allocation2 + $0x2b0] sm:$0xff] }
 0x3b3   :  { %3981 = vst [vmem:[%s6242_s7 + $0x8] sm:$0xff] %v3869_v4  ;;  %3381 = vmatpush1.msra.mxu0 %v1944_v1  ;;  %3452 = vmatpush1.msra.mxu1 %v1946_v2  ;;  %v1529_v21 = vld [vmem:[#allocation2 + $0x1a8] sm:$0xff]  ;;  %v1531_v0 = vld [vmem:[#allocation2 + $0x1b8] sm:$0xff]  ;;  %v1528_v1 = vld [vmem:[#allocation2 + $0x1a0] sm:$0xff] }
 0x3b4   :  { %3382 = vmatprep.subr.mxu0 %v1913_v5  ;;  %3453 = vmatprep.subr.mxu1 %v1915_v6  ;;  %v1530_v2 = vld [vmem:[#allocation2 + $0x1b0] sm:$0xff]  ;;  %v1497_v4 = vld [vmem:[#allocation2 + $0xa8] sm:$0xff]  ;;  %v1499_v5 = vld [vmem:[#allocation2 + $0xb8] sm:$0xff] }
 0x3b5   :  { %3383 = vmatpush1.msra.mxu0 %v1912_v12  ;;  %3454 = vmatpush1.msra.mxu1 %v1914_v14  ;;  %v1496_v6 = vld [vmem:[#allocation2 + $0xa0] sm:$0xff]  ;;  %v1498_v12 = vld [vmem:[#allocation2 + $0xb0] sm:$0xff]  ;;  %v2489_v14 = vld [vmem:[#allocation2 + $0x1fa8] sm:$0xff] }
 0x3b6   :  { %3384 = vmatprep.subr.mxu0 %v1881_v15  ;;  %3455 = vmatprep.subr.mxu1 %v1883_v17  ;;  %v2491_v15 = vld [vmem:[#allocation2 + $0x1fb8] sm:$0xff]  ;;  %v2488_v17 = vld [vmem:[#allocation2 + $0x1fa0] sm:$0xff] }
 0x3b7   :  { %3385 = vmatpush1.msra.mxu0 %v1880_v18  ;;  %3456 = vmatpush1.msra.mxu1 %v1882_v19  ;;  %v2490_v18 = vld [vmem:[#allocation2 + $0x1fb0] sm:$0xff]  ;;  %v2457_v19 = vld [vmem:[#allocation2 + $0x1ea8] sm:$0xff] }
 0x3b8   :  { %3386 = vmatprep.subr.mxu0 %v1849_v20  ;;  %3457 = vmatprep.subr.mxu1 %v1851_v22  ;;  %v2459_v20 = vld [vmem:[#allocation2 + $0x1eb8] sm:$0xff]  ;;  %v2456_v22 = vld [vmem:[#allocation2 + $0x1ea0] sm:$0xff] }
 0x3b9   :  { %3387 = vmatpush1.msra.mxu0 %v1848_v23  ;;  %3458 = vmatpush1.msra.mxu1 %v1850_v24  ;;  %v2458_v23 = vld [vmem:[#allocation2 + $0x1eb0] sm:$0xff]  ;;  %v2425_v24 = vld [vmem:[#allocation2 + $0x1da8] sm:$0xff] }
 0x3ba   :  { %3388 = vmatprep.subr.mxu0 %v1817_v27  ;;  %3459 = vmatprep.subr.mxu1 %v1819_v28  ;;  %v2427_v27 = vld [vmem:[#allocation2 + $0x1db8] sm:$0xff]  ;;  %v2424_v28 = vld [vmem:[#allocation2 + $0x1da0] sm:$0xff] }
 0x3bb   :  { %3389 = vmatpush1.msra.mxu0 %v1816_v34  ;;  %3460 = vmatpush1.msra.mxu1 %v1818_v36  ;;  %v2426_v34 = vld [vmem:[#allocation2 + $0x1db0] sm:$0xff]  ;;  %v2393_v36 = vld [vmem:[#allocation2 + $0x1ca8] sm:$0xff] }
 0x3bc   :  { %3390 = vmatprep.subr.mxu0 %v1785_v37  ;;  %3461 = vmatprep.subr.mxu1 %v1787_v39  ;;  %v2395_v37 = vld [vmem:[#allocation2 + $0x1cb8] sm:$0xff]  ;;  %v2392_v39 = vld [vmem:[#allocation2 + $0x1ca0] sm:$0xff] }
 0x3bd   :  { %3391 = vmatpush1.msra.mxu0 %v1784_v35  ;;  %3462 = vmatpush1.msra.mxu1 %v1786_v40  ;;  %v2394_v35 = vld [vmem:[#allocation2 + $0x1cb0] sm:$0xff]  ;;  %v2361_v40 = vld [vmem:[#allocation2 + $0x1ba8] sm:$0xff] }
 0x3be   :  { %3392 = vmatprep.subr.mxu0 %v1753_v42  ;;  %3463 = vmatprep.subr.mxu1 %v1755_v43  ;;  %v2363_v42 = vld [vmem:[#allocation2 + $0x1bb8] sm:$0xff]  ;;  %v2360_v43 = vld [vmem:[#allocation2 + $0x1ba0] sm:$0xff] }
 0x3bf   :  { %3393 = vmatpush1.msra.mxu0 %v1752_v41  ;;  %3464 = vmatpush1.msra.mxu1 %v1754_v44  ;;  %v2362_v41 = vld [vmem:[#allocation2 + $0x1bb0] sm:$0xff]  ;;  %v2329_v44 = vld [vmem:[#allocation2 + $0x1aa8] sm:$0xff] }
 0x3c0   :  { %3394 = vmatprep.subr.mxu0 %v1721_v45  ;;  %3465 = vmatprep.subr.mxu1 %v1723_v46  ;;  %v2331_v45 = vld [vmem:[#allocation2 + $0x1ab8] sm:$0xff]  ;;  %v2328_v46 = vld [vmem:[#allocation2 + $0x1aa0] sm:$0xff] }
 0x3c1   :  { %3395 = vmatpush1.msra.mxu0 %v1720_v47  ;;  %3466 = vmatpush1.msra.mxu1 %v1722_v48  ;;  %v2330_v47 = vld [vmem:[#allocation2 + $0x1ab0] sm:$0xff]  ;;  %v2297_v48 = vld [vmem:[#allocation2 + $0x19a8] sm:$0xff] }
 0x3c2   :  { %3396 = vmatprep.subr.mxu0 %v1689_v49  ;;  %3467 = vmatprep.subr.mxu1 %v1691_v50  ;;  %v2299_v49 = vld [vmem:[#allocation2 + $0x19b8] sm:$0xff]  ;;  %v2296_v50 = vld [vmem:[#allocation2 + $0x19a0] sm:$0xff] }
 0x3c3   :  { %3397 = vmatpush1.msra.mxu0 %v1688_v51  ;;  %3468 = vmatpush1.msra.mxu1 %v1690_v53  ;;  %v2298_v51 = vld [vmem:[#allocation2 + $0x19b0] sm:$0xff]  ;;  %v2265_v53 = vld [vmem:[#allocation2 + $0x18a8] sm:$0xff] }
 0x3c4   :  { %3398 = vmatprep.subr.mxu0 %v1657_v54  ;;  %3469 = vmatprep.subr.mxu1 %v1659_v8  ;;  %v2267_v54 = vld [vmem:[#allocation2 + $0x18b8] sm:$0xff]  ;;  %v2264_v8 = vld [vmem:[#allocation2 + $0x18a0] sm:$0xff] }
 0x3c5   :  { %3399 = vmatpush1.msra.mxu0 %v1656_v56  ;;  %3470 = vmatpush1.msra.mxu1 %v1658_v62  ;;  %v2266_v56 = vld [vmem:[#allocation2 + $0x18b0] sm:$0xff]  ;;  %v2233_v62 = vld [vmem:[#allocation2 + $0x17a8] sm:$0xff] }
 0x3c6   :  { %3400 = vmatprep.subr.mxu0 %v1625_v11  ;;  %3471 = vmatprep.subr.mxu1 %v1627_v55  ;;  %v2235_v11 = vld [vmem:[#allocation2 + $0x17b8] sm:$0xff]  ;;  %v2232_v55 = vld [vmem:[#allocation2 + $0x17a0] sm:$0xff] }
 0x3c7   :  { %3401 = vmatpush1.msra.mxu0 %v1624_v57  ;;  %3472 = vmatpush1.msra.mxu1 %v1626_v58  ;;  %v2234_v57 = vld [vmem:[#allocation2 + $0x17b0] sm:$0xff]  ;;  %v2201_v58 = vld [vmem:[#allocation2 + $0x16a8] sm:$0xff] }
 0x3c8   :  { %3402 = vmatprep.subr.mxu0 %v1593_v3  ;;  %3473 = vmatprep.subr.mxu1 %v1595_v59  ;;  %v2203_v3 = vld [vmem:[#allocation2 + $0x16b8] sm:$0xff]  ;;  %v2200_v59 = vld [vmem:[#allocation2 + $0x16a0] sm:$0xff] }
 0x3c9   :  { %3403 = vmatpush1.msra.mxu0 %v1592_v60  ;;  %3474 = vmatpush1.msra.mxu1 %v1594_v61  ;;  %v2202_v60 = vld [vmem:[#allocation2 + $0x16b0] sm:$0xff]  ;;  %v2169_v61 = vld [vmem:[#allocation2 + $0x15a8] sm:$0xff] }
 0x3ca   :  { %3404 = vmatprep.subr.mxu0 %v1561_v63  ;;  %3475 = vmatprep.subr.mxu1 %v1563_v26  ;;  %v2171_v63 = vld [vmem:[#allocation2 + $0x15b8] sm:$0xff]  ;;  %v2168_v26 = vld [vmem:[#allocation2 + $0x15a0] sm:$0xff] }
 0x3cb   :  { %3405 = vmatpush1.msra.mxu0 %v1560_v29  ;;  %3476 = vmatpush1.msra.mxu1 %v1562_v16  ;;  %v2170_v29 = vld [vmem:[#allocation2 + $0x15b0] sm:$0xff]  ;;  %v2137_v16 = vld [vmem:[#allocation2 + $0x14a8] sm:$0xff] }
 0x3cc   :  { %3406 = vmatprep.subr.mxu0 %v1529_v21  ;;  %3477 = vmatprep.subr.mxu1 %v1531_v0  ;;  %v2139_v21 = vld [vmem:[#allocation2 + $0x14b8] sm:$0xff]  ;;  %v2136_v0 = vld [vmem:[#allocation2 + $0x14a0] sm:$0xff] }
 0x3cd   :  { %3407 = vmatpush1.msra.mxu0 %v1528_v1  ;;  %3478 = vmatpush1.msra.mxu1 %v1530_v2  ;;  %v2138_v1 = vld [vmem:[#allocation2 + $0x14b0] sm:$0xff]  ;;  %v2105_v2 = vld [vmem:[#allocation2 + $0x13a8] sm:$0xff] }
 0x3ce   :  { %3408 = vmatprep.subr.mxu0 %v1497_v4  ;;  %3479 = vmatprep.subr.mxu1 %v1499_v5  ;;  %v2107_v4 = vld [vmem:[#allocation2 + $0x13b8] sm:$0xff]  ;;  %v6145_v5 = vld [vmem:[%s6241_s6 + $0x8] sm:$0xff] }
 0x3cf   :  { %3409 = vmatpush1.msra.mxu0 %v1496_v6  ;;  %3480 = vmatpush1.msra.mxu1 %v1498_v12  ;;  %v2104_v6 = vld [vmem:[#allocation2 + $0x13a0] sm:$0xff]  ;;  %v2106_v12 = vld [vmem:[#allocation2 + $0x13b0] sm:$0xff] }
 0x3d0   :  { %3410 = vmatprep.subr.mxu0 %v2489_v14  ;;  %3481 = vmatprep.subr.mxu1 %v2491_v15  ;;  %v2073_v14 = vld [vmem:[#allocation2 + $0x12a8] sm:$0xff]  ;;  %v2075_v15 = vld [vmem:[#allocation2 + $0x12b8] sm:$0xff] }
 0x3d1   :  { %3411 = vmatpush2.msra.mxu0 %v2488_v17  ;;  %3482 = vmatpush2.msra.mxu1 %v2490_v18  ;;  %v2072_v17 = vld [vmem:[#allocation2 + $0x12a0] sm:$0xff]  ;;  %v2074_v18 = vld [vmem:[#allocation2 + $0x12b0] sm:$0xff] }
 0x3d2   :  { %3412 = vmatprep.subr.mxu0 %v2457_v19  ;;  %3483 = vmatprep.subr.mxu1 %v2459_v20  ;;  %v2543_v19 = vrot.slane %v6145_v5, %v5942_v32  ;;  %v2041_v20 = vld [vmem:[#allocation2 + $0x11a8] sm:$0xff] }
 0x3d3   :  { %3413 = vmatpush2.msra.mxu0 %v2456_v22  ;;  %3484 = vmatpush2.msra.mxu1 %v2458_v23  ;;  %v2043_v22 = vld [vmem:[#allocation2 + $0x11b8] sm:$0xff]  ;;  %v2551_v23 = vrot.slane %v6145_v5, %v6059_v9 }
 0x3d4   :  { %3414 = vmatprep.subr.mxu0 %v2425_v24  ;;  %3485 = vmatprep.subr.mxu1 %v2427_v27  ;;  %v2547_v24 = vrot.slane %v6145_v5, %v5962_v38  ;;  %v2555_v27 = vrot.slane %v6145_v5, %v6062_v13 }
 0x3d5   :  { %3415 = vmatpush2.msra.mxu0 %v2424_v28  ;;  %3486 = vmatpush2.msra.mxu1 %v2426_v34  ;;  %v2040_v28 = vld [vmem:[#allocation2 + $0x11a0] sm:$0xff]  ;;  %v2042_v34 = vld [vmem:[#allocation2 + $0x11b0] sm:$0xff] }
 0x3d6   :  { %3416 = vmatprep.subr.mxu0 %v2393_v36  ;;  %3487 = vmatprep.subr.mxu1 %v2395_v37 }
 0x3d7   :  { %3417 = vmatpush2.msra.mxu0 %v2392_v39  ;;  %3488 = vmatpush2.msra.mxu1 %v2394_v35  ;;  %v2009_v39 = vld [vmem:[#allocation2 + $0x10a8] sm:$0xff]  ;;  %v2011_v35 = vld [vmem:[#allocation2 + $0x10b8] sm:$0xff] }
 0x3d8   :  { %3418 = vmatprep.subr.mxu0 %v2361_v40  ;;  %3489 = vmatprep.subr.mxu1 %v2363_v42  ;;  %v2008_v40 = vld [vmem:[#allocation2 + $0x10a0] sm:$0xff]  ;;  %v2010_v42 = vld [vmem:[#allocation2 + $0x10b0] sm:$0xff] }
 0x3d9   :  { %3419 = vmatpush2.msra.mxu0 %v2360_v43  ;;  %3490 = vmatpush2.msra.mxu1 %v2362_v41 }
 0x3da   :  { %3420 = vmatprep.subr.mxu0 %v2329_v44  ;;  %3491 = vmatprep.subr.mxu1 %v2331_v45 }
 0x3db   :  { %3421 = vmatpush2.msra.mxu0 %v2328_v46  ;;  %3492 = vmatpush2.msra.mxu1 %v2330_v47 }
 0x3dc   :  { %3422 = vmatprep.subr.mxu0 %v2297_v48  ;;  %3493 = vmatprep.subr.mxu1 %v2299_v49  ;;  %v1981_v48 = vld [vmem:[#allocation2 + $0xfc8] sm:$0xff]  ;;  %v1983_v49 = vld [vmem:[#allocation2 + $0xfd8] sm:$0xff] }
 0x3dd   :  { %3423 = vmatpush2.msra.mxu0 %v2296_v50  ;;  %3494 = vmatpush2.msra.mxu1 %v2298_v51  ;;  %v1980_v50 = vld [vmem:[#allocation2 + $0xfc0] sm:$0xff] }
 0x3de   :  { %3424 = vmatprep.subr.mxu0 %v2265_v53  ;;  %3495 = vmatprep.subr.mxu1 %v2267_v54  ;;  %v1982_v54 = vld [vmem:[#allocation2 + $0xfd0] sm:$0xff] }
 0x3df   :  { %3425 = vmatpush2.msra.mxu0 %v2264_v8  ;;  %3496 = vmatpush2.msra.mxu1 %v2266_v56 }
 0x3e0   :  { %3426 = vmatprep.subr.mxu0 %v2233_v62  ;;  %3497 = vmatprep.subr.mxu1 %v2235_v11  ;;  %v1949_v62 = vld [vmem:[#allocation2 + $0xec8] sm:$0xff]  ;;  %v1951_v11 = vld [vmem:[#allocation2 + $0xed8] sm:$0xff] }
 0x3e1   :  { %3427 = vmatpush2.msra.mxu0 %v2232_v55  ;;  %3498 = vmatpush2.msra.mxu1 %v2234_v57  ;;  %v1948_v55 = vld [vmem:[#allocation2 + $0xec0] sm:$0xff]  ;;  %v1950_v57 = vld [vmem:[#allocation2 + $0xed0] sm:$0xff] }
 0x3e2   :  { %3428 = vmatprep.subr.mxu0 %v2201_v58  ;;  %3499 = vmatprep.subr.mxu1 %v2203_v3  ;;  %v1917_v3 = vld [vmem:[#allocation2 + $0xdc8] sm:$0xff] }
 0x3e3   :  { %3429 = vmatpush2.msra.mxu0 %v2200_v59  ;;  %3500 = vmatpush2.msra.mxu1 %v2202_v60  ;;  %v1919_v59 = vld [vmem:[#allocation2 + $0xdd8] sm:$0xff]  ;;  %v1916_v60 = vld [vmem:[#allocation2 + $0xdc0] sm:$0xff] }
 0x3e4   :  { %3430 = vmatprep.subr.mxu0 %v2169_v61  ;;  %3501 = vmatprep.subr.mxu1 %v2171_v63  ;;  %v1918_v61 = vld [vmem:[#allocation2 + $0xdd0] sm:$0xff]  ;;  %v1885_v63 = vld [vmem:[#allocation2 + $0xcc8] sm:$0xff] }
 0x3e5   :  { %3431 = vmatpush2.msra.mxu0 %v2168_v26  ;;  %3502 = vmatpush2.msra.mxu1 %v2170_v29  ;;  %v1887_v26 = vld [vmem:[#allocation2 + $0xcd8] sm:$0xff]  ;;  %v1884_v29 = vld [vmem:[#allocation2 + $0xcc0] sm:$0xff] }
 0x3e6   :  { %3432 = vmatprep.subr.mxu0 %v2137_v16  ;;  %3503 = vmatprep.subr.mxu1 %v2139_v21  ;;  %v1886_v16 = vld [vmem:[#allocation2 + $0xcd0] sm:$0xff]  ;;  %v1853_v21 = vld [vmem:[#allocation2 + $0xbc8] sm:$0xff] }
 0x3e7   :  { %3433 = vmatpush2.msra.mxu0 %v2136_v0  ;;  %3504 = vmatpush2.msra.mxu1 %v2138_v1  ;;  %v1855_v0 = vld [vmem:[#allocation2 + $0xbd8] sm:$0xff]  ;;  %v1852_v1 = vld [vmem:[#allocation2 + $0xbc0] sm:$0xff] }
 0x3e8   :  { %3434 = vmatprep.subr.mxu0 %v2105_v2  ;;  %3505 = vmatprep.subr.mxu1 %v2107_v4  ;;  %v1854_v2 = vld [vmem:[#allocation2 + $0xbd0] sm:$0xff]  ;;  %v1821_v4 = vld [vmem:[#allocation2 + $0xac8] sm:$0xff] }
 0x3e9   :  { %3435 = vmatpush2.msra.mxu0 %v2104_v6  ;;  %3506 = vmatpush2.msra.mxu1 %v2106_v12  ;;  %v1823_v6 = vld [vmem:[#allocation2 + $0xad8] sm:$0xff]  ;;  %v1820_v12 = vld [vmem:[#allocation2 + $0xac0] sm:$0xff] }
 0x3ea   :  { %3436 = vmatprep.subr.mxu0 %v2073_v14  ;;  %3507 = vmatprep.subr.mxu1 %v2075_v15  ;;  %v3018_v36 = vpop.f32.mrf.mxu0  ;;  %v3089_v37 = vpop.f32.mrf.mxu1  ;;  %v1822_v14 = vld [vmem:[#allocation2 + $0xad0] sm:$0xff]  ;;  %v1789_v15 = vld [vmem:[#allocation2 + $0x9c8] sm:$0xff] }
 0x3eb   :  { %3437 = vmatpush2.msra.mxu0 %v2072_v17  ;;  %3508 = vmatpush2.msra.mxu1 %v2074_v18  ;;  %v3019_v43 = vadd.f32 %v3018_v36, %v2543_v19  ;;  %v3090_v45 = vadd.f32 %v3089_v37, %v2551_v23  ;;  %v1791_v17 = vld [vmem:[#allocation2 + $0x9d8] sm:$0xff]  ;;  %v1788_v18 = vld [vmem:[#allocation2 + $0x9c0] sm:$0xff]  ;;  %v1790_v19 = vld [vmem:[#allocation2 + $0x9d0] sm:$0xff] }
 0x3ec   :  { %3438 = vmatprep.subr.mxu0 %v2041_v20  ;;  %3509 = vmatprep.subr.mxu1 %v2043_v22  ;;  %v3020_v41 = vpop.f32.mrf.mxu0  ;;  %v3091_v44 = vpop.f32.mrf.mxu1  ;;  %v1757_v20 = vld [vmem:[#allocation2 + $0x8c8] sm:$0xff]  ;;  %v1759_v22 = vld [vmem:[#allocation2 + $0x8d8] sm:$0xff]  ;;  %v1756_v23 = vld [vmem:[#allocation2 + $0x8c0] sm:$0xff] }
 0x3ed   :  { %3439 = vmatpush2.msra.mxu0 %v2040_v28  ;;  %3510 = vmatpush2.msra.mxu1 %v2042_v34  ;;  %v3021_v46 = vadd.f32 %v3020_v41, %v2547_v24  ;;  %v3092_v47 = vadd.f32 %v3091_v44, %v2555_v27  ;;  %v1758_v24 = vld [vmem:[#allocation2 + $0x8d0] sm:$0xff]  ;;  %v1725_v27 = vld [vmem:[#allocation2 + $0x7c8] sm:$0xff]  ;;  %v1727_v28 = vld [vmem:[#allocation2 + $0x7d8] sm:$0xff] }
 0x3ee   :  { %3440 = vmatprep.subr.mxu0 %v2009_v39  ;;  %3511 = vmatprep.subr.mxu1 %v2011_v35  ;;  %v1724_v34 = vld [vmem:[#allocation2 + $0x7c0] sm:$0xff]  ;;  %v1726_v36 = vld [vmem:[#allocation2 + $0x7d0] sm:$0xff]  ;;  %v1693_v37 = vld [vmem:[#allocation2 + $0x6c8] sm:$0xff] }
 0x3ef   :  { %3441 = vmatpush2.msra.mxu0 %v2008_v40  ;;  %3512 = vmatpush2.msra.mxu1 %v2010_v42  ;;  %v3870_v51 = vcombine.low %v3019_v43, %v3021_v46  ;;  %v3871_v53 = vcombine.low %v3090_v45, %v3092_v47  ;;  %v1695_v39 = vld [vmem:[#allocation2 + $0x6d8] sm:$0xff]  ;;  %v1692_v35 = vld [vmem:[#allocation2 + $0x6c0] sm:$0xff]  ;;  %v1694_v40 = vld [vmem:[#allocation2 + $0x6d0] sm:$0xff] }
 0x3f0   :  { %3443 = vmatmul.mubr.f32.vlgmr.msra.gmra.mxu0 %v6075_v10  ;;  %3514 = vmatmul.mubr.f32.vlgmr.msra.gmra.mxu1 %v6075_v10  ;;  %v1661_v42 = vld [vmem:[#allocation2 + $0x5c8] sm:$0xff]  ;;  %v1663_v43 = vld [vmem:[#allocation2 + $0x5d8] sm:$0xff]  ;;  %v1660_v41 = vld [vmem:[#allocation2 + $0x5c0] sm:$0xff] }
 0x3f1   :  { %3520 = vmatprep.subr.mxu0 %v1981_v48  ;;  %3591 = vmatprep.subr.mxu1 %v1983_v49  ;;  %v3878_v8 = vrot.slane %v3870_v51, %v4404_v52  ;;  %v3885_v56 = vrot.slane %v3871_v53, %v4404_v52  ;;  %v1662_v44 = vld [vmem:[#allocation2 + $0x5d0] sm:$0xff]  ;;  %v1629_v45 = vld [vmem:[#allocation2 + $0x4c8] sm:$0xff]  ;;  %v1631_v46 = vld [vmem:[#allocation2 + $0x4d8] sm:$0xff] }
 0x3f2   :  { %3521 = vmatpush1.msra.mxu0 %v1980_v50  ;;  %3584 = vmatprep.mubr.f32.mxu0 %v6073_v7  ;;  %v1628_v47 = vld [vmem:[#allocation2 + $0x4c0] sm:$0xff]  ;;  %v1630_v48 = vld [vmem:[#allocation2 + $0x4d0] sm:$0xff]  ;;  %v1597_v49 = vld [vmem:[#allocation2 + $0x3c8] sm:$0xff] }
 0x3f3   :  { %3592 = vmatpush1.msra.mxu1 %v1982_v54  ;;  %3655 = vmatprep.mubr.f32.mxu1 %v6073_v7  ;;  %v3886_v58 = vcombine.low %v3878_v8, %v3885_v56  ;;  %v1599_v50 = vld [vmem:[#allocation2 + $0x3d8] sm:$0xff]  ;;  %v1596_v51 = vld [vmem:[#allocation2 + $0x3c0] sm:$0xff]  ;;  %v1598_v53 = vld [vmem:[#allocation2 + $0x3d0] sm:$0xff] }
 0x3f4   :  { %3522 = vmatprep.subr.mxu0 %v1949_v62  ;;  %3593 = vmatprep.subr.mxu1 %v1951_v11  ;;  %v1565_v54 = vld [vmem:[#allocation2 + $0x2c8] sm:$0xff]  ;;  %v1567_v8 = vld [vmem:[#allocation2 + $0x2d8] sm:$0xff]  ;;  %v1564_v56 = vld [vmem:[#allocation2 + $0x2c0] sm:$0xff] }
 0x3f5   :  { %3982 = vst [vmem:[%s6242_s7 + $0x10] sm:$0xff] %v3886_v58  ;;  %3523 = vmatpush1.msra.mxu0 %v1948_v55  ;;  %3594 = vmatpush1.msra.mxu1 %v1950_v57  ;;  %v1566_v62 = vld [vmem:[#allocation2 + $0x2d0] sm:$0xff]  ;;  %v1533_v11 = vld [vmem:[#allocation2 + $0x1c8] sm:$0xff]  ;;  %v1535_v55 = vld [vmem:[#allocation2 + $0x1d8] sm:$0xff] }
 0x3f6   :  { %3524 = vmatprep.subr.mxu0 %v1917_v3  ;;  %3595 = vmatprep.subr.mxu1 %v1919_v59  ;;  %v1532_v57 = vld [vmem:[#allocation2 + $0x1c0] sm:$0xff]  ;;  %v1534_v58 = vld [vmem:[#allocation2 + $0x1d0] sm:$0xff]  ;;  %v1501_v3 = vld [vmem:[#allocation2 + $0xc8] sm:$0xff] }
 0x3f7   :  { %3525 = vmatpush1.msra.mxu0 %v1916_v60  ;;  %3596 = vmatpush1.msra.mxu1 %v1918_v61  ;;  %v1503_v59 = vld [vmem:[#allocation2 + $0xd8] sm:$0xff]  ;;  %v1500_v60 = vld [vmem:[#allocation2 + $0xc0] sm:$0xff]  ;;  %v1502_v61 = vld [vmem:[#allocation2 + $0xd0] sm:$0xff] }
 0x3f8   :  { %3526 = vmatprep.subr.mxu0 %v1885_v63  ;;  %3597 = vmatprep.subr.mxu1 %v1887_v26  ;;  %v2493_v63 = vld [vmem:[#allocation2 + $0x1fc8] sm:$0xff]  ;;  %v2495_v26 = vld [vmem:[#allocation2 + $0x1fd8] sm:$0xff] }
 0x3f9   :  { %3527 = vmatpush1.msra.mxu0 %v1884_v29  ;;  %3598 = vmatpush1.msra.mxu1 %v1886_v16  ;;  %v2492_v29 = vld [vmem:[#allocation2 + $0x1fc0] sm:$0xff]  ;;  %v2494_v16 = vld [vmem:[#allocation2 + $0x1fd0] sm:$0xff] }
 0x3fa   :  { %3528 = vmatprep.subr.mxu0 %v1853_v21  ;;  %3599 = vmatprep.subr.mxu1 %v1855_v0  ;;  %v2461_v21 = vld [vmem:[#allocation2 + $0x1ec8] sm:$0xff]  ;;  %v2463_v0 = vld [vmem:[#allocation2 + $0x1ed8] sm:$0xff] }
 0x3fb   :  { %3529 = vmatpush1.msra.mxu0 %v1852_v1  ;;  %3600 = vmatpush1.msra.mxu1 %v1854_v2  ;;  %v2460_v1 = vld [vmem:[#allocation2 + $0x1ec0] sm:$0xff]  ;;  %v2462_v2 = vld [vmem:[#allocation2 + $0x1ed0] sm:$0xff] }
 0x3fc   :  { %3530 = vmatprep.subr.mxu0 %v1821_v4  ;;  %3601 = vmatprep.subr.mxu1 %v1823_v6  ;;  %v2429_v4 = vld [vmem:[#allocation2 + $0x1dc8] sm:$0xff]  ;;  %v2431_v6 = vld [vmem:[#allocation2 + $0x1dd8] sm:$0xff] }
 0x3fd   :  { %3531 = vmatpush1.msra.mxu0 %v1820_v12  ;;  %3602 = vmatpush1.msra.mxu1 %v1822_v14  ;;  %v2428_v12 = vld [vmem:[#allocation2 + $0x1dc0] sm:$0xff]  ;;  %v2430_v14 = vld [vmem:[#allocation2 + $0x1dd0] sm:$0xff] }
 0x3fe   :  { %3532 = vmatprep.subr.mxu0 %v1789_v15  ;;  %3603 = vmatprep.subr.mxu1 %v1791_v17  ;;  %v2397_v15 = vld [vmem:[#allocation2 + $0x1cc8] sm:$0xff]  ;;  %v2399_v17 = vld [vmem:[#allocation2 + $0x1cd8] sm:$0xff] }
 0x3ff   :  { %3533 = vmatpush1.msra.mxu0 %v1788_v18  ;;  %3604 = vmatpush1.msra.mxu1 %v1790_v19  ;;  %v2396_v18 = vld [vmem:[#allocation2 + $0x1cc0] sm:$0xff]  ;;  %v2398_v19 = vld [vmem:[#allocation2 + $0x1cd0] sm:$0xff] }
 0x400   :  { %3534 = vmatprep.subr.mxu0 %v1757_v20  ;;  %3605 = vmatprep.subr.mxu1 %v1759_v22  ;;  %v2365_v20 = vld [vmem:[#allocation2 + $0x1bc8] sm:$0xff]  ;;  %v2367_v22 = vld [vmem:[#allocation2 + $0x1bd8] sm:$0xff] }
 0x401   :  { %3535 = vmatpush1.msra.mxu0 %v1756_v23  ;;  %3606 = vmatpush1.msra.mxu1 %v1758_v24  ;;  %v2364_v23 = vld [vmem:[#allocation2 + $0x1bc0] sm:$0xff]  ;;  %v2366_v24 = vld [vmem:[#allocation2 + $0x1bd0] sm:$0xff] }
 0x402   :  { %3536 = vmatprep.subr.mxu0 %v1725_v27  ;;  %3607 = vmatprep.subr.mxu1 %v1727_v28  ;;  %v2333_v27 = vld [vmem:[#allocation2 + $0x1ac8] sm:$0xff]  ;;  %v2335_v28 = vld [vmem:[#allocation2 + $0x1ad8] sm:$0xff] }
 0x403   :  { %3537 = vmatpush1.msra.mxu0 %v1724_v34  ;;  %3608 = vmatpush1.msra.mxu1 %v1726_v36  ;;  %v2332_v34 = vld [vmem:[#allocation2 + $0x1ac0] sm:$0xff]  ;;  %v2334_v36 = vld [vmem:[#allocation2 + $0x1ad0] sm:$0xff] }
 0x404   :  { %3538 = vmatprep.subr.mxu0 %v1693_v37  ;;  %3609 = vmatprep.subr.mxu1 %v1695_v39  ;;  %v2301_v37 = vld [vmem:[#allocation2 + $0x19c8] sm:$0xff]  ;;  %v2303_v39 = vld [vmem:[#allocation2 + $0x19d8] sm:$0xff] }
 0x405   :  { %3539 = vmatpush1.msra.mxu0 %v1692_v35  ;;  %3610 = vmatpush1.msra.mxu1 %v1694_v40  ;;  %v2300_v35 = vld [vmem:[#allocation2 + $0x19c0] sm:$0xff]  ;;  %v2302_v40 = vld [vmem:[#allocation2 + $0x19d0] sm:$0xff] }
 0x406   :  { %3540 = vmatprep.subr.mxu0 %v1661_v42  ;;  %3611 = vmatprep.subr.mxu1 %v1663_v43  ;;  %v2269_v42 = vld [vmem:[#allocation2 + $0x18c8] sm:$0xff]  ;;  %v2271_v43 = vld [vmem:[#allocation2 + $0x18d8] sm:$0xff] }
 0x407   :  { %3541 = vmatpush1.msra.mxu0 %v1660_v41  ;;  %3612 = vmatpush1.msra.mxu1 %v1662_v44  ;;  %v2268_v41 = vld [vmem:[#allocation2 + $0x18c0] sm:$0xff]  ;;  %v2270_v44 = vld [vmem:[#allocation2 + $0x18d0] sm:$0xff] }
 0x408   :  { %3542 = vmatprep.subr.mxu0 %v1629_v45  ;;  %3613 = vmatprep.subr.mxu1 %v1631_v46  ;;  %v2237_v45 = vld [vmem:[#allocation2 + $0x17c8] sm:$0xff]  ;;  %v2239_v46 = vld [vmem:[#allocation2 + $0x17d8] sm:$0xff] }
 0x409   :  { %3543 = vmatpush1.msra.mxu0 %v1628_v47  ;;  %3614 = vmatpush1.msra.mxu1 %v1630_v48  ;;  %v2236_v47 = vld [vmem:[#allocation2 + $0x17c0] sm:$0xff]  ;;  %v2238_v48 = vld [vmem:[#allocation2 + $0x17d0] sm:$0xff] }
 0x40a   :  { %3544 = vmatprep.subr.mxu0 %v1597_v49  ;;  %3615 = vmatprep.subr.mxu1 %v1599_v50  ;;  %v2205_v49 = vld [vmem:[#allocation2 + $0x16c8] sm:$0xff]  ;;  %v2207_v50 = vld [vmem:[#allocation2 + $0x16d8] sm:$0xff] }
 0x40b   :  { %3545 = vmatpush1.msra.mxu0 %v1596_v51  ;;  %3616 = vmatpush1.msra.mxu1 %v1598_v53  ;;  %v2204_v51 = vld [vmem:[#allocation2 + $0x16c0] sm:$0xff]  ;;  %v2206_v53 = vld [vmem:[#allocation2 + $0x16d0] sm:$0xff] }
 0x40c   :  { %3546 = vmatprep.subr.mxu0 %v1565_v54  ;;  %3617 = vmatprep.subr.mxu1 %v1567_v8  ;;  %v2173_v54 = vld [vmem:[#allocation2 + $0x15c8] sm:$0xff]  ;;  %v2175_v8 = vld [vmem:[#allocation2 + $0x15d8] sm:$0xff] }
 0x40d   :  { %3547 = vmatpush1.msra.mxu0 %v1564_v56  ;;  %3618 = vmatpush1.msra.mxu1 %v1566_v62  ;;  %v2172_v56 = vld [vmem:[#allocation2 + $0x15c0] sm:$0xff]  ;;  %v2174_v62 = vld [vmem:[#allocation2 + $0x15d0] sm:$0xff] }
 0x40e   :  { %3548 = vmatprep.subr.mxu0 %v1533_v11  ;;  %3619 = vmatprep.subr.mxu1 %v1535_v55  ;;  %v2141_v11 = vld [vmem:[#allocation2 + $0x14c8] sm:$0xff]  ;;  %v2143_v55 = vld [vmem:[#allocation2 + $0x14d8] sm:$0xff] }
 0x40f   :  { %3549 = vmatpush1.msra.mxu0 %v1532_v57  ;;  %3620 = vmatpush1.msra.mxu1 %v1534_v58  ;;  %v2140_v57 = vld [vmem:[#allocation2 + $0x14c0] sm:$0xff]  ;;  %v2142_v58 = vld [vmem:[#allocation2 + $0x14d0] sm:$0xff] }
 0x410   :  { %3550 = vmatprep.subr.mxu0 %v1501_v3  ;;  %3621 = vmatprep.subr.mxu1 %v1503_v59  ;;  %v2109_v3 = vld [vmem:[#allocation2 + $0x13c8] sm:$0xff]  ;;  %v2111_v59 = vld [vmem:[#allocation2 + $0x13d8] sm:$0xff] }
 0x411   :  { %3551 = vmatpush1.msra.mxu0 %v1500_v60  ;;  %3622 = vmatpush1.msra.mxu1 %v1502_v61  ;;  %v2108_v60 = vld [vmem:[#allocation2 + $0x13c0] sm:$0xff]  ;;  %v2110_v61 = vld [vmem:[#allocation2 + $0x13d0] sm:$0xff] }
 0x412   :  { %3552 = vmatprep.subr.mxu0 %v2493_v63  ;;  %3623 = vmatprep.subr.mxu1 %v2495_v26  ;;  %v2077_v63 = vld [vmem:[#allocation2 + $0x12c8] sm:$0xff]  ;;  %v2079_v26 = vld [vmem:[#allocation2 + $0x12d8] sm:$0xff] }
 0x413   :  { %3553 = vmatpush2.msra.mxu0 %v2492_v29  ;;  %3624 = vmatpush2.msra.mxu1 %v2494_v16  ;;  %v2076_v29 = vld [vmem:[#allocation2 + $0x12c0] sm:$0xff]  ;;  %v2078_v16 = vld [vmem:[#allocation2 + $0x12d0] sm:$0xff] }
 0x414   :  { %3554 = vmatprep.subr.mxu0 %v2461_v21  ;;  %3625 = vmatprep.subr.mxu1 %v2463_v0  ;;  %v2559_v21 = vrot.slane %v6145_v5, %v6114_v25  ;;  %v2045_v0 = vld [vmem:[#allocation2 + $0x11c8] sm:$0xff] }
 0x415   :  { %3555 = vmatpush2.msra.mxu0 %v2460_v1  ;;  %3626 = vmatpush2.msra.mxu1 %v2462_v2  ;;  %v2047_v1 = vld [vmem:[#allocation2 + $0x11d8] sm:$0xff]  ;;  %v2567_v2 = vrot.slane %v6145_v5, %v6117_v30 }
 0x416   :  { %3556 = vmatprep.subr.mxu0 %v2429_v4  ;;  %3627 = vmatprep.subr.mxu1 %v2431_v6  ;;  %v2563_v4 = vrot.slane %v6145_v5, %v6120_v31  ;;  %v2571_v6 = vrot.slane %v6145_v5, %v6123_v33 }
 0x417   :  { %3557 = vmatpush2.msra.mxu0 %v2428_v12  ;;  %3628 = vmatpush2.msra.mxu1 %v2430_v14  ;;  %v2044_v12 = vld [vmem:[#allocation2 + $0x11c0] sm:$0xff]  ;;  %v2046_v14 = vld [vmem:[#allocation2 + $0x11d0] sm:$0xff] }
 0x418   :  { %3558 = vmatprep.subr.mxu0 %v2397_v15  ;;  %3629 = vmatprep.subr.mxu1 %v2399_v17 }
 0x419   :  { %3559 = vmatpush2.msra.mxu0 %v2396_v18  ;;  %3630 = vmatpush2.msra.mxu1 %v2398_v19  ;;  %v2013_v18 = vld [vmem:[#allocation2 + $0x10c8] sm:$0xff]  ;;  %v2015_v19 = vld [vmem:[#allocation2 + $0x10d8] sm:$0xff] }
 0x41a   :  { %3560 = vmatprep.subr.mxu0 %v2365_v20  ;;  %3631 = vmatprep.subr.mxu1 %v2367_v22  ;;  %v2012_v20 = vld [vmem:[#allocation2 + $0x10c0] sm:$0xff]  ;;  %v2014_v22 = vld [vmem:[#allocation2 + $0x10d0] sm:$0xff] }
 0x41b   :  { %3561 = vmatpush2.msra.mxu0 %v2364_v23  ;;  %3632 = vmatpush2.msra.mxu1 %v2366_v24 }
 0x41c   :  { %3562 = vmatprep.subr.mxu0 %v2333_v27  ;;  %3633 = vmatprep.subr.mxu1 %v2335_v28 }
 0x41d   :  { %3563 = vmatpush2.msra.mxu0 %v2332_v34  ;;  %3634 = vmatpush2.msra.mxu1 %v2334_v36  ;;  %v1985_v36 = vld [vmem:[#allocation2 + $0xfe8] sm:$0xff] }
 0x41e   :  { %3564 = vmatprep.subr.mxu0 %v2301_v37  ;;  %3635 = vmatprep.subr.mxu1 %v2303_v39  ;;  %v1987_v37 = vld [vmem:[#allocation2 + $0xff8] sm:$0xff]  ;;  %v1984_v39 = vld [vmem:[#allocation2 + $0xfe0] sm:$0xff] }
 0x41f   :  { %3565 = vmatpush2.msra.mxu0 %v2300_v35  ;;  %3636 = vmatpush2.msra.mxu1 %v2302_v40 }
 0x420   :  { %3566 = vmatprep.subr.mxu0 %v2269_v42  ;;  %3637 = vmatprep.subr.mxu1 %v2271_v43  ;;  %v1986_v42 = vld [vmem:[#allocation2 + $0xff0] sm:$0xff] }
 0x421   :  { %3567 = vmatpush2.msra.mxu0 %v2268_v41  ;;  %3638 = vmatpush2.msra.mxu1 %v2270_v44  ;;  %v1953_v44 = vld [vmem:[#allocation2 + $0xee8] sm:$0xff] }
 0x422   :  { %3568 = vmatprep.subr.mxu0 %v2237_v45  ;;  %3639 = vmatprep.subr.mxu1 %v2239_v46  ;;  %v1955_v45 = vld [vmem:[#allocation2 + $0xef8] sm:$0xff]  ;;  %v1952_v46 = vld [vmem:[#allocation2 + $0xee0] sm:$0xff] }
 0x423   :  { %3569 = vmatpush2.msra.mxu0 %v2236_v47  ;;  %3640 = vmatpush2.msra.mxu1 %v2238_v48  ;;  %v1954_v47 = vld [vmem:[#allocation2 + $0xef0] sm:$0xff] }
 0x424   :  { %3570 = vmatprep.subr.mxu0 %v2205_v49  ;;  %3641 = vmatprep.subr.mxu1 %v2207_v50  ;;  %v1921_v49 = vld [vmem:[#allocation2 + $0xde8] sm:$0xff]  ;;  %v1923_v50 = vld [vmem:[#allocation2 + $0xdf8] sm:$0xff] }
 0x425   :  { %3571 = vmatpush2.msra.mxu0 %v2204_v51  ;;  %3642 = vmatpush2.msra.mxu1 %v2206_v53  ;;  %v1920_v51 = vld [vmem:[#allocation2 + $0xde0] sm:$0xff]  ;;  %v1922_v53 = vld [vmem:[#allocation2 + $0xdf0] sm:$0xff] }
 0x426   :  { %3572 = vmatprep.subr.mxu0 %v2173_v54  ;;  %3643 = vmatprep.subr.mxu1 %v2175_v8  ;;  %v1889_v54 = vld [vmem:[#allocation2 + $0xce8] sm:$0xff]  ;;  %v1891_v8 = vld [vmem:[#allocation2 + $0xcf8] sm:$0xff] }
 0x427   :  { %3573 = vmatpush2.msra.mxu0 %v2172_v56  ;;  %3644 = vmatpush2.msra.mxu1 %v2174_v62  ;;  %v1888_v56 = vld [vmem:[#allocation2 + $0xce0] sm:$0xff]  ;;  %v1890_v62 = vld [vmem:[#allocation2 + $0xcf0] sm:$0xff] }
 0x428   :  { %3574 = vmatprep.subr.mxu0 %v2141_v11  ;;  %3645 = vmatprep.subr.mxu1 %v2143_v55  ;;  %v1859_v11 = vld [vmem:[#allocation2 + $0xbf8] sm:$0xff]  ;;  %v1856_v55 = vld [vmem:[#allocation2 + $0xbe0] sm:$0xff] }
 0x429   :  { %3575 = vmatpush2.msra.mxu0 %v2140_v57  ;;  %3646 = vmatpush2.msra.mxu1 %v2142_v58  ;;  %v1858_v57 = vld [vmem:[#allocation2 + $0xbf0] sm:$0xff]  ;;  %v1825_v58 = vld [vmem:[#allocation2 + $0xae8] sm:$0xff] }
 0x42a   :  { %3576 = vmatprep.subr.mxu0 %v2109_v3  ;;  %3647 = vmatprep.subr.mxu1 %v2111_v59  ;;  %v1827_v3 = vld [vmem:[#allocation2 + $0xaf8] sm:$0xff]  ;;  %v1824_v59 = vld [vmem:[#allocation2 + $0xae0] sm:$0xff] }
 0x42b   :  { %3577 = vmatpush2.msra.mxu0 %v2108_v60  ;;  %3648 = vmatpush2.msra.mxu1 %v2110_v61  ;;  %v1826_v60 = vld [vmem:[#allocation2 + $0xaf0] sm:$0xff]  ;;  %v1793_v61 = vld [vmem:[#allocation2 + $0x9e8] sm:$0xff] }
 0x42c   :  { %3578 = vmatprep.subr.mxu0 %v2077_v63  ;;  %3649 = vmatprep.subr.mxu1 %v2079_v26  ;;  %v3160_v15 = vpop.f32.mrf.mxu0  ;;  %v3231_v17 = vpop.f32.mrf.mxu1  ;;  %v1795_v63 = vld [vmem:[#allocation2 + $0x9f8] sm:$0xff]  ;;  %v1792_v26 = vld [vmem:[#allocation2 + $0x9e0] sm:$0xff] }
 0x42d   :  { %3579 = vmatpush2.msra.mxu0 %v2076_v29  ;;  %3650 = vmatpush2.msra.mxu1 %v2078_v16  ;;  %v3161_v23 = vadd.f32 %v3160_v15, %v2559_v21  ;;  %v3232_v5 = vadd.f32 %v3231_v17, %v2567_v2  ;;  %v1794_v29 = vld [vmem:[#allocation2 + $0x9f0] sm:$0xff]  ;;  %v1761_v16 = vld [vmem:[#allocation2 + $0x8e8] sm:$0xff]  ;;  %v1763_v21 = vld [vmem:[#allocation2 + $0x8f8] sm:$0xff] }
 0x42e   :  { %3580 = vmatprep.subr.mxu0 %v2045_v0  ;;  %3651 = vmatprep.subr.mxu1 %v2047_v1  ;;  %v3162_v24 = vpop.f32.mrf.mxu0  ;;  %v3233_v27 = vpop.f32.mrf.mxu1  ;;  %v1760_v0 = vld [vmem:[#allocation2 + $0x8e0] sm:$0xff]  ;;  %v1762_v1 = vld [vmem:[#allocation2 + $0x8f0] sm:$0xff]  ;;  %v1729_v2 = vld [vmem:[#allocation2 + $0x7e8] sm:$0xff] }
 0x42f   :  { %3581 = vmatpush2.msra.mxu0 %v2044_v12  ;;  %3652 = vmatpush2.msra.mxu1 %v2046_v14  ;;  %v3163_v28 = vadd.f32 %v3162_v24, %v2563_v4  ;;  %v3234_v34 = vadd.f32 %v3233_v27, %v2571_v6  ;;  %v1731_v4 = vld [vmem:[#allocation2 + $0x7f8] sm:$0xff]  ;;  %v1728_v6 = vld [vmem:[#allocation2 + $0x7e0] sm:$0xff]  ;;  %v1730_v12 = vld [vmem:[#allocation2 + $0x7f0] sm:$0xff] }
 0x430   :  { %3582 = vmatprep.subr.mxu0 %v2013_v18  ;;  %3653 = vmatprep.subr.mxu1 %v2015_v19  ;;  %v1697_v14 = vld [vmem:[#allocation2 + $0x6e8] sm:$0xff]  ;;  %v1699_v15 = vld [vmem:[#allocation2 + $0x6f8] sm:$0xff]  ;;  %v1696_v17 = vld [vmem:[#allocation2 + $0x6e0] sm:$0xff] }
 0x431   :  { %3583 = vmatpush2.msra.mxu0 %v2012_v20  ;;  %3654 = vmatpush2.msra.mxu1 %v2014_v22  ;;  %v3887_v35 = vcombine.low %v3161_v23, %v3163_v28  ;;  %v3888_v40 = vcombine.low %v3232_v5, %v3234_v34  ;;  %v1698_v18 = vld [vmem:[#allocation2 + $0x6f0] sm:$0xff]  ;;  %v1665_v19 = vld [vmem:[#allocation2 + $0x5e8] sm:$0xff]  ;;  %v1667_v20 = vld [vmem:[#allocation2 + $0x5f8] sm:$0xff] }
 0x432   :  { %3585 = vmatmul.mubr.f32.vlgmr.msra.gmra.mxu0 %v6075_v10  ;;  %3656 = vmatmul.mubr.f32.vlgmr.msra.gmra.mxu1 %v6075_v10  ;;  %v1664_v22 = vld [vmem:[#allocation2 + $0x5e0] sm:$0xff]  ;;  %v1666_v23 = vld [vmem:[#allocation2 + $0x5f0] sm:$0xff]  ;;  %v1633_v24 = vld [vmem:[#allocation2 + $0x4e8] sm:$0xff] }
 0x433   :  { %3662 = vmatprep.subr.mxu0 %v1985_v36  ;;  %3733 = vmatprep.subr.mxu1 %v1987_v37  ;;  %v3895_v43 = vrot.slane %v3887_v35, %v4404_v52  ;;  %v3902_v41 = vrot.slane %v3888_v40, %v4404_v52  ;;  %v1635_v27 = vld [vmem:[#allocation2 + $0x4f8] sm:$0xff]  ;;  %v1632_v5 = vld [vmem:[#allocation2 + $0x4e0] sm:$0xff]  ;;  %v1634_v28 = vld [vmem:[#allocation2 + $0x4f0] sm:$0xff] }
 0x434   :  { %3663 = vmatpush1.msra.mxu0 %v1984_v39  ;;  %3726 = vmatprep.mubr.f32.mxu0 %v6073_v7  ;;  %v1601_v34 = vld [vmem:[#allocation2 + $0x3e8] sm:$0xff]  ;;  %v1603_v36 = vld [vmem:[#allocation2 + $0x3f8] sm:$0xff]  ;;  %v1600_v37 = vld [vmem:[#allocation2 + $0x3e0] sm:$0xff] }
 0x435   :  { %3734 = vmatpush1.msra.mxu1 %v1986_v42  ;;  %3797 = vmatprep.mubr.f32.mxu1 %v6073_v7  ;;  %v3903_v48 = vcombine.low %v3895_v43, %v3902_v41  ;;  %v1857_v7 = vld [vmem:[#allocation2 + $0xbe8] sm:$0xff]  ;;  %v1602_v39 = vld [vmem:[#allocation2 + $0x3f0] sm:$0xff]  ;;  %v1571_v40 = vld [vmem:[#allocation2 + $0x2f8] sm:$0xff] }
 0x436   :  { %3664 = vmatprep.subr.mxu0 %v1953_v44  ;;  %3735 = vmatprep.subr.mxu1 %v1955_v45  ;;  %v1569_v35 = vld [vmem:[#allocation2 + $0x2e8] sm:$0xff]  ;;  %v1568_v42 = vld [vmem:[#allocation2 + $0x2e0] sm:$0xff]  ;;  %v1570_v43 = vld [vmem:[#allocation2 + $0x2f0] sm:$0xff] }
 0x437   :  { %3983 = vst [vmem:[%s6242_s7 + $0x18] sm:$0xff] %v3903_v48  ;;  %3665 = vmatpush1.msra.mxu0 %v1952_v46  ;;  %3736 = vmatpush1.msra.mxu1 %v1954_v47  ;;  %v1537_v41 = vld [vmem:[#allocation2 + $0x1e8] sm:$0xff]  ;;  %v1539_v44 = vld [vmem:[#allocation2 + $0x1f8] sm:$0xff]  ;;  %v1536_v45 = vld [vmem:[#allocation2 + $0x1e0] sm:$0xff] }
 0x438   :  { %3666 = vmatprep.subr.mxu0 %v1921_v49  ;;  %3737 = vmatprep.subr.mxu1 %v1923_v50  ;;  %v1538_v46 = vld [vmem:[#allocation2 + $0x1f0] sm:$0xff]  ;;  %v1505_v47 = vld [vmem:[#allocation2 + $0xe8] sm:$0xff]  ;;  %v1507_v48 = vld [vmem:[#allocation2 + $0xf8] sm:$0xff] }
 0x439   :  { %3667 = vmatpush1.msra.mxu0 %v1920_v51  ;;  %3738 = vmatpush1.msra.mxu1 %v1922_v53  ;;  %v1504_v49 = vld [vmem:[#allocation2 + $0xe0] sm:$0xff]  ;;  %v1506_v50 = vld [vmem:[#allocation2 + $0xf0] sm:$0xff]  ;;  %v2497_v51 = vld [vmem:[#allocation2 + $0x1fe8] sm:$0xff] }
 0x43a   :  { %3668 = vmatprep.subr.mxu0 %v1889_v54  ;;  %3739 = vmatprep.subr.mxu1 %v1891_v8  ;;  %v2499_v53 = vld [vmem:[#allocation2 + $0x1ff8] sm:$0xff]  ;;  %v2496_v54 = vld [vmem:[#allocation2 + $0x1fe0] sm:$0xff]  ;;  %v2498_v8 = vld [vmem:[#allocation2 + $0x1ff0] sm:$0xff] }
 0x43b   :  { %3669 = vmatpush1.msra.mxu0 %v1888_v56  ;;  %3740 = vmatpush1.msra.mxu1 %v1890_v62  ;;  %v2465_v56 = vld [vmem:[#allocation2 + $0x1ee8] sm:$0xff]  ;;  %v2467_v62 = vld [vmem:[#allocation2 + $0x1ef8] sm:$0xff] }
 0x43c   :  { %3670 = vmatprep.subr.mxu0 %v1857_v7  ;;  %3741 = vmatprep.subr.mxu1 %v1859_v11  ;;  %v2464_v7 = vld [vmem:[#allocation2 + $0x1ee0] sm:$0xff]  ;;  %v2466_v11 = vld [vmem:[#allocation2 + $0x1ef0] sm:$0xff] }
 0x43d   :  { %3671 = vmatpush1.msra.mxu0 %v1856_v55  ;;  %3742 = vmatpush1.msra.mxu1 %v1858_v57  ;;  %v2433_v55 = vld [vmem:[#allocation2 + $0x1de8] sm:$0xff]  ;;  %v2435_v57 = vld [vmem:[#allocation2 + $0x1df8] sm:$0xff] }
 0x43e   :  { %3672 = vmatprep.subr.mxu0 %v1825_v58  ;;  %3743 = vmatprep.subr.mxu1 %v1827_v3  ;;  %v2432_v58 = vld [vmem:[#allocation2 + $0x1de0] sm:$0xff]  ;;  %v2434_v3 = vld [vmem:[#allocation2 + $0x1df0] sm:$0xff] }
 0x43f   :  { %3673 = vmatpush1.msra.mxu0 %v1824_v59  ;;  %3744 = vmatpush1.msra.mxu1 %v1826_v60  ;;  %v2401_v59 = vld [vmem:[#allocation2 + $0x1ce8] sm:$0xff]  ;;  %v2403_v60 = vld [vmem:[#allocation2 + $0x1cf8] sm:$0xff] }
 0x440   :  { %3674 = vmatprep.subr.mxu0 %v1793_v61  ;;  %3745 = vmatprep.subr.mxu1 %v1795_v63  ;;  %v2400_v61 = vld [vmem:[#allocation2 + $0x1ce0] sm:$0xff]  ;;  %v2402_v63 = vld [vmem:[#allocation2 + $0x1cf0] sm:$0xff] }
 0x441   :  { %3675 = vmatpush1.msra.mxu0 %v1792_v26  ;;  %3746 = vmatpush1.msra.mxu1 %v1794_v29  ;;  %v2369_v26 = vld [vmem:[#allocation2 + $0x1be8] sm:$0xff]  ;;  %v2371_v29 = vld [vmem:[#allocation2 + $0x1bf8] sm:$0xff] }
 0x442   :  { %3676 = vmatprep.subr.mxu0 %v1761_v16  ;;  %3747 = vmatprep.subr.mxu1 %v1763_v21  ;;  %v2368_v16 = vld [vmem:[#allocation2 + $0x1be0] sm:$0xff]  ;;  %v2370_v21 = vld [vmem:[#allocation2 + $0x1bf0] sm:$0xff] }
 0x443   :  { %3677 = vmatpush1.msra.mxu0 %v1760_v0  ;;  %3748 = vmatpush1.msra.mxu1 %v1762_v1  ;;  %v2337_v0 = vld [vmem:[#allocation2 + $0x1ae8] sm:$0xff]  ;;  %v2339_v1 = vld [vmem:[#allocation2 + $0x1af8] sm:$0xff] }
 0x444   :  { %3678 = vmatprep.subr.mxu0 %v1729_v2  ;;  %3749 = vmatprep.subr.mxu1 %v1731_v4  ;;  %v2336_v2 = vld [vmem:[#allocation2 + $0x1ae0] sm:$0xff]  ;;  %v2338_v4 = vld [vmem:[#allocation2 + $0x1af0] sm:$0xff] }
 0x445   :  { %3679 = vmatpush1.msra.mxu0 %v1728_v6  ;;  %3750 = vmatpush1.msra.mxu1 %v1730_v12  ;;  %v2305_v6 = vld [vmem:[#allocation2 + $0x19e8] sm:$0xff]  ;;  %v2307_v12 = vld [vmem:[#allocation2 + $0x19f8] sm:$0xff] }
 0x446   :  { %3680 = vmatprep.subr.mxu0 %v1697_v14  ;;  %3751 = vmatprep.subr.mxu1 %v1699_v15  ;;  %v2304_v14 = vld [vmem:[#allocation2 + $0x19e0] sm:$0xff]  ;;  %v2306_v15 = vld [vmem:[#allocation2 + $0x19f0] sm:$0xff] }
 0x447   :  { %3681 = vmatpush1.msra.mxu0 %v1696_v17  ;;  %3752 = vmatpush1.msra.mxu1 %v1698_v18  ;;  %v2273_v17 = vld [vmem:[#allocation2 + $0x18e8] sm:$0xff]  ;;  %v2275_v18 = vld [vmem:[#allocation2 + $0x18f8] sm:$0xff] }
 0x448   :  { %3682 = vmatprep.subr.mxu0 %v1665_v19  ;;  %3753 = vmatprep.subr.mxu1 %v1667_v20  ;;  %v2272_v19 = vld [vmem:[#allocation2 + $0x18e0] sm:$0xff]  ;;  %v2274_v20 = vld [vmem:[#allocation2 + $0x18f0] sm:$0xff] }
 0x449   :  { %3683 = vmatpush1.msra.mxu0 %v1664_v22  ;;  %3754 = vmatpush1.msra.mxu1 %v1666_v23  ;;  %v2241_v22 = vld [vmem:[#allocation2 + $0x17e8] sm:$0xff]  ;;  %v2243_v23 = vld [vmem:[#allocation2 + $0x17f8] sm:$0xff] }
 0x44a   :  { %3684 = vmatprep.subr.mxu0 %v1633_v24  ;;  %3755 = vmatprep.subr.mxu1 %v1635_v27  ;;  %v2240_v24 = vld [vmem:[#allocation2 + $0x17e0] sm:$0xff]  ;;  %v2242_v27 = vld [vmem:[#allocation2 + $0x17f0] sm:$0xff] }
 0x44b   :  { %3685 = vmatpush1.msra.mxu0 %v1632_v5  ;;  %3756 = vmatpush1.msra.mxu1 %v1634_v28  ;;  %v2209_v5 = vld [vmem:[#allocation2 + $0x16e8] sm:$0xff]  ;;  %v2211_v28 = vld [vmem:[#allocation2 + $0x16f8] sm:$0xff] }
 0x44c   :  { %3686 = vmatprep.subr.mxu0 %v1601_v34  ;;  %3757 = vmatprep.subr.mxu1 %v1603_v36  ;;  %v2208_v34 = vld [vmem:[#allocation2 + $0x16e0] sm:$0xff]  ;;  %v2210_v36 = vld [vmem:[#allocation2 + $0x16f0] sm:$0xff] }
 0x44d   :  { %3687 = vmatpush1.msra.mxu0 %v1600_v37  ;;  %3758 = vmatpush1.msra.mxu1 %v1602_v39  ;;  %v2177_v37 = vld [vmem:[#allocation2 + $0x15e8] sm:$0xff]  ;;  %v2179_v39 = vld [vmem:[#allocation2 + $0x15f8] sm:$0xff] }
 0x44e   :  { %3688 = vmatprep.subr.mxu0 %v1569_v35  ;;  %3759 = vmatprep.subr.mxu1 %v1571_v40  ;;  %v2176_v35 = vld [vmem:[#allocation2 + $0x15e0] sm:$0xff]  ;;  %v2178_v40 = vld [vmem:[#allocation2 + $0x15f0] sm:$0xff] }
 0x44f   :  { %3689 = vmatpush1.msra.mxu0 %v1568_v42  ;;  %3760 = vmatpush1.msra.mxu1 %v1570_v43  ;;  %v2145_v42 = vld [vmem:[#allocation2 + $0x14e8] sm:$0xff]  ;;  %v2147_v43 = vld [vmem:[#allocation2 + $0x14f8] sm:$0xff] }
 0x450   :  { %3690 = vmatprep.subr.mxu0 %v1537_v41  ;;  %3761 = vmatprep.subr.mxu1 %v1539_v44  ;;  %v2144_v41 = vld [vmem:[#allocation2 + $0x14e0] sm:$0xff]  ;;  %v2146_v44 = vld [vmem:[#allocation2 + $0x14f0] sm:$0xff] }
 0x451   :  { %3691 = vmatpush1.msra.mxu0 %v1536_v45  ;;  %3762 = vmatpush1.msra.mxu1 %v1538_v46  ;;  %v2113_v45 = vld [vmem:[#allocation2 + $0x13e8] sm:$0xff]  ;;  %v2115_v46 = vld [vmem:[#allocation2 + $0x13f8] sm:$0xff] }
 0x452   :  { %3692 = vmatprep.subr.mxu0 %v1505_v47  ;;  %3763 = vmatprep.subr.mxu1 %v1507_v48  ;;  %v6184_v47 = vld [vmem:[%s6241_s6 + $0x10] sm:$0xff]  ;;  %v2112_v48 = vld [vmem:[#allocation2 + $0x13e0] sm:$0xff] }
 0x453   :  { %3693 = vmatpush1.msra.mxu0 %v1504_v49  ;;  %3764 = vmatpush1.msra.mxu1 %v1506_v50  ;;  %v2114_v49 = vld [vmem:[#allocation2 + $0x13f0] sm:$0xff]  ;;  %v2081_v50 = vld [vmem:[#allocation2 + $0x12e8] sm:$0xff] }
 0x454   :  { %3694 = vmatprep.subr.mxu0 %v2497_v51  ;;  %3765 = vmatprep.subr.mxu1 %v2499_v53  ;;  %v2083_v51 = vld [vmem:[#allocation2 + $0x12f8] sm:$0xff]  ;;  %v2080_v53 = vld [vmem:[#allocation2 + $0x12e0] sm:$0xff] }
 0x455   :  { %3695 = vmatpush2.msra.mxu0 %v2496_v54  ;;  %3766 = vmatpush2.msra.mxu1 %v2498_v8  ;;  %v2082_v54 = vld [vmem:[#allocation2 + $0x12f0] sm:$0xff]  ;;  %v2575_v8 = vrot.slane %v6184_v47, %v5942_v32 }
 0x456   :  { %3696 = vmatprep.subr.mxu0 %v2465_v56  ;;  %3767 = vmatprep.subr.mxu1 %v2467_v62  ;;  %v2049_v56 = vld [vmem:[#allocation2 + $0x11e8] sm:$0xff]  ;;  %v2051_v62 = vld [vmem:[#allocation2 + $0x11f8] sm:$0xff] }
 0x457   :  { %3697 = vmatpush2.msra.mxu0 %v2464_v7  ;;  %3768 = vmatpush2.msra.mxu1 %v2466_v11  ;;  %v2583_v7 = vrot.slane %v6184_v47, %v6059_v9  ;;  %v2579_v11 = vrot.slane %v6184_v47, %v5962_v38 }
 0x458   :  { %3698 = vmatprep.subr.mxu0 %v2433_v55  ;;  %3769 = vmatprep.subr.mxu1 %v2435_v57  ;;  %v2587_v55 = vrot.slane %v6184_v47, %v6062_v13  ;;  %v2048_v57 = vld [vmem:[#allocation2 + $0x11e0] sm:$0xff] }
 0x459   :  { %3699 = vmatpush2.msra.mxu0 %v2432_v58  ;;  %3770 = vmatpush2.msra.mxu1 %v2434_v3  ;;  %v2050_v58 = vld [vmem:[#allocation2 + $0x11f0] sm:$0xff] }
 0x45a   :  { %3700 = vmatprep.subr.mxu0 %v2401_v59  ;;  %3771 = vmatprep.subr.mxu1 %v2403_v60  ;;  %v2017_v60 = vld [vmem:[#allocation2 + $0x10e8] sm:$0xff] }
 0x45b   :  { %3701 = vmatpush2.msra.mxu0 %v2400_v61  ;;  %3772 = vmatpush2.msra.mxu1 %v2402_v63  ;;  %v2019_v61 = vld [vmem:[#allocation2 + $0x10f8] sm:$0xff]  ;;  %v2016_v63 = vld [vmem:[#allocation2 + $0x10e0] sm:$0xff] }
 0x45c   :  { %3702 = vmatprep.subr.mxu0 %v2369_v26  ;;  %3773 = vmatprep.subr.mxu1 %v2371_v29  ;;  %v2018_v26 = vld [vmem:[#allocation2 + $0x10f0] sm:$0xff] }
 0x45d   :  { %3703 = vmatpush2.msra.mxu0 %v2368_v16  ;;  %3774 = vmatpush2.msra.mxu1 %v2370_v21 }
 0x45e   :  { %3704 = vmatprep.subr.mxu0 %v2337_v0  ;;  %3775 = vmatprep.subr.mxu1 %v2339_v1 }
 0x45f   :  { %3705 = vmatpush2.msra.mxu0 %v2336_v2  ;;  %3776 = vmatpush2.msra.mxu1 %v2338_v4 }
 0x460   :  { %3706 = vmatprep.subr.mxu0 %v2305_v6  ;;  %3777 = vmatprep.subr.mxu1 %v2307_v12 }
 0x461   :  { %3707 = vmatpush2.msra.mxu0 %v2304_v14  ;;  %3778 = vmatpush2.msra.mxu1 %v2306_v15 }
 0x462   :  { %3708 = vmatprep.subr.mxu0 %v2273_v17  ;;  %3779 = vmatprep.subr.mxu1 %v2275_v18  ;;  %v2591_v17 = vrot.slane %v6184_v47, %v6114_v25  ;;  %v2599_v18 = vrot.slane %v6184_v47, %v6117_v30 }
 0x463   :  { %3709 = vmatpush2.msra.mxu0 %v2272_v19  ;;  %3780 = vmatpush2.msra.mxu1 %v2274_v20  ;;  %v2595_v19 = vrot.slane %v6184_v47, %v6120_v31 }
 0x464   :  { %3710 = vmatprep.subr.mxu0 %v2241_v22  ;;  %3781 = vmatprep.subr.mxu1 %v2243_v23 }
 0x465   :  { %3711 = vmatpush2.msra.mxu0 %v2240_v24  ;;  %3782 = vmatpush2.msra.mxu1 %v2242_v27 }
 0x466   :  { %3712 = vmatprep.subr.mxu0 %v2209_v5  ;;  %3783 = vmatprep.subr.mxu1 %v2211_v28 }
 0x467   :  { %3713 = vmatpush2.msra.mxu0 %v2208_v34  ;;  %3784 = vmatpush2.msra.mxu1 %v2210_v36 }
 0x468   :  { %3714 = vmatprep.subr.mxu0 %v2177_v37  ;;  %3785 = vmatprep.subr.mxu1 %v2179_v39 }
 0x469   :  { %3715 = vmatpush2.msra.mxu0 %v2176_v35  ;;  %3786 = vmatpush2.msra.mxu1 %v2178_v40 }
 0x46a   :  { %3716 = vmatprep.subr.mxu0 %v2145_v42  ;;  %3787 = vmatprep.subr.mxu1 %v2147_v43  ;;  %v2503_v42 = vld [vmem:[%s6241_s6 + $0x18] sm:$0xff] }
 0x46b   :  { %3717 = vmatpush2.msra.mxu0 %v2144_v41  ;;  %3788 = vmatpush2.msra.mxu1 %v2146_v44  ;;  %v2607_v43 = vrot.slane %v2503_v42, %v5942_v32  ;;  %v2615_v41 = vrot.slane %v2503_v42, %v6059_v9  ;;  %v2611_v44 = vrot.slane %v2503_v42, %v5962_v38 }
 0x46c   :  { %3718 = vmatprep.subr.mxu0 %v2113_v45  ;;  %3789 = vmatprep.subr.mxu1 %v2115_v46  ;;  %v2619_v45 = vrot.slane %v2503_v42, %v6062_v13  ;;  %v2623_v38 = vrot.slane %v2503_v42, %v6114_v25  ;;  %v2631_v9 = vrot.slane %v2503_v42, %v6117_v30 }
 0x46d   :  { %3719 = vmatpush2.msra.mxu0 %v2112_v48  ;;  %3790 = vmatpush2.msra.mxu1 %v2114_v49  ;;  %v2627_v13 = vrot.slane %v2503_v42, %v6120_v31 }
 0x46e   :  { %3720 = vmatprep.subr.mxu0 %v2081_v50  ;;  %3791 = vmatprep.subr.mxu1 %v2083_v51  ;;  %v3302_v3 = vpop.f32.mrf.mxu0  ;;  %v3373_v59 = vpop.f32.mrf.mxu1 }
 0x46f   :  { %3721 = vmatpush2.msra.mxu0 %v2080_v53  ;;  %3792 = vmatpush2.msra.mxu1 %v2082_v54  ;;  %v3303_v29 = vadd.f32 %v3302_v3, %v2575_v8  ;;  %v3374_v0 = vadd.f32 %v3373_v59, %v2583_v7 }
 0x470   :  { %3722 = vmatprep.subr.mxu0 %v2049_v56  ;;  %3793 = vmatprep.subr.mxu1 %v2051_v62  ;;  %v3304_v16 = vpop.f32.mrf.mxu0  ;;  %v3375_v21 = vpop.f32.mrf.mxu1 }
 0x471   :  { %3723 = vmatpush2.msra.mxu0 %v2048_v57  ;;  %3794 = vmatpush2.msra.mxu1 %v2050_v58  ;;  %v3305_v1 = vadd.f32 %v3304_v16, %v2579_v11  ;;  %v3376_v2 = vadd.f32 %v3375_v21, %v2587_v55  ;;  %v2635_v11 = vrot.slane %v2503_v42, %v6123_v33 }
 0x472   :  { %3724 = vmatprep.subr.mxu0 %v2017_v60  ;;  %3795 = vmatprep.subr.mxu1 %v2019_v61 }
 0x473   :  { %3725 = vmatpush2.msra.mxu0 %v2016_v63  ;;  %3796 = vmatpush2.msra.mxu1 %v2018_v26  ;;  %v3904_v4 = vcombine.low %v3303_v29, %v3305_v1  ;;  %v3905_v6 = vcombine.low %v3374_v0, %v3376_v2 }
 0x474   :  { %3727 = vmatmul.mubr.f32.vlgmr.msra.gmra.mxu0 %v6075_v10  ;;  %3798 = vmatmul.mubr.f32.vlgmr.msra.gmra.mxu1 %v6075_v10  ;;  %v2603_v10 = vrot.slane %v6184_v47, %v6123_v33 }
 0x475   :  { %v3912_v12 = vrot.slane %v3904_v4, %v4404_v52  ;;  %v3919_v14 = vrot.slane %v3905_v6, %v4404_v52 }
 0x477   :  { %v3920_v15 = vcombine.low %v3912_v12, %v3919_v14 }
 0x479   :  { %3984 = vst [vmem:[%s6242_s7 + $0x20] sm:$0xff] %v3920_v15 }
 0x4b0   :  { %v3444_v20 = vpop.f32.mrf.mxu0  ;;  %v3515_v22 = vpop.f32.mrf.mxu1 }
 0x4b1   :  { %v3445_v27 = vadd.f32 %v3444_v20, %v2591_v17  ;;  %v3516_v5 = vadd.f32 %v3515_v22, %v2599_v18 }
 0x4b2   :  { %v3446_v23 = vpop.f32.mrf.mxu0  ;;  %v3517_v24 = vpop.f32.mrf.mxu1 }
 0x4b3   :  { %v3447_v28 = vadd.f32 %v3446_v23, %v2595_v19  ;;  %v3518_v34 = vadd.f32 %v3517_v24, %v2603_v10 }
 0x4b5   :  { %v3921_v36 = vcombine.low %v3445_v27, %v3447_v28  ;;  %v3922_v37 = vcombine.low %v3516_v5, %v3518_v34 }
 0x4b7   :  { %v3929_v39 = vrot.slane %v3921_v36, %v4404_v52  ;;  %v3936_v35 = vrot.slane %v3922_v37, %v4404_v52 }
 0x4b9   :  { %v3937_v40 = vcombine.low %v3929_v39, %v3936_v35 }
 0x4bb   :  { %3985 = vst [vmem:[%s6242_s7 + $0x28] sm:$0xff] %v3937_v40 }
 0x4f2   :  { %v3586_v46 = vpop.f32.mrf.mxu0  ;;  %v3657_v47 = vpop.f32.mrf.mxu1 }
 0x4f3   :  { %v3587_v50 = vadd.f32 %v3586_v46, %v2607_v43  ;;  %v3658_v51 = vadd.f32 %v3657_v47, %v2615_v41 }
 0x4f4   :  { %v3588_v48 = vpop.f32.mrf.mxu0  ;;  %v3659_v49 = vpop.f32.mrf.mxu1 }
 0x4f5   :  { %v3589_v53 = vadd.f32 %v3588_v48, %v2611_v44  ;;  %v3660_v54 = vadd.f32 %v3659_v49, %v2619_v45 }
 0x4f7   :  { %v3938_v8 = vcombine.low %v3587_v50, %v3589_v53  ;;  %v3939_v56 = vcombine.low %v3658_v51, %v3660_v54 }
 0x4f9   :  { %v3946_v62 = vrot.slane %v3938_v8, %v4404_v52  ;;  %v3953_v32 = vrot.slane %v3939_v56, %v4404_v52 }
 0x4fb   :  { %v3954_v7 = vcombine.low %v3946_v62, %v3953_v32 }
 0x4fd   :  { %3986 = vst [vmem:[%s6242_s7 + $0x30] sm:$0xff] %v3954_v7 }
 0x534   :  { %v3728_v55 = vpop.f32.mrf.mxu0  ;;  %v3799_v57 = vpop.f32.mrf.mxu1 }
 0x535   :  { %v3729_v59 = vadd.f32 %v3728_v55, %v2623_v38  ;;  %v3800_v60 = vadd.f32 %v3799_v57, %v2631_v9 }
 0x536   :  { %v3730_v58 = vpop.f32.mrf.mxu0  ;;  %v3801_v3 = vpop.f32.mrf.mxu1 }
 0x537   :  { %v3731_v61 = vadd.f32 %v3730_v58, %v2627_v13  ;;  %v3802_v63 = vadd.f32 %v3801_v3, %v2635_v11 }
 0x539   :  { %v3955_v26 = vcombine.low %v3729_v59, %v3731_v61  ;;  %v3956_v29 = vcombine.low %v3800_v60, %v3802_v63 }
 0x53b   :  { %v3963_v16 = vrot.slane %v3955_v26, %v4404_v52  ;;  %v3970_v25 = vrot.slane %v3956_v29, %v4404_v52 }
 0x53d   :  { %v3971_v21 = vcombine.low %v3963_v16, %v3970_v25 }
 0x53f   :  { %3987 = vst [vmem:[%s6242_s7 + $0x38] sm:$0xff] %v3971_v21 }
 0x540   :  { %3992 = vsyncpa [#allocation3], 1 }

</bundles_post_ra>
